<compile_context>
chip_gen: v7x
topology: tpu7x:2x2x1
jax: 0.10.0
libtpu: 0.0.40
codegen_flags: <defaults>
</compile_context>

<pallas_src>
import functools

import jax
import jax.numpy as jnp
import numpy as np
from jax.experimental import pallas as pl
from jax.experimental.pallas import tpu as pltpu

NEG_SLOPE = 0.2
NEG_INF = -1e30                 # additive mask value (bf16-representable)
CLAMP = -1e20                   # online-softmax row-max clamp (>> NEG_INF, << real scores)
LANE = 128                      # lane width: feature dims are zero-padded to this
ALPHA_COL = LANE - 1            # augmented-weight column carrying the attention logit
TILE = 128                      # dst/src tile size (tied: shared-adjacency transpose trick)


def _round_up(n, m):
    return ((n + m - 1) // m) * m


# ------------------------------ kernels -------------------------------------- #

def _project_kernel(x_ref, w_ref, o_ref, *, mxu_dtype):
    """Row-tiled x @ W_aug (augmented column = attention logit)."""
    o_ref[...] = jnp.dot(x_ref[...].astype(mxu_dtype), w_ref[...].astype(mxu_dtype),
                         preferred_element_type=jnp.float32)


def _gat_attn_kernel(hs_ref, xd_ref, wd_ref, adj_ref, bias_ref, out_ref,
                     ad_sc, m_sc, l_sc, acc_sc,
                     *, transpose_adj, apply_relu, mxu_dtype):
    """One (dst_tile, src_tile) step of a GATConv: online masked softmax + agg.

    hs_ref  : [TILE, LANE]  projected src features (src tile k), logit in ALPHA_COL
    xd_ref  : [TILE, LANE]  raw dst features (dst tile i)
    wd_ref  : [LANE, LANE]  augmented dst weight (only the alpha column is used)
    adj_ref : [TILE, TILE]  bf16 additive mask tile (0 on edge, NEG_INF off edge)
    bias_ref: [1, LANE]     conv bias
    out_ref : [TILE, LANE]  conv output (dst tile i), resident across the src axis
    """
    k = pl.program_id(1)

    @pl.when(k == 0)
    def _():
        # Per-dst-tile alpha logit (computed once, reused for every src tile).
        hd = jnp.dot(xd_ref[...].astype(mxu_dtype), wd_ref[...].astype(mxu_dtype),
                     preferred_element_type=jnp.float32)
        ad_sc[...] = hd[:, ALPHA_COL:ALPHA_COL + 1]
        m_sc[...] = jnp.full_like(m_sc, CLAMP)
        l_sc[...] = jnp.zeros_like(l_sc)
        acc_sc[...] = jnp.zeros_like(acc_sc)

    hs = hs_ref[...]                                                # [Ts, LANE]
    a_src = jnp.reshape(hs[:, ALPHA_COL:ALPHA_COL + 1], (1, hs.shape[0]))
    a_dst = ad_sc[...]                                              # [Td, 1]

    # Lazy per-tile upcast of the bf16 mask; reverse direction reuses the same
    # HBM array through a transposed index_map + in-kernel tile transpose.
    adj = adj_ref[...].astype(jnp.float32)
    if transpose_adj:
        adj = adj.T

    raw = a_dst + a_src                                             # [Td, Ts]
    # TODO(synk): on v6e/v7x this [Td,Ts] elementwise chain + exp can run in
    # bf16 for 2x VPU/EUP throughput; kept f32 for v5e compatibility/accuracy.
    e = jnp.where(raw > 0, raw, NEG_SLOPE * raw) + adj              # LeakyReLU + mask

    # Online softmax: the row max is clamped at CLAMP so off-edge entries
    # (e ~ NEG_INF) underflow to exact 0 in exp -- no post-exp select needed,
    # and zero-in-degree rows end up bias-only (matches PyG).
    m_prev = m_sc[...]
    m_new = jnp.maximum(m_prev, jnp.max(e, axis=-1, keepdims=True))
    p = jnp.exp(e - m_new)
    corr = jnp.exp(m_prev - m_new)
    l_sc[...] = corr * l_sc[...] + jnp.sum(p, axis=-1, keepdims=True)
    acc_sc[...] = corr * acc_sc[...] + jnp.dot(
        p.astype(mxu_dtype), hs.astype(mxu_dtype),
        preferred_element_type=jnp.float32)
    m_sc[...] = m_new

    @pl.when(k == pl.num_programs(1) - 1)
    def _():
        denom = jnp.maximum(l_sc[...], 1e-16)
        # EUP approximate reciprocal + one Newton step (no VALU divide).
        r = pl.reciprocal(denom, approx=True)
        r = r * (2.0 - denom * r)
        out = acc_sc[...] * r + bias_ref[...]
        if apply_relu:
            out = jnp.maximum(out, 0.0)
        out_ref[...] = out


def _classifier_kernel(su_ref, sb_ref, xu_ref, xb_ref, red_ref, out_ref, *, mxu_dtype):
    """Dot-product link classifier via one-hot MXU gathers + feature reduce."""
    # TODO(synk): for large E/N replace the dense one-hot selector matmuls with
    # a scalar-prefetched row gather (PrefetchScalarGridSpec + per-edge DMA).
    u = jnp.dot(su_ref[...].astype(mxu_dtype), xu_ref[...].astype(mxu_dtype),
                preferred_element_type=jnp.float32)
    b = jnp.dot(sb_ref[...].astype(mxu_dtype), xb_ref[...].astype(mxu_dtype),
                preferred_element_type=jnp.float32)
    out_ref[...] = jnp.dot((u * b).astype(mxu_dtype), red_ref[...].astype(mxu_dtype),
                           preferred_element_type=jnp.float32)


# --------------------------- pallas_call wrappers ----------------------------- #

def _project(x, w, mxu_dtype):
    n = x.shape[0]
    kernel = functools.partial(_project_kernel, mxu_dtype=mxu_dtype)
    return pl.pallas_call(
        kernel,
        out_shape=jax.ShapeDtypeStruct((n, LANE), jnp.float32),
        grid=(n // TILE,),
        in_specs=[pl.BlockSpec((TILE, LANE), lambda i: (i, 0)),
                  pl.BlockSpec((LANE, LANE), lambda i: (0, 0))],
        out_specs=pl.BlockSpec((TILE, LANE), lambda i: (i, 0)),
        compiler_params=pltpu.CompilerParams(dimension_semantics=("parallel",)),
    )(x, w)


def _gat_attention(hs, x_dst, wd, adj, bias, *, transpose_adj, apply_relu, mxu_dtype):
    ns = hs.shape[0]
    nd = x_dst.shape[0]
    if transpose_adj:
        adj_map = lambda i, k: (k, i)      # reverse direction: reuse ub adjacency
    else:
        adj_map = lambda i, k: (i, k)
    kernel = functools.partial(_gat_attn_kernel, transpose_adj=transpose_adj,
                               apply_relu=apply_relu, mxu_dtype=mxu_dtype)
    return pl.pallas_call(
        kernel,
        out_shape=jax.ShapeDtypeStruct((nd, LANE), jnp.float32),
        grid=(nd // TILE, ns // TILE),
        in_specs=[pl.BlockSpec((TILE, LANE), lambda i, k: (k, 0)),   # hs (src tile)
                  pl.BlockSpec((TILE, LANE), lambda i, k: (i, 0)),   # x_dst (dst tile)
                  pl.BlockSpec((LANE, LANE), lambda i, k: (0, 0)),   # wd (augmented)
                  pl.BlockSpec((TILE, TILE), adj_map),               # bf16 mask tile
                  pl.BlockSpec((1, LANE), lambda i, k: (0, 0))],     # conv bias
        out_specs=pl.BlockSpec((TILE, LANE), lambda i, k: (i, 0)),
        scratch_shapes=[pltpu.VMEM((TILE, 1), jnp.float32),          # a_dst
                        pltpu.VMEM((TILE, 1), jnp.float32),          # m
                        pltpu.VMEM((TILE, 1), jnp.float32),          # l
                        pltpu.VMEM((TILE, LANE), jnp.float32)],      # acc
        compiler_params=pltpu.CompilerParams(
            dimension_semantics=("parallel", "arbitrary"),
            vmem_limit_bytes=48 * 1024 * 1024),
    )(hs, x_dst, wd, adj, bias)


def _classifier(su, sb, xu, xb, red, mxu_dtype):
    ep = su.shape[0]
    kernel = functools.partial(_classifier_kernel, mxu_dtype=mxu_dtype)
    return pl.pallas_call(
        kernel,
        out_shape=jax.ShapeDtypeStruct((ep, LANE), jnp.float32),
        in_specs=[pl.BlockSpec(memory_space=pltpu.MemorySpace.VMEM)] * 5,
        out_specs=pl.BlockSpec(memory_space=pltpu.MemorySpace.VMEM),
    )(su, sb, xu, xb, red)


# ------------------------------ weight prep ----------------------------------- #

def _pad2(a, rows, cols, dtype=jnp.float32):
    out = jnp.zeros((rows, cols), dtype)
    return out.at[:a.shape[0], :a.shape[1]].set(a.astype(dtype))


def _augment(p):
    """[F,C] weight + [1,C] attention vector -> [LANE,LANE] augmented weight."""
    c = p["w_src"].shape[1]
    assert c <= ALPHA_COL, "hidden channels must be <= 127 (alpha column is col 127)"
    assert p["w_src"].shape[0] <= LANE and p["w_dst"].shape[0] <= LANE

    def one(w, a):
        aug = _pad2(w, LANE, LANE)
        return aug.at[:w.shape[0], ALPHA_COL:ALPHA_COL + 1].set(w @ a.T)

    return (one(p["w_src"], p["a_src"]),
            one(p["w_dst"], p["a_dst"]),
            _pad2(p["bias"], 1, LANE))


# -------------------------------- forward ------------------------------------- #

def model_forward_pallas(params, edges_ub, edge_label_index, *, mxu_dtype=jnp.bfloat16):
    nu = params["user_emb"].shape[0]
    nb = params["book_emb"].shape[0]
    hidden = params["user_emb"].shape[1]
    e_lbl = edge_label_index.shape[1]

    # Node counts sit on the lane axis of the adjacency/selectors -> pad to 128;
    # supervision-edge rows to 16 (bf16 sublane packing).
    nup = _round_up(nu, LANE)
    nbp = _round_up(nb, LANE)
    ep = _round_up(e_lbl, 16)

    xu0 = _pad2(params["user_emb"], nup, LANE)
    xb0 = _pad2(params["book_emb"], nbp, LANE)

    # Single bf16 additive-mask adjacency, book-major [nbp, nup].  The reverse
    # (book->user) direction reuses it (transposed index_map + in-kernel tile
    # transpose) -- no second O(N^2) array in HBM.
    adj = jnp.full((nbp, nup), NEG_INF, jnp.float32)
    adj = adj.at[edges_ub[1], edges_ub[0]].set(0.0).astype(jnp.bfloat16)

    def conv(x_src, x_dst, p, transpose_adj, apply_relu):
        ws, wd, b = _augment(p)
        hs = _project(x_src, ws, mxu_dtype)        # src projection once per conv
        return _gat_attention(hs, x_dst, wd, adj, b,
                              transpose_adj=transpose_adj,
                              apply_relu=apply_relu, mxu_dtype=mxu_dtype)

    # Layer 1 (+ fused ReLU epilogue), layer 2.
    xb1 = conv(xu0, xb0, params["conv1_ub"], False, True)
    xu1 = conv(xb0, xu0, params["conv1_bu"], True, True)
    xb2 = conv(xu1, xb1, params["conv2_ub"], False, False)
    xu2 = conv(xb1, xu1, params["conv2_bu"], True, False)

    # Classifier: bf16 one-hot endpoint gathers + feature reduction on the MXU,
    # lane-dense [ep, LANE] store.  `red` drops pad/alpha columns.
    su = jnp.zeros((ep, nup), jnp.float32).at[
        jnp.arange(e_lbl), edge_label_index[0]].set(1.0).astype(jnp.bfloat16)
    sb = jnp.zeros((ep, nbp), jnp.float32).at[
        jnp.arange(e_lbl), edge_label_index[1]].set(1.0).astype(jnp.bfloat16)
    red = jnp.zeros((LANE, LANE), jnp.float32).at[:hidden, :].set(1.0)

    # TODO(synk): for tiny graphs (N of a few hundred) a fully fused single
    # pallas_call has a lower launch/DMA-descriptor floor than this tiled path.
    out = _classifier(su, sb, xu2, xb2, red, mxu_dtype)
    return out[:e_lbl, 0]


# --------------------------- pure-JAX reference ------------------------------- #

def gat_conv_ref(x_src, x_dst, p, adj01):
    h_src = x_src @ p["w_src"]
    h_dst = x_dst @ p["w_dst"]
    a_s = jnp.sum(h_src * p["a_src"], axis=-1)
    a_d = jnp.sum(h_dst * p["a_dst"], axis=-1)
    e = a_d[:, None] + a_s[None, :]
    e = jnp.where(e > 0, e, NEG_SLOPE * e)
    mask = adj01 > 0.5
    e = jnp.where(mask, e, NEG_INF)
    m = jnp.max(e, axis=-1, keepdims=True)
    pexp = jnp.where(mask, jnp.exp(e - m), 0.0)
    attn = pexp / jnp.maximum(jnp.sum(pexp, axis=-1, keepdims=True), 1e-16)
    return attn @ h_src + p["bias"]


def model_forward_ref(params, adj01_ub, adj01_bu, edge_label_index):
    x_user = params["user_emb"]
    x_book = params["book_emb"]
    xb1 = jax.nn.relu(gat_conv_ref(x_user, x_book, params["conv1_ub"], adj01_ub))
    xu1 = jax.nn.relu(gat_conv_ref(x_book, x_user, params["conv1_bu"], adj01_bu))
    xb2 = gat_conv_ref(xu1, xb1, params["conv2_ub"], adj01_ub)
    xu2 = gat_conv_ref(xb1, xu1, params["conv2_bu"], adj01_bu)
    u = xu2[edge_label_index[0]]
    b = xb2[edge_label_index[1]]
    return jnp.sum(u * b, axis=-1)


# ------------------------------ param init ------------------------------------ #

def _glorot(key, shape):
    fan_in, fan_out = shape[-2], shape[-1]
    lim = float(np.sqrt(6.0 / (fan_in + fan_out)))
    return jax.random.uniform(key, shape, jnp.float32, -lim, lim)


def make_conv_params(key, fin_src, fin_dst, c, shared_lin=False):
    k = jax.random.split(key, 5)
    w_src = _glorot(k[0], (fin_src, c))
    w_dst = w_src if shared_lin else _glorot(k[1], (fin_dst, c))
    return {
        "w_src": w_src,
        "w_dst": w_dst,
        "a_src": _glorot(k[2], (1, c)),
        "a_dst": _glorot(k[3], (1, c)),
        "bias": 0.1 * jax.random.normal(k[4], (1, c), jnp.float32),
    }


# --------------------------------- main ---------------------------------------- #

if __name__ == "__main__":
    num_users, num_books, hidden = 150, 200, 32

    key = jax.random.PRNGKey(0)
    ks = jax.random.split(key, 8)

    params = {
        # torch.nn.Embedding default init ~ N(0, 1)
        "user_emb": jax.random.normal(ks[0], (num_users, hidden), jnp.float32),
        "book_emb": jax.random.normal(ks[1], (num_books, hidden), jnp.float32),
        # conv1: GATConv((-1,-1), hidden) -> separate lin_src / lin_dst
        "conv1_ub": make_conv_params(ks[2], hidden, hidden, hidden, shared_lin=False),
        "conv1_bu": make_conv_params(ks[3], hidden, hidden, hidden, shared_lin=False),
        # conv2: GATConv(hidden, hidden) -> shared lin for src and dst
        "conv2_ub": make_conv_params(ks[4], hidden, hidden, hidden, shared_lin=True),
        "conv2_bu": make_conv_params(ks[5], hidden, hidden, hidden, shared_lin=True),
    }

    # Deterministic bipartite edge list user -> book, 3 per user, no duplicates.
    # Books >= 152 have zero in-degree (exercises the bias-only softmax rows).
    edges_np = np.array([[u, (u + k) % num_books]
                         for u in range(num_users) for k in (0, 1, 2)],
                        dtype=np.int32).T                       # [2, 450]
    assert len({(int(u), int(b)) for u, b in zip(edges_np[0], edges_np[1])}) \
        == edges_np.shape[1], "dense masked softmax requires a duplicate-free edge list"
    edges_ub = jnp.asarray(edges_np)

    # 0/1 adjacencies (dst-major) for the pure-JAX reference.
    adj01_ub = jnp.zeros((num_books, num_users), jnp.float32).at[
        edges_ub[1], edges_ub[0]].set(1.0)                      # user -> book
    adj01_bu = adj01_ub.T                                       # reverse (ToUndirected)

    # Supervision edges for the classifier: [2, E_label]
    edge_label_index = jnp.array(
        [[0, 3, 7, 20, 50, 99, 120, 149, 10, 77],
         [5, 60, 199, 0, 123, 87, 44, 150, 9, 33]], dtype=jnp.int32)

    fwd_bf16 = jax.jit(functools.partial(model_forward_pallas, mxu_dtype=jnp.bfloat16))
    fwd_f32 = jax.jit(functools.partial(model_forward_pallas, mxu_dtype=jnp.float32))

    pred_bf16 = jax.block_until_ready(fwd_bf16(params, edges_ub, edge_label_index))
    pred_f32 = jax.block_until_ready(fwd_f32(params, edges_ub, edge_label_index))
    ref = jax.block_until_ready(
        model_forward_ref(params, adj01_ub, adj01_bu, edge_label_index))

    # f32-MXU path: exact structural check against the f32 reference.
    np.testing.assert_allclose(np.asarray(pred_f32), np.asarray(ref),
                               rtol=2e-3, atol=2e-3)
    # bf16-MXU path (production default): rounding compounds across two GAT
    # layers + the 32-dim dot-product classifier -> percent-level deviations.
    np.testing.assert_allclose(np.asarray(pred_bf16), np.asarray(ref),
                               rtol=1e-1, atol=3e-1)
    print("KERNEL_OK")
</pallas_src>

<mosaic_0001>
module attributes {stable_mosaic.version = 11 : i64} {
  func.func @_project_kernel(%arg0: i32, %arg1: memref<128x128xf32, #tpu.memory_space<vmem>>, %arg2: memref<128x128xf32, #tpu.memory_space<vmem>>, %arg3: memref<128x128xf32, #tpu.memory_space<vmem>>) attributes {dimension_semantics = [#tpu.dimension_semantics<parallel>], iteration_bounds = array<i64: 2>, scalar_prefetch = 0 : i64, scratch_operands = 0 : i64, tpu.core_type = #tpu.core_type<tc>, window_params = [{transform_indices = @transform_0, window_bounds = array<i64: 128, 128>}, {pipeline_mode = #tpu.pipeline_mode<synchronous>, transform_indices = @transform_1, window_bounds = array<i64: 128, 128>}, {transform_indices = @transform_2, window_bounds = array<i64: 128, 128>}]} {
    %c0 = arith.constant 0 : index
    %c0_0 = arith.constant 0 : index
    %0 = vector.load %arg1[%c0, %c0_0] : memref<128x128xf32, #tpu.memory_space<vmem>>, vector<128x128xf32>
    %1 = arith.truncf %0 : vector<128x128xf32> to vector<128x128xbf16>
    %c0_1 = arith.constant 0 : index
    %c0_2 = arith.constant 0 : index
    %2 = vector.load %arg2[%c0_1, %c0_2] : memref<128x128xf32, #tpu.memory_space<vmem>>, vector<128x128xf32>
    %3 = arith.truncf %2 : vector<128x128xf32> to vector<128x128xbf16>
    %cst = arith.constant dense<0.000000e+00> : vector<128x128xf32>
    %4 = tpu.matmul %1, %3, %cst {dimension_numbers = #tpu.dot_dimension_numbers<[1], [0], [0], [1], [0, 0, 1, 1], [], []>} : vector<128x128xbf16>, vector<128x128xbf16>, vector<128x128xf32> -> vector<128x128xf32>
    %c0_3 = arith.constant 0 : index
    %c0_4 = arith.constant 0 : index
    %5 = vector.load %arg3[%c0_3, %c0_4] : memref<128x128xf32, #tpu.memory_space<vmem>>, vector<128x128xf32>
    tpu.vector_store %arg3[%c0_3, %c0_4], %4 {strides = array<i32>} : memref<128x128xf32, #tpu.memory_space<vmem>>, vector<128x128xf32>,
    return
  }
  func.func @transform_0(%arg0: i32) -> (i32, i32) {
    %c0_i32 = arith.constant 0 : i32
    %c0_i32_0 = arith.constant 0 : i32
    return %arg0, %c0_i32 : i32, i32
  }
  func.func @transform_1(%arg0: i32) -> (i32, i32) {
    %c0_i32 = arith.constant 0 : i32
    %c0_i32_0 = arith.constant 0 : i32
    %c0_i32_1 = arith.constant 0 : i32
    return %c0_i32, %c0_i32_0 : i32, i32
  }
  func.func @transform_2(%arg0: i32) -> (i32, i32) {
    %c0_i32 = arith.constant 0 : i32
    %c0_i32_0 = arith.constant 0 : i32
    return %arg0, %c0_i32 : i32, i32
  }
}

module attributes {stable_mosaic.version = 11 : i64} {
  func.func @_gat_attn_kernel(%arg0: i32, %arg1: i32, %arg2: memref<128x128xf32, #tpu.memory_space<vmem>>, %arg3: memref<128x128xf32, #tpu.memory_space<vmem>>, %arg4: memref<128x128xf32, #tpu.memory_space<vmem>>, %arg5: memref<128x128xbf16, #tpu.memory_space<vmem>>, %arg6: memref<1x128xf32, #tpu.memory_space<vmem>>, %arg7: memref<128x128xf32, #tpu.memory_space<vmem>>, %arg8: memref<128x1xf32, #tpu.memory_space<vmem>>, %arg9: memref<128x1xf32, #tpu.memory_space<vmem>>, %arg10: memref<128x1xf32, #tpu.memory_space<vmem>>, %arg11: memref<128x128xf32, #tpu.memory_space<vmem>>) attributes {dimension_semantics = [#tpu.dimension_semantics<parallel>, #tpu.dimension_semantics<arbitrary>], iteration_bounds = array<i64: 2, 2>, scalar_prefetch = 0 : i64, scratch_operands = 4 : i64, tpu.core_type = #tpu.core_type<tc>, window_params = [{transform_indices = @transform_0, window_bounds = array<i64: 128, 128>}, {transform_indices = @transform_1, window_bounds = array<i64: 128, 128>}, {pipeline_mode = #tpu.pipeline_mode<synchronous>, transform_indices = @transform_2, window_bounds = array<i64: 128, 128>}, {transform_indices = @transform_3, window_bounds = array<i64: 128, 128>}, {pipeline_mode = #tpu.pipeline_mode<synchronous>, transform_indices = @transform_4, window_bounds = array<i64: 1, 128>}, {transform_indices = @transform_5, window_bounds = array<i64: 128, 128>}]} {
    %c0_i32 = arith.constant 0 : i32
    %0 = arith.cmpi eq, %arg1, %c0_i32 : i32
    %1 = arith.extui %0 : i1 to i32
    %c0_i32_0 = arith.constant 0 : i32
    %2 = arith.cmpi ne, %1, %c0_i32_0 : i32
    scf.if %2 {
      %c0_23 = arith.constant 0 : index
      %c0_24 = arith.constant 0 : index
      %46 = vector.load %arg3[%c0_23, %c0_24] : memref<128x128xf32, #tpu.memory_space<vmem>>, vector<128x128xf32>
      %47 = arith.truncf %46 : vector<128x128xf32> to vector<128x128xbf16>
      %c0_25 = arith.constant 0 : index
      %c0_26 = arith.constant 0 : index
      %48 = vector.load %arg4[%c0_25, %c0_26] : memref<128x128xf32, #tpu.memory_space<vmem>>, vector<128x128xf32>
      %49 = arith.truncf %48 : vector<128x128xf32> to vector<128x128xbf16>
      %cst_27 = arith.constant dense<0.000000e+00> : vector<128x128xf32>
      %50 = tpu.matmul %47, %49, %cst_27 {dimension_numbers = #tpu.dot_dimension_numbers<[1], [0], [0], [1], [0, 0, 1, 1], [], []>} : vector<128x128xbf16>, vector<128x128xbf16>, vector<128x128xf32> -> vector<128x128xf32>
      %51 = vector.extract_strided_slice %50 {offsets = [0, 127], sizes = [128, 1], strides = [1, 1]} : vector<128x128xf32> to vector<128x1xf32>
      %c0_28 = arith.constant 0 : index
      %c0_29 = arith.constant 0 : index
      %52 = vector.load %arg8[%c0_28, %c0_29] : memref<128x1xf32, #tpu.memory_space<vmem>>, vector<128x1xf32>
      tpu.vector_store %arg8[%c0_28, %c0_29], %51 {strides = array<i32>} : memref<128x1xf32, #tpu.memory_space<vmem>>, vector<128x1xf32>,
      %cst_30 = arith.constant -1.000000e+20 : f32
      %53 = vector.broadcast %cst_30 : f32 to vector<128x1xf32>
      %c0_31 = arith.constant 0 : index
      %c0_32 = arith.constant 0 : index
      %54 = vector.load %arg9[%c0_31, %c0_32] : memref<128x1xf32, #tpu.memory_space<vmem>>, vector<128x1xf32>
      tpu.vector_store %arg9[%c0_31, %c0_32], %53 {strides = array<i32>} : memref<128x1xf32, #tpu.memory_space<vmem>>, vector<128x1xf32>,
      %cst_33 = arith.constant 0.000000e+00 : f32
      %55 = vector.broadcast %cst_33 : f32 to vector<128x1xf32>
      %c0_34 = arith.constant 0 : index
      %c0_35 = arith.constant 0 : index
      %56 = vector.load %arg10[%c0_34, %c0_35] : memref<128x1xf32, #tpu.memory_space<vmem>>, vector<128x1xf32>
      tpu.vector_store %arg10[%c0_34, %c0_35], %55 {strides = array<i32>} : memref<128x1xf32, #tpu.memory_space<vmem>>, vector<128x1xf32>,
      %cst_36 = arith.constant 0.000000e+00 : f32
      %57 = vector.broadcast %cst_36 : f32 to vector<128x128xf32>
      %c0_37 = arith.constant 0 : index
      %c0_38 = arith.constant 0 : index
      %58 = vector.load %arg11[%c0_37, %c0_38] : memref<128x128xf32, #tpu.memory_space<vmem>>, vector<128x128xf32>
      tpu.vector_store %arg11[%c0_37, %c0_38], %57 {strides = array<i32>} : memref<128x128xf32, #tpu.memory_space<vmem>>, vector<128x128xf32>,
    } else {
    }
    %c0 = arith.constant 0 : index
    %c0_1 = arith.constant 0 : index
    %3 = vector.load %arg2[%c0, %c0_1] : memref<128x128xf32, #tpu.memory_space<vmem>>, vector<128x128xf32>
    %4 = vector.extract_strided_slice %3 {offsets = [0, 127], sizes = [128, 1], strides = [1, 1]} : vector<128x128xf32> to vector<128x1xf32>
    %5 = vector.shape_cast %4 : vector<128x1xf32> to vector<1x128xf32>
    %c0_2 = arith.constant 0 : index
    %c0_3 = arith.constant 0 : index
    %6 = vector.load %arg8[%c0_2, %c0_3] : memref<128x1xf32, #tpu.memory_space<vmem>>, vector<128x1xf32>
    %c0_4 = arith.constant 0 : index
    %c0_5 = arith.constant 0 : index
    %7 = vector.load %arg5[%c0_4, %c0_5] : memref<128x128xbf16, #tpu.memory_space<vmem>>, vector<128x128xbf16>
    %8 = arith.extf %7 : vector<128x128xbf16> to vector<128x128xf32>
    %9 = tpu.transpose %8, [1, 0] : vector<128x128xf32> -> vector<128x128xf32>
    %10 = vector.broadcast %6 : vector<128x1xf32> to vector<128x128xf32>
    %11 = vector.broadcast %5 : vector<1x128xf32> to vector<128x128xf32>
    %12 = arith.addf %10, %11 : vector<128x128xf32>
    %cst = arith.constant 0.000000e+00 : f32
    %13 = vector.broadcast %cst : f32 to vector<128x128xf32>
    %14 = arith.cmpf ogt, %12, %13 : vector<128x128xf32>
    %cst_6 = arith.constant 2.000000e-01 : f32
    %15 = vector.broadcast %cst_6 : f32 to vector<128x128xf32>
    %16 = arith.mulf %15, %12 : vector<128x128xf32>
    %17 = arith.select %14, %12, %16 : vector<128x128xi1>, vector<128x128xf32>
    %18 = arith.addf %17, %9 : vector<128x128xf32>
    %c0_7 = arith.constant 0 : index
    %c0_8 = arith.constant 0 : index
    %19 = vector.load %arg9[%c0_7, %c0_8] : memref<128x1xf32, #tpu.memory_space<vmem>>, vector<128x1xf32>
    %cst_9 = arith.constant dense<0xFF800000> : vector<128xf32>
    %20 = vector.multi_reduction <maximumf>, %18, %cst_9 [1] : vector<128x128xf32> to vector<128xf32>
    %21 = vector.shape_cast %20 : vector<128xf32> to vector<128x1xf32>
    %22 = arith.maximumf %19, %21 : vector<128x1xf32>
    %23 = vector.broadcast %22 : vector<128x1xf32> to vector<128x128xf32>
    %24 = arith.subf %18, %23 : vector<128x128xf32>
    %25 = math.exp %24 : vector<128x128xf32>
    %26 = arith.subf %19, %22 : vector<128x1xf32>
    %27 = math.exp %26 : vector<128x1xf32>
    %c0_10 = arith.constant 0 : index
    %c0_11 = arith.constant 0 : index
    %28 = vector.load %arg10[%c0_10, %c0_11] : memref<128x1xf32, #tpu.memory_space<vmem>>, vector<128x1xf32>
    %29 = arith.mulf %27, %28 : vector<128x1xf32>
    %cst_12 = arith.constant dense<0.000000e+00> : vector<128xf32>
    %30 = vector.multi_reduction <add>, %25, %cst_12 [1] : vector<128x128xf32> to vector<128xf32>
    %31 = vector.shape_cast %30 : vector<128xf32> to vector<128x1xf32>
    %32 = arith.addf %29, %31 : vector<128x1xf32>
    %c0_13 = arith.constant 0 : index
    %c0_14 = arith.constant 0 : index
    %33 = vector.load %arg10[%c0_13, %c0_14] : memref<128x1xf32, #tpu.memory_space<vmem>>, vector<128x1xf32>
    tpu.vector_store %arg10[%c0_13, %c0_14], %32 {strides = array<i32>} : memref<128x1xf32, #tpu.memory_space<vmem>>, vector<128x1xf32>,
    %c0_15 = arith.constant 0 : index
    %c0_16 = arith.constant 0 : index
    %34 = vector.load %arg11[%c0_15, %c0_16] : memref<128x128xf32, #tpu.memory_space<vmem>>, vector<128x128xf32>
    %35 = vector.broadcast %27 : vector<128x1xf32> to vector<128x128xf32>
    %36 = arith.mulf %35, %34 : vector<128x128xf32>
    %37 = arith.truncf %25 : vector<128x128xf32> to vector<128x128xbf16>
    %38 = arith.truncf %3 : vector<128x128xf32> to vector<128x128xbf16>
    %cst_17 = arith.constant dense<0.000000e+00> : vector<128x128xf32>
    %39 = tpu.matmul %37, %38, %cst_17 {dimension_numbers = #tpu.dot_dimension_numbers<[1], [0], [0], [1], [0, 0, 1, 1], [], []>} : vector<128x128xbf16>, vector<128x128xbf16>, vector<128x128xf32> -> vector<128x128xf32>
    %40 = arith.addf %36, %39 : vector<128x128xf32>
    %c0_18 = arith.constant 0 : index
    %c0_19 = arith.constant 0 : index
    %41 = vector.load %arg11[%c0_18, %c0_19] : memref<128x128xf32, #tpu.memory_space<vmem>>, vector<128x128xf32>
    tpu.vector_store %arg11[%c0_18, %c0_19], %40 {strides = array<i32>} : memref<128x128xf32, #tpu.memory_space<vmem>>, vector<128x128xf32>,
    %c0_20 = arith.constant 0 : index
    %c0_21 = arith.constant 0 : index
    %42 = vector.load %arg9[%c0_20, %c0_21] : memref<128x1xf32, #tpu.memory_space<vmem>>, vector<128x1xf32>
    tpu.vector_store %arg9[%c0_20, %c0_21], %22 {strides = array<i32>} : memref<128x1xf32, #tpu.memory_space<vmem>>, vector<128x1xf32>,
    %c1_i32 = arith.constant 1 : i32
    %43 = arith.cmpi eq, %arg1, %c1_i32 : i32
    %44 = arith.extui %43 : i1 to i32
    %c0_i32_22 = arith.constant 0 : i32
    %45 = arith.cmpi ne, %44, %c0_i32_22 : i32
    scf.if %45 {
      %c0_23 = arith.constant 0 : index
      %c0_24 = arith.constant 0 : index
      %46 = vector.load %arg10[%c0_23, %c0_24] : memref<128x1xf32, #tpu.memory_space<vmem>>, vector<128x1xf32>
      %cst_25 = arith.constant 1.000000e-16 : f32
      %47 = vector.broadcast %cst_25 : f32 to vector<128x1xf32>
      %48 = arith.maximumf %46, %47 : vector<128x1xf32>
      %49 = tpu.reciprocal %48 {approx = true} : vector<128x1xf32> -> vector<128x1xf32>
      %50 = arith.mulf %48, %49 : vector<128x1xf32>
      %cst_26 = arith.constant 2.000000e+00 : f32
      %51 = vector.broadcast %cst_26 : f32 to vector<128x1xf32>
      %52 = arith.subf %51, %50 : vector<128x1xf32>
      %53 = arith.mulf %49, %52 : vector<128x1xf32>
      %c0_27 = arith.constant 0 : index
      %c0_28 = arith.constant 0 : index
      %54 = vector.load %arg11[%c0_27, %c0_28] : memref<128x128xf32, #tpu.memory_space<vmem>>, vector<128x128xf32>
      %55 = vector.broadcast %53 : vector<128x1xf32> to vector<128x128xf32>
      %56 = arith.mulf %54, %55 : vector<128x128xf32>
      %c0_29 = arith.constant 0 : index
      %c0_30 = arith.constant 0 : index
      %57 = vector.load %arg6[%c0_29, %c0_30] : memref<1x128xf32, #tpu.memory_space<vmem>>, vector<1x128xf32>
      %58 = vector.broadcast %57 : vector<1x128xf32> to vector<128x128xf32>
      %59 = arith.addf %56, %58 : vector<128x128xf32>
      %cst_31 = arith.constant 0.000000e+00 : f32
      %60 = vector.broadcast %cst_31 : f32 to vector<128x128xf32>
      %61 = arith.maximumf %59, %60 : vector<128x128xf32>
      %c0_32 = arith.constant 0 : index
      %c0_33 = arith.constant 0 : index
      %62 = vector.load %arg7[%c0_32, %c0_33] : memref<128x128xf32, #tpu.memory_space<vmem>>, vector<128x128xf32>
      tpu.vector_store %arg7[%c0_32, %c0_33], %61 {strides = array<i32>} : memref<128x128xf32, #tpu.memory_space<vmem>>, vector<128x128xf32>,
    } else {
    }
    return
  }
  func.func @transform_0(%arg0: i32, %arg1: i32) -> (i32, i32) {
    %c0_i32 = arith.constant 0 : i32
    %c0_i32_0 = arith.constant 0 : i32
    return %arg1, %c0_i32 : i32, i32
  }
  func.func @transform_1(%arg0: i32, %arg1: i32) -> (i32, i32) {
    %c0_i32 = arith.constant 0 : i32
    %c0_i32_0 = arith.constant 0 : i32
    return %arg0, %c0_i32 : i32, i32
  }
  func.func @transform_2(%arg0: i32, %arg1: i32) -> (i32, i32) {
    %c0_i32 = arith.constant 0 : i32
    %c0_i32_0 = arith.constant 0 : i32
    %c0_i32_1 = arith.constant 0 : i32
    return %c0_i32, %c0_i32_0 : i32, i32
  }
  func.func @transform_3(%arg0: i32, %arg1: i32) -> (i32, i32) {
    %c0_i32 = arith.constant 0 : i32
    return %arg1, %arg0 : i32, i32
  }
  func.func @transform_4(%arg0: i32, %arg1: i32) -> (i32, i32) {
    %c0_i32 = arith.constant 0 : i32
    %c0_i32_0 = arith.constant 0 : i32
    %c0_i32_1 = arith.constant 0 : i32
    return %c0_i32, %c0_i32_0 : i32, i32
  }
  func.func @transform_5(%arg0: i32, %arg1: i32) -> (i32, i32) {
    %c0_i32 = arith.constant 0 : i32
    %c0_i32_0 = arith.constant 0 : i32
    return %arg0, %c0_i32 : i32, i32
  }
}

module attributes {stable_mosaic.version = 11 : i64} {
  func.func @_gat_attn_kernel(%arg0: i32, %arg1: i32, %arg2: memref<128x128xf32, #tpu.memory_space<vmem>>, %arg3: memref<128x128xf32, #tpu.memory_space<vmem>>, %arg4: memref<128x128xf32, #tpu.memory_space<vmem>>, %arg5: memref<128x128xbf16, #tpu.memory_space<vmem>>, %arg6: memref<1x128xf32, #tpu.memory_space<vmem>>, %arg7: memref<128x128xf32, #tpu.memory_space<vmem>>, %arg8: memref<128x1xf32, #tpu.memory_space<vmem>>, %arg9: memref<128x1xf32, #tpu.memory_space<vmem>>, %arg10: memref<128x1xf32, #tpu.memory_space<vmem>>, %arg11: memref<128x128xf32, #tpu.memory_space<vmem>>) attributes {dimension_semantics = [#tpu.dimension_semantics<parallel>, #tpu.dimension_semantics<arbitrary>], iteration_bounds = array<i64: 2, 2>, scalar_prefetch = 0 : i64, scratch_operands = 4 : i64, tpu.core_type = #tpu.core_type<tc>, window_params = [{transform_indices = @transform_0, window_bounds = array<i64: 128, 128>}, {transform_indices = @transform_1, window_bounds = array<i64: 128, 128>}, {pipeline_mode = #tpu.pipeline_mode<synchronous>, transform_indices = @transform_2, window_bounds = array<i64: 128, 128>}, {transform_indices = @transform_3, window_bounds = array<i64: 128, 128>}, {pipeline_mode = #tpu.pipeline_mode<synchronous>, transform_indices = @transform_4, window_bounds = array<i64: 1, 128>}, {transform_indices = @transform_5, window_bounds = array<i64: 128, 128>}]} {
    %c0_i32 = arith.constant 0 : i32
    %0 = arith.cmpi eq, %arg1, %c0_i32 : i32
    %1 = arith.extui %0 : i1 to i32
    %c0_i32_0 = arith.constant 0 : i32
    %2 = arith.cmpi ne, %1, %c0_i32_0 : i32
    scf.if %2 {
      %c0_23 = arith.constant 0 : index
      %c0_24 = arith.constant 0 : index
      %45 = vector.load %arg3[%c0_23, %c0_24] : memref<128x128xf32, #tpu.memory_space<vmem>>, vector<128x128xf32>
      %46 = arith.truncf %45 : vector<128x128xf32> to vector<128x128xbf16>
      %c0_25 = arith.constant 0 : index
      %c0_26 = arith.constant 0 : index
      %47 = vector.load %arg4[%c0_25, %c0_26] : memref<128x128xf32, #tpu.memory_space<vmem>>, vector<128x128xf32>
      %48 = arith.truncf %47 : vector<128x128xf32> to vector<128x128xbf16>
      %cst_27 = arith.constant dense<0.000000e+00> : vector<128x128xf32>
      %49 = tpu.matmul %46, %48, %cst_27 {dimension_numbers = #tpu.dot_dimension_numbers<[1], [0], [0], [1], [0, 0, 1, 1], [], []>} : vector<128x128xbf16>, vector<128x128xbf16>, vector<128x128xf32> -> vector<128x128xf32>
      %50 = vector.extract_strided_slice %49 {offsets = [0, 127], sizes = [128, 1], strides = [1, 1]} : vector<128x128xf32> to vector<128x1xf32>
      %c0_28 = arith.constant 0 : index
      %c0_29 = arith.constant 0 : index
      %51 = vector.load %arg8[%c0_28, %c0_29] : memref<128x1xf32, #tpu.memory_space<vmem>>, vector<128x1xf32>
      tpu.vector_store %arg8[%c0_28, %c0_29], %50 {strides = array<i32>} : memref<128x1xf32, #tpu.memory_space<vmem>>, vector<128x1xf32>,
      %cst_30 = arith.constant -1.000000e+20 : f32
      %52 = vector.broadcast %cst_30 : f32 to vector<128x1xf32>
      %c0_31 = arith.constant 0 : index
      %c0_32 = arith.constant 0 : index
      %53 = vector.load %arg9[%c0_31, %c0_32] : memref<128x1xf32, #tpu.memory_space<vmem>>, vector<128x1xf32>
      tpu.vector_store %arg9[%c0_31, %c0_32], %52 {strides = array<i32>} : memref<128x1xf32, #tpu.memory_space<vmem>>, vector<128x1xf32>,
      %cst_33 = arith.constant 0.000000e+00 : f32
      %54 = vector.broadcast %cst_33 : f32 to vector<128x1xf32>
      %c0_34 = arith.constant 0 : index
      %c0_35 = arith.constant 0 : index
      %55 = vector.load %arg10[%c0_34, %c0_35] : memref<128x1xf32, #tpu.memory_space<vmem>>, vector<128x1xf32>
      tpu.vector_store %arg10[%c0_34, %c0_35], %54 {strides = array<i32>} : memref<128x1xf32, #tpu.memory_space<vmem>>, vector<128x1xf32>,
      %cst_36 = arith.constant 0.000000e+00 : f32
      %56 = vector.broadcast %cst_36 : f32 to vector<128x128xf32>
      %c0_37 = arith.constant 0 : index
      %c0_38 = arith.constant 0 : index
      %57 = vector.load %arg11[%c0_37, %c0_38] : memref<128x128xf32, #tpu.memory_space<vmem>>, vector<128x128xf32>
      tpu.vector_store %arg11[%c0_37, %c0_38], %56 {strides = array<i32>} : memref<128x128xf32, #tpu.memory_space<vmem>>, vector<128x128xf32>,
    } else {
    }
    %c0 = arith.constant 0 : index
    %c0_1 = arith.constant 0 : index
    %3 = vector.load %arg2[%c0, %c0_1] : memref<128x128xf32, #tpu.memory_space<vmem>>, vector<128x128xf32>
    %4 = vector.extract_strided_slice %3 {offsets = [0, 127], sizes = [128, 1], strides = [1, 1]} : vector<128x128xf32> to vector<128x1xf32>
    %5 = vector.shape_cast %4 : vector<128x1xf32> to vector<1x128xf32>
    %c0_2 = arith.constant 0 : index
    %c0_3 = arith.constant 0 : index
    %6 = vector.load %arg8[%c0_2, %c0_3] : memref<128x1xf32, #tpu.memory_space<vmem>>, vector<128x1xf32>
    %c0_4 = arith.constant 0 : index
    %c0_5 = arith.constant 0 : index
    %7 = vector.load %arg5[%c0_4, %c0_5] : memref<128x128xbf16, #tpu.memory_space<vmem>>, vector<128x128xbf16>
    %8 = arith.extf %7 : vector<128x128xbf16> to vector<128x128xf32>
    %9 = vector.broadcast %6 : vector<128x1xf32> to vector<128x128xf32>
    %10 = vector.broadcast %5 : vector<1x128xf32> to vector<128x128xf32>
    %11 = arith.addf %9, %10 : vector<128x128xf32>
    %cst = arith.constant 0.000000e+00 : f32
    %12 = vector.broadcast %cst : f32 to vector<128x128xf32>
    %13 = arith.cmpf ogt, %11, %12 : vector<128x128xf32>
    %cst_6 = arith.constant 2.000000e-01 : f32
    %14 = vector.broadcast %cst_6 : f32 to vector<128x128xf32>
    %15 = arith.mulf %14, %11 : vector<128x128xf32>
    %16 = arith.select %13, %11, %15 : vector<128x128xi1>, vector<128x128xf32>
    %17 = arith.addf %16, %8 : vector<128x128xf32>
    %c0_7 = arith.constant 0 : index
    %c0_8 = arith.constant 0 : index
    %18 = vector.load %arg9[%c0_7, %c0_8] : memref<128x1xf32, #tpu.memory_space<vmem>>, vector<128x1xf32>
    %cst_9 = arith.constant dense<0xFF800000> : vector<128xf32>
    %19 = vector.multi_reduction <maximumf>, %17, %cst_9 [1] : vector<128x128xf32> to vector<128xf32>
    %20 = vector.shape_cast %19 : vector<128xf32> to vector<128x1xf32>
    %21 = arith.maximumf %18, %20 : vector<128x1xf32>
    %22 = vector.broadcast %21 : vector<128x1xf32> to vector<128x128xf32>
    %23 = arith.subf %17, %22 : vector<128x128xf32>
    %24 = math.exp %23 : vector<128x128xf32>
    %25 = arith.subf %18, %21 : vector<128x1xf32>
    %26 = math.exp %25 : vector<128x1xf32>
    %c0_10 = arith.constant 0 : index
    %c0_11 = arith.constant 0 : index
    %27 = vector.load %arg10[%c0_10, %c0_11] : memref<128x1xf32, #tpu.memory_space<vmem>>, vector<128x1xf32>
    %28 = arith.mulf %26, %27 : vector<128x1xf32>
    %cst_12 = arith.constant dense<0.000000e+00> : vector<128xf32>
    %29 = vector.multi_reduction <add>, %24, %cst_12 [1] : vector<128x128xf32> to vector<128xf32>
    %30 = vector.shape_cast %29 : vector<128xf32> to vector<128x1xf32>
    %31 = arith.addf %28, %30 : vector<128x1xf32>
    %c0_13 = arith.constant 0 : index
    %c0_14 = arith.constant 0 : index
    %32 = vector.load %arg10[%c0_13, %c0_14] : memref<128x1xf32, #tpu.memory_space<vmem>>, vector<128x1xf32>
    tpu.vector_store %arg10[%c0_13, %c0_14], %31 {strides = array<i32>} : memref<128x1xf32, #tpu.memory_space<vmem>>, vector<128x1xf32>,
    %c0_15 = arith.constant 0 : index
    %c0_16 = arith.constant 0 : index
    %33 = vector.load %arg11[%c0_15, %c0_16] : memref<128x128xf32, #tpu.memory_space<vmem>>, vector<128x128xf32>
    %34 = vector.broadcast %26 : vector<128x1xf32> to vector<128x128xf32>
    %35 = arith.mulf %34, %33 : vector<128x128xf32>
    %36 = arith.truncf %24 : vector<128x128xf32> to vector<128x128xbf16>
    %37 = arith.truncf %3 : vector<128x128xf32> to vector<128x128xbf16>
    %cst_17 = arith.constant dense<0.000000e+00> : vector<128x128xf32>
    %38 = tpu.matmul %36, %37, %cst_17 {dimension_numbers = #tpu.dot_dimension_numbers<[1], [0], [0], [1], [0, 0, 1, 1], [], []>} : vector<128x128xbf16>, vector<128x128xbf16>, vector<128x128xf32> -> vector<128x128xf32>
    %39 = arith.addf %35, %38 : vector<128x128xf32>
    %c0_18 = arith.constant 0 : index
    %c0_19 = arith.constant 0 : index
    %40 = vector.load %arg11[%c0_18, %c0_19] : memref<128x128xf32, #tpu.memory_space<vmem>>, vector<128x128xf32>
    tpu.vector_store %arg11[%c0_18, %c0_19], %39 {strides = array<i32>} : memref<128x128xf32, #tpu.memory_space<vmem>>, vector<128x128xf32>,
    %c0_20 = arith.constant 0 : index
    %c0_21 = arith.constant 0 : index
    %41 = vector.load %arg9[%c0_20, %c0_21] : memref<128x1xf32, #tpu.memory_space<vmem>>, vector<128x1xf32>
    tpu.vector_store %arg9[%c0_20, %c0_21], %21 {strides = array<i32>} : memref<128x1xf32, #tpu.memory_space<vmem>>, vector<128x1xf32>,
    %c1_i32 = arith.constant 1 : i32
    %42 = arith.cmpi eq, %arg1, %c1_i32 : i32
    %43 = arith.extui %42 : i1 to i32
    %c0_i32_22 = arith.constant 0 : i32
    %44 = arith.cmpi ne, %43, %c0_i32_22 : i32
    scf.if %44 {
      %c0_23 = arith.constant 0 : index
      %c0_24 = arith.constant 0 : index
      %45 = vector.load %arg10[%c0_23, %c0_24] : memref<128x1xf32, #tpu.memory_space<vmem>>, vector<128x1xf32>
      %cst_25 = arith.constant 1.000000e-16 : f32
      %46 = vector.broadcast %cst_25 : f32 to vector<128x1xf32>
      %47 = arith.maximumf %45, %46 : vector<128x1xf32>
      %48 = tpu.reciprocal %47 {approx = true} : vector<128x1xf32> -> vector<128x1xf32>
      %49 = arith.mulf %47, %48 : vector<128x1xf32>
      %cst_26 = arith.constant 2.000000e+00 : f32
      %50 = vector.broadcast %cst_26 : f32 to vector<128x1xf32>
      %51 = arith.subf %50, %49 : vector<128x1xf32>
      %52 = arith.mulf %48, %51 : vector<128x1xf32>
      %c0_27 = arith.constant 0 : index
      %c0_28 = arith.constant 0 : index
      %53 = vector.load %arg11[%c0_27, %c0_28] : memref<128x128xf32, #tpu.memory_space<vmem>>, vector<128x128xf32>
      %54 = vector.broadcast %52 : vector<128x1xf32> to vector<128x128xf32>
      %55 = arith.mulf %53, %54 : vector<128x128xf32>
      %c0_29 = arith.constant 0 : index
      %c0_30 = arith.constant 0 : index
      %56 = vector.load %arg6[%c0_29, %c0_30] : memref<1x128xf32, #tpu.memory_space<vmem>>, vector<1x128xf32>
      %57 = vector.broadcast %56 : vector<1x128xf32> to vector<128x128xf32>
      %58 = arith.addf %55, %57 : vector<128x128xf32>
      %cst_31 = arith.constant 0.000000e+00 : f32
      %59 = vector.broadcast %cst_31 : f32 to vector<128x128xf32>
      %60 = arith.maximumf %58, %59 : vector<128x128xf32>
      %c0_32 = arith.constant 0 : index
      %c0_33 = arith.constant 0 : index
      %61 = vector.load %arg7[%c0_32, %c0_33] : memref<128x128xf32, #tpu.memory_space<vmem>>, vector<128x128xf32>
      tpu.vector_store %arg7[%c0_32, %c0_33], %60 {strides = array<i32>} : memref<128x128xf32, #tpu.memory_space<vmem>>, vector<128x128xf32>,
    } else {
    }
    return
  }
  func.func @transform_0(%arg0: i32, %arg1: i32) -> (i32, i32) {
    %c0_i32 = arith.constant 0 : i32
    %c0_i32_0 = arith.constant 0 : i32
    return %arg1, %c0_i32 : i32, i32
  }
  func.func @transform_1(%arg0: i32, %arg1: i32) -> (i32, i32) {
    %c0_i32 = arith.constant 0 : i32
    %c0_i32_0 = arith.constant 0 : i32
    return %arg0, %c0_i32 : i32, i32
  }
  func.func @transform_2(%arg0: i32, %arg1: i32) -> (i32, i32) {
    %c0_i32 = arith.constant 0 : i32
    %c0_i32_0 = arith.constant 0 : i32
    %c0_i32_1 = arith.constant 0 : i32
    return %c0_i32, %c0_i32_0 : i32, i32
  }
  func.func @transform_3(%arg0: i32, %arg1: i32) -> (i32, i32) {
    %c0_i32 = arith.constant 0 : i32
    return %arg0, %arg1 : i32, i32
  }
  func.func @transform_4(%arg0: i32, %arg1: i32) -> (i32, i32) {
    %c0_i32 = arith.constant 0 : i32
    %c0_i32_0 = arith.constant 0 : i32
    %c0_i32_1 = arith.constant 0 : i32
    return %c0_i32, %c0_i32_0 : i32, i32
  }
  func.func @transform_5(%arg0: i32, %arg1: i32) -> (i32, i32) {
    %c0_i32 = arith.constant 0 : i32
    %c0_i32_0 = arith.constant 0 : i32
    return %arg0, %c0_i32 : i32, i32
  }
}

module attributes {stable_mosaic.version = 11 : i64} {
  func.func @_gat_attn_kernel(%arg0: i32, %arg1: i32, %arg2: memref<128x128xf32, #tpu.memory_space<vmem>>, %arg3: memref<128x128xf32, #tpu.memory_space<vmem>>, %arg4: memref<128x128xf32, #tpu.memory_space<vmem>>, %arg5: memref<128x128xbf16, #tpu.memory_space<vmem>>, %arg6: memref<1x128xf32, #tpu.memory_space<vmem>>, %arg7: memref<128x128xf32, #tpu.memory_space<vmem>>, %arg8: memref<128x1xf32, #tpu.memory_space<vmem>>, %arg9: memref<128x1xf32, #tpu.memory_space<vmem>>, %arg10: memref<128x1xf32, #tpu.memory_space<vmem>>, %arg11: memref<128x128xf32, #tpu.memory_space<vmem>>) attributes {dimension_semantics = [#tpu.dimension_semantics<parallel>, #tpu.dimension_semantics<arbitrary>], iteration_bounds = array<i64: 2, 2>, scalar_prefetch = 0 : i64, scratch_operands = 4 : i64, tpu.core_type = #tpu.core_type<tc>, window_params = [{transform_indices = @transform_0, window_bounds = array<i64: 128, 128>}, {transform_indices = @transform_1, window_bounds = array<i64: 128, 128>}, {pipeline_mode = #tpu.pipeline_mode<synchronous>, transform_indices = @transform_2, window_bounds = array<i64: 128, 128>}, {transform_indices = @transform_3, window_bounds = array<i64: 128, 128>}, {pipeline_mode = #tpu.pipeline_mode<synchronous>, transform_indices = @transform_4, window_bounds = array<i64: 1, 128>}, {transform_indices = @transform_5, window_bounds = array<i64: 128, 128>}]} {
    %c0_i32 = arith.constant 0 : i32
    %0 = arith.cmpi eq, %arg1, %c0_i32 : i32
    %1 = arith.extui %0 : i1 to i32
    %c0_i32_0 = arith.constant 0 : i32
    %2 = arith.cmpi ne, %1, %c0_i32_0 : i32
    scf.if %2 {
      %c0_23 = arith.constant 0 : index
      %c0_24 = arith.constant 0 : index
      %45 = vector.load %arg3[%c0_23, %c0_24] : memref<128x128xf32, #tpu.memory_space<vmem>>, vector<128x128xf32>
      %46 = arith.truncf %45 : vector<128x128xf32> to vector<128x128xbf16>
      %c0_25 = arith.constant 0 : index
      %c0_26 = arith.constant 0 : index
      %47 = vector.load %arg4[%c0_25, %c0_26] : memref<128x128xf32, #tpu.memory_space<vmem>>, vector<128x128xf32>
      %48 = arith.truncf %47 : vector<128x128xf32> to vector<128x128xbf16>
      %cst_27 = arith.constant dense<0.000000e+00> : vector<128x128xf32>
      %49 = tpu.matmul %46, %48, %cst_27 {dimension_numbers = #tpu.dot_dimension_numbers<[1], [0], [0], [1], [0, 0, 1, 1], [], []>} : vector<128x128xbf16>, vector<128x128xbf16>, vector<128x128xf32> -> vector<128x128xf32>
      %50 = vector.extract_strided_slice %49 {offsets = [0, 127], sizes = [128, 1], strides = [1, 1]} : vector<128x128xf32> to vector<128x1xf32>
      %c0_28 = arith.constant 0 : index
      %c0_29 = arith.constant 0 : index
      %51 = vector.load %arg8[%c0_28, %c0_29] : memref<128x1xf32, #tpu.memory_space<vmem>>, vector<128x1xf32>
      tpu.vector_store %arg8[%c0_28, %c0_29], %50 {strides = array<i32>} : memref<128x1xf32, #tpu.memory_space<vmem>>, vector<128x1xf32>,
      %cst_30 = arith.constant -1.000000e+20 : f32
      %52 = vector.broadcast %cst_30 : f32 to vector<128x1xf32>
      %c0_31 = arith.constant 0 : index
      %c0_32 = arith.constant 0 : index
      %53 = vector.load %arg9[%c0_31, %c0_32] : memref<128x1xf32, #tpu.memory_space<vmem>>, vector<128x1xf32>
      tpu.vector_store %arg9[%c0_31, %c0_32], %52 {strides = array<i32>} : memref<128x1xf32, #tpu.memory_space<vmem>>, vector<128x1xf32>,
      %cst_33 = arith.constant 0.000000e+00 : f32
      %54 = vector.broadcast %cst_33 : f32 to vector<128x1xf32>
      %c0_34 = arith.constant 0 : index
      %c0_35 = arith.constant 0 : index
      %55 = vector.load %arg10[%c0_34, %c0_35] : memref<128x1xf32, #tpu.memory_space<vmem>>, vector<128x1xf32>
      tpu.vector_store %arg10[%c0_34, %c0_35], %54 {strides = array<i32>} : memref<128x1xf32, #tpu.memory_space<vmem>>, vector<128x1xf32>,
      %cst_36 = arith.constant 0.000000e+00 : f32
      %56 = vector.broadcast %cst_36 : f32 to vector<128x128xf32>
      %c0_37 = arith.constant 0 : index
      %c0_38 = arith.constant 0 : index
      %57 = vector.load %arg11[%c0_37, %c0_38] : memref<128x128xf32, #tpu.memory_space<vmem>>, vector<128x128xf32>
      tpu.vector_store %arg11[%c0_37, %c0_38], %56 {strides = array<i32>} : memref<128x128xf32, #tpu.memory_space<vmem>>, vector<128x128xf32>,
    } else {
    }
    %c0 = arith.constant 0 : index
    %c0_1 = arith.constant 0 : index
    %3 = vector.load %arg2[%c0, %c0_1] : memref<128x128xf32, #tpu.memory_space<vmem>>, vector<128x128xf32>
    %4 = vector.extract_strided_slice %3 {offsets = [0, 127], sizes = [128, 1], strides = [1, 1]} : vector<128x128xf32> to vector<128x1xf32>
    %5 = vector.shape_cast %4 : vector<128x1xf32> to vector<1x128xf32>
    %c0_2 = arith.constant 0 : index
    %c0_3 = arith.constant 0 : index
    %6 = vector.load %arg8[%c0_2, %c0_3] : memref<128x1xf32, #tpu.memory_space<vmem>>, vector<128x1xf32>
    %c0_4 = arith.constant 0 : index
    %c0_5 = arith.constant 0 : index
    %7 = vector.load %arg5[%c0_4, %c0_5] : memref<128x128xbf16, #tpu.memory_space<vmem>>, vector<128x128xbf16>
    %8 = arith.extf %7 : vector<128x128xbf16> to vector<128x128xf32>
    %9 = vector.broadcast %6 : vector<128x1xf32> to vector<128x128xf32>
    %10 = vector.broadcast %5 : vector<1x128xf32> to vector<128x128xf32>
    %11 = arith.addf %9, %10 : vector<128x128xf32>
    %cst = arith.constant 0.000000e+00 : f32
    %12 = vector.broadcast %cst : f32 to vector<128x128xf32>
    %13 = arith.cmpf ogt, %11, %12 : vector<128x128xf32>
    %cst_6 = arith.constant 2.000000e-01 : f32
    %14 = vector.broadcast %cst_6 : f32 to vector<128x128xf32>
    %15 = arith.mulf %14, %11 : vector<128x128xf32>
    %16 = arith.select %13, %11, %15 : vector<128x128xi1>, vector<128x128xf32>
    %17 = arith.addf %16, %8 : vector<128x128xf32>
    %c0_7 = arith.constant 0 : index
    %c0_8 = arith.constant 0 : index
    %18 = vector.load %arg9[%c0_7, %c0_8] : memref<128x1xf32, #tpu.memory_space<vmem>>, vector<128x1xf32>
    %cst_9 = arith.constant dense<0xFF800000> : vector<128xf32>
    %19 = vector.multi_reduction <maximumf>, %17, %cst_9 [1] : vector<128x128xf32> to vector<128xf32>
    %20 = vector.shape_cast %19 : vector<128xf32> to vector<128x1xf32>
    %21 = arith.maximumf %18, %20 : vector<128x1xf32>
    %22 = vector.broadcast %21 : vector<128x1xf32> to vector<128x128xf32>
    %23 = arith.subf %17, %22 : vector<128x128xf32>
    %24 = math.exp %23 : vector<128x128xf32>
    %25 = arith.subf %18, %21 : vector<128x1xf32>
    %26 = math.exp %25 : vector<128x1xf32>
    %c0_10 = arith.constant 0 : index
    %c0_11 = arith.constant 0 : index
    %27 = vector.load %arg10[%c0_10, %c0_11] : memref<128x1xf32, #tpu.memory_space<vmem>>, vector<128x1xf32>
    %28 = arith.mulf %26, %27 : vector<128x1xf32>
    %cst_12 = arith.constant dense<0.000000e+00> : vector<128xf32>
    %29 = vector.multi_reduction <add>, %24, %cst_12 [1] : vector<128x128xf32> to vector<128xf32>
    %30 = vector.shape_cast %29 : vector<128xf32> to vector<128x1xf32>
    %31 = arith.addf %28, %30 : vector<128x1xf32>
    %c0_13 = arith.constant 0 : index
    %c0_14 = arith.constant 0 : index
    %32 = vector.load %arg10[%c0_13, %c0_14] : memref<128x1xf32, #tpu.memory_space<vmem>>, vector<128x1xf32>
    tpu.vector_store %arg10[%c0_13, %c0_14], %31 {strides = array<i32>} : memref<128x1xf32, #tpu.memory_space<vmem>>, vector<128x1xf32>,
    %c0_15 = arith.constant 0 : index
    %c0_16 = arith.constant 0 : index
    %33 = vector.load %arg11[%c0_15, %c0_16] : memref<128x128xf32, #tpu.memory_space<vmem>>, vector<128x128xf32>
    %34 = vector.broadcast %26 : vector<128x1xf32> to vector<128x128xf32>
    %35 = arith.mulf %34, %33 : vector<128x128xf32>
    %36 = arith.truncf %24 : vector<128x128xf32> to vector<128x128xbf16>
    %37 = arith.truncf %3 : vector<128x128xf32> to vector<128x128xbf16>
    %cst_17 = arith.constant dense<0.000000e+00> : vector<128x128xf32>
    %38 = tpu.matmul %36, %37, %cst_17 {dimension_numbers = #tpu.dot_dimension_numbers<[1], [0], [0], [1], [0, 0, 1, 1], [], []>} : vector<128x128xbf16>, vector<128x128xbf16>, vector<128x128xf32> -> vector<128x128xf32>
    %39 = arith.addf %35, %38 : vector<128x128xf32>
    %c0_18 = arith.constant 0 : index
    %c0_19 = arith.constant 0 : index
    %40 = vector.load %arg11[%c0_18, %c0_19] : memref<128x128xf32, #tpu.memory_space<vmem>>, vector<128x128xf32>
    tpu.vector_store %arg11[%c0_18, %c0_19], %39 {strides = array<i32>} : memref<128x128xf32, #tpu.memory_space<vmem>>, vector<128x128xf32>,
    %c0_20 = arith.constant 0 : index
    %c0_21 = arith.constant 0 : index
    %41 = vector.load %arg9[%c0_20, %c0_21] : memref<128x1xf32, #tpu.memory_space<vmem>>, vector<128x1xf32>
    tpu.vector_store %arg9[%c0_20, %c0_21], %21 {strides = array<i32>} : memref<128x1xf32, #tpu.memory_space<vmem>>, vector<128x1xf32>,
    %c1_i32 = arith.constant 1 : i32
    %42 = arith.cmpi eq, %arg1, %c1_i32 : i32
    %43 = arith.extui %42 : i1 to i32
    %c0_i32_22 = arith.constant 0 : i32
    %44 = arith.cmpi ne, %43, %c0_i32_22 : i32
    scf.if %44 {
      %c0_23 = arith.constant 0 : index
      %c0_24 = arith.constant 0 : index
      %45 = vector.load %arg10[%c0_23, %c0_24] : memref<128x1xf32, #tpu.memory_space<vmem>>, vector<128x1xf32>
      %cst_25 = arith.constant 1.000000e-16 : f32
      %46 = vector.broadcast %cst_25 : f32 to vector<128x1xf32>
      %47 = arith.maximumf %45, %46 : vector<128x1xf32>
      %48 = tpu.reciprocal %47 {approx = true} : vector<128x1xf32> -> vector<128x1xf32>
      %49 = arith.mulf %47, %48 : vector<128x1xf32>
      %cst_26 = arith.constant 2.000000e+00 : f32
      %50 = vector.broadcast %cst_26 : f32 to vector<128x1xf32>
      %51 = arith.subf %50, %49 : vector<128x1xf32>
      %52 = arith.mulf %48, %51 : vector<128x1xf32>
      %c0_27 = arith.constant 0 : index
      %c0_28 = arith.constant 0 : index
      %53 = vector.load %arg11[%c0_27, %c0_28] : memref<128x128xf32, #tpu.memory_space<vmem>>, vector<128x128xf32>
      %54 = vector.broadcast %52 : vector<128x1xf32> to vector<128x128xf32>
      %55 = arith.mulf %53, %54 : vector<128x128xf32>
      %c0_29 = arith.constant 0 : index
      %c0_30 = arith.constant 0 : index
      %56 = vector.load %arg6[%c0_29, %c0_30] : memref<1x128xf32, #tpu.memory_space<vmem>>, vector<1x128xf32>
      %57 = vector.broadcast %56 : vector<1x128xf32> to vector<128x128xf32>
      %58 = arith.addf %55, %57 : vector<128x128xf32>
      %c0_31 = arith.constant 0 : index
      %c0_32 = arith.constant 0 : index
      %59 = vector.load %arg7[%c0_31, %c0_32] : memref<128x128xf32, #tpu.memory_space<vmem>>, vector<128x128xf32>
      tpu.vector_store %arg7[%c0_31, %c0_32], %58 {strides = array<i32>} : memref<128x128xf32, #tpu.memory_space<vmem>>, vector<128x128xf32>,
    } else {
    }
    return
  }
  func.func @transform_0(%arg0: i32, %arg1: i32) -> (i32, i32) {
    %c0_i32 = arith.constant 0 : i32
    %c0_i32_0 = arith.constant 0 : i32
    return %arg1, %c0_i32 : i32, i32
  }
  func.func @transform_1(%arg0: i32, %arg1: i32) -> (i32, i32) {
    %c0_i32 = arith.constant 0 : i32
    %c0_i32_0 = arith.constant 0 : i32
    return %arg0, %c0_i32 : i32, i32
  }
  func.func @transform_2(%arg0: i32, %arg1: i32) -> (i32, i32) {
    %c0_i32 = arith.constant 0 : i32
    %c0_i32_0 = arith.constant 0 : i32
    %c0_i32_1 = arith.constant 0 : i32
    return %c0_i32, %c0_i32_0 : i32, i32
  }
  func.func @transform_3(%arg0: i32, %arg1: i32) -> (i32, i32) {
    %c0_i32 = arith.constant 0 : i32
    return %arg0, %arg1 : i32, i32
  }
  func.func @transform_4(%arg0: i32, %arg1: i32) -> (i32, i32) {
    %c0_i32 = arith.constant 0 : i32
    %c0_i32_0 = arith.constant 0 : i32
    %c0_i32_1 = arith.constant 0 : i32
    return %c0_i32, %c0_i32_0 : i32, i32
  }
  func.func @transform_5(%arg0: i32, %arg1: i32) -> (i32, i32) {
    %c0_i32 = arith.constant 0 : i32
    %c0_i32_0 = arith.constant 0 : i32
    return %arg0, %c0_i32 : i32, i32
  }
}

module attributes {stable_mosaic.version = 11 : i64} {
  func.func @_gat_attn_kernel(%arg0: i32, %arg1: i32, %arg2: memref<128x128xf32, #tpu.memory_space<vmem>>, %arg3: memref<128x128xf32, #tpu.memory_space<vmem>>, %arg4: memref<128x128xf32, #tpu.memory_space<vmem>>, %arg5: memref<128x128xbf16, #tpu.memory_space<vmem>>, %arg6: memref<1x128xf32, #tpu.memory_space<vmem>>, %arg7: memref<128x128xf32, #tpu.memory_space<vmem>>, %arg8: memref<128x1xf32, #tpu.memory_space<vmem>>, %arg9: memref<128x1xf32, #tpu.memory_space<vmem>>, %arg10: memref<128x1xf32, #tpu.memory_space<vmem>>, %arg11: memref<128x128xf32, #tpu.memory_space<vmem>>) attributes {dimension_semantics = [#tpu.dimension_semantics<parallel>, #tpu.dimension_semantics<arbitrary>], iteration_bounds = array<i64: 2, 2>, scalar_prefetch = 0 : i64, scratch_operands = 4 : i64, tpu.core_type = #tpu.core_type<tc>, window_params = [{transform_indices = @transform_0, window_bounds = array<i64: 128, 128>}, {transform_indices = @transform_1, window_bounds = array<i64: 128, 128>}, {pipeline_mode = #tpu.pipeline_mode<synchronous>, transform_indices = @transform_2, window_bounds = array<i64: 128, 128>}, {transform_indices = @transform_3, window_bounds = array<i64: 128, 128>}, {pipeline_mode = #tpu.pipeline_mode<synchronous>, transform_indices = @transform_4, window_bounds = array<i64: 1, 128>}, {transform_indices = @transform_5, window_bounds = array<i64: 128, 128>}]} {
    %c0_i32 = arith.constant 0 : i32
    %0 = arith.cmpi eq, %arg1, %c0_i32 : i32
    %1 = arith.extui %0 : i1 to i32
    %c0_i32_0 = arith.constant 0 : i32
    %2 = arith.cmpi ne, %1, %c0_i32_0 : i32
    scf.if %2 {
      %c0_23 = arith.constant 0 : index
      %c0_24 = arith.constant 0 : index
      %46 = vector.load %arg3[%c0_23, %c0_24] : memref<128x128xf32, #tpu.memory_space<vmem>>, vector<128x128xf32>
      %47 = arith.truncf %46 : vector<128x128xf32> to vector<128x128xbf16>
      %c0_25 = arith.constant 0 : index
      %c0_26 = arith.constant 0 : index
      %48 = vector.load %arg4[%c0_25, %c0_26] : memref<128x128xf32, #tpu.memory_space<vmem>>, vector<128x128xf32>
      %49 = arith.truncf %48 : vector<128x128xf32> to vector<128x128xbf16>
      %cst_27 = arith.constant dense<0.000000e+00> : vector<128x128xf32>
      %50 = tpu.matmul %47, %49, %cst_27 {dimension_numbers = #tpu.dot_dimension_numbers<[1], [0], [0], [1], [0, 0, 1, 1], [], []>} : vector<128x128xbf16>, vector<128x128xbf16>, vector<128x128xf32> -> vector<128x128xf32>
      %51 = vector.extract_strided_slice %50 {offsets = [0, 127], sizes = [128, 1], strides = [1, 1]} : vector<128x128xf32> to vector<128x1xf32>
      %c0_28 = arith.constant 0 : index
      %c0_29 = arith.constant 0 : index
      %52 = vector.load %arg8[%c0_28, %c0_29] : memref<128x1xf32, #tpu.memory_space<vmem>>, vector<128x1xf32>
      tpu.vector_store %arg8[%c0_28, %c0_29], %51 {strides = array<i32>} : memref<128x1xf32, #tpu.memory_space<vmem>>, vector<128x1xf32>,
      %cst_30 = arith.constant -1.000000e+20 : f32
      %53 = vector.broadcast %cst_30 : f32 to vector<128x1xf32>
      %c0_31 = arith.constant 0 : index
      %c0_32 = arith.constant 0 : index
      %54 = vector.load %arg9[%c0_31, %c0_32] : memref<128x1xf32, #tpu.memory_space<vmem>>, vector<128x1xf32>
      tpu.vector_store %arg9[%c0_31, %c0_32], %53 {strides = array<i32>} : memref<128x1xf32, #tpu.memory_space<vmem>>, vector<128x1xf32>,
      %cst_33 = arith.constant 0.000000e+00 : f32
      %55 = vector.broadcast %cst_33 : f32 to vector<128x1xf32>
      %c0_34 = arith.constant 0 : index
      %c0_35 = arith.constant 0 : index
      %56 = vector.load %arg10[%c0_34, %c0_35] : memref<128x1xf32, #tpu.memory_space<vmem>>, vector<128x1xf32>
      tpu.vector_store %arg10[%c0_34, %c0_35], %55 {strides = array<i32>} : memref<128x1xf32, #tpu.memory_space<vmem>>, vector<128x1xf32>,
      %cst_36 = arith.constant 0.000000e+00 : f32
      %57 = vector.broadcast %cst_36 : f32 to vector<128x128xf32>
      %c0_37 = arith.constant 0 : index
      %c0_38 = arith.constant 0 : index
      %58 = vector.load %arg11[%c0_37, %c0_38] : memref<128x128xf32, #tpu.memory_space<vmem>>, vector<128x128xf32>
      tpu.vector_store %arg11[%c0_37, %c0_38], %57 {strides = array<i32>} : memref<128x128xf32, #tpu.memory_space<vmem>>, vector<128x128xf32>,
    } else {
    }
    %c0 = arith.constant 0 : index
    %c0_1 = arith.constant 0 : index
    %3 = vector.load %arg2[%c0, %c0_1] : memref<128x128xf32, #tpu.memory_space<vmem>>, vector<128x128xf32>
    %4 = vector.extract_strided_slice %3 {offsets = [0, 127], sizes = [128, 1], strides = [1, 1]} : vector<128x128xf32> to vector<128x1xf32>
    %5 = vector.shape_cast %4 : vector<128x1xf32> to vector<1x128xf32>
    %c0_2 = arith.constant 0 : index
    %c0_3 = arith.constant 0 : index
    %6 = vector.load %arg8[%c0_2, %c0_3] : memref<128x1xf32, #tpu.memory_space<vmem>>, vector<128x1xf32>
    %c0_4 = arith.constant 0 : index
    %c0_5 = arith.constant 0 : index
    %7 = vector.load %arg5[%c0_4, %c0_5] : memref<128x128xbf16, #tpu.memory_space<vmem>>, vector<128x128xbf16>
    %8 = arith.extf %7 : vector<128x128xbf16> to vector<128x128xf32>
    %9 = tpu.transpose %8, [1, 0] : vector<128x128xf32> -> vector<128x128xf32>
    %10 = vector.broadcast %6 : vector<128x1xf32> to vector<128x128xf32>
    %11 = vector.broadcast %5 : vector<1x128xf32> to vector<128x128xf32>
    %12 = arith.addf %10, %11 : vector<128x128xf32>
    %cst = arith.constant 0.000000e+00 : f32
    %13 = vector.broadcast %cst : f32 to vector<128x128xf32>
    %14 = arith.cmpf ogt, %12, %13 : vector<128x128xf32>
    %cst_6 = arith.constant 2.000000e-01 : f32
    %15 = vector.broadcast %cst_6 : f32 to vector<128x128xf32>
    %16 = arith.mulf %15, %12 : vector<128x128xf32>
    %17 = arith.select %14, %12, %16 : vector<128x128xi1>, vector<128x128xf32>
    %18 = arith.addf %17, %9 : vector<128x128xf32>
    %c0_7 = arith.constant 0 : index
    %c0_8 = arith.constant 0 : index
    %19 = vector.load %arg9[%c0_7, %c0_8] : memref<128x1xf32, #tpu.memory_space<vmem>>, vector<128x1xf32>
    %cst_9 = arith.constant dense<0xFF800000> : vector<128xf32>
    %20 = vector.multi_reduction <maximumf>, %18, %cst_9 [1] : vector<128x128xf32> to vector<128xf32>
    %21 = vector.shape_cast %20 : vector<128xf32> to vector<128x1xf32>
    %22 = arith.maximumf %19, %21 : vector<128x1xf32>
    %23 = vector.broadcast %22 : vector<128x1xf32> to vector<128x128xf32>
    %24 = arith.subf %18, %23 : vector<128x128xf32>
    %25 = math.exp %24 : vector<128x128xf32>
    %26 = arith.subf %19, %22 : vector<128x1xf32>
    %27 = math.exp %26 : vector<128x1xf32>
    %c0_10 = arith.constant 0 : index
    %c0_11 = arith.constant 0 : index
    %28 = vector.load %arg10[%c0_10, %c0_11] : memref<128x1xf32, #tpu.memory_space<vmem>>, vector<128x1xf32>
    %29 = arith.mulf %27, %28 : vector<128x1xf32>
    %cst_12 = arith.constant dense<0.000000e+00> : vector<128xf32>
    %30 = vector.multi_reduction <add>, %25, %cst_12 [1] : vector<128x128xf32> to vector<128xf32>
    %31 = vector.shape_cast %30 : vector<128xf32> to vector<128x1xf32>
    %32 = arith.addf %29, %31 : vector<128x1xf32>
    %c0_13 = arith.constant 0 : index
    %c0_14 = arith.constant 0 : index
    %33 = vector.load %arg10[%c0_13, %c0_14] : memref<128x1xf32, #tpu.memory_space<vmem>>, vector<128x1xf32>
    tpu.vector_store %arg10[%c0_13, %c0_14], %32 {strides = array<i32>} : memref<128x1xf32, #tpu.memory_space<vmem>>, vector<128x1xf32>,
    %c0_15 = arith.constant 0 : index
    %c0_16 = arith.constant 0 : index
    %34 = vector.load %arg11[%c0_15, %c0_16] : memref<128x128xf32, #tpu.memory_space<vmem>>, vector<128x128xf32>
    %35 = vector.broadcast %27 : vector<128x1xf32> to vector<128x128xf32>
    %36 = arith.mulf %35, %34 : vector<128x128xf32>
    %37 = arith.truncf %25 : vector<128x128xf32> to vector<128x128xbf16>
    %38 = arith.truncf %3 : vector<128x128xf32> to vector<128x128xbf16>
    %cst_17 = arith.constant dense<0.000000e+00> : vector<128x128xf32>
    %39 = tpu.matmul %37, %38, %cst_17 {dimension_numbers = #tpu.dot_dimension_numbers<[1], [0], [0], [1], [0, 0, 1, 1], [], []>} : vector<128x128xbf16>, vector<128x128xbf16>, vector<128x128xf32> -> vector<128x128xf32>
    %40 = arith.addf %36, %39 : vector<128x128xf32>
    %c0_18 = arith.constant 0 : index
    %c0_19 = arith.constant 0 : index
    %41 = vector.load %arg11[%c0_18, %c0_19] : memref<128x128xf32, #tpu.memory_space<vmem>>, vector<128x128xf32>
    tpu.vector_store %arg11[%c0_18, %c0_19], %40 {strides = array<i32>} : memref<128x128xf32, #tpu.memory_space<vmem>>, vector<128x128xf32>,
    %c0_20 = arith.constant 0 : index
    %c0_21 = arith.constant 0 : index
    %42 = vector.load %arg9[%c0_20, %c0_21] : memref<128x1xf32, #tpu.memory_space<vmem>>, vector<128x1xf32>
    tpu.vector_store %arg9[%c0_20, %c0_21], %22 {strides = array<i32>} : memref<128x1xf32, #tpu.memory_space<vmem>>, vector<128x1xf32>,
    %c1_i32 = arith.constant 1 : i32
    %43 = arith.cmpi eq, %arg1, %c1_i32 : i32
    %44 = arith.extui %43 : i1 to i32
    %c0_i32_22 = arith.constant 0 : i32
    %45 = arith.cmpi ne, %44, %c0_i32_22 : i32
    scf.if %45 {
      %c0_23 = arith.constant 0 : index
      %c0_24 = arith.constant 0 : index
      %46 = vector.load %arg10[%c0_23, %c0_24] : memref<128x1xf32, #tpu.memory_space<vmem>>, vector<128x1xf32>
      %cst_25 = arith.constant 1.000000e-16 : f32
      %47 = vector.broadcast %cst_25 : f32 to vector<128x1xf32>
      %48 = arith.maximumf %46, %47 : vector<128x1xf32>
      %49 = tpu.reciprocal %48 {approx = true} : vector<128x1xf32> -> vector<128x1xf32>
      %50 = arith.mulf %48, %49 : vector<128x1xf32>
      %cst_26 = arith.constant 2.000000e+00 : f32
      %51 = vector.broadcast %cst_26 : f32 to vector<128x1xf32>
      %52 = arith.subf %51, %50 : vector<128x1xf32>
      %53 = arith.mulf %49, %52 : vector<128x1xf32>
      %c0_27 = arith.constant 0 : index
      %c0_28 = arith.constant 0 : index
      %54 = vector.load %arg11[%c0_27, %c0_28] : memref<128x128xf32, #tpu.memory_space<vmem>>, vector<128x128xf32>
      %55 = vector.broadcast %53 : vector<128x1xf32> to vector<128x128xf32>
      %56 = arith.mulf %54, %55 : vector<128x128xf32>
      %c0_29 = arith.constant 0 : index
      %c0_30 = arith.constant 0 : index
      %57 = vector.load %arg6[%c0_29, %c0_30] : memref<1x128xf32, #tpu.memory_space<vmem>>, vector<1x128xf32>
      %58 = vector.broadcast %57 : vector<1x128xf32> to vector<128x128xf32>
      %59 = arith.addf %56, %58 : vector<128x128xf32>
      %c0_31 = arith.constant 0 : index
      %c0_32 = arith.constant 0 : index
      %60 = vector.load %arg7[%c0_31, %c0_32] : memref<128x128xf32, #tpu.memory_space<vmem>>, vector<128x128xf32>
      tpu.vector_store %arg7[%c0_31, %c0_32], %59 {strides = array<i32>} : memref<128x128xf32, #tpu.memory_space<vmem>>, vector<128x128xf32>,
    } else {
    }
    return
  }
  func.func @transform_0(%arg0: i32, %arg1: i32) -> (i32, i32) {
    %c0_i32 = arith.constant 0 : i32
    %c0_i32_0 = arith.constant 0 : i32
    return %arg1, %c0_i32 : i32, i32
  }
  func.func @transform_1(%arg0: i32, %arg1: i32) -> (i32, i32) {
    %c0_i32 = arith.constant 0 : i32
    %c0_i32_0 = arith.constant 0 : i32
    return %arg0, %c0_i32 : i32, i32
  }
  func.func @transform_2(%arg0: i32, %arg1: i32) -> (i32, i32) {
    %c0_i32 = arith.constant 0 : i32
    %c0_i32_0 = arith.constant 0 : i32
    %c0_i32_1 = arith.constant 0 : i32
    return %c0_i32, %c0_i32_0 : i32, i32
  }
  func.func @transform_3(%arg0: i32, %arg1: i32) -> (i32, i32) {
    %c0_i32 = arith.constant 0 : i32
    return %arg1, %arg0 : i32, i32
  }
  func.func @transform_4(%arg0: i32, %arg1: i32) -> (i32, i32) {
    %c0_i32 = arith.constant 0 : i32
    %c0_i32_0 = arith.constant 0 : i32
    %c0_i32_1 = arith.constant 0 : i32
    return %c0_i32, %c0_i32_0 : i32, i32
  }
  func.func @transform_5(%arg0: i32, %arg1: i32) -> (i32, i32) {
    %c0_i32 = arith.constant 0 : i32
    %c0_i32_0 = arith.constant 0 : i32
    return %arg0, %c0_i32 : i32, i32
  }
}

module attributes {stable_mosaic.version = 11 : i64} {
  func.func @_classifier_kernel(%arg0: memref<16x256xbf16, #tpu.memory_space<vmem>>, %arg1: memref<16x256xbf16, #tpu.memory_space<vmem>>, %arg2: memref<256x128xf32, #tpu.memory_space<vmem>>, %arg3: memref<256x128xf32, #tpu.memory_space<vmem>>, %arg4: memref<128x128xf32, #tpu.memory_space<vmem>>, %arg5: memref<16x128xf32, #tpu.memory_space<vmem>>) attributes {dimension_semantics = [], scalar_prefetch = 0 : i64, scratch_operands = 0 : i64, tpu.core_type = #tpu.core_type<tc>} {
    %c0 = arith.constant 0 : index
    %c0_0 = arith.constant 0 : index
    %0 = vector.load %arg0[%c0, %c0_0] : memref<16x256xbf16, #tpu.memory_space<vmem>>, vector<16x256xbf16>
    %c0_1 = arith.constant 0 : index
    %c0_2 = arith.constant 0 : index
    %1 = vector.load %arg2[%c0_1, %c0_2] : memref<256x128xf32, #tpu.memory_space<vmem>>, vector<256x128xf32>
    %2 = arith.truncf %1 : vector<256x128xf32> to vector<256x128xbf16>
    %cst = arith.constant dense<0.000000e+00> : vector<16x128xf32>
    %3 = tpu.matmul %0, %2, %cst {dimension_numbers = #tpu.dot_dimension_numbers<[1], [0], [0], [1], [0, 0, 1, 1], [], []>} : vector<16x256xbf16>, vector<256x128xbf16>, vector<16x128xf32> -> vector<16x128xf32>
    %c0_3 = arith.constant 0 : index
    %c0_4 = arith.constant 0 : index
    %4 = vector.load %arg1[%c0_3, %c0_4] : memref<16x256xbf16, #tpu.memory_space<vmem>>, vector<16x256xbf16>
    %c0_5 = arith.constant 0 : index
    %c0_6 = arith.constant 0 : index
    %5 = vector.load %arg3[%c0_5, %c0_6] : memref<256x128xf32, #tpu.memory_space<vmem>>, vector<256x128xf32>
    %6 = arith.truncf %5 : vector<256x128xf32> to vector<256x128xbf16>
    %cst_7 = arith.constant dense<0.000000e+00> : vector<16x128xf32>
    %7 = tpu.matmul %4, %6, %cst_7 {dimension_numbers = #tpu.dot_dimension_numbers<[1], [0], [0], [1], [0, 0, 1, 1], [], []>} : vector<16x256xbf16>, vector<256x128xbf16>, vector<16x128xf32> -> vector<16x128xf32>
    %8 = arith.mulf %3, %7 : vector<16x128xf32>
    %9 = arith.truncf %8 : vector<16x128xf32> to vector<16x128xbf16>
    %c0_8 = arith.constant 0 : index
    %c0_9 = arith.constant 0 : index
    %10 = vector.load %arg4[%c0_8, %c0_9] : memref<128x128xf32, #tpu.memory_space<vmem>>, vector<128x128xf32>
    %11 = arith.truncf %10 : vector<128x128xf32> to vector<128x128xbf16>
    %cst_10 = arith.constant dense<0.000000e+00> : vector<16x128xf32>
    %12 = tpu.matmul %9, %11, %cst_10 {dimension_numbers = #tpu.dot_dimension_numbers<[1], [0], [0], [1], [0, 0, 1, 1], [], []>} : vector<16x128xbf16>, vector<128x128xbf16>, vector<16x128xf32> -> vector<16x128xf32>
    %c0_11 = arith.constant 0 : index
    %c0_12 = arith.constant 0 : index
    %13 = vector.load %arg5[%c0_11, %c0_12] : memref<16x128xf32, #tpu.memory_space<vmem>>, vector<16x128xf32>
    tpu.vector_store %arg5[%c0_11, %c0_12], %12 {strides = array<i32>} : memref<16x128xf32, #tpu.memory_space<vmem>>, vector<16x128xf32>,
    return
  }
}

</mosaic_0001>

<bundles_post_ra>
// kernel: model_forward_pallas.11
= control target key start
LH: loop header
LB: loop body
LE: loop exit
PB: predicated region body
PF: predicated region fallthrough
CT: control target
= control target key end

     0   :  { %s471_s9 = smov 0   ;;  %s579_s0 = inlined_call_operand.vmem [shape: f32[256,128], index: 0, kind: input, shape index: {}]   ;;  %s580_s1 = inlined_call_operand.vmem [shape: f32[128,128], index: 1, kind: input, shape index: {}]   ;;  %s581_s2 = inlined_call_operand.vmem [shape: f32[256,128], index: 2, kind: output, shape index: {}]  }
   0x1 LB: > { %s365_s10 = sadd.s32 4294967295, %s454_s9   ;;  %p369_p0 = scmp.ge.s32.totalorder %s454_s9, 1  ;;  %s454_s9 = sphi %s471_s9, %s12_s9  }
   0x2   : > { %p113_p1 = scmp.lt.s32.totalorder %s454_s9, 3 }
   0x4   : > { %p114_p2 = pnand %p369_p0, %p113_p1 }
   0x5   : > { %v172_v0 = vld [vmem:[%s580_s1] sm:$0xff] (!%p114_p2)  ;;  %v173_v1 = vld [vmem:[%s580_s1 + $0x8] sm:$0xff] (!%p114_p2)  ;;  %v174_v2 = vld [vmem:[%s580_s1 + $0x10] sm:$0xff] (!%p114_p2)  ;;  %s370_s17 = sshll.u32 (!%p114_p2), %s365_s10, 4 }
   0x6   : > { %117 = sbr.rel (%p114_p2) target bundleno = 264 (0x108), region = 28  ;;  %v188_v3 = vpack.c.bf16 (!%p114_p2), %v173_v1, %v172_v0  ;;  %v175_v4 = vld [vmem:[%s580_s1 + $0x18] sm:$0xff] (!%p114_p2)  ;;  %p136_p3 = scmp.lt.s32.totalorder (!%p114_p2), %s370_s17, 31  ;;  %v176_v6 = vld [vmem:[%s580_s1 + $0x20] sm:$0xff] (!%p114_p2)  ;;  %v177_v7 = vld [vmem:[%s580_s1 + $0x28] sm:$0xff] (!%p114_p2) }
   0x7   : > { %v189_v5 = vpack.c.bf16 (!%p114_p2), %v175_v4, %v174_v2  ;;  %v190_v8 = vpack.c.bf16 (!%p114_p2), %v177_v7, %v176_v6  ;;  %v178_v9 = vld [vmem:[%s580_s1 + $0x30] sm:$0xff] (!%p114_p2)  ;;  %v179_v10 = vld [vmem:[%s580_s1 + $0x38] sm:$0xff] (!%p114_p2)  ;;  %v180_v18 = vld [vmem:[%s580_s1 + $0x40] sm:$0xff] (!%p114_p2) }
   0x8   : > { %392 = vmatprep.subr.bf16.mxu0 (!%p114_p2), %v188_v3  ;;  %424 = vmatprep.subr.bf16.mxu1 (!%p114_p2), %v188_v3  ;;  %v191_v16 = vpack.c.bf16 (!%p114_p2), %v179_v10, %v178_v9  ;;  %v181_v19 = vld [vmem:[%s580_s1 + $0x48] sm:$0xff] (!%p114_p2)  ;;  %v182_v21 = vld [vmem:[%s580_s1 + $0x50] sm:$0xff] (!%p114_p2)  ;;  %v183_v22 = vld [vmem:[%s580_s1 + $0x58] sm:$0xff] (!%p114_p2) }
   0x9   : > { %393 = vmatpush3.bf16.msra.mxu0 (!%p114_p2), %v188_v3  ;;  %432 = vmatpush3.bf16.msra.mxu1 (!%p114_p2), %v188_v3  ;;  %v192_v20 = vpack.c.bf16 (!%p114_p2), %v181_v19, %v180_v18  ;;  %v193_v23 = vpack.c.bf16 (!%p114_p2), %v183_v22, %v182_v21  ;;  %v184_v24 = vld [vmem:[%s580_s1 + $0x60] sm:$0xff] (!%p114_p2)  ;;  %v185_v25 = vld [vmem:[%s580_s1 + $0x68] sm:$0xff] (!%p114_p2)  ;;  %v186_v27 = vld [vmem:[%s580_s1 + $0x70] sm:$0xff] (!%p114_p2) }
   0xa   : > { %394 = vmatprep.subr.bf16.mxu0 (!%p114_p2), %v189_v5  ;;  %425 = vmatprep.subr.bf16.mxu1 (!%p114_p2), %v189_v5  ;;  %v194_v26 = vpack.c.bf16 (!%p114_p2), %v185_v25, %v184_v24  ;;  %v187_v28 = vld [vmem:[%s580_s1 + $0x78] sm:$0xff] (!%p114_p2) }
   0xb   : > { %v195_v29 = vpack.c.bf16 (!%p114_p2), %v187_v28, %v186_v27 }
   0xd   : > { %s583_s17 = smov (!%p136_p3, %s370_s17), 31  ;;  %395 = vmatpush3.bf16.msra.mxu0 %v189_v5  ;;  %433 = vmatpush3.bf16.msra.mxu1 %v189_v5 }
   0xe   : > { %s371_s24 = sshll.u32 %s583_s17, 3  ;;  %396 = vmatprep.subr.bf16.mxu0 %v190_v8  ;;  %426 = vmatprep.subr.bf16.mxu1 %v190_v8 }
   0xf   : > { %s511_s3 = scalar_lea.vmem %s579_s0, %s371_s24  ;;  %s558_s25 = scalar_lea.vmem %s581_s2, %s371_s24 }
  0x10   : > { %v148_v11 = vld [vmem:[%s511_s3] sm:$0xff]  ;;  %v149_v12 = vld [vmem:[%s511_s3 + $0x8] sm:$0xff]  ;;  %v150_v30 = vld [vmem:[%s511_s3 + $0x10] sm:$0xff] }
  0x11   : > { %v156_v13 = vld [vmem:[%s511_s3 + $0x40] sm:$0xff]  ;;  %v164_v14 = vpack.c.bf16 %v149_v12, %v148_v11  ;;  %v157_v15 = vld [vmem:[%s511_s3 + $0x48] sm:$0xff]  ;;  %397 = vmatpush3.bf16.msra.mxu0 %v190_v8  ;;  %434 = vmatpush3.bf16.msra.mxu1 %v190_v8  ;;  %v151_v31 = vld [vmem:[%s511_s3 + $0x18] sm:$0xff] }
  0x12   : > { %v168_v17 = vpack.c.bf16 %v157_v15, %v156_v13  ;;  %398 = vmatprep.subr.bf16.mxu0 %v191_v16  ;;  %427 = vmatprep.subr.bf16.mxu1 %v191_v16  ;;  %v158_v32 = vld [vmem:[%s511_s3 + $0x50] sm:$0xff]  ;;  %v159_v33 = vld [vmem:[%s511_s3 + $0x58] sm:$0xff]  ;;  %v152_v34 = vld [vmem:[%s511_s3 + $0x20] sm:$0xff]  ;;  %v165_v38 = vpack.c.bf16 %v151_v31, %v150_v30 }
  0x13   : > { %408 = vmatprep.mubr.bf16.mxu0 %v164_v14  ;;  %v153_v35 = vld [vmem:[%s511_s3 + $0x28] sm:$0xff]  ;;  %v160_v36 = vld [vmem:[%s511_s3 + $0x60] sm:$0xff]  ;;  %v169_v39 = vpack.c.bf16 %v159_v33, %v158_v32  ;;  %v154_v42 = vld [vmem:[%s511_s3 + $0x30] sm:$0xff] }
  0x14   : > { %416 = vmatprep.mubr.bf16.mxu1 %v168_v17  ;;  %v161_v37 = vld [vmem:[%s511_s3 + $0x68] sm:$0xff]  ;;  %v166_v40 = vpack.c.bf16 %v153_v35, %v152_v34  ;;  %v155_v43 = vld [vmem:[%s511_s3 + $0x38] sm:$0xff]  ;;  %v162_v44 = vld [vmem:[%s511_s3 + $0x70] sm:$0xff] }
  0x15   : > { %399 = vmatpush3.bf16.msra.mxu0 %v191_v16  ;;  %435 = vmatpush3.bf16.msra.mxu1 %v191_v16  ;;  %v170_v41 = vpack.c.bf16 %v161_v37, %v160_v36  ;;  %v163_v45 = vld [vmem:[%s511_s3 + $0x78] sm:$0xff]  ;;  %v167_v46 = vpack.c.bf16 %v155_v43, %v154_v42 }
  0x16   : > { %400 = vmatprep.subr.bf16.mxu0 %v192_v20  ;;  %428 = vmatprep.subr.bf16.mxu1 %v192_v20  ;;  %v171_v47 = vpack.c.bf16 %v163_v45, %v162_v44 }
  0x19   : > { %401 = vmatpush3.bf16.msra.mxu0 %v192_v20  ;;  %436 = vmatpush3.bf16.msra.mxu1 %v192_v20 }
  0x1a   : > { %402 = vmatprep.subr.bf16.mxu0 %v193_v23  ;;  %429 = vmatprep.subr.bf16.mxu1 %v193_v23 }
  0x1d   : > { %403 = vmatpush3.bf16.msra.mxu0 %v193_v23  ;;  %437 = vmatpush3.bf16.msra.mxu1 %v193_v23 }
  0x1e   : > { %404 = vmatprep.subr.bf16.mxu0 %v194_v26  ;;  %430 = vmatprep.subr.bf16.mxu1 %v194_v26 }
  0x21   : > { %405 = vmatpush3.bf16.msra.mxu0 %v194_v26  ;;  %438 = vmatpush3.bf16.msra.mxu1 %v194_v26 }
  0x22   : > { %406 = vmatprep.subr.bf16.mxu0 %v195_v29  ;;  %431 = vmatprep.subr.bf16.mxu1 %v195_v29 }
  0x25   : > { %407 = vmatpush3.bf16.msra.mxu0 %v195_v29  ;;  %439 = vmatpush3.bf16.msra.mxu1 %v195_v29 }
  0x28   : > { %409 = vmatmul.mubr.bf16.vlgmr.msra.gmra.mrb[0].mxu0 %v165_v38  ;;  %417 = vmatmul.mubr.bf16.vlgmr.msra.gmra.mrb[0].mxu1 %v169_v39 }
  0x29   : > { %412 = vmatprep.mubr.bf16.mxu0 %v166_v40  ;;  %420 = vmatprep.mubr.bf16.mxu1 %v170_v41 }
  0x30   : > { %413 = vmatmul.mubr.bf16.gmra.mrb[4].mxu0 %v167_v46  ;;  %421 = vmatmul.mubr.bf16.gmra.mrb[4].mxu1 %v171_v47 }
  0xfb   : > { %v410_v48 = vpop.f32.mrb[0].mxu0  ;;  %v418_v49 = vpop.f32.mrb[0].mxu1 }
  0xfc   : > { %295 = vst [vmem:[%s558_s25 + $0x10] sm:$0xff] %v410_v48  ;;  %303 = vst [vmem:[%s558_s25 + $0x50] sm:$0xff] %v418_v49  ;;  %v230_v50 = vpop.f32.mrb[1].mxu0  ;;  %v262_v51 = vpop.f32.mrb[1].mxu1 }
  0xfd   : > { %293 = vst [vmem:[%s558_s25] sm:$0xff] %v230_v50  ;;  %301 = vst [vmem:[%s558_s25 + $0x40] sm:$0xff] %v262_v51  ;;  %v411_v52 = vpop.f32.mrb[2].mxu0  ;;  %v419_v53 = vpop.f32.mrb[2].mxu1 }
  0xfe   : > { %296 = vst [vmem:[%s558_s25 + $0x18] sm:$0xff] %v411_v52  ;;  %304 = vst [vmem:[%s558_s25 + $0x58] sm:$0xff] %v419_v53  ;;  %v233_v54 = vpop.f32.mrb[3].mxu0  ;;  %v265_v55 = vpop.f32.mrb[3].mxu1 }
  0xff   : > { %294 = vst [vmem:[%s558_s25 + $0x8] sm:$0xff] %v233_v54  ;;  %302 = vst [vmem:[%s558_s25 + $0x48] sm:$0xff] %v265_v55 }
 0x103   : > { %v414_v56 = vpop.f32.mrb[4].mxu0  ;;  %v422_v57 = vpop.f32.mrb[4].mxu1 }
 0x104   : > { %299 = vst [vmem:[%s558_s25 + $0x30] sm:$0xff] %v414_v56  ;;  %307 = vst [vmem:[%s558_s25 + $0x70] sm:$0xff] %v422_v57  ;;  %v246_v58 = vpop.f32.mrb[5].mxu0  ;;  %v278_v59 = vpop.f32.mrb[5].mxu1 }
 0x105   : > { %297 = vst [vmem:[%s558_s25 + $0x20] sm:$0xff] %v246_v58  ;;  %305 = vst [vmem:[%s558_s25 + $0x60] sm:$0xff] %v278_v59  ;;  %v415_v60 = vpop.f32.mrb[6].mxu0  ;;  %v423_v61 = vpop.f32.mrb[6].mxu1 }
 0x106   : > { %300 = vst [vmem:[%s558_s25 + $0x38] sm:$0xff] %v415_v60  ;;  %308 = vst [vmem:[%s558_s25 + $0x78] sm:$0xff] %v423_v61  ;;  %v249_v62 = vpop.f32.mrb[7].mxu0  ;;  %v281_v63 = vpop.f32.mrb[7].mxu1 }
 0x107   : > { %298 = vst [vmem:[%s558_s25 + $0x28] sm:$0xff] %v249_v62  ;;  %306 = vst [vmem:[%s558_s25 + $0x68] sm:$0xff] %v281_v63 }
 0x108 PF: > { %s12_s9 = sadd.s32 1, %s454_s9  }
 0x109   : > { %p9_p4 = scmp.ge.s32.totalorder %s12_s9, 4  }
 0x10b   :  { %11 = sbr.rel (!%p9_p4) target bundleno = 1 (0x1), region = 58 }

// kernel: model_forward_pallas.14
= control target key start
LH: loop header
LB: loop body
LE: loop exit
PB: predicated region body
PF: predicated region fallthrough
CT: control target
= control target key end

     0   :  { %s2486_s18 = smov 0   ;;  %s2488_s19 = smov 0   ;;  %s3144_s0 = inlined_call_operand.vmem [shape: f32[256,128], index: 0, kind: input, shape index: {}]   ;;  %s3145_s1 = inlined_call_operand.vmem [shape: f32[256,128], index: 1, kind: input, shape index: {}]   ;;  %s3146_s2 = inlined_call_operand.vmem [shape: f32[128,128], index: 2, kind: input, shape index: {}]   ;;  %s3147_s3 = inlined_call_operand.vmem [shape: bf16[256,256], index: 3, kind: input, shape index: {}]   ;;  %s3148_s4 = inlined_call_operand.vmem [shape: f32[1,128], index: 4, kind: input, shape index: {}]   ;;  %s3149_s5 = inlined_call_operand.vmem [shape: f32[256,128], index: 5, kind: output, shape index: {}]  }
   0x1   :  { %s2490_s20 = smov 0   ;;  %s2492_s21 = smov 0  }
   0x2   :  { %s2494_s22 = smov 0   ;;  %s2496_s23 = smov 0  }
   0x3   :  { %s2498_s24 = smov 0  }
   0x4 LB: > { %s24_s25 = sadd.s32 1, %s2440_s22  ;;  %s27_s26 = sadd.s32 1, %s2444_s23  ;;  %s2448_s24 = sphi %s2498_s24, %s15_s24   ;;  %s2444_s23 = sphi %s2496_s23, %s3155_s23   ;;  %s2440_s22 = sphi %s2494_s22, %s3154_s22   ;;  %s2436_s21 = sphi %s2492_s21, %s3153_s21   ;;  %s2432_s20 = sphi %s2490_s20, %s3152_s20   ;;  %s2428_s19 = sphi %s2488_s19, %s3151_s19   ;;  %s2424_s18 = sphi %s2486_s18, %s3150_s18  }
   0x5   : > { %p25_p0 = scmp.ge.s32.totalorder %s24_s25, 2  ;;  %p116_p1 = scmp.ne.s32.totalorder %s2428_s19, %s2424_s18 }
   0x6   : > { %p117_p2 = scmp.eq.s32.totalorder %s2448_s24, 0  ;;  %s109_s30 = sadd.s32 1, %s2428_s19 }
   0x7   : > { %s3157_s25 = smov (%p25_p0, %s24_s25), 0  ;;  %s3159_s26 = smov (!%p25_p0, %s27_s26), %s2444_s23 }
   0x8   : > { %p118_p3 = por %p117_p2, %p116_p1  ;;  %p29_p4 = scmp.ge.s32.totalorder %s3159_s26, 2 }
   0x9   : > { %s105_s27 = ssub.s32 %s2440_s22, %s3157_s25  ;;  %p2044_p6 = scmp.ge.s32.totalorder %s2448_s24, 4 }
   0xa   : > { %s3161_s26 = smov (%p29_p4, %s3159_s26), 0 }
   0xb   : > { %s104_s28 = ssub.s32 %s2444_s23, %s3161_s26  ;;  %195 = sbr.rel (%p2044_p6) target bundleno = 34 (0x22), region = 24 }
   0xc   : > { %s106_s29 = sor.u32 %s105_s27, %s104_s28 }
   0xd   : > { %p107_p5 = scmp.eq.s32.totalorder %s106_s29, 0 }
   0xf   : > { %s2537_s6 = scalar_select %p107_p5, %s2428_s19, %s109_s30  }
  0x12   : > { %216 = sbr.rel (!%p118_p3) target bundleno = 34 (0x22), region = 36  ;;  %s218_s7 = sand.u32 (%p118_p3), 1, %s2428_s19  }
  0x13   : > { %s2062_s8 = sshll.u32 (%p118_p3), %s2444_s23, 5  ;;  %s2045_s9 = sshll.u32 (%p118_p3), %s218_s7, 6 }
  0x14   : > { %s223_s10 = sadd.s32 (%p118_p3), %s2440_s22, %s2062_s8  ;;  %s220_s15 = scalar_lea.vmem (%p118_p3), [#allocation6], %s2045_s9 }
  0x15   : > { %s2048_s11 = sshll.u32 (%p118_p3), %s223_s10, 2 }
  0x16   : > { %s2546_s14 = scalar_lea.vmem (%p118_p3), %s3147_s3, %s2048_s11 }
  0x17   : > { %v241_v0 = vld [vmem:[%s2546_s14] sm:$0xf] (%p118_p3)  ;;  %v243_v1 = vld [vmem:[%s2546_s14 + $0x8] sm:$0xf] (%p118_p3)  ;;  %v245_v2 = vld [vmem:[%s2546_s14 + $0x10] sm:$0xf] (%p118_p3) }
  0x18   : > { %242 = vst [vmem:[%s220_s15] sm:$0xf] (%p118_p3), %v241_v0  ;;  %244 = vst [vmem:[%s220_s15 + $0x4] sm:$0xf] (%p118_p3), %v243_v1  ;;  %v247_v3 = vld [vmem:[%s2546_s14 + $0x18] sm:$0xf] (%p118_p3) }
  0x19   : > { %246 = vst [vmem:[%s220_s15 + $0x8] sm:$0xf] %v245_v2  ;;  %v249_v4 = vld [vmem:[%s2546_s14 + $0x20] sm:$0xf]  ;;  %v251_v5 = vld [vmem:[%s2546_s14 + $0x28] sm:$0xf] }
  0x1a   : > { %248 = vst [vmem:[%s220_s15 + $0xc] sm:$0xf] %v247_v3  ;;  %250 = vst [vmem:[%s220_s15 + $0x10] sm:$0xf] %v249_v4  ;;  %v253_v6 = vld [vmem:[%s2546_s14 + $0x30] sm:$0xf] }
  0x1b   : > { %252 = vst [vmem:[%s220_s15 + $0x14] sm:$0xf] %v251_v5  ;;  %v255_v7 = vld [vmem:[%s2546_s14 + $0x38] sm:$0xf]  ;;  %v257_v8 = vld [vmem:[%s2546_s14 + $0x40] sm:$0xf] }
  0x1c   : > { %254 = vst [vmem:[%s220_s15 + $0x18] sm:$0xf] %v253_v6  ;;  %256 = vst [vmem:[%s220_s15 + $0x1c] sm:$0xf] %v255_v7  ;;  %v259_v9 = vld [vmem:[%s2546_s14 + $0x48] sm:$0xf] }
  0x1d   : > { %258 = vst [vmem:[%s220_s15 + $0x20] sm:$0xf] %v257_v8  ;;  %v261_v10 = vld [vmem:[%s2546_s14 + $0x50] sm:$0xf]  ;;  %v263_v11 = vld [vmem:[%s2546_s14 + $0x58] sm:$0xf] }
  0x1e   : > { %260 = vst [vmem:[%s220_s15 + $0x24] sm:$0xf] %v259_v9  ;;  %262 = vst [vmem:[%s220_s15 + $0x28] sm:$0xf] %v261_v10  ;;  %v265_v12 = vld [vmem:[%s2546_s14 + $0x60] sm:$0xf] }
  0x1f   : > { %264 = vst [vmem:[%s220_s15 + $0x2c] sm:$0xf] %v263_v11  ;;  %v267_v13 = vld [vmem:[%s2546_s14 + $0x68] sm:$0xf]  ;;  %v269_v14 = vld [vmem:[%s2546_s14 + $0x70] sm:$0xf] }
  0x20   : > { %266 = vst [vmem:[%s220_s15 + $0x30] sm:$0xf] %v265_v12  ;;  %268 = vst [vmem:[%s220_s15 + $0x34] sm:$0xf] %v267_v13  ;;  %v271_v15 = vld [vmem:[%s2546_s14 + $0x78] sm:$0xf] }
  0x21   : > { %270 = vst [vmem:[%s220_s15 + $0x38] sm:$0xf] %v269_v14  ;;  %272 = vst [vmem:[%s220_s15 + $0x3c] sm:$0xf] %v271_v15 }
  0x22 PF: > { %p2049_p7 = scmp.ge.s32.totalorder %s2448_s24, 1  ;;  %p326_p8 = scmp.lt.s32.totalorder %s2448_s24, 5 }
  0x24   : > { %p327_p9 = pnand %p2049_p7, %p326_p8 }
  0x25   : > { %s333_s16 = sand.u32 (!%p327_p9), 1, %s2424_s18   ;;  %s2051_s17 = sshll.u32 (!%p327_p9), %s2432_s20, 4 }
  0x26   : > { %330 = sbr.rel (%p327_p9) target bundleno = 1300 (0x514), region = 77  ;;  %s2050_s27 = sshll.u32 (!%p327_p9), %s333_s16, 6 }
  0x27   : > { %p371_p10 = scmp.lt.s32.totalorder (!%p327_p9), %s2051_s17, 31  ;;  %s2053_s28 = sshll.u32 (!%p327_p9), %s2436_s21, 4 }
  0x28   : > { %p377_p11 = scmp.lt.s32.totalorder (!%p327_p9), %s2053_s28, 31  ;;  %s2584_s21 = scalar_lea.vmem (!%p327_p9), [#allocation6], %s2050_s27 }
  0x29   : > { %p2057_p12 = scmp.ne.s32.totalorder (!%p327_p9), %s2432_s20, 0 }
  0x2d   : > { %s3163_s17 = smov (!%p371_p10, %s2051_s17), 31  ;;  %s3165_s28 = smov (!%p377_p11, %s2053_s28), 31 }
  0x2e   : > { %s2052_s29 = sshll.u32 %s3163_s17, 3  ;;  %s2054_s9 = sshll.u32 %s3165_s28, 3  ;;  %v418_v16 = vld [vmem:[%s3146_s2] sm:$0xff] (!%p2057_p12)  ;;  %v419_v17 = vld [vmem:[%s3146_s2 + $0x8] sm:$0xff] (!%p2057_p12)  ;;  %v420_v18 = vld [vmem:[%s3146_s2 + $0x10] sm:$0xff] (!%p2057_p12)  ;;  %vm603_vm0 = vcmask (!%p2057_p12), 7168  }
  0x2f   : > { %s2572_s8 = scalar_lea.vmem %s3144_s0, %s2052_s29  ;;  %s2577_s12 = scalar_lea.vmem %s3145_s1, %s2054_s9  ;;  %v434_v19 = vpack.c.bf16 (!%p2057_p12), %v419_v17, %v418_v16  ;;  %v421_v20 = vld [vmem:[%s3146_s2 + $0x18] sm:$0xff] (!%p2057_p12)  ;;  %v422_v22 = vld [vmem:[%s3146_s2 + $0x20] sm:$0xff] (!%p2057_p12)  ;;  %v423_v23 = vld [vmem:[%s3146_s2 + $0x28] sm:$0xff] (!%p2057_p12)  ;;  %v2450_v0 = vmov (!%p2057_p12), -1e+20   ;;  %v2451_v1 = vmov (!%p2057_p12), 0.0  }
  0x30   : > { %s2582_s14 = scalar_lea.vmem %s3149_s5, %s2054_s9  ;;  %393 = sbr.rel (%p2057_p12) target bundleno = 437 (0x1b5), region = 85  ;;  %v435_v21 = vpack.c.bf16 (!%p2057_p12), %v421_v20, %v420_v18  ;;  %v436_v24 = vpack.c.bf16 (!%p2057_p12), %v423_v23, %v422_v22  ;;  %v424_v25 = vld [vmem:[%s3146_s2 + $0x30] sm:$0xff] (!%p2057_p12)  ;;  %v394_v26 = vld [vmem:[%s2577_s12] sm:$0xff] (!%p2057_p12)  ;;  %v395_v27 = vld [vmem:[%s2577_s12 + $0x8] sm:$0xff] (!%p2057_p12)  ;;  %620 = vst.msk [vmem:[#allocation3] sm:$0xff] (!%p2057_p12), %vm603_vm0, %v2450_v0 }
  0x31   : > { %2134 = vmatprep.subr.bf16.mxu0 (!%p2057_p12), %v434_v19  ;;  %2198 = vmatprep.subr.bf16.mxu1 (!%p2057_p12), %v434_v19  ;;  %v425_v28 = vld [vmem:[%s3146_s2 + $0x38] sm:$0xff] (!%p2057_p12)  ;;  %v410_v29 = vpack.c.bf16 (!%p2057_p12), %v395_v27, %v394_v26  ;;  %v402_v30 = vld [vmem:[%s2577_s12 + $0x40] sm:$0xff] (!%p2057_p12)  ;;  %v403_v31 = vld [vmem:[%s2577_s12 + $0x48] sm:$0xff] (!%p2057_p12)  ;;  %621 = vst.msk [vmem:[#allocation3 + $0x8] sm:$0xff] (!%p2057_p12), %vm603_vm0, %v2450_v0 }
  0x32   : > { %2135 = vmatpush3.bf16.msra.mxu0 (!%p2057_p12), %v434_v19  ;;  %2206 = vmatpush3.bf16.msra.mxu1 (!%p2057_p12), %v434_v19  ;;  %v414_v32 = vpack.c.bf16 (!%p2057_p12), %v403_v31, %v402_v30  ;;  %v437_v33 = vpack.c.bf16 (!%p2057_p12), %v425_v28, %v424_v25  ;;  %v426_v34 = vld [vmem:[%s3146_s2 + $0x40] sm:$0xff] (!%p2057_p12)  ;;  %v427_v35 = vld [vmem:[%s3146_s2 + $0x48] sm:$0xff] (!%p2057_p12)  ;;  %v428_v37 = vld [vmem:[%s3146_s2 + $0x50] sm:$0xff] (!%p2057_p12)  ;;  %622 = vst.msk [vmem:[#allocation3 + $0x10] sm:$0xff] (!%p2057_p12), %vm603_vm0, %v2450_v0 }
  0x33   : > { %2136 = vmatprep.subr.bf16.mxu0 (!%p2057_p12), %v435_v21  ;;  %2199 = vmatprep.subr.bf16.mxu1 (!%p2057_p12), %v435_v21  ;;  %v438_v36 = vpack.c.bf16 (!%p2057_p12), %v427_v35, %v426_v34  ;;  %v429_v38 = vld [vmem:[%s3146_s2 + $0x58] sm:$0xff] (!%p2057_p12)  ;;  %v430_v40 = vld [vmem:[%s3146_s2 + $0x60] sm:$0xff] (!%p2057_p12)  ;;  %v431_v41 = vld [vmem:[%s3146_s2 + $0x68] sm:$0xff] (!%p2057_p12)  ;;  %623 = vst.msk [vmem:[#allocation3 + $0x18] sm:$0xff] (!%p2057_p12), %vm603_vm0, %v2450_v0 }
  0x34   : > { %2150 = vmatprep.mubr.bf16.mxu0 (!%p2057_p12), %v410_v29  ;;  %2158 = vmatprep.mubr.bf16.mxu1 (!%p2057_p12), %v414_v32  ;;  %v439_v39 = vpack.c.bf16 (!%p2057_p12), %v429_v38, %v428_v37  ;;  %v440_v42 = vpack.c.bf16 (!%p2057_p12), %v431_v41, %v430_v40  ;;  %v432_v43 = vld [vmem:[%s3146_s2 + $0x70] sm:$0xff] (!%p2057_p12)  ;;  %v433_v44 = vld [vmem:[%s3146_s2 + $0x78] sm:$0xff] (!%p2057_p12)  ;;  %v398_v50 = vld [vmem:[%s2577_s12 + $0x20] sm:$0xff] (!%p2057_p12)  ;;  %624 = vst.msk [vmem:[#allocation3 + $0x20] sm:$0xff] (!%p2057_p12), %vm603_vm0, %v2450_v0 }
  0x35   : > { %v441_v45 = vpack.c.bf16 (!%p2057_p12), %v433_v44, %v432_v43  ;;  %v396_v46 = vld [vmem:[%s2577_s12 + $0x10] sm:$0xff] (!%p2057_p12)  ;;  %v397_v47 = vld [vmem:[%s2577_s12 + $0x18] sm:$0xff] (!%p2057_p12)  ;;  %v399_v51 = vld [vmem:[%s2577_s12 + $0x28] sm:$0xff] (!%p2057_p12)  ;;  %625 = vst.msk [vmem:[#allocation3 + $0x28] sm:$0xff] (!%p2057_p12), %vm603_vm0, %v2450_v0 }
  0x36   : > { %2137 = vmatpush3.bf16.msra.mxu0 (!%p2057_p12), %v435_v21  ;;  %2207 = vmatpush3.bf16.msra.mxu1 (!%p2057_p12), %v435_v21  ;;  %v404_v48 = vld [vmem:[%s2577_s12 + $0x50] sm:$0xff] (!%p2057_p12)  ;;  %v405_v49 = vld [vmem:[%s2577_s12 + $0x58] sm:$0xff] (!%p2057_p12)  ;;  %v406_v52 = vld [vmem:[%s2577_s12 + $0x60] sm:$0xff] (!%p2057_p12)  ;;  %v411_v54 = vpack.c.bf16 (!%p2057_p12), %v397_v47, %v396_v46  ;;  %v412_v56 = vpack.c.bf16 (!%p2057_p12), %v399_v51, %v398_v50  ;;  %626 = vst.msk [vmem:[#allocation3 + $0x30] sm:$0xff] (!%p2057_p12), %vm603_vm0, %v2450_v0 }
  0x37   : > { %2138 = vmatprep.subr.bf16.mxu0 %v436_v24  ;;  %2200 = vmatprep.subr.bf16.mxu1 %v436_v24  ;;  %v407_v53 = vld [vmem:[%s2577_s12 + $0x68] sm:$0xff]  ;;  %v415_v55 = vpack.c.bf16 %v405_v49, %v404_v48  ;;  %v400_v58 = vld [vmem:[%s2577_s12 + $0x30] sm:$0xff]  ;;  %v401_v59 = vld [vmem:[%s2577_s12 + $0x38] sm:$0xff]  ;;  %627 = vst.msk [vmem:[#allocation3 + $0x38] sm:$0xff] %vm603_vm0, %v2450_v0 }
  0x38   : > { %v416_v57 = vpack.c.bf16 %v407_v53, %v406_v52  ;;  %v408_v60 = vld [vmem:[%s2577_s12 + $0x70] sm:$0xff]  ;;  %v409_v61 = vld [vmem:[%s2577_s12 + $0x78] sm:$0xff]  ;;  %v413_v62 = vpack.c.bf16 %v401_v59, %v400_v58  ;;  %628 = vst.msk [vmem:[#allocation3 + $0x40] sm:$0xff] %vm603_vm0, %v2450_v0  ;;  %629 = vst.msk [vmem:[#allocation3 + $0x48] sm:$0xff] %vm603_vm0, %v2450_v0  ;;  %s2452_s12 = smov 1  }
  0x39   : > { %v417_v63 = vpack.c.bf16 %v409_v61, %v408_v60  ;;  %630 = vst.msk [vmem:[#allocation3 + $0x50] sm:$0xff] %vm603_vm0, %v2450_v0  ;;  %631 = vst.msk [vmem:[#allocation3 + $0x58] sm:$0xff] %vm603_vm0, %v2450_v0 }
  0x3a   : > { %2139 = vmatpush3.bf16.msra.mxu0 %v436_v24  ;;  %2208 = vmatpush3.bf16.msra.mxu1 %v436_v24  ;;  %632 = vst.msk [vmem:[#allocation3 + $0x60] sm:$0xff] %vm603_vm0, %v2450_v0  ;;  %633 = vst.msk [vmem:[#allocation3 + $0x68] sm:$0xff] %vm603_vm0, %v2450_v0 }
  0x3b   : > { %2140 = vmatprep.subr.bf16.mxu0 %v437_v33  ;;  %2201 = vmatprep.subr.bf16.mxu1 %v437_v33  ;;  %634 = vst.msk [vmem:[#allocation3 + $0x70] sm:$0xff] %vm603_vm0, %v2450_v0  ;;  %635 = vst.msk [vmem:[#allocation3 + $0x78] sm:$0xff] %vm603_vm0, %v2450_v0 }
  0x3c   : > { %636 = vst.msk [vmem:[#allocation4] sm:$0xff] %vm603_vm0, %v2451_v1  ;;  %637 = vst.msk [vmem:[#allocation4 + $0x8] sm:$0xff] %vm603_vm0, %v2451_v1 }
  0x3d   : > { %638 = vst.msk [vmem:[#allocation4 + $0x10] sm:$0xff] %vm603_vm0, %v2451_v1  ;;  %639 = vst.msk [vmem:[#allocation4 + $0x18] sm:$0xff] %vm603_vm0, %v2451_v1 }
  0x3e   : > { %2141 = vmatpush3.bf16.msra.mxu0 %v437_v33  ;;  %2209 = vmatpush3.bf16.msra.mxu1 %v437_v33  ;;  %640 = vst.msk [vmem:[#allocation4 + $0x20] sm:$0xff] %vm603_vm0, %v2451_v1  ;;  %641 = vst.msk [vmem:[#allocation4 + $0x28] sm:$0xff] %vm603_vm0, %v2451_v1 }
  0x3f   : > { %2142 = vmatprep.subr.bf16.mxu0 %v438_v36  ;;  %2202 = vmatprep.subr.bf16.mxu1 %v438_v36  ;;  %642 = vst.msk [vmem:[#allocation4 + $0x30] sm:$0xff] %vm603_vm0, %v2451_v1  ;;  %643 = vst.msk [vmem:[#allocation4 + $0x38] sm:$0xff] %vm603_vm0, %v2451_v1 }
  0x40   : > { %644 = vst.msk [vmem:[#allocation4 + $0x40] sm:$0xff] %vm603_vm0, %v2451_v1  ;;  %645 = vst.msk [vmem:[#allocation4 + $0x48] sm:$0xff] %vm603_vm0, %v2451_v1 }
  0x41   : > { %646 = vst.msk [vmem:[#allocation4 + $0x50] sm:$0xff] %vm603_vm0, %v2451_v1  ;;  %647 = vst.msk [vmem:[#allocation4 + $0x58] sm:$0xff] %vm603_vm0, %v2451_v1 }
  0x42   : > { %2143 = vmatpush3.bf16.msra.mxu0 %v438_v36  ;;  %2210 = vmatpush3.bf16.msra.mxu1 %v438_v36  ;;  %648 = vst.msk [vmem:[#allocation4 + $0x60] sm:$0xff] %vm603_vm0, %v2451_v1  ;;  %649 = vst.msk [vmem:[#allocation4 + $0x68] sm:$0xff] %vm603_vm0, %v2451_v1 }
  0x43   : > { %2144 = vmatprep.subr.bf16.mxu0 %v439_v39  ;;  %2203 = vmatprep.subr.bf16.mxu1 %v439_v39  ;;  %650 = vst.msk [vmem:[#allocation4 + $0x70] sm:$0xff] %vm603_vm0, %v2451_v1  ;;  %651 = vst.msk [vmem:[#allocation4 + $0x78] sm:$0xff] %vm603_vm0, %v2451_v1 }
  0x44   : > { %652 = vst [vmem:[#allocation5] sm:$0xff] %v2451_v1  ;;  %653 = vst [vmem:[#allocation5 + $0x8] sm:$0xff] %v2451_v1 }
  0x45   : > { %654 = vst [vmem:[#allocation5 + $0x10] sm:$0xff] %v2451_v1  ;;  %655 = vst [vmem:[#allocation5 + $0x18] sm:$0xff] %v2451_v1 }
  0x46   : > { %2145 = vmatpush3.bf16.msra.mxu0 %v439_v39  ;;  %2211 = vmatpush3.bf16.msra.mxu1 %v439_v39  ;;  %656 = vst [vmem:[#allocation5 + $0x20] sm:$0xff] %v2451_v1  ;;  %657 = vst [vmem:[#allocation5 + $0x28] sm:$0xff] %v2451_v1 }
  0x47   : > { %2146 = vmatprep.subr.bf16.mxu0 %v440_v42  ;;  %2204 = vmatprep.subr.bf16.mxu1 %v440_v42  ;;  %658 = vst [vmem:[#allocation5 + $0x30] sm:$0xff] %v2451_v1  ;;  %659 = vst [vmem:[#allocation5 + $0x38] sm:$0xff] %v2451_v1 }
  0x48   : > { %660 = vst [vmem:[#allocation5 + $0x40] sm:$0xff] %v2451_v1  ;;  %661 = vst [vmem:[#allocation5 + $0x48] sm:$0xff] %v2451_v1 }
  0x49   : > { %662 = vst [vmem:[#allocation5 + $0x50] sm:$0xff] %v2451_v1  ;;  %663 = vst [vmem:[#allocation5 + $0x58] sm:$0xff] %v2451_v1 }
  0x4a   : > { %2147 = vmatpush3.bf16.msra.mxu0 %v440_v42  ;;  %2212 = vmatpush3.bf16.msra.mxu1 %v440_v42  ;;  %664 = vst [vmem:[#allocation5 + $0x60] sm:$0xff] %v2451_v1  ;;  %665 = vst [vmem:[#allocation5 + $0x68] sm:$0xff] %v2451_v1 }
  0x4b   : > { %2148 = vmatprep.subr.bf16.mxu0 %v441_v45  ;;  %2205 = vmatprep.subr.bf16.mxu1 %v441_v45  ;;  %666 = vst [vmem:[#allocation5 + $0x70] sm:$0xff] %v2451_v1  ;;  %667 = vst [vmem:[#allocation5 + $0x78] sm:$0xff] %v2451_v1 }
  0x4e   : > { %2149 = vmatpush3.bf16.msra.mxu0 %v441_v45  ;;  %2213 = vmatpush3.bf16.msra.mxu1 %v441_v45 }
  0x51   : > { %2151 = vmatmul.mubr.bf16.vlgmr.msra.gmra.mrb[0].mxu0 %v411_v54  ;;  %2159 = vmatmul.mubr.bf16.vlgmr.msra.gmra.mrb[0].mxu1 %v415_v55 }
  0x52   : > { %2154 = vmatprep.mubr.bf16.mxu0 %v412_v56  ;;  %2162 = vmatprep.mubr.bf16.mxu1 %v416_v57 }
  0x59   : > { %2155 = vmatmul.mubr.bf16.gmra.mrb[4].mxu0 %v413_v62  ;;  %2163 = vmatmul.mubr.bf16.gmra.mrb[4].mxu1 %v417_v63 }
 0x124   : > { %v2152_v2 = vpop.f32.mrb[0].mxu0  ;;  %v2160_v3 = vpop.f32.mrb[0].mxu1 }
 0x125   : > { %575 = vrot.lane.b32.xlu0 %v2160_v3, %s2452_s12  ;;  %v508_v4 = vpop.f32.mrb[1].mxu1  ;;  %559 = vrot.lane.b32.xlu1 %v2152_v2, %s2452_s12  ;;  %v476_v5 = vpop.f32.mrb[1].mxu0 }
 0x126   : > { %v2153_v6 = vpop.f32.mrb[2].mxu0  ;;  %v2161_v7 = vpop.f32.mrb[2].mxu1 }
 0x127   : > { %v479_v8 = vpop.f32.mrb[3].mxu0  ;;  %v511_v9 = vpop.f32.mrb[3].mxu1 }
 0x129   : > { %555 = vrot.lane.b32.xlu0 %v476_v5, %s2452_s12  ;;  %561 = vrot.lane.b32.xlu1 %v2153_v6, %s2452_s12 }
 0x12c   : > { %v2156_v10 = vpop.f32.mrb[4].mxu0  ;;  %v2164_v11 = vpop.f32.mrb[4].mxu1 }
 0x12d   : > { %571 = vrot.lane.b32.xlu0 %v508_v4, %s2452_s12  ;;  %577 = vrot.lane.b32.xlu1 %v2161_v7, %s2452_s12  ;;  %v492_v12 = vpop.f32.mrb[5].mxu0  ;;  %v524_v13 = vpop.f32.mrb[5].mxu1 }
 0x12e   : > { %v2157_v14 = vpop.f32.mrb[6].mxu0  ;;  %v2165_v15 = vpop.f32.mrb[6].mxu1 }
 0x12f   : > { %v495_v16 = vpop.f32.mrb[7].mxu0  ;;  %v527_v17 = vpop.f32.mrb[7].mxu1 }
 0x131   : > { %573 = vrot.lane.b32.xlu1 %v511_v9, %s2452_s12  ;;  %557 = vrot.lane.b32.xlu0 %v479_v8, %s2452_s12 }
 0x135   : > { %567 = vrot.lane.b32.xlu0 %v2156_v10, %s2452_s12  ;;  %569 = vrot.lane.b32.xlu1 %v2157_v14, %s2452_s12 }
 0x139   : > { %563 = vrot.lane.b32.xlu0 %v492_v12, %s2452_s12  ;;  %565 = vrot.lane.b32.xlu1 %v495_v16, %s2452_s12 }
 0x13d   : > { %579 = vrot.lane.b32.xlu0 %v524_v13, %s2452_s12  ;;  %581 = vrot.lane.b32.xlu1 %v527_v17, %s2452_s12 }
 0x141   : > { %583 = vrot.lane.b32.xlu0 %v2164_v11, %s2452_s12  ;;  %585 = vrot.lane.b32.xlu1 %v2165_v15, %s2452_s12 }
 0x197   : > { %v576_v18 = vpop.permute.xlu0 %575  ;;  %v560_v19 = vpop.permute.xlu1 %559 }
 0x198   : > { %614 = vst.msk [vmem:[#allocation2 + $0x50] sm:$0xff] %vm603_vm0, %v576_v18  ;;  %606 = vst.msk [vmem:[#allocation2 + $0x10] sm:$0xff] %vm603_vm0, %v560_v19 }
 0x19b   : > { %v556_v20 = vpop.permute.xlu0 %555  ;;  %v562_v21 = vpop.permute.xlu1 %561 }
 0x19c   : > { %604 = vst.msk [vmem:[#allocation2] sm:$0xff] %vm603_vm0, %v556_v20  ;;  %607 = vst.msk [vmem:[#allocation2 + $0x18] sm:$0xff] %vm603_vm0, %v562_v21 }
 0x19f   : > { %v572_v22 = vpop.permute.xlu0 %571  ;;  %v578_v23 = vpop.permute.xlu1 %577 }
 0x1a0   : > { %612 = vst.msk [vmem:[#allocation2 + $0x40] sm:$0xff] %vm603_vm0, %v572_v22  ;;  %615 = vst.msk [vmem:[#allocation2 + $0x58] sm:$0xff] %vm603_vm0, %v578_v23 }
 0x1a3   : > { %v574_v24 = vpop.permute.xlu1 %573  ;;  %v558_v25 = vpop.permute.xlu0 %557 }
 0x1a4   : > { %613 = vst.msk [vmem:[#allocation2 + $0x48] sm:$0xff] %vm603_vm0, %v574_v24  ;;  %605 = vst.msk [vmem:[#allocation2 + $0x8] sm:$0xff] %vm603_vm0, %v558_v25 }
 0x1a7   : > { %v568_v26 = vpop.permute.xlu0 %567  ;;  %v570_v27 = vpop.permute.xlu1 %569 }
 0x1a8   : > { %610 = vst.msk [vmem:[#allocation2 + $0x30] sm:$0xff] %vm603_vm0, %v568_v26  ;;  %611 = vst.msk [vmem:[#allocation2 + $0x38] sm:$0xff] %vm603_vm0, %v570_v27 }
 0x1ab   : > { %v564_v28 = vpop.permute.xlu0 %563  ;;  %v566_v29 = vpop.permute.xlu1 %565 }
 0x1ac   : > { %608 = vst.msk [vmem:[#allocation2 + $0x20] sm:$0xff] %vm603_vm0, %v564_v28  ;;  %609 = vst.msk [vmem:[#allocation2 + $0x28] sm:$0xff] %vm603_vm0, %v566_v29 }
 0x1af   : > { %v580_v30 = vpop.permute.xlu0 %579  ;;  %v582_v31 = vpop.permute.xlu1 %581 }
 0x1b0   : > { %616 = vst.msk [vmem:[#allocation2 + $0x60] sm:$0xff] %vm603_vm0, %v580_v30  ;;  %617 = vst.msk [vmem:[#allocation2 + $0x68] sm:$0xff] %vm603_vm0, %v582_v31 }
 0x1b3   : > { %v584_v32 = vpop.permute.xlu0 %583  ;;  %v586_v33 = vpop.permute.xlu1 %585 }
 0x1b4   : > { %618 = vst.msk [vmem:[#allocation2 + $0x70] sm:$0xff] %vm603_vm0, %v584_v32  ;;  %619 = vst.msk [vmem:[#allocation2 + $0x78] sm:$0xff] %vm603_vm0, %v586_v33 }
 0x1b5 PF: > { %v670_v34 = vld [vmem:[%s2572_s8 + $0x10] sm:$0xff]  ;;  %v668_v35 = vld [vmem:[%s2572_s8] sm:$0xff]  ;;  %v2453_v36 = vmov 127   ;;  %v669_v37 = vld [vmem:[%s2572_s8 + $0x8] sm:$0xff]  ;;  %v2454_v61 = vmov 0   ;;  %v876_v12 = vlaneseq  ;;  %vm887_vm1 = vcmask 130112  }
 0x1b6   : > { %2293 = vset.pattern.permute.xlu1 %v2453_v36  ;;  %2292 = vset.pattern.permute.xlu0 %v2453_v36  ;;  %v671_v38 = vld [vmem:[%s2572_s8 + $0x18] sm:$0xff]  ;;  %v1537_v39 = vpack.c.bf16 %v669_v37, %v668_v35  ;;  %v673_v41 = vld [vmem:[%s2572_s8 + $0x28] sm:$0xff]  ;;  %v672_v42 = vld [vmem:[%s2572_s8 + $0x20] sm:$0xff]  ;;  %vm894_vm2 = vcmask 195712   ;;  %vm901_vm3 = vcmask 261312   ;;  %vm908_vm4 = vcmask 326912  }
 0x1b7   : > { %835 = vperm.xlu1 %2293, %v670_v34   ;;  %829 = vperm.xlu0 %2292, %v668_v35   ;;  %v1538_v40 = vpack.c.bf16 %v671_v38, %v670_v34  ;;  %v1539_v43 = vpack.c.bf16 %v673_v41, %v672_v42  ;;  %v675_v44 = vld [vmem:[%s2572_s8 + $0x38] sm:$0xff]  ;;  %v674_v45 = vld [vmem:[%s2572_s8 + $0x30] sm:$0xff]  ;;  %v677_v47 = vld [vmem:[%s2572_s8 + $0x48] sm:$0xff]  ;;  %v2715_v13 = vand.u32 127, %v876_v12  ;;  %v2717_v14 = vshrl.u32 %v876_v12, 7  ;;  %p2058_p13 = scmp.ne.s32.totalorder %s2432_s20, 1 }
 0x1b8   : > { %2166 = vmatprep.subr.bf16.mxu0 %v1537_v39  ;;  %2214 = vmatprep.subr.bf16.mxu1 %v1537_v39  ;;  %v1540_v46 = vpack.c.bf16 %v675_v44, %v674_v45  ;;  %v676_v48 = vld [vmem:[%s2572_s8 + $0x40] sm:$0xff]  ;;  %v679_v50 = vld [vmem:[%s2572_s8 + $0x58] sm:$0xff]  ;;  %v678_v51 = vld [vmem:[%s2572_s8 + $0x50] sm:$0xff]  ;;  %vm915_vm5 = vcmask 392512   ;;  %vm922_vm6 = vcmask 458112   ;;  %vm929_vm7 = vcmask 523712  }
 0x1b9   : > { %2167 = vmatpush3.bf16.msra.mxu0 %v1537_v39  ;;  %2222 = vmatpush3.bf16.msra.mxu1 %v1537_v39  ;;  %v1541_v49 = vpack.c.bf16 %v677_v47, %v676_v48  ;;  %v1542_v52 = vpack.c.bf16 %v679_v50, %v678_v51  ;;  %v681_v53 = vld [vmem:[%s2572_s8 + $0x68] sm:$0xff]  ;;  %v680_v54 = vld [vmem:[%s2572_s8 + $0x60] sm:$0xff]  ;;  %v683_v56 = vld [vmem:[%s2572_s8 + $0x78] sm:$0xff]  ;;  %v882_v15 = vadd.s32 4294967288, %v2715_v13  ;;  %v889_v16 = vadd.s32 4294967280, %v2715_v13 }
 0x1ba   : > { %2168 = vmatprep.subr.bf16.mxu0 %v1538_v40  ;;  %2215 = vmatprep.subr.bf16.mxu1 %v1538_v40  ;;  %v1543_v55 = vpack.c.bf16 %v681_v53, %v680_v54  ;;  %v682_v57 = vld [vmem:[%s2572_s8 + $0x70] sm:$0xff]  ;;  %v685_v59 = vld [vmem:[#allocation2 + $0x8] sm:$0xff]  ;;  %v684_v60 = vld [vmem:[#allocation2] sm:$0xff]  ;;  %v896_v17 = vadd.s32 4294967272, %v2715_v13  ;;  %v880_v20 = vsub.s32 %v2715_v13, %v2717_v14  ;;  %v903_v22 = vadd.s32 4294967264, %v2715_v13 }
 0x1bb   : > { %838 = vperm.xlu1 %2293, %v671_v38   ;;  %832 = vperm.xlu0 %2292, %v669_v37   ;;  %v1544_v58 = vpack.c.bf16 %v683_v56, %v682_v57  ;;  %v692_v62 = vld [vmem:[#allocation2 + $0x40] sm:$0xff]  ;;  %v693_v63 = vld [vmem:[#allocation2 + $0x48] sm:$0xff]  ;;  %v686_v0 = vld [vmem:[#allocation2 + $0x10] sm:$0xff]  ;;  %v885_v21 = vsub.s32 %v882_v15, %v2717_v14  ;;  %v892_v23 = vsub.s32 %v889_v16, %v2717_v14  ;;  %v910_v24 = vadd.s32 4294967256, %v2715_v13 }
 0x1bc   : > { %v687_v1 = vld [vmem:[#allocation2 + $0x18] sm:$0xff]  ;;  %v694_v2 = vld [vmem:[#allocation2 + $0x50] sm:$0xff]  ;;  %v688_v4 = vld [vmem:[#allocation2 + $0x20] sm:$0xff]  ;;  %v899_v25 = vsub.s32 %v896_v17, %v2717_v14  ;;  %v906_v30 = vsub.s32 %v903_v22, %v2717_v14  ;;  %v917_v31 = vadd.s32 4294967248, %v2715_v13  ;;  %v924_v34 = vadd.s32 4294967240, %v2715_v13 }
 0x1bd   : > { %2169 = vmatpush3.bf16.msra.mxu0 %v1538_v40  ;;  %2223 = vmatpush3.bf16.msra.mxu1 %v1538_v40  ;;  %v695_v3 = vld [vmem:[#allocation2 + $0x58] sm:$0xff]  ;;  %v689_v5 = vld [vmem:[#allocation2 + $0x28] sm:$0xff]  ;;  %v696_v6 = vld [vmem:[#allocation2 + $0x60] sm:$0xff]  ;;  %v913_v33 = vsub.s32 %v910_v24, %v2717_v14  ;;  %vm936_vm8 = vcmask 589312   ;;  %vm943_vm9 = vcmask 654912   ;;  %vm950_vm10 = vcmask 720512  }
 0x1be   : > { %2170 = vmatprep.subr.bf16.mxu0 %v1539_v43  ;;  %2216 = vmatprep.subr.bf16.mxu1 %v1539_v43  ;;  %v697_v7 = vld [vmem:[#allocation2 + $0x68] sm:$0xff]  ;;  %v690_v8 = vld [vmem:[#allocation2 + $0x30] sm:$0xff]  ;;  %v691_v9 = vld [vmem:[#allocation2 + $0x38] sm:$0xff]  ;;  %vm957_vm11 = vcmask 786112   ;;  %vm964_vm12 = vcmask 851712   ;;  %vm971_vm13 = vcmask 917312  }
 0x1bf   : > { %844 = vperm.xlu1 %2293, %v673_v41   ;;  %841 = vperm.xlu0 %2292, %v672_v42   ;;  %v698_v10 = vld [vmem:[#allocation2 + $0x70] sm:$0xff]  ;;  %v699_v11 = vld [vmem:[#allocation2 + $0x78] sm:$0xff]  ;;  %v920_v42 = vsub.s32 %v917_v31, %v2717_v14  ;;  %vm978_vm14 = vcmask 982912   ;;  %vm985_vm15 = vcmask 1048512  }
 0x1c1   : > { %2171 = vmatpush3.bf16.msra.mxu0 %v1539_v43  ;;  %2224 = vmatpush3.bf16.msra.mxu1 %v1539_v43  ;;  %v931_v43 = vadd.s32 4294967232, %v2715_v13 }
 0x1c2   : > { %2172 = vmatprep.subr.bf16.mxu0 %v1540_v46  ;;  %2217 = vmatprep.subr.bf16.mxu1 %v1540_v46 }
 0x1c3   : > { %850 = vperm.xlu1 %2293, %v675_v44   ;;  %847 = vperm.xlu0 %2292, %v674_v45   ;;  %v927_v45 = vsub.s32 %v924_v34, %v2717_v14 }
 0x1c5   : > { %2173 = vmatpush3.bf16.msra.mxu0 %v1540_v46  ;;  %2225 = vmatpush3.bf16.msra.mxu1 %v1540_v46  ;;  %v938_v46 = vadd.s32 4294967224, %v2715_v13 }
 0x1c6   : > { %2174 = vmatprep.subr.bf16.mxu0 %v1541_v49  ;;  %2218 = vmatprep.subr.bf16.mxu1 %v1541_v49 }
 0x1c7   : > { %856 = vperm.xlu1 %2293, %v677_v47   ;;  %853 = vperm.xlu0 %2292, %v676_v48  }
 0x1c9   : > { %2175 = vmatpush3.bf16.msra.mxu0 %v1541_v49  ;;  %2226 = vmatpush3.bf16.msra.mxu1 %v1541_v49 }
 0x1ca   : > { %2176 = vmatprep.subr.bf16.mxu0 %v1542_v52  ;;  %2219 = vmatprep.subr.bf16.mxu1 %v1542_v52 }
 0x1cb   : > { %862 = vperm.xlu1 %2293, %v679_v50   ;;  %859 = vperm.xlu0 %2292, %v678_v51   ;;  %v934_v51 = vsub.s32 %v931_v43, %v2717_v14 }
 0x1cd   : > { %2177 = vmatpush3.bf16.msra.mxu0 %v1542_v52  ;;  %2227 = vmatpush3.bf16.msra.mxu1 %v1542_v52  ;;  %v945_v52 = vadd.s32 4294967216, %v2715_v13 }
 0x1ce   : > { %2178 = vmatprep.subr.bf16.mxu0 %v1543_v55  ;;  %2220 = vmatprep.subr.bf16.mxu1 %v1543_v55 }
 0x1cf   : > { %868 = vperm.xlu1 %2293, %v681_v53   ;;  %865 = vperm.xlu0 %2292, %v680_v54  }
 0x1d1   : > { %2179 = vmatpush3.bf16.msra.mxu0 %v1543_v55  ;;  %2228 = vmatpush3.bf16.msra.mxu1 %v1543_v55  ;;  %v941_v55 = vsub.s32 %v938_v46, %v2717_v14 }
 0x1d2   : > { %2180 = vmatprep.subr.bf16.mxu0 %v1544_v58  ;;  %2221 = vmatprep.subr.bf16.mxu1 %v1544_v58 }
 0x1d3   : > { %874 = vperm.xlu1 %2293, %v683_v56   ;;  %871 = vperm.xlu0 %2292, %v682_v57   ;;  %v952_v56 = vadd.s32 4294967208, %v2715_v13 }
 0x1d5   : > { %2181 = vmatpush3.bf16.msra.mxu0 %v1544_v58  ;;  %2229 = vmatpush3.bf16.msra.mxu1 %v1544_v58 }
 0x1d7   : > { %2295 = vset.pattern.permute.xlu1 %v2454_v61  ;;  %2294 = vset.pattern.permute.xlu0 %v2454_v61  ;;  %v948_v61 = vsub.s32 %v945_v52, %v2717_v14 }
 0x1d8   : > { %739 = vperm.xlu1 %2295, %v685_v59   ;;  %734 = vperm.xlu0 %2294, %v684_v60  }
 0x1dc   : > { %774 = vperm.xlu1 %2295, %v692_v62   ;;  %779 = vperm.xlu0 %2294, %v693_v63   ;;  %v959_v62 = vadd.s32 4294967200, %v2715_v13 }
 0x1e0   : > { %744 = vperm.xlu1 %2295, %v686_v0   ;;  %749 = vperm.xlu0 %2294, %v687_v1   ;;  %v955_v1 = vsub.s32 %v952_v56, %v2717_v14 }
 0x1e4   : > { %784 = vperm.xlu1 %2295, %v694_v2   ;;  %789 = vperm.xlu0 %2294, %v695_v3   ;;  %v966_v2 = vadd.s32 4294967192, %v2715_v13 }
 0x1e6   : > { %v969_v12 = vsub.s32 %v966_v2, %v2717_v14 }
 0x1e8   : > { %754 = vperm.xlu1 %2295, %v688_v4   ;;  %759 = vperm.xlu0 %2294, %v689_v5  }
 0x1ec   : > { %794 = vperm.xlu1 %2295, %v696_v6   ;;  %799 = vperm.xlu0 %2294, %v697_v7   ;;  %v962_v7 = vsub.s32 %v959_v62, %v2717_v14  ;;  %v2099_v62 = vld [vmem:[%s2584_s21 + $0x28] sm:$0xff]  }
 0x1f0   : > { %764 = vperm.xlu1 %2295, %v690_v8   ;;  %769 = vperm.xlu0 %2294, %v691_v9   ;;  %v980_v8 = vadd.s32 4294967176, %v2715_v13  ;;  %v973_v9 = vadd.s32 4294967184, %v2715_v13 }
 0x1f4   : > { %804 = vperm.xlu1 %2295, %v698_v10   ;;  %809 = vperm.xlu0 %2294, %v699_v11  }
 0x236   : > { %v836_v18 = vpop.permute.xlu1 %835  ;;  %v830_v19 = vpop.permute.xlu0 %829 }
 0x237   : > { %v881_v28 = vrot.slane %v830_v19, %v880_v20  ;;  %v893_v32 = vrot.slane %v836_v18, %v892_v23  ;;  %v983_v19 = vsub.s32 %v980_v8, %v2717_v14  ;;  %v976_v20 = vsub.s32 %v973_v9, %v2717_v14 }
 0x238   : > { %v2085_v9 = vunpack.c.l.bf16 %v2099_v62 }
 0x23a   : > { %v839_v26 = vpop.permute.xlu1 %838  ;;  %v833_v27 = vpop.permute.xlu0 %832 }
 0x23b   : > { %v886_v29 = vrot.slane %v833_v27, %v885_v21  ;;  %v900_v35 = vrot.slane %v839_v26, %v899_v25 }
 0x23d   : > { %v888_v36 = vsel %vm887_vm1, %v886_v29, %v881_v28 }
 0x23e   : > { %v895_v37 = vsel %vm894_vm2, %v893_v32, %v888_v36  ;;  %v845_v38 = vpop.permute.xlu1 %844  ;;  %v842_v39 = vpop.permute.xlu0 %841  ;;  %v2098_v36 = vld [vmem:[%s2584_s21 + $0x20] sm:$0xff]  }
 0x23f   : > { %v902_v40 = vsel %vm901_vm3, %v900_v35, %v895_v37  ;;  %v907_v41 = vrot.slane %v842_v39, %v906_v30  ;;  %v914_v44 = vrot.slane %v845_v38, %v913_v33  ;;  %v2064_v30 = vld [vmem:[%s2584_s21] sm:$0xff]  }
 0x240   : > { %v2066_v34 = vunpack.c.h.bf16 %v2064_v30  ;;  %v2065_v35 = vunpack.c.l.bf16 %v2064_v30 }
 0x241   : > { %v909_v47 = vsel %vm908_vm4, %v907_v41, %v902_v40 }
 0x242   : > { %v851_v48 = vpop.permute.xlu1 %850  ;;  %v848_v49 = vpop.permute.xlu0 %847  ;;  %v916_v54 = vsel %vm915_vm5, %v914_v44, %v909_v47  ;;  %v2081_v47 = vunpack.c.l.bf16 %v2098_v36 }
 0x243   : > { %v921_v50 = vrot.slane %v848_v49, %v920_v42  ;;  %v928_v53 = vrot.slane %v851_v48, %v927_v45  ;;  %v2082_v48 = vunpack.c.h.bf16 %v2098_v36  ;;  %v2095_v49 = vld [vmem:[%s2584_s21 + $0x8] sm:$0xff]  }
 0x245   : > { %v923_v57 = vsel %vm922_vm6, %v921_v50, %v916_v54 }
 0x246   : > { %v857_v58 = vpop.permute.xlu1 %856  ;;  %v854_v59 = vpop.permute.xlu0 %853  ;;  %v930_v0 = vsel %vm929_vm7, %v928_v53, %v923_v57 }
 0x247   : > { %v935_v60 = vrot.slane %v854_v59, %v934_v51  ;;  %v942_v63 = vrot.slane %v857_v58, %v941_v55 }
 0x249   : > { %v937_v3 = vsel %vm936_vm8, %v935_v60, %v930_v0  ;;  %v2069_v60 = vunpack.c.l.bf16 %v2095_v49 }
 0x24a   : > { %v863_v4 = vpop.permute.xlu1 %862  ;;  %v860_v5 = vpop.permute.xlu0 %859  ;;  %v944_v11 = vsel %vm943_vm9, %v942_v63, %v937_v3 }
 0x24b   : > { %v949_v6 = vrot.slane %v860_v5, %v948_v61  ;;  %v956_v10 = vrot.slane %v863_v4, %v955_v1  ;;  %v2070_v61 = vunpack.c.h.bf16 %v2095_v49 }
 0x24d   : > { %v951_v15 = vsel %vm950_vm10, %v949_v6, %v944_v11  ;;  %v2096_v11 = vld [vmem:[%s2584_s21 + $0x10] sm:$0xff]  }
 0x24e   : > { %v869_v16 = vpop.permute.xlu1 %868  ;;  %v866_v17 = vpop.permute.xlu0 %865  ;;  %v958_v22 = vsel %vm957_vm11, %v956_v10, %v951_v15  ;;  %v2086_v10 = vunpack.c.h.bf16 %v2099_v62 }
 0x24f   : > { %v963_v18 = vrot.slane %v866_v17, %v962_v7  ;;  %v970_v21 = vrot.slane %v869_v16, %v969_v12 }
 0x251   : > { %v965_v23 = vsel %vm964_vm12, %v963_v18, %v958_v22 }
 0x252   : > { %v875_v13 = vpop.permute.xlu1 %874  ;;  %v872_v24 = vpop.permute.xlu0 %871  ;;  %v972_v27 = vsel %vm971_vm13, %v970_v21, %v965_v23 }
 0x253   : > { %v984_v25 = vrot.slane %v875_v13, %v983_v19  ;;  %v977_v26 = vrot.slane %v872_v24, %v976_v20  ;;  %v2073_v13 = vunpack.c.l.bf16 %v2096_v11  ;;  %v2074_v24 = vunpack.c.h.bf16 %v2096_v11  ;;  %v1080_v11 = vld [vmem:[#allocation3] sm:$0xff] }
 0x255   : > { %v979_v28 = vsel %vm978_vm14, %v977_v26, %v972_v27 }
 0x256   : > { %v2751_v29 = vsel %vm985_vm15, %v984_v25, %v979_v28  ;;  %v2100_v25 = vld [vmem:[%s2584_s21 + $0x30] sm:$0xff]  }
 0x257   : > { %v740_v31 = vpop.permute.xlu1 %739  ;;  %v735_v32 = vpop.permute.xlu0 %734  ;;  %v2089_v36 = vunpack.c.l.bf16 %v2100_v25 }
 0x258   : > { %v1001_v14 = vadd.f32 %v2751_v29, %v740_v31  ;;  %v1000_v33 = vadd.f32 %v2751_v29, %v735_v32 }
 0x25a   : > { %v1033_v37 = vmul.f32 0.2, %v1001_v14  ;;  %v1032_v38 = vmul.f32 0.2, %v1000_v33  ;;  %vm1017_vm0 = vcmp.gt.f32.partialorder %v1001_v14, 0.0  ;;  %vm1016_vm1 = vcmp.gt.f32.partialorder %v1000_v33, 0.0 }
 0x25b   : > { %v775_v39 = vpop.permute.xlu1 %774  ;;  %v780_v40 = vpop.permute.xlu0 %779 }
 0x25c   : > { %v1008_v41 = vadd.f32 %v2751_v29, %v775_v39  ;;  %v1009_v42 = vadd.f32 %v2751_v29, %v780_v40  ;;  %v1049_v43 = vsel %vm1017_vm0, %v1001_v14, %v1033_v37  ;;  %v1048_v44 = vsel %vm1016_vm1, %v1000_v33, %v1032_v38  ;;  %v2097_v38 = vld [vmem:[%s2584_s21 + $0x18] sm:$0xff]  }
 0x25d   : > { %v2759_v45 = vadd.f32 %v2066_v34, %v1049_v43  ;;  %v2761_v46 = vadd.f32 %v2065_v35, %v1048_v44  ;;  %v2090_v37 = vunpack.c.h.bf16 %v2100_v25  ;;  %vm1400_vm0 = vcmask 7168  }
 0x25e   : > { %v1040_v50 = vmul.f32 0.2, %v1008_v41  ;;  %v1041_v51 = vmul.f32 0.2, %v1009_v42  ;;  %vm1024_vm2 = vcmp.gt.f32.partialorder %v1008_v41, 0.0  ;;  %vm1025_vm3 = vcmp.gt.f32.partialorder %v1009_v42, 0.0 }
 0x25f   : > { %v745_v52 = vpop.permute.xlu1 %744  ;;  %1098 = vmax.xlane.f32.xlu0 %v2759_v45  ;;  %1096 = vmax.xlane.f32.xlu1 %v2761_v46  ;;  %v750_v53 = vpop.permute.xlu0 %749 }
 0x260   : > { %v1002_v54 = vadd.f32 %v2751_v29, %v745_v52  ;;  %v1003_v55 = vadd.f32 %v2751_v29, %v750_v53  ;;  %v1056_v56 = vsel %vm1024_vm2, %v1008_v41, %v1040_v50  ;;  %v1057_v57 = vsel %vm1025_vm3, %v1009_v42, %v1041_v51  ;;  %v2101_v53 = vld [vmem:[%s2584_s21 + $0x38] sm:$0xff]  }
 0x261   : > { %v2768_v58 = vadd.f32 %v2081_v47, %v1056_v56  ;;  %v2770_v59 = vadd.f32 %v2082_v48, %v1057_v57  ;;  %v2077_v51 = vunpack.c.l.bf16 %v2097_v38  ;;  %v2078_v52 = vunpack.c.h.bf16 %v2097_v38 }
 0x262   : > { %v1034_v63 = vmul.f32 0.2, %v1002_v54  ;;  %v1035_v0 = vmul.f32 0.2, %v1003_v55  ;;  %vm1018_vm4 = vcmp.gt.f32.partialorder %v1002_v54, 0.0  ;;  %vm1019_vm5 = vcmp.gt.f32.partialorder %v1003_v55, 0.0 }
 0x263   : > { %v785_v1 = vpop.permute.xlu1 %784  ;;  %1112 = vmax.xlane.f32.xlu0 %v2768_v58  ;;  %1114 = vmax.xlane.f32.xlu1 %v2770_v59  ;;  %v790_v2 = vpop.permute.xlu0 %789 }
 0x264   : > { %v1010_v3 = vadd.f32 %v2751_v29, %v785_v1  ;;  %v1011_v4 = vadd.f32 %v2751_v29, %v790_v2  ;;  %v1050_v5 = vsel %vm1018_vm4, %v1002_v54, %v1034_v63  ;;  %v1051_v6 = vsel %vm1019_vm5, %v1003_v55, %v1035_v0 }
 0x265   : > { %v2777_v7 = vadd.f32 %v2069_v60, %v1050_v5  ;;  %v2779_v8 = vadd.f32 %v2070_v61, %v1051_v6  ;;  %v2093_v2 = vunpack.c.l.bf16 %v2101_v53 }
 0x266   : > { %v1042_v12 = vmul.f32 0.2, %v1010_v3  ;;  %v1043_v15 = vmul.f32 0.2, %v1011_v4  ;;  %vm1026_vm6 = vcmp.gt.f32.partialorder %v1010_v3, 0.0  ;;  %vm1027_vm7 = vcmp.gt.f32.partialorder %v1011_v4, 0.0 }
 0x267   : > { %v755_v16 = vpop.permute.xlu1 %754  ;;  %1100 = vmax.xlane.f32.xlu0 %v2777_v7  ;;  %1102 = vmax.xlane.f32.xlu1 %v2779_v8  ;;  %v760_v17 = vpop.permute.xlu0 %759 }
 0x268   : > { %v1004_v18 = vadd.f32 %v2751_v29, %v755_v16  ;;  %v1005_v19 = vadd.f32 %v2751_v29, %v760_v17  ;;  %v1058_v20 = vsel %vm1026_vm6, %v1010_v3, %v1042_v12  ;;  %v1059_v21 = vsel %vm1027_vm7, %v1011_v4, %v1043_v15  ;;  %v1081_v12 = vld [vmem:[#allocation3 + $0x8] sm:$0xff] }
 0x269   : > { %v2786_v22 = vadd.f32 %v2085_v9, %v1058_v20  ;;  %v2788_v23 = vadd.f32 %v2086_v10, %v1059_v21  ;;  %v2094_v3 = vunpack.c.h.bf16 %v2101_v53  ;;  %v2827_v20 = vld [vmem:[#allocation3 + $0x40] sm:$0xff] }
 0x26a   : > { %v1036_v26 = vmul.f32 0.2, %v1004_v18  ;;  %v1037_v27 = vmul.f32 0.2, %v1005_v19  ;;  %vm1020_vm8 = vcmp.gt.f32.partialorder %v1004_v18, 0.0  ;;  %vm1021_vm9 = vcmp.gt.f32.partialorder %v1005_v19, 0.0 }
 0x26b   : > { %v795_v28 = vpop.permute.xlu1 %794  ;;  %1116 = vmax.xlane.f32.xlu0 %v2786_v22  ;;  %1118 = vmax.xlane.f32.xlu1 %v2788_v23  ;;  %v800_v30 = vpop.permute.xlu0 %799  ;;  %v2863_v53 = vld [vmem:[#allocation3 + $0x60] sm:$0xff] }
 0x26c   : > { %v1012_v31 = vadd.f32 %v2751_v29, %v795_v28  ;;  %v1013_v32 = vadd.f32 %v2751_v29, %v800_v30  ;;  %v1052_v14 = vsel %vm1020_vm8, %v1004_v18, %v1036_v26  ;;  %v1053_v33 = vsel %vm1021_vm9, %v1005_v19, %v1037_v27  ;;  %v2825_v19 = vld [vmem:[#allocation3 + $0x48] sm:$0xff]  ;;  %v1083_v26 = vld [vmem:[#allocation3 + $0x18] sm:$0xff]  ;;  %v1082_v27 = vld [vmem:[#allocation3 + $0x10] sm:$0xff] }
 0x26d   : > { %v2795_v34 = vadd.f32 %v2073_v13, %v1052_v14  ;;  %v2797_v35 = vadd.f32 %v2074_v24, %v1053_v33  ;;  %v2843_v14 = vld [vmem:[#allocation3 + $0x58] sm:$0xff]  ;;  %v2845_v33 = vld [vmem:[#allocation3 + $0x50] sm:$0xff] }
 0x26e   : > { %v1044_v39 = vmul.f32 0.2, %v1012_v31  ;;  %v1045_v40 = vmul.f32 0.2, %v1013_v32  ;;  %vm1028_vm10 = vcmp.gt.f32.partialorder %v1012_v31, 0.0  ;;  %vm1029_vm11 = vcmp.gt.f32.partialorder %v1013_v32, 0.0 }
 0x26f   : > { %v765_v41 = vpop.permute.xlu1 %764  ;;  %1104 = vmax.xlane.f32.xlu0 %v2795_v34  ;;  %1106 = vmax.xlane.f32.xlu1 %v2797_v35  ;;  %v770_v42 = vpop.permute.xlu0 %769 }
 0x270   : > { %v1006_v43 = vadd.f32 %v2751_v29, %v765_v41  ;;  %v1007_v44 = vadd.f32 %v2751_v29, %v770_v42  ;;  %v1060_v47 = vsel %vm1028_vm10, %v1012_v31, %v1044_v39  ;;  %v1061_v48 = vsel %vm1029_vm11, %v1013_v32, %v1045_v40  ;;  %v1085_v40 = vld [vmem:[#allocation3 + $0x28] sm:$0xff]  ;;  %v1084_v41 = vld [vmem:[#allocation3 + $0x20] sm:$0xff] }
 0x271   : > { %v2804_v49 = vadd.f32 %v2089_v36, %v1060_v47  ;;  %v2806_v50 = vadd.f32 %v2090_v37, %v1061_v48 }
 0x272   : > { %v1038_v54 = vmul.f32 0.2, %v1006_v43  ;;  %v1039_v55 = vmul.f32 0.2, %v1007_v44  ;;  %vm1022_vm12 = vcmp.gt.f32.partialorder %v1006_v43, 0.0  ;;  %vm1023_vm13 = vcmp.gt.f32.partialorder %v1007_v44, 0.0 }
 0x273   : > { %v805_v56 = vpop.permute.xlu1 %804  ;;  %1120 = vmax.xlane.f32.xlu0 %v2804_v49  ;;  %1122 = vmax.xlane.f32.xlu1 %v2806_v50  ;;  %v810_v57 = vpop.permute.xlu0 %809 }
 0x274   : > { %v1014_v60 = vadd.f32 %v2751_v29, %v805_v56  ;;  %v1015_v61 = vadd.f32 %v2751_v29, %v810_v57  ;;  %v1054_v62 = vsel %vm1022_vm12, %v1006_v43, %v1038_v54  ;;  %v1055_v63 = vsel %vm1023_vm13, %v1007_v44, %v1039_v55 }
 0x275   : > { %v2813_v0 = vadd.f32 %v2077_v51, %v1054_v62  ;;  %v2815_v1 = vadd.f32 %v2078_v52, %v1055_v63  ;;  %v2861_v52 = vld [vmem:[#allocation3 + $0x68] sm:$0xff] }
 0x276   : > { %v1046_v4 = vmul.f32 0.2, %v1014_v60  ;;  %v1047_v5 = vmul.f32 0.2, %v1015_v61  ;;  %vm1030_vm14 = vcmp.gt.f32.partialorder %v1014_v60, 0.0  ;;  %vm1031_vm15 = vcmp.gt.f32.partialorder %v1015_v61, 0.0 }
 0x277   : > { %1108 = vmax.xlane.f32.xlu0 %v2813_v0  ;;  %1110 = vmax.xlane.f32.xlu1 %v2815_v1 }
 0x278   : > { %v1062_v6 = vsel %vm1030_vm14, %v1014_v60, %v1046_v4  ;;  %v1063_v9 = vsel %vm1031_vm15, %v1015_v61, %v1047_v5 }
 0x279   : > { %v2819_v10 = vadd.f32 %v2093_v2, %v1062_v6  ;;  %v2821_v29 = vadd.f32 %v2094_v3, %v1063_v9  ;;  %v1087_v2 = vld [vmem:[#allocation3 + $0x38] sm:$0xff]  ;;  %v1086_v3 = vld [vmem:[#allocation3 + $0x30] sm:$0xff] }
 0x27b   : > { %1124 = vmax.xlane.f32.xlu0 %v2819_v10  ;;  %1126 = vmax.xlane.f32.xlu1 %v2821_v29 }
 0x2ec   : > { %v1097_v15 = vpop.xlane.xlu1 %1096  ;;  %v1099_v16 = vpop.xlane.xlu0 %1098 }
 0x2ed   : > { %v1128_v17 = vmax.f32 %v1080_v11, %v1097_v15  ;;  %v1129_v18 = vmax.f32 %v1081_v12, %v1099_v16 }
 0x2ef   : > { %1674 = vst.msk [vmem:[#allocation3] sm:$0xff] %vm1400_vm0, %v1128_v17  ;;  %1675 = vst.msk [vmem:[#allocation3 + $0x8] sm:$0xff] %vm1400_vm0, %v1129_v18  ;;  %1146 = vperm.xlu0 %2294, %v1128_v17   ;;  %1151 = vperm.xlu1 %2295, %v1129_v18   ;;  %v1272_v42 = vsub.f32 %v1080_v11, %v1128_v17  ;;  %v1273_v43 = vsub.f32 %v1081_v12, %v1129_v18  ;;  %v2879_v17 = vld [vmem:[#allocation3 + $0x78] sm:$0xff]  ;;  %v2881_v18 = vld [vmem:[#allocation3 + $0x70] sm:$0xff] }
 0x2f0   : > { %v1115_v21 = vpop.xlane.xlu1 %1114  ;;  %v1113_v13 = vpop.xlane.xlu0 %1112 }
 0x2f1   : > { %v2832_v24 = vmax.f32 %v2825_v19, %v1115_v21  ;;  %v2835_v25 = vmax.f32 %v2827_v20, %v1113_v13  ;;  %v1288_v54 = vmul.f32 1.442695, %v1272_v42  ;;  %v1290_v56 = vmul.f32 1.442695, %v1273_v43 }
 0x2f3   : > { %1683 = vst.msk [vmem:[#allocation3 + $0x48] sm:$0xff] %vm1400_vm0, %v2832_v24  ;;  %1682 = vst.msk [vmem:[#allocation3 + $0x40] sm:$0xff] %vm1400_vm0, %v2835_v25  ;;  %1191 = vperm.xlu0 %2294, %v2832_v24   ;;  %1186 = vperm.xlu1 %2295, %v2835_v25   ;;  %2296 = vpow2.f32 %v1288_v54 }
 0x2f4   : > { %v1103_v28 = vpop.xlane.xlu1 %1102  ;;  %v1101_v30 = vpop.xlane.xlu0 %1100  ;;  %2298 = vpow2.f32 %v1290_v56 }
 0x2f5   : > { %v1131_v31 = vmax.f32 %v1083_v26, %v1103_v28  ;;  %v1130_v32 = vmax.f32 %v1082_v27, %v1101_v30 }
 0x2f7   : > { %1677 = vst.msk [vmem:[#allocation3 + $0x18] sm:$0xff] %vm1400_vm0, %v1131_v31  ;;  %1676 = vst.msk [vmem:[#allocation3 + $0x10] sm:$0xff] %vm1400_vm0, %v1130_v32  ;;  %1161 = vperm.xlu0 %2294, %v1131_v31   ;;  %1156 = vperm.xlu1 %2295, %v1130_v32   ;;  %v1275_v55 = vsub.f32 %v1083_v26, %v1131_v31  ;;  %v1274_v57 = vsub.f32 %v1082_v27, %v1130_v32 }
 0x2f8   : > { %v1119_v36 = vpop.xlane.xlu1 %1118  ;;  %v1117_v37 = vpop.xlane.xlu0 %1116 }
 0x2f9   : > { %v2850_v38 = vmax.f32 %v2843_v14, %v1119_v36  ;;  %v2853_v39 = vmax.f32 %v2845_v33, %v1117_v37  ;;  %v1294_v4 = vmul.f32 1.442695, %v1275_v55  ;;  %v1292_v6 = vmul.f32 1.442695, %v1274_v57 }
 0x2fa   : > { %v1281_v36 = vsub.f32 %v2825_v19, %v2832_v24  ;;  %v1280_v19 = vsub.f32 %v2827_v20, %v2835_v25 }
 0x2fb   : > { %1685 = vst.msk [vmem:[#allocation3 + $0x58] sm:$0xff] %vm1400_vm0, %v2850_v38  ;;  %1684 = vst.msk [vmem:[#allocation3 + $0x50] sm:$0xff] %vm1400_vm0, %v2853_v39  ;;  %1201 = vperm.xlu0 %2294, %v2850_v38   ;;  %1196 = vperm.xlu1 %2295, %v2853_v39   ;;  %2300 = vpow2.f32 %v1294_v4 }
 0x2fc   : > { %v1107_v44 = vpop.xlane.xlu1 %1106  ;;  %v1105_v47 = vpop.xlane.xlu0 %1104  ;;  %2302 = vpow2.f32 %v1292_v6 }
 0x2fd   : > { %v1133_v48 = vmax.f32 %v1085_v40, %v1107_v44  ;;  %v1132_v51 = vmax.f32 %v1084_v41, %v1105_v47  ;;  %v2905_v42 = vpop.eup %2296  ;;  %v1306_v44 = vmul.f32 1.442695, %v1281_v36  ;;  %v1283_v47 = vsub.f32 %v2843_v14, %v2850_v38 }
 0x2fe   : > { %v2907_v43 = vpop.eup %2298 }
 0x2ff   : > { %1679 = vst.msk [vmem:[#allocation3 + $0x28] sm:$0xff] %vm1400_vm0, %v1133_v48  ;;  %1678 = vst.msk [vmem:[#allocation3 + $0x20] sm:$0xff] %vm1400_vm0, %v1132_v51  ;;  %1171 = vperm.xlu0 %2294, %v1133_v48   ;;  %1166 = vperm.xlu1 %2295, %v1132_v51   ;;  %v1277_v5 = vsub.f32 %v1085_v40, %v1133_v48  ;;  %v1276_v9 = vsub.f32 %v1084_v41, %v1132_v51  ;;  %v1304_v48 = vmul.f32 1.442695, %v1280_v19 }
 0x300   : > { %v1123_v60 = vpop.xlane.xlu1 %1122  ;;  %v1121_v61 = vpop.xlane.xlu0 %1120  ;;  %v1282_v51 = vsub.f32 %v2845_v33, %v2853_v39  ;;  %v1310_v54 = vmul.f32 1.442695, %v1283_v47 }
 0x301   : > { %v2868_v62 = vmax.f32 %v2861_v52, %v1123_v60  ;;  %v2871_v63 = vmax.f32 %v2863_v53, %v1121_v61  ;;  %v1298_v21 = vmul.f32 1.442695, %v1277_v5  ;;  %v1296_v26 = vmul.f32 1.442695, %v1276_v9 }
 0x302   : > { %v1308_v14 = vmul.f32 1.442695, %v1282_v51 }
 0x303   : > { %1687 = vst.msk [vmem:[#allocation3 + $0x68] sm:$0xff] %vm1400_vm0, %v2868_v62  ;;  %1686 = vst.msk [vmem:[#allocation3 + $0x60] sm:$0xff] %vm1400_vm0, %v2871_v63  ;;  %1211 = vperm.xlu0 %2294, %v2868_v62   ;;  %1206 = vperm.xlu1 %2295, %v2871_v63   ;;  %2304 = vpow2.f32 %v1298_v21  ;;  %v1285_v55 = vsub.f32 %v2861_v52, %v2868_v62  ;;  %v1284_v38 = vsub.f32 %v2863_v53, %v2871_v63 }
 0x304   : > { %v1111_v11 = vpop.xlane.xlu1 %1110  ;;  %v1109_v12 = vpop.xlane.xlu0 %1108  ;;  %2306 = vpow2.f32 %v1296_v26 }
 0x305   : > { %v1135_v15 = vmax.f32 %v1087_v2, %v1111_v11  ;;  %v1134_v16 = vmax.f32 %v1086_v3, %v1109_v12  ;;  %v2915_v20 = vpop.eup %2300  ;;  %v1314_v56 = vmul.f32 1.442695, %v1285_v55  ;;  %v1312_v52 = vmul.f32 1.442695, %v1284_v38 }
 0x306   : > { %v2917_v25 = vpop.eup %2302 }
 0x307   : > { %v1279_v13 = vsub.f32 %v1087_v2, %v1135_v15  ;;  %1681 = vst.msk [vmem:[#allocation3 + $0x38] sm:$0xff] %vm1400_vm0, %v1135_v15  ;;  %1680 = vst.msk [vmem:[#allocation3 + $0x30] sm:$0xff] %vm1400_vm0, %v1134_v16  ;;  %1181 = vperm.xlu0 %2294, %v1135_v15   ;;  %1176 = vperm.xlu1 %2295, %v1134_v16   ;;  %v1278_v27 = vsub.f32 %v1086_v3, %v1134_v16 }
 0x308   : > { %v1127_v28 = vpop.xlane.xlu1 %1126  ;;  %v1125_v30 = vpop.xlane.xlu0 %1124 }
 0x309   : > { %v2886_v31 = vmax.f32 %v2879_v17, %v1127_v28  ;;  %v2889_v32 = vmax.f32 %v2881_v18, %v1125_v30  ;;  %v1302_v37 = vmul.f32 1.442695, %v1279_v13  ;;  %v1300_v24 = vmul.f32 1.442695, %v1278_v27 }
 0x30b   : > { %v1287_v40 = vsub.f32 %v2879_v17, %v2886_v31  ;;  %1689 = vst.msk [vmem:[#allocation3 + $0x78] sm:$0xff] %vm1400_vm0, %v2886_v31  ;;  %v1286_v41 = vsub.f32 %v2881_v18, %v2889_v32  ;;  %1688 = vst.msk [vmem:[#allocation3 + $0x70] sm:$0xff] %vm1400_vm0, %v2889_v32  ;;  %1221 = vperm.xlu0 %2294, %v2886_v31   ;;  %1216 = vperm.xlu1 %2295, %v2889_v32   ;;  %2308 = vpow2.f32 %v1302_v37 }
 0x30c   : > { %2310 = vpow2.f32 %v1300_v24 }
 0x30d   : > { %2312 = vpow2.f32 %v1306_v44  ;;  %v2925_v33 = vpop.eup %2304 }
 0x30e   : > { %2314 = vpow2.f32 %v1304_v48  ;;  %v2927_v39 = vpop.eup %2306 }
 0x30f   : > { %1435 = vperm.xlu0 %2294, %v2905_v42   ;;  %1440 = vperm.xlu1 %2295, %v2907_v43   ;;  %2316 = vpow2.f32 %v1310_v54 }
 0x310   : > { %2318 = vpow2.f32 %v1308_v14 }
 0x311   : > { %2320 = vpow2.f32 %v1314_v56 }
 0x312   : > { %2322 = vpow2.f32 %v1312_v52 }
 0x313   : > { %1450 = vperm.xlu0 %2294, %v2915_v20   ;;  %1445 = vperm.xlu1 %2295, %v2917_v25  }
 0x315   : > { %v2931_v57 = vpop.eup %2308 }
 0x316   : > { %v2933_v60 = vpop.eup %2310 }
 0x317   : > { %1460 = vperm.xlu0 %2294, %v2925_v33   ;;  %1455 = vperm.xlu1 %2295, %v2927_v39   ;;  %v2937_v53 = vpop.eup %2312 }
 0x318   : > { %v2939_v61 = vpop.eup %2314 }
 0x319   : > { %v2943_v62 = vpop.eup %2316 }
 0x31a   : > { %v2945_v63 = vpop.eup %2318 }
 0x31b   : > { %1470 = vperm.xlu0 %2294, %v2931_v57   ;;  %1465 = vperm.xlu1 %2295, %v2933_v60   ;;  %v2949_v2 = vpop.eup %2320 }
 0x31c   : > { %v2951_v3 = vpop.eup %2322 }
 0x31f   : > { %1480 = vperm.xlu0 %2294, %v2937_v53   ;;  %1475 = vperm.xlu1 %2295, %v2939_v61  }
 0x323   : > { %1490 = vperm.xlu0 %2294, %v2943_v62   ;;  %1485 = vperm.xlu1 %2295, %v2945_v63  }
 0x327   : > { %1500 = vperm.xlu0 %2294, %v2949_v2   ;;  %1495 = vperm.xlu1 %2295, %v2951_v3  }
 0x36e   : > { %v1152_v4 = vpop.permute.xlu1 %1151  ;;  %v1147_v5 = vpop.permute.xlu0 %1146 }
 0x36f   : > { %v1225_v6 = vsub.f32 %v2759_v45, %v1152_v4  ;;  %v1224_v9 = vsub.f32 %v2761_v46, %v1147_v5 }
 0x371   : > { %v1242_v11 = vmul.f32 1.442695, %v1225_v6  ;;  %v1240_v12 = vmul.f32 1.442695, %v1224_v9 }
 0x372   : > { %v1187_v15 = vpop.permute.xlu1 %1186  ;;  %v1192_v16 = vpop.permute.xlu0 %1191 }
 0x373   : > { %2324 = vpow2.f32 %v1242_v11  ;;  %v1232_v21 = vsub.f32 %v2768_v58, %v1187_v15  ;;  %v1233_v13 = vsub.f32 %v2770_v59, %v1192_v16 }
 0x374   : > { %2326 = vpow2.f32 %v1240_v12 }
 0x375   : > { %v1256_v26 = vmul.f32 1.442695, %v1232_v21  ;;  %v1258_v27 = vmul.f32 1.442695, %v1233_v13 }
 0x376   : > { %v1157_v28 = vpop.permute.xlu1 %1156  ;;  %v1162_v30 = vpop.permute.xlu0 %1161 }
 0x377   : > { %2328 = vpow2.f32 %v1256_v26  ;;  %v1226_v36 = vsub.f32 %v2777_v7, %v1157_v28  ;;  %v1227_v45 = vsub.f32 %v2779_v8, %v1162_v30 }
 0x378   : > { %2330 = vpow2.f32 %v1258_v27 }
 0x379   : > { %v1244_v46 = vmul.f32 1.442695, %v1226_v36  ;;  %v1246_v37 = vmul.f32 1.442695, %v1227_v45 }
 0x37a   : > { %v1197_v19 = vpop.permute.xlu1 %1196  ;;  %v1202_v24 = vpop.permute.xlu0 %1201 }
 0x37b   : > { %2332 = vpow2.f32 %v1244_v46  ;;  %v1234_v58 = vsub.f32 %v2786_v22, %v1197_v19  ;;  %v1235_v59 = vsub.f32 %v2788_v23, %v1202_v24 }
 0x37c   : > { %2334 = vpow2.f32 %v1246_v37 }
 0x37d   : > { %v2325_v44 = vpop.eup %2324  ;;  %v1260_v47 = vmul.f32 1.442695, %v1234_v58  ;;  %v1262_v48 = vmul.f32 1.442695, %v1235_v59 }
 0x37e   : > { %v2327_v51 = vpop.eup %2326  ;;  %1354 = vadd.xlane.f32.xlu0 %v2325_v44  ;;  %v1167_v54 = vpop.permute.xlu1 %1166 }
 0x37f   : > { %v1172_v7 = vpop.permute.xlu0 %1171  ;;  %2336 = vpow2.f32 %v1260_v47  ;;  %v1228_v8 = vsub.f32 %v2795_v34, %v1167_v54  ;;  %1352 = vadd.xlane.f32.xlu1 %v2327_v51  ;;  %v1529_v14 = vpack.c.bf16 %v2325_v44, %v2327_v51 }
 0x380   : > { %v1229_v55 = vsub.f32 %v2797_v35, %v1172_v7  ;;  %2338 = vpow2.f32 %v1262_v48 }
 0x381   : > { %v2329_v38 = vpop.eup %2328  ;;  %v1248_v22 = vmul.f32 1.442695, %v1228_v8  ;;  %2182 = vmatprep.mubr.bf16.mxu0 %v1529_v14  ;;  %v1316_v8 = vmul.f32 1.442695, %v1286_v41 }
 0x382   : > { %v1250_v56 = vmul.f32 1.442695, %v1229_v55  ;;  %v2331_v23 = vpop.eup %2330  ;;  %v1207_v52 = vpop.permute.xlu1 %1206  ;;  %v1318_v55 = vmul.f32 1.442695, %v1287_v40 }
 0x383   : > { %v1212_v4 = vpop.permute.xlu0 %1211  ;;  %2340 = vpow2.f32 %v1248_v22  ;;  %v1236_v5 = vsub.f32 %v2804_v49, %v1207_v52  ;;  %v1533_v9 = vpack.c.bf16 %v2331_v23, %v2329_v38 }
 0x384   : > { %v1237_v6 = vsub.f32 %v2806_v50, %v1212_v4  ;;  %2342 = vpow2.f32 %v1250_v56 }
 0x385   : > { %v2333_v34 = vpop.eup %2332  ;;  %v1264_v11 = vmul.f32 1.442695, %v1236_v5  ;;  %2190 = vmatprep.mubr.bf16.mxu1 %v1533_v9  ;;  %v1321_v9 = vld [vmem:[#allocation4 + $0x8] sm:$0xff] }
 0x386   : > { %v1266_v12 = vmul.f32 1.442695, %v1237_v6  ;;  %v2335_v35 = vpop.eup %2334  ;;  %1356 = vadd.xlane.f32.xlu0 %v2333_v34  ;;  %v1177_v15 = vpop.permute.xlu1 %1176 }
 0x387   : > { %v1182_v16 = vpop.permute.xlu0 %1181  ;;  %2344 = vpow2.f32 %v1264_v11  ;;  %v1230_v21 = vsub.f32 %v2813_v0, %v1177_v15  ;;  %1358 = vadd.xlane.f32.xlu1 %v2335_v35  ;;  %v1530_v26 = vpack.c.bf16 %v2335_v35, %v2333_v34  ;;  %v1320_v11 = vld [vmem:[#allocation4] sm:$0xff] }
 0x388   : > { %v1231_v13 = vsub.f32 %v2815_v1, %v1182_v16  ;;  %2346 = vpow2.f32 %v1266_v12  ;;  %v1337_v12 = vmul.f32 %v2907_v43, %v1321_v9  ;;  %v1336_v35 = vmul.f32 %v2905_v42, %v1320_v11  ;;  %v1324_v42 = vld [vmem:[#allocation4 + $0x20] sm:$0xff] }
 0x389   : > { %v2337_v49 = vpop.eup %2336  ;;  %v1252_v50 = vmul.f32 1.442695, %v1230_v21  ;;  %2183 = vmatmul.mubr.bf16.vlgmr.msra.gmra.mrb[0].mxu0 %v1530_v26  ;;  %v1322_v26 = vld [vmem:[#allocation4 + $0x10] sm:$0xff] }
 0x38a   : > { %v1254_v27 = vmul.f32 1.442695, %v1231_v13  ;;  %v2339_v28 = vpop.eup %2338  ;;  %v1217_v30 = vpop.permute.xlu1 %1216 }
 0x38b   : > { %v1222_v36 = vpop.permute.xlu0 %1221  ;;  %2348 = vpow2.f32 %v1252_v50  ;;  %v1238_v45 = vsub.f32 %v2819_v10, %v1217_v30  ;;  %v1534_v37 = vpack.c.bf16 %v2339_v28, %v2337_v49  ;;  %v1338_v50 = vmul.f32 %v2917_v25, %v1322_v26 }
 0x38c   : > { %v1239_v46 = vsub.f32 %v2821_v29, %v1222_v36  ;;  %2350 = vpow2.f32 %v1254_v27 }
 0x38d   : > { %v2341_v0 = vpop.eup %2340  ;;  %v1268_v19 = vmul.f32 1.442695, %v1238_v45  ;;  %2191 = vmatmul.mubr.bf16.vlgmr.msra.gmra.mrb[0].mxu1 %v1534_v37  ;;  %v1325_v45 = vld [vmem:[#allocation4 + $0x28] sm:$0xff] }
 0x38e   : > { %v1270_v24 = vmul.f32 1.442695, %v1239_v46  ;;  %v2343_v1 = vpop.eup %2342  ;;  %1360 = vadd.xlane.f32.xlu0 %v2341_v0  ;;  %v2985_v56 = vpop.permute.xlu1 %1440  ;;  %v1340_v46 = vmul.f32 %v2927_v39, %v1324_v42  ;;  %v1341_v37 = vmul.f32 %v2925_v33, %v1325_v45  ;;  %v1417_v45 = vld [vmem:[#allocation5] sm:$0xff] }
 0x38f   : > { %2352 = vpow2.f32 %v1268_v19  ;;  %1362 = vadd.xlane.f32.xlu1 %v2343_v1  ;;  %v1531_v58 = vpack.c.bf16 %v2343_v1, %v2341_v0  ;;  %v2983_v22 = vpop.permute.xlu0 %1435  ;;  %v1327_v1 = vld [vmem:[#allocation4 + $0x38] sm:$0xff] }
 0x390   : > { %2354 = vpow2.f32 %v1270_v24 }
 0x391   : > { %v2345_v59 = vpop.eup %2344  ;;  %2186 = vmatprep.mubr.bf16.mxu0 %v1531_v58  ;;  %2356 = vpow2.f32 %v1316_v8 }
 0x392   : > { %v2347_v44 = vpop.eup %2346  ;;  %2358 = vpow2.f32 %v1318_v55  ;;  %v2989_v32 = vpop.permute.xlu1 %1445  ;;  %v1331_v55 = vld [vmem:[#allocation4 + $0x58] sm:$0xff] }
 0x393   : > { %v1535_v47 = vpack.c.bf16 %v2347_v44, %v2345_v59  ;;  %v2987_v18 = vpop.permute.xlu0 %1450  ;;  %v1347_v11 = vmul.f32 %v2943_v62, %v1331_v55 }
 0x395   : > { %v2349_v48 = vpop.eup %2348  ;;  %2194 = vmatprep.mubr.bf16.mxu1 %v1535_v47  ;;  %v1328_v47 = vld [vmem:[#allocation4 + $0x40] sm:$0xff] }
 0x396   : > { %v2351_v10 = vpop.eup %2350  ;;  %1364 = vadd.xlane.f32.xlu0 %v2349_v48  ;;  %v2993_v31 = vpop.permute.xlu1 %1455 }
 0x397   : > { %1366 = vadd.xlane.f32.xlu1 %v2351_v10  ;;  %v1532_v29 = vpack.c.bf16 %v2351_v10, %v2349_v48  ;;  %v2991_v17 = vpop.permute.xlu0 %1460  ;;  %v1329_v10 = vld [vmem:[#allocation4 + $0x48] sm:$0xff] }
 0x399   : > { %v2353_v51 = vpop.eup %2352  ;;  %2187 = vmatmul.mubr.bf16.gmra.mrb[4].mxu0 %v1532_v29  ;;  %v1344_v29 = vmul.f32 %v2939_v61, %v1328_v47  ;;  %v1332_v61 = vld [vmem:[#allocation4 + $0x60] sm:$0xff] }
 0x39a   : > { %v2355_v54 = vpop.eup %2354  ;;  %1368 = vadd.xlane.f32.xlu0 %v2329_v38  ;;  %v2997_v41 = vpop.permute.xlu1 %1465 }
 0x39b   : > { %1370 = vadd.xlane.f32.xlu1 %v2331_v23  ;;  %v1536_v7 = vpack.c.bf16 %v2355_v54, %v2353_v51  ;;  %v2977_v14 = vpop.eup %2356  ;;  %v2995_v40 = vpop.permute.xlu0 %1470 }
 0x39c   : > { %v2980_v38 = vpop.eup %2358 }
 0x39d   : > { %2195 = vmatmul.mubr.bf16.gmra.mrb[4].mxu1 %v1536_v7  ;;  %v1330_v7 = vld [vmem:[#allocation4 + $0x50] sm:$0xff] }
 0x39e   : > { %1372 = vadd.xlane.f32.xlu0 %v2337_v49  ;;  %v3001_v52 = vpop.permute.xlu1 %1475  ;;  %v1323_v49 = vld [vmem:[#allocation4 + $0x18] sm:$0xff]  ;;  %v1346_v9 = vmul.f32 %v2945_v63, %v1330_v7  ;;  %v1334_v63 = vld [vmem:[#allocation4 + $0x70] sm:$0xff] }
 0x39f   : > { %1374 = vadd.xlane.f32.xlu1 %v2339_v28  ;;  %v2999_v23 = vpop.permute.xlu0 %1480  ;;  %v1339_v27 = vmul.f32 %v2915_v20, %v1323_v49  ;;  %v1326_v20 = vld [vmem:[#allocation4 + $0x30] sm:$0xff] }
 0x3a0   : > { %v1342_v58 = vmul.f32 %v2933_v60, %v1326_v20 }
 0x3a2   : > { %1376 = vadd.xlane.f32.xlu0 %v2345_v59  ;;  %v3005_v5 = vpop.permute.xlu1 %1485  ;;  %v1343_v59 = vmul.f32 %v2931_v57, %v1327_v1 }
 0x3a3   : > { %1378 = vadd.xlane.f32.xlu1 %v2347_v44  ;;  %v3003_v4 = vpop.permute.xlu0 %1490 }
 0x3a6   : > { %1380 = vadd.xlane.f32.xlu0 %v2353_v51  ;;  %v3009_v34 = vpop.permute.xlu1 %1495  ;;  %v1345_v51 = vmul.f32 %v2937_v53, %v1329_v10 }
 0x3a7   : > { %1382 = vadd.xlane.f32.xlu1 %v2355_v54  ;;  %v3007_v6 = vpop.permute.xlu0 %1500 }
 0x3b8   : > { %1505 = vperm.xlu1 %2295, %v2977_v14  }
 0x3bc   : > { %1510 = vperm.xlu0 %2294, %v2980_v38  }
 0x40b   : > { %v1355_v15 = vpop.xlane.xlu0 %1354 }
 0x40c   : > { %v1353_v16 = vpop.xlane.xlu1 %1352  ;;  %v1385_v21 = vadd.f32 %v1355_v15, %v1337_v12 }
 0x40d   : > { %v1384_v13 = vadd.f32 %v1353_v16, %v1336_v35  ;;  %v1333_v16 = vld [vmem:[#allocation4 + $0x68] sm:$0xff] }
 0x40e   : > { %1402 = vst.msk [vmem:[#allocation4 + $0x8] sm:$0xff] %vm1400_vm0, %v1385_v21  ;;  %v1348_v21 = vmul.f32 %v2951_v3, %v1332_v61  ;;  %v1431_v61 = vld [vmem:[#allocation5 + $0x70] sm:$0xff] }
 0x40f   : > { %1401 = vst.msk [vmem:[#allocation4] sm:$0xff] %vm1400_vm0, %v1384_v13  ;;  %v1349_v13 = vmul.f32 %v2949_v2, %v1333_v16  ;;  %v1419_v2 = vld [vmem:[#allocation5 + $0x10] sm:$0xff]  ;;  %v1429_v16 = vld [vmem:[#allocation5 + $0x60] sm:$0xff] }
 0x413   : > { %v1357_v28 = vpop.xlane.xlu0 %1356 }
 0x414   : > { %v1359_v30 = vpop.xlane.xlu1 %1358  ;;  %v1386_v36 = vadd.f32 %v1357_v28, %v1338_v50  ;;  %v1350_v28 = vmul.f32 %v2977_v14, %v1334_v63  ;;  %v1513_v14 = vmul.f32 %v2983_v22, %v1417_v45 }
 0x415   : > { %v1387_v43 = vadd.f32 %v1359_v30, %v1339_v27  ;;  %v1335_v27 = vld [vmem:[#allocation4 + $0x78] sm:$0xff] }
 0x416   : > { %1403 = vst.msk [vmem:[#allocation4 + $0x10] sm:$0xff] %vm1400_vm0, %v1386_v36  ;;  %v1351_v30 = vmul.f32 %v2980_v38, %v1335_v27  ;;  %v1430_v27 = vld [vmem:[#allocation5 + $0x68] sm:$0xff] }
 0x417   : > { %1404 = vst.msk [vmem:[#allocation4 + $0x18] sm:$0xff] %vm1400_vm0, %v1387_v43 }
 0x41b   : > { %v1361_v0 = vpop.xlane.xlu0 %1360 }
 0x41c   : > { %v1363_v19 = vpop.xlane.xlu1 %1362  ;;  %v1388_v24 = vadd.f32 %v1361_v0, %v1340_v46  ;;  %v1420_v46 = vld [vmem:[#allocation5 + $0x18] sm:$0xff]  ;;  %v1515_v0 = vmul.f32 %v2989_v32, %v1419_v2 }
 0x41d   : > { %v1389_v25 = vadd.f32 %v1363_v19, %v1341_v37  ;;  %v1418_v37 = vld [vmem:[#allocation5 + $0x8] sm:$0xff]  ;;  %v1427_v19 = vld [vmem:[#allocation5 + $0x50] sm:$0xff]  ;;  %v1516_v38 = vmul.f32 %v2987_v18, %v1420_v46 }
 0x41e   : > { %1405 = vst.msk [vmem:[#allocation4 + $0x20] sm:$0xff] %vm1400_vm0, %v1388_v24 }
 0x41f   : > { %1406 = vst.msk [vmem:[#allocation4 + $0x28] sm:$0xff] %vm1400_vm0, %v1389_v25  ;;  %v1425_v25 = vld [vmem:[#allocation5 + $0x40] sm:$0xff] }
 0x420   : > { %v1521_v22 = vmul.f32 %v3001_v52, %v1425_v25  ;;  %v1423_v52 = vld [vmem:[#allocation5 + $0x30] sm:$0xff]  ;;  %v1695_v25 = vld [vmem:[#allocation4 + $0x8] sm:$0xff] (!%p2058_p13) }
 0x423   : > { %v1365_v44 = vpop.xlane.xlu0 %1364 }
 0x424   : > { %v1367_v48 = vpop.xlane.xlu1 %1366  ;;  %v1390_v39 = vadd.f32 %v1365_v44, %v1342_v58  ;;  %v1514_v58 = vmul.f32 %v2985_v56, %v1418_v37 }
 0x425   : > { %v1391_v33 = vadd.f32 %v1367_v48, %v1343_v59  ;;  %v1428_v59 = vld [vmem:[#allocation5 + $0x58] sm:$0xff]  ;;  %v1426_v48 = vld [vmem:[#allocation5 + $0x48] sm:$0xff] }
 0x426   : > { %1407 = vst.msk [vmem:[#allocation4 + $0x30] sm:$0xff] %vm1400_vm0, %v1390_v39  ;;  %v1523_v39 = vmul.f32 %v3005_v5, %v1427_v19  ;;  %v1524_v18 = vmul.f32 %v3003_v4, %v1428_v59  ;;  %v1522_v56 = vmul.f32 %v2999_v23, %v1426_v48  ;;  %v1519_v4 = vmul.f32 %v2997_v41, %v1423_v52 }
 0x427   : > { %1408 = vst.msk [vmem:[#allocation4 + $0x38] sm:$0xff] %vm1400_vm0, %v1391_v33  ;;  %v1369_v54 = vpop.xlane.xlu0 %1368  ;;  %v2455_v19 = vmov (!%p2058_p13), 0  }
 0x428   : > { %v1371_v8 = vpop.xlane.xlu1 %1370  ;;  %v1392_v60 = vadd.f32 %v1369_v54, %v1344_v29  ;;  %2361 = vset.pattern.permute.xlu1 (!%p2058_p13), %v2455_v19  ;;  %2360 = vset.pattern.permute.xlu0 (!%p2058_p13), %v2455_v19 }
 0x429   : > { %v1393_v57 = vadd.f32 %v1371_v8, %v1345_v51 }
 0x42a   : > { %1409 = vst.msk [vmem:[#allocation4 + $0x40] sm:$0xff] %vm1400_vm0, %v1392_v60 }
 0x42b   : > { %1410 = vst.msk [vmem:[#allocation4 + $0x48] sm:$0xff] %vm1400_vm0, %v1393_v57  ;;  %v1373_v12 = vpop.xlane.xlu0 %1372  ;;  %v1421_v57 = vld [vmem:[#allocation5 + $0x20] sm:$0xff] }
 0x42c   : > { %v1375_v35 = vpop.xlane.xlu1 %1374  ;;  %v1394_v15 = vadd.f32 %v1373_v12, %v1346_v9  ;;  %v1424_v9 = vld [vmem:[#allocation5 + $0x38] sm:$0xff]  ;;  %v1517_v12 = vmul.f32 %v2993_v31, %v1421_v57  ;;  %v1525_v31 = vmul.f32 %v3009_v34, %v1429_v16  ;;  %v1696_v34 = vld [vmem:[#allocation4 + $0x10] sm:$0xff] (!%p2058_p13) }
 0x42d   : > { %v1395_v53 = vadd.f32 %v1375_v35, %v1347_v11  ;;  %v1422_v11 = vld [vmem:[#allocation5 + $0x28] sm:$0xff]  ;;  %v1700_v48 = vld [vmem:[#allocation4 + $0x30] sm:$0xff] (!%p2058_p13) }
 0x42e   : > { %1411 = vst.msk [vmem:[#allocation4 + $0x50] sm:$0xff] %vm1400_vm0, %v1394_v15  ;;  %v1520_v15 = vmul.f32 %v2995_v40, %v1424_v9 }
 0x42f   : > { %1412 = vst.msk [vmem:[#allocation4 + $0x58] sm:$0xff] %vm1400_vm0, %v1395_v53  ;;  %v1377_v26 = vpop.xlane.xlu0 %1376 }
 0x430   : > { %v1379_v49 = vpop.xlane.xlu1 %1378  ;;  %v1396_v50 = vadd.f32 %v1377_v26, %v1348_v21  ;;  %v1432_v26 = vld [vmem:[#allocation5 + $0x78] sm:$0xff] }
 0x431   : > { %v1397_v62 = vadd.f32 %v1379_v49, %v1349_v13  ;;  %v1518_v13 = vmul.f32 %v2991_v17, %v1422_v11  ;;  %v1526_v17 = vmul.f32 %v3007_v6, %v1430_v27  ;;  %v1712_v6 = vmax.f32 (!%p2058_p13), %v1696_v34, 1e-16 }
 0x432   : > { %1413 = vst.msk [vmem:[#allocation4 + $0x60] sm:$0xff] %vm1400_vm0, %v1396_v50 }
 0x433   : > { %1414 = vst.msk [vmem:[#allocation4 + $0x68] sm:$0xff] %vm1400_vm0, %v1397_v62  ;;  %v1381_v36 = vpop.xlane.xlu0 %1380  ;;  %2362 = vrcp.f32 (!%p2058_p13), %v1712_v6 }
 0x434   : > { %v1383_v3 = vpop.xlane.xlu1 %1382  ;;  %v1398_v43 = vadd.f32 %v1381_v36, %v1350_v28 }
 0x435   : > { %v1399_v42 = vadd.f32 %v1383_v3, %v1351_v30 }
 0x436   : > { %1415 = vst.msk [vmem:[#allocation4 + $0x70] sm:$0xff] %vm1400_vm0, %v1398_v43 }
 0x437   : > { %1416 = vst.msk [vmem:[#allocation4 + $0x78] sm:$0xff] %vm1400_vm0, %v1399_v42 }
 0x438   : > { %v1506_v23 = vpop.permute.xlu1 %1505 }
 0x439   : > { %v1527_v62 = vmul.f32 %v1506_v23, %v1431_v61 }
 0x43b   : > { %v1511_v63 = vpop.permute.xlu0 %1510 }
 0x43c   : > { %v1528_v40 = vmul.f32 %v1511_v63, %v1432_v26 }
 0x43e   : > { %v3074_v52 = vld [vmem:[#allocation4 + $0x78] sm:$0xff] (!%p2058_p13) }
 0x45c   : > { %v2184_v24 = vpop.f32.mrb[0].mxu0 }
 0x45d   : > { %v1644_v20 = vadd.f32 %v2184_v24, %v1515_v0  ;;  %v1579_v1 = vpop.f32.mrb[1].mxu0  ;;  %v1694_v0 = vld [vmem:[#allocation4] sm:$0xff] (!%p2058_p13) }
 0x45e   : > { %v1642_v44 = vadd.f32 %v1579_v1, %v1513_v14  ;;  %v2185_v47 = vpop.f32.mrb[2].mxu0  ;;  %v1697_v14 = vld [vmem:[#allocation4 + $0x18] sm:$0xff] (!%p2058_p13)  ;;  %v1710_v24 = vmax.f32 (!%p2058_p13), %v1694_v0, 1e-16  ;;  %v1698_v1 = vld [vmem:[#allocation4 + $0x20] sm:$0xff] (!%p2058_p13) }
 0x45f   : > { %1660 = vst [vmem:[#allocation5 + $0x10] sm:$0xff] %v1644_v20  ;;  %v1645_v10 = vadd.f32 %v2185_v47, %v1516_v38  ;;  %v1582_v32 = vpop.f32.mrb[3].mxu0  ;;  %v1713_v38 = vmax.f32 (!%p2058_p13), %v1697_v14, 1e-16  ;;  %v1699_v20 = vld [vmem:[#allocation4 + $0x28] sm:$0xff] (!%p2058_p13)  ;;  %v1701_v47 = vld [vmem:[#allocation4 + $0x38] sm:$0xff] (!%p2058_p13) }
 0x460   : > { %1658 = vst [vmem:[#allocation5] sm:$0xff] %v1642_v44  ;;  %v1643_v33 = vadd.f32 %v1582_v32, %v1514_v58  ;;  %v2192_v29 = vpop.f32.mrb[0].mxu1  ;;  %v1711_v58 = vmax.f32 (!%p2058_p13), %v1695_v25, 1e-16  ;;  %v1715_v59 = vmax.f32 (!%p2058_p13), %v1699_v20, 1e-16  ;;  %2364 = vrcp.f32 (!%p2058_p13), %v1710_v24 }
 0x461   : > { %1661 = vst [vmem:[#allocation5 + $0x18] sm:$0xff] %v1645_v10  ;;  %v1652_v51 = vadd.f32 %v2192_v29, %v1523_v39  ;;  %v1611_v54 = vpop.f32.mrb[1].mxu1  ;;  %v1714_v44 = vmax.f32 (!%p2058_p13), %v1698_v1, 1e-16  ;;  %v3058_v39 = vld [vmem:[#allocation4 + $0x48] sm:$0xff] (!%p2058_p13)  ;;  %2366 = vrcp.f32 (!%p2058_p13), %v1713_v38 }
 0x462   : > { %1659 = vst [vmem:[#allocation5 + $0x8] sm:$0xff] %v1643_v33  ;;  %v1650_v7 = vadd.f32 %v1611_v54, %v1521_v22  ;;  %v2193_v8 = vpop.f32.mrb[2].mxu1  ;;  %v1717_v10 = vmax.f32 (!%p2058_p13), %v1701_v47, 1e-16  ;;  %2368 = vrcp.f32 (!%p2058_p13), %v1711_v58  ;;  %v1716_v32 = vmax.f32 (!%p2058_p13), %v1700_v48, 1e-16 }
 0x463   : > { %1668 = vst [vmem:[#allocation5 + $0x50] sm:$0xff] %v1652_v51  ;;  %v1653_v5 = vadd.f32 %v2193_v8, %v1524_v18  ;;  %v1614_v60 = vpop.f32.mrb[3].mxu1  ;;  %v3060_v22 = vld [vmem:[#allocation4 + $0x40] sm:$0xff] (!%p2058_p13)  ;;  %2370 = vrcp.f32 (!%p2058_p13), %v1715_v59  ;;  %v1719_v33 = vmax.f32 (!%p2058_p13), %v3058_v39, 1e-16  ;;  %v3064_v18 = vld [vmem:[#allocation4 + $0x58] sm:$0xff] (!%p2058_p13)  ;;  %v2363_v8 = vpop.eup (!%p2058_p13), %2362 }
 0x464   : > { %1666 = vst [vmem:[#allocation5 + $0x40] sm:$0xff] %v1650_v7  ;;  %v1651_v55 = vadd.f32 %v1614_v60, %v1522_v56  ;;  %2372 = vrcp.f32 (!%p2058_p13), %v1714_v44  ;;  %v1718_v29 = vmax.f32 (!%p2058_p13), %v3060_v22, 1e-16  ;;  %v3066_v51 = vld [vmem:[#allocation4 + $0x50] sm:$0xff] (!%p2058_p13)  ;;  %v1721_v54 = vmax.f32 (!%p2058_p13), %v3064_v18, 1e-16 }
 0x465   : > { %1669 = vst [vmem:[#allocation5 + $0x58] sm:$0xff] %v1653_v5  ;;  %2374 = vrcp.f32 (!%p2058_p13), %v1717_v10  ;;  %v1720_v56 = vmax.f32 (!%p2058_p13), %v3066_v51, 1e-16  ;;  %v3070_v7 = vld [vmem:[#allocation4 + $0x68] sm:$0xff] (!%p2058_p13)  ;;  %v3072_v5 = vld [vmem:[#allocation4 + $0x60] sm:$0xff] (!%p2058_p13) }
 0x466   : > { %1667 = vst [vmem:[#allocation5 + $0x48] sm:$0xff] %v1651_v55  ;;  %2376 = vrcp.f32 (!%p2058_p13), %v1716_v32  ;;  %v1744_v55 = vmul.f32 (!%p2058_p13), %v2363_v8, %v1712_v6  ;;  %v1723_v11 = vmax.f32 (!%p2058_p13), %v3070_v7, 1e-16 }
 0x467   : > { %2378 = vrcp.f32 (!%p2058_p13), %v1719_v33 }
 0x468   : > { %2380 = vrcp.f32 (!%p2058_p13), %v1718_v29  ;;  %v1760_v61 = vsub.f32 (!%p2058_p13), 2.0, %v1744_v55 }
 0x469   : > { %2382 = vrcp.f32 (!%p2058_p13), %v1721_v54 }
 0x46a   : > { %v2365_v60 = vpop.eup (!%p2058_p13), %2364  ;;  %2384 = vrcp.f32 (!%p2058_p13), %v1720_v56  ;;  %v1776_v26 = vmul.f32 (!%p2058_p13), %v2363_v8, %v1760_v61 }
 0x46b   : > { %v2367_v57 = vpop.eup (!%p2058_p13), %2366  ;;  %v1742_v9 = vmul.f32 (!%p2058_p13), %v2365_v60, %v1710_v24  ;;  %2386 = vrcp.f32 (!%p2058_p13), %v1723_v11 }
 0x46c   : > { %v2188_v35 = vpop.f32.mrb[4].mxu0  ;;  %v1745_v23 = vmul.f32 (!%p2058_p13), %v2367_v57, %v1713_v38  ;;  %1818 = vperm.xlu1 (!%p2058_p13), %2361, %v1776_v26  }
 0x46d   : > { %v1648_v53 = vadd.f32 %v2188_v35, %v1519_v4  ;;  %v1595_v21 = vpop.f32.mrb[5].mxu0  ;;  %v3077_v4 = vld [vmem:[#allocation4 + $0x70] sm:$0xff] (!%p2058_p13)  ;;  %v1722_v35 = vmax.f32 (!%p2058_p13), %v3072_v5, 1e-16  ;;  %v1758_v16 = vsub.f32 (!%p2058_p13), 2.0, %v1742_v9 }
 0x46e   : > { %v1646_v49 = vadd.f32 %v1595_v21, %v1517_v12  ;;  %v2189_v50 = vpop.f32.mrb[6].mxu0  ;;  %v2369_v12 = vpop.eup (!%p2058_p13), %2368  ;;  %v1725_v21 = vmax.f32 (!%p2058_p13), %v3074_v52, 1e-16  ;;  %v1761_v63 = vsub.f32 (!%p2058_p13), 2.0, %v1745_v23 }
 0x46f   : > { %1664 = vst [vmem:[#allocation5 + $0x30] sm:$0xff] %v1648_v53  ;;  %v1649_v41 = vadd.f32 %v2189_v50, %v1520_v15  ;;  %v1598_v28 = vpop.f32.mrb[7].mxu0  ;;  %v2371_v15 = vpop.eup (!%p2058_p13), %2370  ;;  %v1743_v53 = vmul.f32 (!%p2058_p13), %v2369_v12, %v1711_v58  ;;  %v1724_v50 = vmax.f32 (!%p2058_p13), %v3077_v4, 1e-16  ;;  %2388 = vrcp.f32 (!%p2058_p13), %v1722_v35  ;;  %v1790_v4 = vld [vmem:[#allocation5] sm:$0xff] (!%p2058_p13) }
 0x470   : > { %1662 = vst [vmem:[#allocation5 + $0x20] sm:$0xff] %v1646_v49  ;;  %v1647_v30 = vadd.f32 %v1598_v28, %v1518_v13  ;;  %v2196_v36 = vpop.f32.mrb[4].mxu1  ;;  %1693 = sbr.rel (%p2058_p13) target bundleno = 1300 (0x514), region = 89  ;;  %v2373_v13 = vpop.eup (!%p2058_p13), %2372  ;;  %v1747_v49 = vmul.f32 (!%p2058_p13), %v2371_v15, %v1715_v59  ;;  %2390 = vrcp.f32 (!%p2058_p13), %v1725_v21 }
 0x471   : > { %1665 = vst [vmem:[#allocation5 + $0x38] sm:$0xff] %v1649_v41  ;;  %v1656_v3 = vadd.f32 %v2196_v36, %v1527_v62  ;;  %v1627_v43 = vpop.f32.mrb[5].mxu1  ;;  %v2375_v27 = vpop.eup (!%p2058_p13), %2374  ;;  %v1774_v62 = vmul.f32 (!%p2058_p13), %v2365_v60, %v1758_v16  ;;  %v1759_v41 = vsub.f32 (!%p2058_p13), 2.0, %v1743_v53  ;;  %v1746_v28 = vmul.f32 (!%p2058_p13), %v2373_v13, %v1714_v44  ;;  %v1793_v16 = vld [vmem:[#allocation5 + $0x18] sm:$0xff] (!%p2058_p13) }
 0x472   : > { %1663 = vst [vmem:[#allocation5 + $0x28] sm:$0xff] %v1647_v30  ;;  %v1654_v42 = vadd.f32 %v1627_v43, %v1525_v31  ;;  %v2197_v2 = vpop.f32.mrb[6].mxu1  ;;  %v2377_v31 = vpop.eup (!%p2058_p13), %2376  ;;  %v1777_v30 = vmul.f32 (!%p2058_p13), %v2367_v57, %v1761_v63  ;;  %v1763_v36 = vsub.f32 (!%p2058_p13), 2.0, %v1747_v49  ;;  %2392 = vrcp.f32 (!%p2058_p13), %v1724_v50 }
 0x473   : > { %1672 = vst [vmem:[#allocation5 + $0x70] sm:$0xff] %v1656_v3  ;;  %v1657_v45 = vadd.f32 %v2197_v2, %v1528_v40  ;;  %v1630_v46 = vpop.f32.mrb[7].mxu1  ;;  %v1749_v40 = vmul.f32 (!%p2058_p13), %v2375_v27, %v1717_v10  ;;  %v2379_v3 = vpop.eup (!%p2058_p13), %2378  ;;  %1808 = vperm.xlu0 (!%p2058_p13), %2360, %v1774_v62   ;;  %v1775_v43 = vmul.f32 (!%p2058_p13), %v2369_v12, %v1759_v41  ;;  %v3089_v12 = vld [vmem:[%s3148_s4] ss:$0 sm:$0xff] (!%p2058_p13) }
 0x474   : > { %1670 = vst [vmem:[#allocation5 + $0x60] sm:$0xff] %v1654_v42  ;;  %v1655_v37 = vadd.f32 %v1630_v46, %v1526_v17  ;;  %v1762_v17 = vsub.f32 (!%p2058_p13), 2.0, %v1746_v28  ;;  %v1748_v42 = vmul.f32 (!%p2058_p13), %v2377_v31, %v1716_v32  ;;  %v2381_v2 = vpop.eup (!%p2058_p13), %2380  ;;  %1823 = vperm.xlu1 (!%p2058_p13), %2361, %v1777_v30  }
 0x475   : > { %1673 = vst [vmem:[#allocation5 + $0x78] sm:$0xff] %v1657_v45  ;;  %v1779_v45 = vmul.f32 (!%p2058_p13), %v2371_v15, %v1763_v36  ;;  %v1765_v46 = vsub.f32 (!%p2058_p13), 2.0, %v1749_v40  ;;  %v2383_v34 = vpop.eup (!%p2058_p13), %2382  ;;  %v1750_v19 = vmul.f32 (!%p2058_p13), %v2381_v2, %v1718_v29 }
 0x476   : > { %1671 = vst [vmem:[#allocation5 + $0x68] sm:$0xff] %v1655_v37  ;;  %v1751_v37 = vmul.f32 (!%p2058_p13), %v2379_v3, %v1719_v33  ;;  %v1778_v0 = vmul.f32 (!%p2058_p13), %v2373_v13, %v1762_v17  ;;  %v1764_v14 = vsub.f32 (!%p2058_p13), 2.0, %v1748_v42  ;;  %v2385_v6 = vpop.eup (!%p2058_p13), %2384  ;;  %v1753_v25 = vmul.f32 (!%p2058_p13), %v2383_v34, %v1721_v54  ;;  %v1796_v17 = vld [vmem:[#allocation5 + $0x30] sm:$0xff] (!%p2058_p13) }
 0x477   : > { %1813 = vperm.xlu0 %2360, %v1775_v43   ;;  %v1781_v24 = vmul.f32 %v2375_v27, %v1765_v46  ;;  %v2387_v20 = vpop.eup %2386  ;;  %v1766_v58 = vsub.f32 2.0, %v1750_v19  ;;  %v1752_v59 = vmul.f32 %v2385_v6, %v1720_v56  ;;  %v1794_v41 = vld [vmem:[#allocation5 + $0x20] sm:$0xff] }
 0x478   : > { %1833 = vperm.xlu1 %2361, %v1779_v45   ;;  %v1767_v38 = vsub.f32 2.0, %v1751_v37  ;;  %v1780_v1 = vmul.f32 %v2377_v31, %v1764_v14  ;;  %v1769_v48 = vsub.f32 2.0, %v1753_v25  ;;  %v1755_v39 = vmul.f32 %v2387_v20, %v1723_v11  ;;  %v1792_v11 = vld [vmem:[#allocation5 + $0x10] sm:$0xff]  ;;  %v1798_v14 = vld [vmem:[#allocation5 + $0x40] sm:$0xff] }
 0x479   : > { %v2389_v44 = vpop.eup %2388  ;;  %v1782_v32 = vmul.f32 %v2381_v2, %v1766_v58  ;;  %v1768_v22 = vsub.f32 2.0, %v1752_v59  ;;  %v1795_v27 = vld [vmem:[#allocation5 + $0x28] sm:$0xff]  ;;  %v1800_v58 = vld [vmem:[#allocation5 + $0x50] sm:$0xff] }
 0x47a   : > { %v1783_v47 = vmul.f32 %v2379_v3, %v1767_v38  ;;  %v2391_v10 = vpop.eup %2390  ;;  %v1754_v33 = vmul.f32 %v2389_v44, %v1722_v35  ;;  %v1785_v18 = vmul.f32 %v2383_v34, %v1769_v48  ;;  %v1771_v54 = vsub.f32 2.0, %v1755_v39  ;;  %v1797_v3 = vld [vmem:[#allocation5 + $0x38] sm:$0xff]  ;;  %v1799_v34 = vld [vmem:[#allocation5 + $0x48] sm:$0xff] }
 0x47b   : > { %1828 = vperm.xlu0 %2360, %v1778_v0   ;;  %v1757_v7 = vmul.f32 %v2391_v10, %v1725_v21  ;;  %v1784_v8 = vmul.f32 %v2385_v6, %v1768_v22  ;;  %v1791_v21 = vld [vmem:[#allocation5 + $0x8] sm:$0xff]  ;;  %v1802_v22 = vld [vmem:[#allocation5 + $0x60] sm:$0xff] }
 0x47c   : > { %1843 = vperm.xlu1 %2361, %v1781_v24   ;;  %v2393_v29 = vpop.eup %2392  ;;  %v1770_v5 = vsub.f32 2.0, %v1754_v33  ;;  %v1787_v56 = vmul.f32 %v2387_v20, %v1771_v54  ;;  %v1801_v20 = vld [vmem:[#allocation5 + $0x58] sm:$0xff] }
 0x47d   : > { %v1756_v51 = vmul.f32 %v2393_v29, %v1724_v50  ;;  %v1773_v60 = vsub.f32 2.0, %v1757_v7 }
 0x47e   : > { %v1786_v55 = vmul.f32 %v2389_v44, %v1770_v5 }
 0x47f   : > { %1838 = vperm.xlu0 %2360, %v1780_v1   ;;  %v1772_v52 = vsub.f32 2.0, %v1756_v51  ;;  %v1789_v57 = vmul.f32 %v2391_v10, %v1773_v60  ;;  %v1803_v10 = vld [vmem:[#allocation5 + $0x68] sm:$0xff]  ;;  %v1804_v51 = vld [vmem:[#allocation5 + $0x70] sm:$0xff] }
 0x480   : > { %1853 = vperm.xlu1 %2361, %v1783_v47  }
 0x481   : > { %v1788_v9 = vmul.f32 %v2393_v29, %v1772_v52 }
 0x483   : > { %1848 = vperm.xlu0 %2360, %v1782_v32  }
 0x484   : > { %1863 = vperm.xlu1 %2361, %v1785_v18  }
 0x487   : > { %1858 = vperm.xlu0 %2360, %v1784_v8   ;;  %v1805_v8 = vld [vmem:[#allocation5 + $0x78] sm:$0xff] }
 0x488   : > { %1873 = vperm.xlu1 %2361, %v1787_v56  }
 0x48b   : > { %1868 = vperm.xlu0 %2360, %v1786_v55  }
 0x48c   : > { %1883 = vperm.xlu1 %2361, %v1789_v57  }
 0x48f   : > { %1878 = vperm.xlu0 %2360, %v1788_v9  }
 0x4eb   : > { %v1819_v61 = vpop.permute.xlu1 %1818 }
 0x4ec   : > { %v1888_v23 = vmul.f32 %v1819_v61, %v1792_v11 }
 0x4ee   : > { %v1911_v53 = vadd.f32 %v3089_v12, %v1888_v23 }
 0x4f0   : > { %1927 = vst [vmem:[%s2582_s14 + $0x10] sm:$0xff] %v1911_v53 }
 0x4f2   : > { %v1809_v35 = vpop.permute.xlu0 %1808 }
 0x4f3   : > { %v1886_v15 = vmul.f32 %v1809_v35, %v1790_v4  ;;  %v1824_v26 = vpop.permute.xlu1 %1823 }
 0x4f4   : > { %v1889_v63 = vmul.f32 %v1824_v26, %v1793_v16 }
 0x4f5   : > { %v1909_v13 = vadd.f32 %v3089_v12, %v1886_v15 }
 0x4f6   : > { %v1814_v49 = vpop.permute.xlu0 %1813  ;;  %v1912_v62 = vadd.f32 %v3089_v12, %v1889_v63 }
 0x4f7   : > { %1925 = vst [vmem:[%s2582_s14] sm:$0xff] %v1909_v13  ;;  %v1887_v50 = vmul.f32 %v1814_v49, %v1791_v21  ;;  %v1834_v31 = vpop.permute.xlu1 %1833 }
 0x4f8   : > { %1928 = vst [vmem:[%s2582_s14 + $0x18] sm:$0xff] %v1912_v62  ;;  %v1891_v30 = vmul.f32 %v1834_v31, %v1795_v27 }
 0x4f9   : > { %v1910_v28 = vadd.f32 %v3089_v12, %v1887_v50 }
 0x4fa   : > { %v1829_v36 = vpop.permute.xlu0 %1828  ;;  %v1914_v43 = vadd.f32 %v3089_v12, %v1891_v30 }
 0x4fb   : > { %1926 = vst [vmem:[%s2582_s14 + $0x8] sm:$0xff] %v1910_v28  ;;  %v1890_v40 = vmul.f32 %v1829_v36, %v1794_v41  ;;  %v1844_v2 = vpop.permute.xlu1 %1843 }
 0x4fc   : > { %1930 = vst [vmem:[%s2582_s14 + $0x28] sm:$0xff] %v1914_v43  ;;  %v1893_v45 = vmul.f32 %v1844_v2, %v1797_v3 }
 0x4fd   : > { %v1913_v42 = vadd.f32 %v3089_v12, %v1890_v40 }
 0x4fe   : > { %v1839_v46 = vpop.permute.xlu0 %1838  ;;  %v1916_v0 = vadd.f32 %v3089_v12, %v1893_v45 }
 0x4ff   : > { %1929 = vst [vmem:[%s2582_s14 + $0x20] sm:$0xff] %v1913_v42  ;;  %v1892_v37 = vmul.f32 %v1839_v46, %v1796_v17  ;;  %v1854_v6 = vpop.permute.xlu1 %1853 }
 0x500   : > { %1932 = vst [vmem:[%s2582_s14 + $0x38] sm:$0xff] %v1916_v0  ;;  %v1895_v24 = vmul.f32 %v1854_v6, %v1799_v34 }
 0x501   : > { %v1915_v19 = vadd.f32 %v3089_v12, %v1892_v37 }
 0x502   : > { %v1849_v38 = vpop.permute.xlu0 %1848  ;;  %v1918_v1 = vadd.f32 %v3089_v12, %v1895_v24 }
 0x503   : > { %1931 = vst [vmem:[%s2582_s14 + $0x30] sm:$0xff] %v1915_v19  ;;  %v1894_v25 = vmul.f32 %v1849_v38, %v1798_v14  ;;  %v1864_v44 = vpop.permute.xlu1 %1863 }
 0x504   : > { %1934 = vst [vmem:[%s2582_s14 + $0x48] sm:$0xff] %v1918_v1  ;;  %v1897_v47 = vmul.f32 %v1864_v44, %v1801_v20 }
 0x505   : > { %v1917_v59 = vadd.f32 %v3089_v12, %v1894_v25 }
 0x506   : > { %v1859_v48 = vpop.permute.xlu0 %1858  ;;  %v1920_v32 = vadd.f32 %v3089_v12, %v1897_v47 }
 0x507   : > { %1933 = vst [vmem:[%s2582_s14 + $0x40] sm:$0xff] %v1917_v59  ;;  %v1896_v39 = vmul.f32 %v1859_v48, %v1800_v58  ;;  %v1874_v29 = vpop.permute.xlu1 %1873 }
 0x508   : > { %1936 = vst [vmem:[%s2582_s14 + $0x58] sm:$0xff] %v1920_v32  ;;  %v1899_v18 = vmul.f32 %v1874_v29, %v1803_v10 }
 0x509   : > { %v1919_v33 = vadd.f32 %v3089_v12, %v1896_v39 }
 0x50a   : > { %v1869_v54 = vpop.permute.xlu0 %1868  ;;  %v1922_v5 = vadd.f32 %v3089_v12, %v1899_v18 }
 0x50b   : > { %1935 = vst [vmem:[%s2582_s14 + $0x50] sm:$0xff] %v1919_v33  ;;  %v1898_v7 = vmul.f32 %v1869_v54, %v1802_v22  ;;  %v1884_v60 = vpop.permute.xlu1 %1883 }
 0x50c   : > { %1938 = vst [vmem:[%s2582_s14 + $0x68] sm:$0xff] %v1922_v5  ;;  %v1901_v55 = vmul.f32 %v1884_v60, %v1805_v8 }
 0x50d   : > { %v1921_v56 = vadd.f32 %v3089_v12, %v1898_v7 }
 0x50e   : > { %v1879_v52 = vpop.permute.xlu0 %1878  ;;  %v1924_v9 = vadd.f32 %v3089_v12, %v1901_v55 }
 0x50f   : > { %1937 = vst [vmem:[%s2582_s14 + $0x60] sm:$0xff] %v1921_v56  ;;  %v1900_v57 = vmul.f32 %v1879_v52, %v1804_v51 }
 0x510   : > { %1940 = vst [vmem:[%s2582_s14 + $0x78] sm:$0xff] %v1924_v9 }
 0x511   : > { %v1923_v11 = vadd.f32 %v3089_v12, %v1900_v57 }
 0x513   : > { %1939 = vst [vmem:[%s2582_s14 + $0x70] sm:$0xff] %v1923_v11 }
 0x514 PF: > { %s15_s24 = sadd.s32 1, %s2448_s24   ;;  %s3150_s18 = smov %s2428_s19 }
 0x515   : > { %p12_p0 = scmp.ge.s32.totalorder %s15_s24, 6   ;;  %s3151_s19 = smov %s2537_s6 }
 0x516   : > { %s3152_s20 = smov %s2440_s22  ;;  %s3153_s21 = smov %s2444_s23 }
 0x517   : > { %s3154_s22 = smov %s3157_s25  ;;  %s3155_s23 = smov %s3161_s26 }
 0x518   :  { %14 = sbr.rel (!%p12_p0) target bundleno = 4 (0x4), region = 130 }

// kernel: model_forward_pallas.12
= control target key start
LH: loop header
LB: loop body
LE: loop exit
PB: predicated region body
PF: predicated region fallthrough
CT: control target
= control target key end

     0   :  { %s2534_s18 = smov 0   ;;  %s2536_s19 = smov 0   ;;  %s3263_s0 = inlined_call_operand.vmem [shape: f32[256,128], index: 0, kind: input, shape index: {}]   ;;  %s3264_s1 = inlined_call_operand.vmem [shape: f32[256,128], index: 1, kind: input, shape index: {}]   ;;  %s3265_s2 = inlined_call_operand.vmem [shape: f32[128,128], index: 2, kind: input, shape index: {}]   ;;  %s3266_s3 = inlined_call_operand.vmem [shape: bf16[256,256], index: 3, kind: input, shape index: {}]   ;;  %s3267_s4 = inlined_call_operand.vmem [shape: f32[1,128], index: 4, kind: input, shape index: {}]   ;;  %s3268_s5 = inlined_call_operand.vmem [shape: f32[256,128], index: 5, kind: output, shape index: {}]  }
   0x1   :  { %s2538_s20 = smov 0   ;;  %s2540_s21 = smov 0  }
   0x2   :  { %s2542_s22 = smov 0   ;;  %s2544_s23 = smov 0  }
   0x3   :  { %s2546_s24 = smov 0  }
   0x4 LB: > { %s24_s25 = sadd.s32 1, %s2488_s22  ;;  %s27_s26 = sadd.s32 1, %s2492_s23  ;;  %s2496_s24 = sphi %s2546_s24, %s15_s24   ;;  %s2492_s23 = sphi %s2544_s23, %s3274_s23   ;;  %s2488_s22 = sphi %s2542_s22, %s3273_s22   ;;  %s2484_s21 = sphi %s2540_s21, %s3272_s21   ;;  %s2480_s20 = sphi %s2538_s20, %s3271_s20   ;;  %s2476_s19 = sphi %s2536_s19, %s3270_s19   ;;  %s2472_s18 = sphi %s2534_s18, %s3269_s18  }
   0x5   : > { %p25_p0 = scmp.ge.s32.totalorder %s24_s25, 2  ;;  %p116_p1 = scmp.ne.s32.totalorder %s2476_s19, %s2472_s18 }
   0x6   : > { %p117_p2 = scmp.eq.s32.totalorder %s2496_s24, 0  ;;  %s109_s30 = sadd.s32 1, %s2476_s19 }
   0x7   : > { %s3276_s25 = smov (%p25_p0, %s24_s25), 0  ;;  %s3278_s26 = smov (!%p25_p0, %s27_s26), %s2492_s23 }
   0x8   : > { %p118_p3 = por %p117_p2, %p116_p1  ;;  %p29_p4 = scmp.ge.s32.totalorder %s3278_s26, 2 }
   0x9   : > { %s104_s27 = ssub.s32 %s2488_s22, %s3276_s25  ;;  %p2092_p6 = scmp.ge.s32.totalorder %s2496_s24, 4 }
   0xa   : > { %s3280_s26 = smov (%p29_p4, %s3278_s26), 0 }
   0xb   : > { %s105_s28 = ssub.s32 %s2492_s23, %s3280_s26  ;;  %195 = sbr.rel (%p2092_p6) target bundleno = 34 (0x22), region = 24 }
   0xc   : > { %s106_s29 = sor.u32 %s105_s28, %s104_s27 }
   0xd   : > { %p107_p5 = scmp.eq.s32.totalorder %s106_s29, 0 }
   0xf   : > { %s2585_s6 = scalar_select %p107_p5, %s2476_s19, %s109_s30  }
  0x12   : > { %216 = sbr.rel (!%p118_p3) target bundleno = 34 (0x22), region = 36  ;;  %s218_s7 = sand.u32 (%p118_p3), 1, %s2476_s19  }
  0x13   : > { %s2110_s8 = sshll.u32 (%p118_p3), %s2488_s22, 5  ;;  %s2093_s9 = sshll.u32 (%p118_p3), %s218_s7, 6 }
  0x14   : > { %s223_s10 = sadd.s32 (%p118_p3), %s2492_s23, %s2110_s8  ;;  %s220_s15 = scalar_lea.vmem (%p118_p3), [#allocation6], %s2093_s9 }
  0x15   : > { %s2096_s11 = sshll.u32 (%p118_p3), %s223_s10, 2 }
  0x16   : > { %s2594_s14 = scalar_lea.vmem (%p118_p3), %s3266_s3, %s2096_s11 }
  0x17   : > { %v241_v0 = vld [vmem:[%s2594_s14] sm:$0xf] (%p118_p3)  ;;  %v243_v1 = vld [vmem:[%s2594_s14 + $0x8] sm:$0xf] (%p118_p3)  ;;  %v245_v2 = vld [vmem:[%s2594_s14 + $0x10] sm:$0xf] (%p118_p3) }
  0x18   : > { %242 = vst [vmem:[%s220_s15] sm:$0xf] (%p118_p3), %v241_v0  ;;  %244 = vst [vmem:[%s220_s15 + $0x4] sm:$0xf] (%p118_p3), %v243_v1  ;;  %v247_v3 = vld [vmem:[%s2594_s14 + $0x18] sm:$0xf] (%p118_p3) }
  0x19   : > { %246 = vst [vmem:[%s220_s15 + $0x8] sm:$0xf] %v245_v2  ;;  %v249_v4 = vld [vmem:[%s2594_s14 + $0x20] sm:$0xf]  ;;  %v251_v5 = vld [vmem:[%s2594_s14 + $0x28] sm:$0xf] }
  0x1a   : > { %248 = vst [vmem:[%s220_s15 + $0xc] sm:$0xf] %v247_v3  ;;  %250 = vst [vmem:[%s220_s15 + $0x10] sm:$0xf] %v249_v4  ;;  %v253_v6 = vld [vmem:[%s2594_s14 + $0x30] sm:$0xf] }
  0x1b   : > { %252 = vst [vmem:[%s220_s15 + $0x14] sm:$0xf] %v251_v5  ;;  %v255_v7 = vld [vmem:[%s2594_s14 + $0x38] sm:$0xf]  ;;  %v257_v8 = vld [vmem:[%s2594_s14 + $0x40] sm:$0xf] }
  0x1c   : > { %254 = vst [vmem:[%s220_s15 + $0x18] sm:$0xf] %v253_v6  ;;  %256 = vst [vmem:[%s220_s15 + $0x1c] sm:$0xf] %v255_v7  ;;  %v259_v9 = vld [vmem:[%s2594_s14 + $0x48] sm:$0xf] }
  0x1d   : > { %258 = vst [vmem:[%s220_s15 + $0x20] sm:$0xf] %v257_v8  ;;  %v261_v10 = vld [vmem:[%s2594_s14 + $0x50] sm:$0xf]  ;;  %v263_v11 = vld [vmem:[%s2594_s14 + $0x58] sm:$0xf] }
  0x1e   : > { %260 = vst [vmem:[%s220_s15 + $0x24] sm:$0xf] %v259_v9  ;;  %262 = vst [vmem:[%s220_s15 + $0x28] sm:$0xf] %v261_v10  ;;  %v265_v12 = vld [vmem:[%s2594_s14 + $0x60] sm:$0xf] }
  0x1f   : > { %264 = vst [vmem:[%s220_s15 + $0x2c] sm:$0xf] %v263_v11  ;;  %v267_v13 = vld [vmem:[%s2594_s14 + $0x68] sm:$0xf]  ;;  %v269_v14 = vld [vmem:[%s2594_s14 + $0x70] sm:$0xf] }
  0x20   : > { %266 = vst [vmem:[%s220_s15 + $0x30] sm:$0xf] %v265_v12  ;;  %268 = vst [vmem:[%s220_s15 + $0x34] sm:$0xf] %v267_v13  ;;  %v271_v15 = vld [vmem:[%s2594_s14 + $0x78] sm:$0xf] }
  0x21   : > { %270 = vst [vmem:[%s220_s15 + $0x38] sm:$0xf] %v269_v14  ;;  %272 = vst [vmem:[%s220_s15 + $0x3c] sm:$0xf] %v271_v15 }
  0x22 PF: > { %p2097_p7 = scmp.ge.s32.totalorder %s2496_s24, 1  ;;  %p326_p8 = scmp.lt.s32.totalorder %s2496_s24, 5 }
  0x24   : > { %p327_p9 = pnand %p2097_p7, %p326_p8 }
  0x25   : > { %s333_s16 = sand.u32 (!%p327_p9), 1, %s2472_s18   ;;  %s2099_s17 = sshll.u32 (!%p327_p9), %s2480_s20, 4 }
  0x26   : > { %330 = sbr.rel (%p327_p9) target bundleno = 1395 (0x573), region = 77  ;;  %s2098_s27 = sshll.u32 (!%p327_p9), %s333_s16, 6 }
  0x27   : > { %p371_p10 = scmp.lt.s32.totalorder (!%p327_p9), %s2099_s17, 31  ;;  %s2101_s28 = sshll.u32 (!%p327_p9), %s2484_s21, 4 }
  0x28   : > { %p377_p11 = scmp.lt.s32.totalorder (!%p327_p9), %s2101_s28, 31  ;;  %s2632_s21 = scalar_lea.vmem (!%p327_p9), [#allocation6], %s2098_s27 }
  0x29   : > { %p2105_p12 = scmp.ne.s32.totalorder (!%p327_p9), %s2480_s20, 0 }
  0x2d   : > { %s3282_s17 = smov (!%p371_p10, %s2099_s17), 31  ;;  %s3284_s28 = smov (!%p377_p11, %s2101_s28), 31 }
  0x2e   : > { %s2100_s29 = sshll.u32 %s3282_s17, 3  ;;  %s2102_s9 = sshll.u32 %s3284_s28, 3  ;;  %v418_v16 = vld [vmem:[%s3265_s2] sm:$0xff] (!%p2105_p12)  ;;  %v419_v17 = vld [vmem:[%s3265_s2 + $0x8] sm:$0xff] (!%p2105_p12)  ;;  %v420_v18 = vld [vmem:[%s3265_s2 + $0x10] sm:$0xff] (!%p2105_p12)  ;;  %vm603_vm0 = vcmask (!%p2105_p12), 7168  }
  0x2f   : > { %s2620_s8 = scalar_lea.vmem %s3263_s0, %s2100_s29  ;;  %s2625_s12 = scalar_lea.vmem %s3264_s1, %s2102_s9  ;;  %v434_v19 = vpack.c.bf16 (!%p2105_p12), %v419_v17, %v418_v16  ;;  %v421_v20 = vld [vmem:[%s3265_s2 + $0x18] sm:$0xff] (!%p2105_p12)  ;;  %v422_v22 = vld [vmem:[%s3265_s2 + $0x20] sm:$0xff] (!%p2105_p12)  ;;  %v423_v23 = vld [vmem:[%s3265_s2 + $0x28] sm:$0xff] (!%p2105_p12)  ;;  %v2498_v0 = vmov (!%p2105_p12), -1e+20   ;;  %v2499_v1 = vmov (!%p2105_p12), 0.0  }
  0x30   : > { %s2630_s14 = scalar_lea.vmem %s3268_s5, %s2102_s9  ;;  %393 = sbr.rel (%p2105_p12) target bundleno = 437 (0x1b5), region = 85  ;;  %v435_v21 = vpack.c.bf16 (!%p2105_p12), %v421_v20, %v420_v18  ;;  %v436_v24 = vpack.c.bf16 (!%p2105_p12), %v423_v23, %v422_v22  ;;  %v424_v25 = vld [vmem:[%s3265_s2 + $0x30] sm:$0xff] (!%p2105_p12)  ;;  %v394_v26 = vld [vmem:[%s2625_s12] sm:$0xff] (!%p2105_p12)  ;;  %v395_v27 = vld [vmem:[%s2625_s12 + $0x8] sm:$0xff] (!%p2105_p12)  ;;  %620 = vst.msk [vmem:[#allocation3] sm:$0xff] (!%p2105_p12), %vm603_vm0, %v2498_v0 }
  0x31   : > { %2182 = vmatprep.subr.bf16.mxu0 (!%p2105_p12), %v434_v19  ;;  %2246 = vmatprep.subr.bf16.mxu1 (!%p2105_p12), %v434_v19  ;;  %v425_v28 = vld [vmem:[%s3265_s2 + $0x38] sm:$0xff] (!%p2105_p12)  ;;  %v410_v29 = vpack.c.bf16 (!%p2105_p12), %v395_v27, %v394_v26  ;;  %v402_v30 = vld [vmem:[%s2625_s12 + $0x40] sm:$0xff] (!%p2105_p12)  ;;  %v403_v31 = vld [vmem:[%s2625_s12 + $0x48] sm:$0xff] (!%p2105_p12)  ;;  %621 = vst.msk [vmem:[#allocation3 + $0x8] sm:$0xff] (!%p2105_p12), %vm603_vm0, %v2498_v0 }
  0x32   : > { %2183 = vmatpush3.bf16.msra.mxu0 (!%p2105_p12), %v434_v19  ;;  %2254 = vmatpush3.bf16.msra.mxu1 (!%p2105_p12), %v434_v19  ;;  %v414_v32 = vpack.c.bf16 (!%p2105_p12), %v403_v31, %v402_v30  ;;  %v437_v33 = vpack.c.bf16 (!%p2105_p12), %v425_v28, %v424_v25  ;;  %v426_v34 = vld [vmem:[%s3265_s2 + $0x40] sm:$0xff] (!%p2105_p12)  ;;  %v427_v35 = vld [vmem:[%s3265_s2 + $0x48] sm:$0xff] (!%p2105_p12)  ;;  %v428_v37 = vld [vmem:[%s3265_s2 + $0x50] sm:$0xff] (!%p2105_p12)  ;;  %622 = vst.msk [vmem:[#allocation3 + $0x10] sm:$0xff] (!%p2105_p12), %vm603_vm0, %v2498_v0 }
  0x33   : > { %2184 = vmatprep.subr.bf16.mxu0 (!%p2105_p12), %v435_v21  ;;  %2247 = vmatprep.subr.bf16.mxu1 (!%p2105_p12), %v435_v21  ;;  %v438_v36 = vpack.c.bf16 (!%p2105_p12), %v427_v35, %v426_v34  ;;  %v429_v38 = vld [vmem:[%s3265_s2 + $0x58] sm:$0xff] (!%p2105_p12)  ;;  %v430_v40 = vld [vmem:[%s3265_s2 + $0x60] sm:$0xff] (!%p2105_p12)  ;;  %v431_v41 = vld [vmem:[%s3265_s2 + $0x68] sm:$0xff] (!%p2105_p12)  ;;  %623 = vst.msk [vmem:[#allocation3 + $0x18] sm:$0xff] (!%p2105_p12), %vm603_vm0, %v2498_v0 }
  0x34   : > { %2198 = vmatprep.mubr.bf16.mxu0 (!%p2105_p12), %v410_v29  ;;  %2206 = vmatprep.mubr.bf16.mxu1 (!%p2105_p12), %v414_v32  ;;  %v439_v39 = vpack.c.bf16 (!%p2105_p12), %v429_v38, %v428_v37  ;;  %v440_v42 = vpack.c.bf16 (!%p2105_p12), %v431_v41, %v430_v40  ;;  %v432_v43 = vld [vmem:[%s3265_s2 + $0x70] sm:$0xff] (!%p2105_p12)  ;;  %v433_v44 = vld [vmem:[%s3265_s2 + $0x78] sm:$0xff] (!%p2105_p12)  ;;  %v398_v50 = vld [vmem:[%s2625_s12 + $0x20] sm:$0xff] (!%p2105_p12)  ;;  %624 = vst.msk [vmem:[#allocation3 + $0x20] sm:$0xff] (!%p2105_p12), %vm603_vm0, %v2498_v0 }
  0x35   : > { %v441_v45 = vpack.c.bf16 (!%p2105_p12), %v433_v44, %v432_v43  ;;  %v396_v46 = vld [vmem:[%s2625_s12 + $0x10] sm:$0xff] (!%p2105_p12)  ;;  %v397_v47 = vld [vmem:[%s2625_s12 + $0x18] sm:$0xff] (!%p2105_p12)  ;;  %v399_v51 = vld [vmem:[%s2625_s12 + $0x28] sm:$0xff] (!%p2105_p12)  ;;  %625 = vst.msk [vmem:[#allocation3 + $0x28] sm:$0xff] (!%p2105_p12), %vm603_vm0, %v2498_v0 }
  0x36   : > { %2185 = vmatpush3.bf16.msra.mxu0 (!%p2105_p12), %v435_v21  ;;  %2255 = vmatpush3.bf16.msra.mxu1 (!%p2105_p12), %v435_v21  ;;  %v404_v48 = vld [vmem:[%s2625_s12 + $0x50] sm:$0xff] (!%p2105_p12)  ;;  %v405_v49 = vld [vmem:[%s2625_s12 + $0x58] sm:$0xff] (!%p2105_p12)  ;;  %v406_v52 = vld [vmem:[%s2625_s12 + $0x60] sm:$0xff] (!%p2105_p12)  ;;  %v411_v54 = vpack.c.bf16 (!%p2105_p12), %v397_v47, %v396_v46  ;;  %v412_v56 = vpack.c.bf16 (!%p2105_p12), %v399_v51, %v398_v50  ;;  %626 = vst.msk [vmem:[#allocation3 + $0x30] sm:$0xff] (!%p2105_p12), %vm603_vm0, %v2498_v0 }
  0x37   : > { %2186 = vmatprep.subr.bf16.mxu0 %v436_v24  ;;  %2248 = vmatprep.subr.bf16.mxu1 %v436_v24  ;;  %v407_v53 = vld [vmem:[%s2625_s12 + $0x68] sm:$0xff]  ;;  %v415_v55 = vpack.c.bf16 %v405_v49, %v404_v48  ;;  %v400_v58 = vld [vmem:[%s2625_s12 + $0x30] sm:$0xff]  ;;  %v401_v59 = vld [vmem:[%s2625_s12 + $0x38] sm:$0xff]  ;;  %627 = vst.msk [vmem:[#allocation3 + $0x38] sm:$0xff] %vm603_vm0, %v2498_v0 }
  0x38   : > { %v416_v57 = vpack.c.bf16 %v407_v53, %v406_v52  ;;  %v408_v60 = vld [vmem:[%s2625_s12 + $0x70] sm:$0xff]  ;;  %v409_v61 = vld [vmem:[%s2625_s12 + $0x78] sm:$0xff]  ;;  %v413_v62 = vpack.c.bf16 %v401_v59, %v400_v58  ;;  %628 = vst.msk [vmem:[#allocation3 + $0x40] sm:$0xff] %vm603_vm0, %v2498_v0  ;;  %629 = vst.msk [vmem:[#allocation3 + $0x48] sm:$0xff] %vm603_vm0, %v2498_v0  ;;  %s2500_s12 = smov 1  }
  0x39   : > { %v417_v63 = vpack.c.bf16 %v409_v61, %v408_v60  ;;  %630 = vst.msk [vmem:[#allocation3 + $0x50] sm:$0xff] %vm603_vm0, %v2498_v0  ;;  %631 = vst.msk [vmem:[#allocation3 + $0x58] sm:$0xff] %vm603_vm0, %v2498_v0 }
  0x3a   : > { %2187 = vmatpush3.bf16.msra.mxu0 %v436_v24  ;;  %2256 = vmatpush3.bf16.msra.mxu1 %v436_v24  ;;  %632 = vst.msk [vmem:[#allocation3 + $0x60] sm:$0xff] %vm603_vm0, %v2498_v0  ;;  %633 = vst.msk [vmem:[#allocation3 + $0x68] sm:$0xff] %vm603_vm0, %v2498_v0 }
  0x3b   : > { %2188 = vmatprep.subr.bf16.mxu0 %v437_v33  ;;  %2249 = vmatprep.subr.bf16.mxu1 %v437_v33  ;;  %634 = vst.msk [vmem:[#allocation3 + $0x70] sm:$0xff] %vm603_vm0, %v2498_v0  ;;  %635 = vst.msk [vmem:[#allocation3 + $0x78] sm:$0xff] %vm603_vm0, %v2498_v0 }
  0x3c   : > { %636 = vst.msk [vmem:[#allocation4] sm:$0xff] %vm603_vm0, %v2499_v1  ;;  %637 = vst.msk [vmem:[#allocation4 + $0x8] sm:$0xff] %vm603_vm0, %v2499_v1 }
  0x3d   : > { %638 = vst.msk [vmem:[#allocation4 + $0x10] sm:$0xff] %vm603_vm0, %v2499_v1  ;;  %639 = vst.msk [vmem:[#allocation4 + $0x18] sm:$0xff] %vm603_vm0, %v2499_v1 }
  0x3e   : > { %2189 = vmatpush3.bf16.msra.mxu0 %v437_v33  ;;  %2257 = vmatpush3.bf16.msra.mxu1 %v437_v33  ;;  %640 = vst.msk [vmem:[#allocation4 + $0x20] sm:$0xff] %vm603_vm0, %v2499_v1  ;;  %641 = vst.msk [vmem:[#allocation4 + $0x28] sm:$0xff] %vm603_vm0, %v2499_v1 }
  0x3f   : > { %2190 = vmatprep.subr.bf16.mxu0 %v438_v36  ;;  %2250 = vmatprep.subr.bf16.mxu1 %v438_v36  ;;  %642 = vst.msk [vmem:[#allocation4 + $0x30] sm:$0xff] %vm603_vm0, %v2499_v1  ;;  %643 = vst.msk [vmem:[#allocation4 + $0x38] sm:$0xff] %vm603_vm0, %v2499_v1 }
  0x40   : > { %644 = vst.msk [vmem:[#allocation4 + $0x40] sm:$0xff] %vm603_vm0, %v2499_v1  ;;  %645 = vst.msk [vmem:[#allocation4 + $0x48] sm:$0xff] %vm603_vm0, %v2499_v1 }
  0x41   : > { %646 = vst.msk [vmem:[#allocation4 + $0x50] sm:$0xff] %vm603_vm0, %v2499_v1  ;;  %647 = vst.msk [vmem:[#allocation4 + $0x58] sm:$0xff] %vm603_vm0, %v2499_v1 }
  0x42   : > { %2191 = vmatpush3.bf16.msra.mxu0 %v438_v36  ;;  %2258 = vmatpush3.bf16.msra.mxu1 %v438_v36  ;;  %648 = vst.msk [vmem:[#allocation4 + $0x60] sm:$0xff] %vm603_vm0, %v2499_v1  ;;  %649 = vst.msk [vmem:[#allocation4 + $0x68] sm:$0xff] %vm603_vm0, %v2499_v1 }
  0x43   : > { %2192 = vmatprep.subr.bf16.mxu0 %v439_v39  ;;  %2251 = vmatprep.subr.bf16.mxu1 %v439_v39  ;;  %650 = vst.msk [vmem:[#allocation4 + $0x70] sm:$0xff] %vm603_vm0, %v2499_v1  ;;  %651 = vst.msk [vmem:[#allocation4 + $0x78] sm:$0xff] %vm603_vm0, %v2499_v1 }
  0x44   : > { %652 = vst [vmem:[#allocation5] sm:$0xff] %v2499_v1  ;;  %653 = vst [vmem:[#allocation5 + $0x8] sm:$0xff] %v2499_v1 }
  0x45   : > { %654 = vst [vmem:[#allocation5 + $0x10] sm:$0xff] %v2499_v1  ;;  %655 = vst [vmem:[#allocation5 + $0x18] sm:$0xff] %v2499_v1 }
  0x46   : > { %2193 = vmatpush3.bf16.msra.mxu0 %v439_v39  ;;  %2259 = vmatpush3.bf16.msra.mxu1 %v439_v39  ;;  %656 = vst [vmem:[#allocation5 + $0x20] sm:$0xff] %v2499_v1  ;;  %657 = vst [vmem:[#allocation5 + $0x28] sm:$0xff] %v2499_v1 }
  0x47   : > { %2194 = vmatprep.subr.bf16.mxu0 %v440_v42  ;;  %2252 = vmatprep.subr.bf16.mxu1 %v440_v42  ;;  %658 = vst [vmem:[#allocation5 + $0x30] sm:$0xff] %v2499_v1  ;;  %659 = vst [vmem:[#allocation5 + $0x38] sm:$0xff] %v2499_v1 }
  0x48   : > { %660 = vst [vmem:[#allocation5 + $0x40] sm:$0xff] %v2499_v1  ;;  %661 = vst [vmem:[#allocation5 + $0x48] sm:$0xff] %v2499_v1 }
  0x49   : > { %662 = vst [vmem:[#allocation5 + $0x50] sm:$0xff] %v2499_v1  ;;  %663 = vst [vmem:[#allocation5 + $0x58] sm:$0xff] %v2499_v1 }
  0x4a   : > { %2195 = vmatpush3.bf16.msra.mxu0 %v440_v42  ;;  %2260 = vmatpush3.bf16.msra.mxu1 %v440_v42  ;;  %664 = vst [vmem:[#allocation5 + $0x60] sm:$0xff] %v2499_v1  ;;  %665 = vst [vmem:[#allocation5 + $0x68] sm:$0xff] %v2499_v1 }
  0x4b   : > { %2196 = vmatprep.subr.bf16.mxu0 %v441_v45  ;;  %2253 = vmatprep.subr.bf16.mxu1 %v441_v45  ;;  %666 = vst [vmem:[#allocation5 + $0x70] sm:$0xff] %v2499_v1  ;;  %667 = vst [vmem:[#allocation5 + $0x78] sm:$0xff] %v2499_v1 }
  0x4e   : > { %2197 = vmatpush3.bf16.msra.mxu0 %v441_v45  ;;  %2261 = vmatpush3.bf16.msra.mxu1 %v441_v45 }
  0x51   : > { %2199 = vmatmul.mubr.bf16.vlgmr.msra.gmra.mrb[0].mxu0 %v411_v54  ;;  %2207 = vmatmul.mubr.bf16.vlgmr.msra.gmra.mrb[0].mxu1 %v415_v55 }
  0x52   : > { %2202 = vmatprep.mubr.bf16.mxu0 %v412_v56  ;;  %2210 = vmatprep.mubr.bf16.mxu1 %v416_v57 }
  0x59   : > { %2203 = vmatmul.mubr.bf16.gmra.mrb[4].mxu0 %v413_v62  ;;  %2211 = vmatmul.mubr.bf16.gmra.mrb[4].mxu1 %v417_v63 }
 0x124   : > { %v2200_v2 = vpop.f32.mrb[0].mxu0  ;;  %v2208_v3 = vpop.f32.mrb[0].mxu1 }
 0x125   : > { %575 = vrot.lane.b32.xlu0 %v2208_v3, %s2500_s12  ;;  %v508_v4 = vpop.f32.mrb[1].mxu1  ;;  %559 = vrot.lane.b32.xlu1 %v2200_v2, %s2500_s12  ;;  %v476_v5 = vpop.f32.mrb[1].mxu0 }
 0x126   : > { %v2201_v6 = vpop.f32.mrb[2].mxu0  ;;  %v2209_v7 = vpop.f32.mrb[2].mxu1 }
 0x127   : > { %v479_v8 = vpop.f32.mrb[3].mxu0  ;;  %v511_v9 = vpop.f32.mrb[3].mxu1 }
 0x129   : > { %555 = vrot.lane.b32.xlu0 %v476_v5, %s2500_s12  ;;  %561 = vrot.lane.b32.xlu1 %v2201_v6, %s2500_s12 }
 0x12c   : > { %v2204_v10 = vpop.f32.mrb[4].mxu0  ;;  %v2212_v11 = vpop.f32.mrb[4].mxu1 }
 0x12d   : > { %571 = vrot.lane.b32.xlu0 %v508_v4, %s2500_s12  ;;  %577 = vrot.lane.b32.xlu1 %v2209_v7, %s2500_s12  ;;  %v492_v12 = vpop.f32.mrb[5].mxu0  ;;  %v524_v13 = vpop.f32.mrb[5].mxu1 }
 0x12e   : > { %v2205_v14 = vpop.f32.mrb[6].mxu0  ;;  %v2213_v15 = vpop.f32.mrb[6].mxu1 }
 0x12f   : > { %v495_v16 = vpop.f32.mrb[7].mxu0  ;;  %v527_v17 = vpop.f32.mrb[7].mxu1 }
 0x131   : > { %573 = vrot.lane.b32.xlu1 %v511_v9, %s2500_s12  ;;  %557 = vrot.lane.b32.xlu0 %v479_v8, %s2500_s12 }
 0x135   : > { %567 = vrot.lane.b32.xlu0 %v2204_v10, %s2500_s12  ;;  %569 = vrot.lane.b32.xlu1 %v2205_v14, %s2500_s12 }
 0x139   : > { %563 = vrot.lane.b32.xlu0 %v492_v12, %s2500_s12  ;;  %565 = vrot.lane.b32.xlu1 %v495_v16, %s2500_s12 }
 0x13d   : > { %579 = vrot.lane.b32.xlu0 %v524_v13, %s2500_s12  ;;  %581 = vrot.lane.b32.xlu1 %v527_v17, %s2500_s12 }
 0x141   : > { %583 = vrot.lane.b32.xlu0 %v2212_v11, %s2500_s12  ;;  %585 = vrot.lane.b32.xlu1 %v2213_v15, %s2500_s12 }
 0x197   : > { %v576_v18 = vpop.permute.xlu0 %575  ;;  %v560_v19 = vpop.permute.xlu1 %559 }
 0x198   : > { %614 = vst.msk [vmem:[#allocation2 + $0x50] sm:$0xff] %vm603_vm0, %v576_v18  ;;  %606 = vst.msk [vmem:[#allocation2 + $0x10] sm:$0xff] %vm603_vm0, %v560_v19 }
 0x19b   : > { %v556_v20 = vpop.permute.xlu0 %555  ;;  %v562_v21 = vpop.permute.xlu1 %561 }
 0x19c   : > { %604 = vst.msk [vmem:[#allocation2] sm:$0xff] %vm603_vm0, %v556_v20  ;;  %607 = vst.msk [vmem:[#allocation2 + $0x18] sm:$0xff] %vm603_vm0, %v562_v21 }
 0x19f   : > { %v572_v22 = vpop.permute.xlu0 %571  ;;  %v578_v23 = vpop.permute.xlu1 %577 }
 0x1a0   : > { %612 = vst.msk [vmem:[#allocation2 + $0x40] sm:$0xff] %vm603_vm0, %v572_v22  ;;  %615 = vst.msk [vmem:[#allocation2 + $0x58] sm:$0xff] %vm603_vm0, %v578_v23 }
 0x1a3   : > { %v574_v24 = vpop.permute.xlu1 %573  ;;  %v558_v25 = vpop.permute.xlu0 %557 }
 0x1a4   : > { %613 = vst.msk [vmem:[#allocation2 + $0x48] sm:$0xff] %vm603_vm0, %v574_v24  ;;  %605 = vst.msk [vmem:[#allocation2 + $0x8] sm:$0xff] %vm603_vm0, %v558_v25 }
 0x1a7   : > { %v568_v26 = vpop.permute.xlu0 %567  ;;  %v570_v27 = vpop.permute.xlu1 %569 }
 0x1a8   : > { %610 = vst.msk [vmem:[#allocation2 + $0x30] sm:$0xff] %vm603_vm0, %v568_v26  ;;  %611 = vst.msk [vmem:[#allocation2 + $0x38] sm:$0xff] %vm603_vm0, %v570_v27 }
 0x1ab   : > { %v564_v28 = vpop.permute.xlu0 %563  ;;  %v566_v29 = vpop.permute.xlu1 %565 }
 0x1ac   : > { %608 = vst.msk [vmem:[#allocation2 + $0x20] sm:$0xff] %vm603_vm0, %v564_v28  ;;  %609 = vst.msk [vmem:[#allocation2 + $0x28] sm:$0xff] %vm603_vm0, %v566_v29 }
 0x1af   : > { %v580_v30 = vpop.permute.xlu0 %579  ;;  %v582_v31 = vpop.permute.xlu1 %581 }
 0x1b0   : > { %616 = vst.msk [vmem:[#allocation2 + $0x60] sm:$0xff] %vm603_vm0, %v580_v30  ;;  %617 = vst.msk [vmem:[#allocation2 + $0x68] sm:$0xff] %vm603_vm0, %v582_v31 }
 0x1b3   : > { %v584_v32 = vpop.permute.xlu0 %583  ;;  %v586_v33 = vpop.permute.xlu1 %585 }
 0x1b4   : > { %618 = vst.msk [vmem:[#allocation2 + $0x70] sm:$0xff] %vm603_vm0, %v584_v32  ;;  %619 = vst.msk [vmem:[#allocation2 + $0x78] sm:$0xff] %vm603_vm0, %v586_v33 }
 0x1b5 PF: > { %v670_v34 = vld [vmem:[%s2620_s8 + $0x10] sm:$0xff]  ;;  %v668_v35 = vld [vmem:[%s2620_s8] sm:$0xff]  ;;  %v2501_v36 = vmov 127   ;;  %v669_v37 = vld [vmem:[%s2620_s8 + $0x8] sm:$0xff]  ;;  %v2502_v61 = vmov 0   ;;  %vm919_vm1 = vcmask 130112  }
 0x1b6   : > { %2341 = vset.pattern.permute.xlu1 %v2501_v36  ;;  %2340 = vset.pattern.permute.xlu0 %v2501_v36  ;;  %v671_v38 = vld [vmem:[%s2620_s8 + $0x18] sm:$0xff]  ;;  %v1569_v39 = vpack.c.bf16 %v669_v37, %v668_v35  ;;  %v673_v41 = vld [vmem:[%s2620_s8 + $0x28] sm:$0xff]  ;;  %v672_v42 = vld [vmem:[%s2620_s8 + $0x20] sm:$0xff]  ;;  %vm926_vm2 = vcmask 195712   ;;  %vm933_vm3 = vcmask 261312   ;;  %vm940_vm4 = vcmask 326912  }
 0x1b7   : > { %867 = vperm.xlu1 %2341, %v670_v34   ;;  %861 = vperm.xlu0 %2340, %v668_v35   ;;  %v1570_v40 = vpack.c.bf16 %v671_v38, %v670_v34  ;;  %v1571_v43 = vpack.c.bf16 %v673_v41, %v672_v42  ;;  %v675_v44 = vld [vmem:[%s2620_s8 + $0x38] sm:$0xff]  ;;  %v674_v45 = vld [vmem:[%s2620_s8 + $0x30] sm:$0xff]  ;;  %v677_v47 = vld [vmem:[%s2620_s8 + $0x48] sm:$0xff]  ;;  %vm947_vm5 = vcmask 392512   ;;  %vm954_vm6 = vcmask 458112   ;;  %p2106_p13 = scmp.ne.s32.totalorder %s2480_s20, 1 }
 0x1b8   : > { %2214 = vmatprep.subr.bf16.mxu0 %v1569_v39  ;;  %2262 = vmatprep.subr.bf16.mxu1 %v1569_v39  ;;  %v1572_v46 = vpack.c.bf16 %v675_v44, %v674_v45  ;;  %v676_v48 = vld [vmem:[%s2620_s8 + $0x40] sm:$0xff]  ;;  %v679_v50 = vld [vmem:[%s2620_s8 + $0x58] sm:$0xff]  ;;  %v678_v51 = vld [vmem:[%s2620_s8 + $0x50] sm:$0xff]  ;;  %vm961_vm7 = vcmask 523712   ;;  %vm968_vm8 = vcmask 589312   ;;  %vm975_vm9 = vcmask 654912  }
 0x1b9   : > { %2215 = vmatpush3.bf16.msra.mxu0 %v1569_v39  ;;  %2270 = vmatpush3.bf16.msra.mxu1 %v1569_v39  ;;  %v1573_v49 = vpack.c.bf16 %v677_v47, %v676_v48  ;;  %v1574_v52 = vpack.c.bf16 %v679_v50, %v678_v51  ;;  %v681_v53 = vld [vmem:[%s2620_s8 + $0x68] sm:$0xff]  ;;  %v680_v54 = vld [vmem:[%s2620_s8 + $0x60] sm:$0xff]  ;;  %v683_v56 = vld [vmem:[%s2620_s8 + $0x78] sm:$0xff]  ;;  %vm982_vm10 = vcmask 720512   ;;  %vm989_vm11 = vcmask 786112  }
 0x1ba   : > { %2216 = vmatprep.subr.bf16.mxu0 %v1570_v40  ;;  %2263 = vmatprep.subr.bf16.mxu1 %v1570_v40  ;;  %v1575_v55 = vpack.c.bf16 %v681_v53, %v680_v54  ;;  %v682_v57 = vld [vmem:[%s2620_s8 + $0x70] sm:$0xff]  ;;  %v685_v59 = vld [vmem:[#allocation2 + $0x8] sm:$0xff]  ;;  %v684_v60 = vld [vmem:[#allocation2] sm:$0xff]  ;;  %vm996_vm12 = vcmask 851712   ;;  %vm1003_vm13 = vcmask 917312   ;;  %vm1010_vm14 = vcmask 982912  }
 0x1bb   : > { %870 = vperm.xlu1 %2341, %v671_v38   ;;  %864 = vperm.xlu0 %2340, %v669_v37   ;;  %v1576_v58 = vpack.c.bf16 %v683_v56, %v682_v57  ;;  %v692_v62 = vld [vmem:[#allocation2 + $0x40] sm:$0xff]  ;;  %v693_v63 = vld [vmem:[#allocation2 + $0x48] sm:$0xff]  ;;  %v686_v0 = vld [vmem:[#allocation2 + $0x10] sm:$0xff]  ;;  %vm1017_vm15 = vcmask 1048512  }
 0x1bc   : > { %v687_v1 = vld [vmem:[#allocation2 + $0x18] sm:$0xff]  ;;  %v694_v2 = vld [vmem:[#allocation2 + $0x50] sm:$0xff]  ;;  %v688_v4 = vld [vmem:[#allocation2 + $0x20] sm:$0xff] }
 0x1bd   : > { %2217 = vmatpush3.bf16.msra.mxu0 %v1570_v40  ;;  %2271 = vmatpush3.bf16.msra.mxu1 %v1570_v40  ;;  %v695_v3 = vld [vmem:[#allocation2 + $0x58] sm:$0xff]  ;;  %v689_v5 = vld [vmem:[#allocation2 + $0x28] sm:$0xff]  ;;  %v696_v6 = vld [vmem:[#allocation2 + $0x60] sm:$0xff] }
 0x1be   : > { %2218 = vmatprep.subr.bf16.mxu0 %v1571_v43  ;;  %2264 = vmatprep.subr.bf16.mxu1 %v1571_v43  ;;  %v697_v7 = vld [vmem:[#allocation2 + $0x68] sm:$0xff]  ;;  %v690_v8 = vld [vmem:[#allocation2 + $0x30] sm:$0xff]  ;;  %v691_v9 = vld [vmem:[#allocation2 + $0x38] sm:$0xff] }
 0x1bf   : > { %876 = vperm.xlu1 %2341, %v673_v41   ;;  %873 = vperm.xlu0 %2340, %v672_v42   ;;  %v698_v10 = vld [vmem:[#allocation2 + $0x70] sm:$0xff]  ;;  %v699_v11 = vld [vmem:[#allocation2 + $0x78] sm:$0xff]  ;;  %v2112_v12 = vld [vmem:[%s2632_s21] sm:$0xff]  }
 0x1c0   : > { %v2113_v13 = vunpack.c.l.bf16 %v2112_v12  ;;  %v2114_v14 = vunpack.c.h.bf16 %v2112_v12  ;;  %v2143_v15 = vld [vmem:[%s2632_s21 + $0x8] sm:$0xff]   ;;  %v2144_v18 = vld [vmem:[%s2632_s21 + $0x10] sm:$0xff]   ;;  %v2145_v21 = vld [vmem:[%s2632_s21 + $0x18] sm:$0xff]  }
 0x1c1   : > { %2219 = vmatpush3.bf16.msra.mxu0 %v1571_v43  ;;  %2272 = vmatpush3.bf16.msra.mxu1 %v1571_v43  ;;  %v2117_v16 = vunpack.c.l.bf16 %v2143_v15  ;;  %v2118_v17 = vunpack.c.h.bf16 %v2143_v15  ;;  %v2121_v19 = vunpack.c.l.bf16 %v2144_v18  ;;  %v2122_v20 = vunpack.c.h.bf16 %v2144_v18  ;;  %v2146_v24 = vld [vmem:[%s2632_s21 + $0x20] sm:$0xff]   ;;  %v2147_v27 = vld [vmem:[%s2632_s21 + $0x28] sm:$0xff]   ;;  %v2148_v32 = vld [vmem:[%s2632_s21 + $0x30] sm:$0xff]  }
 0x1c2   : > { %2220 = vmatprep.subr.bf16.mxu0 %v1572_v46  ;;  %2265 = vmatprep.subr.bf16.mxu1 %v1572_v46  ;;  %v2125_v22 = vunpack.c.l.bf16 %v2145_v21  ;;  %v2126_v23 = vunpack.c.h.bf16 %v2145_v21  ;;  %v2129_v25 = vunpack.c.l.bf16 %v2146_v24  ;;  %v2130_v26 = vunpack.c.h.bf16 %v2146_v24  ;;  %v2149_v36 = vld [vmem:[%s2632_s21 + $0x38] sm:$0xff]  }
 0x1c3   : > { %882 = vperm.xlu1 %2341, %v675_v44   ;;  %879 = vperm.xlu0 %2340, %v674_v45   ;;  %v2133_v29 = vunpack.c.l.bf16 %v2147_v27  ;;  %v2134_v31 = vunpack.c.h.bf16 %v2147_v27  ;;  %v2137_v33 = vunpack.c.l.bf16 %v2148_v32  ;;  %v2138_v35 = vunpack.c.h.bf16 %v2148_v32 }
 0x1c4   : > { %v2141_v38 = vunpack.c.l.bf16 %v2149_v36  ;;  %v2142_v39 = vunpack.c.h.bf16 %v2149_v36  ;;  %v908_v43 = vlaneseq }
 0x1c5   : > { %2221 = vmatpush3.bf16.msra.mxu0 %v1572_v46  ;;  %2273 = vmatpush3.bf16.msra.mxu1 %v1572_v46 }
 0x1c6   : > { %2222 = vmatprep.subr.bf16.mxu0 %v1573_v49  ;;  %2266 = vmatprep.subr.bf16.mxu1 %v1573_v49  ;;  %v2777_v46 = vand.u32 127, %v908_v43 }
 0x1c7   : > { %888 = vperm.xlu1 %2341, %v677_v47   ;;  %885 = vperm.xlu0 %2340, %v676_v48  }
 0x1c8   : > { %v914_v47 = vadd.s32 4294967288, %v2777_v46 }
 0x1c9   : > { %2223 = vmatpush3.bf16.msra.mxu0 %v1573_v49  ;;  %2274 = vmatpush3.bf16.msra.mxu1 %v1573_v49  ;;  %v2780_v49 = vshrl.u32 %v908_v43, 7 }
 0x1ca   : > { %2224 = vmatprep.subr.bf16.mxu0 %v1574_v52  ;;  %2267 = vmatprep.subr.bf16.mxu1 %v1574_v52 }
 0x1cb   : > { %894 = vperm.xlu1 %2341, %v679_v50   ;;  %891 = vperm.xlu0 %2340, %v678_v51   ;;  %v912_v51 = vsub.s32 %v2777_v46, %v2780_v49 }
 0x1cd   : > { %2225 = vmatpush3.bf16.msra.mxu0 %v1574_v52  ;;  %2275 = vmatpush3.bf16.msra.mxu1 %v1574_v52  ;;  %v917_v52 = vsub.s32 %v914_v47, %v2780_v49 }
 0x1ce   : > { %2226 = vmatprep.subr.bf16.mxu0 %v1575_v55  ;;  %2268 = vmatprep.subr.bf16.mxu1 %v1575_v55 }
 0x1cf   : > { %900 = vperm.xlu1 %2341, %v681_v53   ;;  %897 = vperm.xlu0 %2340, %v680_v54   ;;  %v921_v53 = vadd.s32 4294967280, %v2777_v46 }
 0x1d1   : > { %2227 = vmatpush3.bf16.msra.mxu0 %v1575_v55  ;;  %2276 = vmatpush3.bf16.msra.mxu1 %v1575_v55 }
 0x1d2   : > { %2228 = vmatprep.subr.bf16.mxu0 %v1576_v58  ;;  %2269 = vmatprep.subr.bf16.mxu1 %v1576_v58 }
 0x1d3   : > { %906 = vperm.xlu1 %2341, %v683_v56   ;;  %903 = vperm.xlu0 %2340, %v682_v57   ;;  %v928_v56 = vadd.s32 4294967272, %v2777_v46 }
 0x1d5   : > { %2229 = vmatpush3.bf16.msra.mxu0 %v1576_v58  ;;  %2277 = vmatpush3.bf16.msra.mxu1 %v1576_v58  ;;  %v924_v58 = vsub.s32 %v921_v53, %v2780_v49 }
 0x1d7   : > { %2343 = vset.pattern.permute.xlu1 %v2502_v61  ;;  %2342 = vset.pattern.permute.xlu0 %v2502_v61  ;;  %v931_v61 = vsub.s32 %v928_v56, %v2780_v49 }
 0x1d8   : > { %771 = vperm.xlu1 %2343, %v685_v59   ;;  %766 = vperm.xlu0 %2342, %v684_v60   ;;  %v935_v59 = vadd.s32 4294967264, %v2777_v46 }
 0x1dc   : > { %806 = vperm.xlu1 %2343, %v692_v62   ;;  %811 = vperm.xlu0 %2342, %v693_v63   ;;  %v942_v63 = vadd.s32 4294967256, %v2777_v46 }
 0x1e0   : > { %776 = vperm.xlu1 %2343, %v686_v0   ;;  %781 = vperm.xlu0 %2342, %v687_v1  }
 0x1e4   : > { %816 = vperm.xlu1 %2343, %v694_v2   ;;  %821 = vperm.xlu0 %2342, %v695_v3   ;;  %v938_v2 = vsub.s32 %v935_v59, %v2780_v49  ;;  %v949_v3 = vadd.s32 4294967248, %v2777_v46 }
 0x1e8   : > { %786 = vperm.xlu1 %2343, %v688_v4   ;;  %791 = vperm.xlu0 %2342, %v689_v5  }
 0x1ec   : > { %826 = vperm.xlu1 %2343, %v696_v6   ;;  %831 = vperm.xlu0 %2342, %v697_v7   ;;  %v945_v7 = vsub.s32 %v942_v63, %v2780_v49 }
 0x1f0   : > { %796 = vperm.xlu1 %2343, %v690_v8   ;;  %801 = vperm.xlu0 %2342, %v691_v9   ;;  %v956_v8 = vadd.s32 4294967240, %v2777_v46 }
 0x1f2   : > { %v959_v15 = vsub.s32 %v956_v8, %v2780_v49 }
 0x1f4   : > { %836 = vperm.xlu1 %2343, %v698_v10   ;;  %841 = vperm.xlu0 %2342, %v699_v11   ;;  %v952_v10 = vsub.s32 %v949_v3, %v2780_v49  ;;  %v963_v11 = vadd.s32 4294967232, %v2777_v46 }
 0x21d   : > { %732 = vxpose.xlu1.b32.start [1/16] %v2113_v13, 128 }
 0x221   : > { %733 = vxpose.xlu1.b32.cont [2/16] %v2114_v14, 128 }
 0x225   : > { %734 = vxpose.xlu1.b32.cont [3/16] %v2117_v16, 128  ;;  %v970_v16 = vadd.s32 4294967224, %v2777_v46 }
 0x229   : > { %735 = vxpose.xlu1.b32.cont [4/16] %v2118_v17, 128 }
 0x22d   : > { %736 = vxpose.xlu1.b32.cont [5/16] %v2121_v19, 128  ;;  %v966_v19 = vsub.s32 %v963_v11, %v2780_v49 }
 0x231   : > { %737 = vxpose.xlu1.b32.cont [6/16] %v2122_v20, 128  ;;  %v977_v20 = vadd.s32 4294967216, %v2777_v46 }
 0x235   : > { %738 = vxpose.xlu1.b32.cont [7/16] %v2125_v22, 128  ;;  %v984_v22 = vadd.s32 4294967208, %v2777_v46 }
 0x236   : > { %v868_v28 = vpop.permute.xlu1 %867  ;;  %v862_v41 = vpop.permute.xlu0 %861 }
 0x237   : > { %v913_v55 = vrot.slane %v862_v41, %v912_v51  ;;  %v925_v1 = vrot.slane %v868_v28, %v924_v58 }
 0x239   : > { %739 = vxpose.xlu1.b32.cont [8/16] %v2126_v23, 128 }
 0x23a   : > { %v871_v30 = vpop.permute.xlu1 %870  ;;  %v865_v44 = vpop.permute.xlu0 %864 }
 0x23b   : > { %v918_v57 = vrot.slane %v865_v44, %v917_v52  ;;  %v932_v6 = vrot.slane %v871_v30, %v931_v61  ;;  %v991_v30 = vadd.s32 4294967200, %v2777_v46 }
 0x23d   : > { %740 = vxpose.xlu1.b32.cont [9/16] %v2129_v25, 128  ;;  %v920_v62 = vsel %vm919_vm1, %v918_v57, %v913_v55  ;;  %v973_v25 = vsub.s32 %v970_v16, %v2780_v49 }
 0x23e   : > { %v877_v34 = vpop.permute.xlu1 %876  ;;  %v874_v48 = vpop.permute.xlu0 %873  ;;  %v927_v4 = vsel %vm926_vm2, %v925_v1, %v920_v62 }
 0x23f   : > { %v939_v9 = vrot.slane %v874_v48, %v938_v2  ;;  %v934_v12 = vsel %vm933_vm3, %v932_v6, %v927_v4  ;;  %v946_v14 = vrot.slane %v877_v34, %v945_v7  ;;  %v1012_v48 = vadd.s32 4294967176, %v2777_v46 }
 0x241   : > { %741 = vxpose.xlu1.b32.cont [10/16] %v2130_v26, 128  ;;  %v941_v17 = vsel %vm940_vm4, %v939_v9, %v934_v12  ;;  %v1015_v56 = vsub.s32 %v1012_v48, %v2780_v49 }
 0x242   : > { %v883_v37 = vpop.permute.xlu1 %882  ;;  %v880_v54 = vpop.permute.xlu0 %879  ;;  %v948_v24 = vsel %vm947_vm5, %v946_v14, %v941_v17 }
 0x243   : > { %v953_v18 = vrot.slane %v880_v54, %v952_v10  ;;  %v960_v23 = vrot.slane %v883_v37, %v959_v15 }
 0x245   : > { %742 = vxpose.xlu1.b32.cont [11/16] %v2133_v29, 128  ;;  %v955_v27 = vsel %vm954_vm6, %v953_v18, %v948_v24  ;;  %v980_v29 = vsub.s32 %v977_v20, %v2780_v49 }
 0x246   : > { %v2771_v40 = vpop.permute.xlu1 %888  ;;  %v886_v0 = vpop.permute.xlu0 %885  ;;  %v962_v34 = vsel %vm961_vm7, %v960_v23, %v955_v27 }
 0x247   : > { %v967_v28 = vrot.slane %v886_v0, %v966_v19 }
 0x249   : > { %743 = vxpose.xlu1.b32.cont [12/16] %v2134_v31, 128  ;;  %v987_v31 = vsub.s32 %v984_v22, %v2780_v49  ;;  %v969_v36 = vsel %vm968_vm8, %v967_v28, %v962_v34 }
 0x24a   : > { %v2773_v42 = vpop.permute.xlu1 %894  ;;  %v892_v13 = vpop.permute.xlu0 %891 }
 0x24b   : > { %v981_v37 = vrot.slane %v892_v13, %v980_v29  ;;  %v988_v43 = vrot.slane %v2773_v42, %v987_v31 }
 0x24d   : > { %744 = vxpose.xlu1.b32.cont [13/16] %v2137_v33, 128  ;;  %v974_v33 = vrot.slane %v2771_v40, %v973_v25 }
 0x24e   : > { %v2775_v45 = vpop.permute.xlu1 %900  ;;  %v898_v26 = vpop.permute.xlu0 %897 }
 0x24f   : > { %v976_v44 = vsel %vm975_vm9, %v974_v33, %v969_v36 }
 0x250   : > { %v983_v40 = vsel %vm982_vm10, %v981_v37, %v976_v44 }
 0x251   : > { %745 = vxpose.xlu1.b32.cont [14/16] %v2138_v35, 128  ;;  %v998_v35 = vadd.s32 4294967192, %v2777_v46  ;;  %v990_v55 = vsel %vm989_vm11, %v988_v43, %v983_v40 }
 0x252   : > { %v2782_v50 = vpop.permute.xlu1 %906  ;;  %v904_v41 = vpop.permute.xlu0 %903 }
 0x253   : > { %v1001_v47 = vsub.s32 %v998_v35, %v2780_v49 }
 0x255   : > { %746 = vxpose.xlu1.b32.cont [15/16] %v2141_v38, 128  ;;  %v994_v38 = vsub.s32 %v991_v30, %v2780_v49  ;;  %v1002_v54 = vrot.slane %v2775_v45, %v1001_v47 }
 0x257   : > { %v2791_v60 = vpop.permute.xlu1 %771  ;;  %v995_v51 = vrot.slane %v898_v26, %v994_v38  ;;  %v767_v57 = vpop.permute.xlu0 %766 }
 0x259   : > { %747 = vxpose.xlu1.b32.end [16/16] %v2142_v39, 128  ;;  %v1005_v39 = vadd.s32 4294967184, %v2777_v46  ;;  %v997_v58 = vsel %vm996_vm12, %v995_v51, %v990_v55  ;;  %v1016_v46 = vrot.slane %v2782_v50, %v1015_v56 }
 0x25a   : > { %v1004_v61 = vsel %vm1003_vm13, %v1002_v54, %v997_v58 }
 0x25b   : > { %v2797_v5 = vpop.permute.xlu1 %806  ;;  %v1008_v52 = vsub.s32 %v1005_v39, %v2780_v49  ;;  %v2827_v63 = vpop.permute.xlu0 %811 }
 0x25d   : > { %v1009_v42 = vrot.slane %v904_v41, %v1008_v52 }
 0x25f   : > { %v777_v21 = vpop.permute.xlu1 %776  ;;  %v1011_v62 = vsel %vm1010_vm14, %v1009_v42, %v1004_v61  ;;  %v782_v49 = vpop.permute.xlu0 %781 }
 0x260   : > { %v2829_v0 = vsel %vm1017_vm15, %v1016_v46, %v1011_v62 }
 0x261   : > { %v1032_v1 = vadd.f32 %v2829_v0, %v767_v57  ;;  %v1033_v2 = vadd.f32 %v2829_v0, %v2791_v60  ;;  %v1034_v7 = vadd.f32 %v2829_v0, %v777_v21  ;;  %v1035_v12 = vadd.f32 %v2829_v0, %v782_v49 }
 0x262   : > { %v1040_v39 = vadd.f32 %v2829_v0, %v2797_v5  ;;  %v1041_v40 = vadd.f32 %v2829_v0, %v2827_v63 }
 0x263   : > { %v2812_v32 = vpop.permute.xlu1 %816  ;;  %v1064_v4 = vmul.f32 0.2, %v1032_v1  ;;  %vm1048_vm0 = vcmp.gt.f32.partialorder %v1032_v1, 0.0  ;;  %v2836_v6 = vpop.permute.xlu0 %821  ;;  %v1065_v50 = vmul.f32 0.2, %v1033_v2  ;;  %vm1049_vm1 = vcmp.gt.f32.partialorder %v1033_v2, 0.0 }
 0x264   : > { %v1066_v11 = vmul.f32 0.2, %v1034_v7  ;;  %vm1050_vm2 = vcmp.gt.f32.partialorder %v1034_v7, 0.0  ;;  %v1067_v16 = vmul.f32 0.2, %v1035_v12  ;;  %vm1051_vm3 = vcmp.gt.f32.partialorder %v1035_v12, 0.0 }
 0x265   : > { %v1080_v9 = vsel %vm1048_vm0, %v1032_v1, %v1064_v4  ;;  %v1081_v13 = vsel %vm1049_vm1, %v1033_v2, %v1065_v50  ;;  %v1072_v48 = vmul.f32 0.2, %v1040_v39  ;;  %vm1056_vm8 = vcmp.gt.f32.partialorder %v1040_v39, 0.0 }
 0x266   : > { %v1082_v19 = vsel %vm1050_vm2, %v1034_v7, %v1066_v11  ;;  %v1083_v25 = vsel %vm1051_vm3, %v1035_v12, %v1067_v16  ;;  %v1073_v5 = vmul.f32 0.2, %v1041_v40  ;;  %v1042_v54 = vadd.f32 %v2829_v0, %v2812_v32 }
 0x267   : > { %v787_v53 = vpop.permute.xlu1 %786  ;;  %v792_v14 = vpop.permute.xlu0 %791  ;;  %v1088_v56 = vsel %vm1056_vm8, %v1040_v39, %v1072_v48  ;;  %vm1057_vm9 = vcmp.gt.f32.partialorder %v1041_v40, 0.0  ;;  %v1043_v42 = vadd.f32 %v2829_v0, %v2836_v6  ;;  %vm1432_vm0 = vcmask 7168  }
 0x268   : > { %v1036_v17 = vadd.f32 %v2829_v0, %v787_v53  ;;  %v1037_v23 = vadd.f32 %v2829_v0, %v792_v14  ;;  %v1074_v58 = vmul.f32 0.2, %v1042_v54  ;;  %v1089_v61 = vsel %vm1057_vm9, %v1041_v40, %v1073_v5  ;;  %v2926_v40 = vld [vmem:[#allocation3 + $0x28] sm:$0xff]  ;;  %v2932_v5 = vld [vmem:[#allocation3 + $0x30] sm:$0xff] }
 0x269   : > { %vm1058_vm10 = vcmp.gt.f32.partialorder %v1042_v54, 0.0  ;;  %v1075_v63 = vmul.f32 0.2, %v1043_v42  ;;  %vm1059_vm11 = vcmp.gt.f32.partialorder %v1043_v42, 0.0 }
 0x26a   : > { %v1068_v22 = vmul.f32 0.2, %v1036_v17  ;;  %vm1052_vm4 = vcmp.gt.f32.partialorder %v1036_v17, 0.0  ;;  %v1069_v27 = vmul.f32 0.2, %v1037_v23  ;;  %vm1053_vm5 = vcmp.gt.f32.partialorder %v1037_v23, 0.0 }
 0x26b   : > { %v2824_v59 = vpop.permute.xlu1 %826  ;;  %v832_v21 = vpop.permute.xlu0 %831  ;;  %v1090_v1 = vsel %vm1058_vm10, %v1042_v54, %v1074_v58  ;;  %v1091_v50 = vsel %vm1059_vm11, %v1043_v42, %v1075_v63 }
 0x26c   : > { %v1084_v30 = vsel %vm1052_vm4, %v1036_v17, %v1068_v22  ;;  %v1085_v37 = vsel %vm1053_vm5, %v1037_v23, %v1069_v27  ;;  %v1044_v32 = vadd.f32 %v2829_v0, %v2824_v59  ;;  %v1045_v4 = vadd.f32 %v2829_v0, %v832_v21 }
 0x26e   : > { %v1076_v2 = vmul.f32 0.2, %v1044_v32  ;;  %vm1060_vm12 = vcmp.gt.f32.partialorder %v1044_v32, 0.0  ;;  %vm1061_vm13 = vcmp.gt.f32.partialorder %v1045_v4, 0.0 }
 0x26f   : > { %v797_v45 = vpop.permute.xlu1 %796  ;;  %v802_v31 = vpop.permute.xlu0 %801 }
 0x270   : > { %v1038_v28 = vadd.f32 %v2829_v0, %v797_v45  ;;  %v1039_v35 = vadd.f32 %v2829_v0, %v802_v31  ;;  %v1092_v11 = vsel %vm1060_vm12, %v1044_v32, %v1076_v2  ;;  %v2956_v32 = vld [vmem:[#allocation3 + $0x48] sm:$0xff]  ;;  %v2964_v2 = vld [vmem:[#allocation3 + $0x50] sm:$0xff] }
 0x272   : > { %v1070_v34 = vmul.f32 0.2, %v1038_v28  ;;  %vm1054_vm6 = vcmp.gt.f32.partialorder %v1038_v28, 0.0  ;;  %v1071_v41 = vmul.f32 0.2, %v1039_v35  ;;  %vm1055_vm7 = vcmp.gt.f32.partialorder %v1039_v35, 0.0 }
 0x273   : > { %v2834_v3 = vpop.permute.xlu1 %836  ;;  %v842_v12 = vpop.permute.xlu0 %841 }
 0x274   : > { %v1086_v44 = vsel %vm1054_vm6, %v1038_v28, %v1070_v34  ;;  %v1087_v52 = vsel %vm1055_vm7, %v1039_v35, %v1071_v41  ;;  %v1046_v59 = vadd.f32 %v2829_v0, %v2834_v3  ;;  %v1047_v14 = vadd.f32 %v2829_v0, %v842_v12  ;;  %v2906_v0 = vld [vmem:[#allocation3] sm:$0xff]  ;;  %v2914_v34 = vld [vmem:[#allocation3 + $0x10] sm:$0xff] }
 0x276   : > { %vm1062_vm14 = vcmp.gt.f32.partialorder %v1046_v59, 0.0  ;;  %vm1063_vm15 = vcmp.gt.f32.partialorder %v1047_v14, 0.0 }
 0x29d   : > { %v748_v8 = vpop.trf.xlu1 }
 0x29e   : > { %v2839_v10 = vadd.f32 %v1080_v9, %v748_v8  ;;  %v1077_v8 = vmul.f32 0.2, %v1045_v4 }
 0x2a0   : > { %1128 = vmax.xlane.f32.xlu0 %v2839_v10  ;;  %v1093_v17 = vsel %vm1061_vm13, %v1045_v4, %v1077_v8 }
 0x2a1   : > { %v749_v60 = vpop.trf.xlu1 }
 0x2a2   : > { %v2843_v15 = vadd.f32 %v1081_v13, %v749_v60  ;;  %v1078_v13 = vmul.f32 0.2, %v1046_v59 }
 0x2a4   : > { %1130 = vmax.xlane.f32.xlu0 %v2843_v15  ;;  %v1094_v21 = vsel %vm1062_vm14, %v1046_v59, %v1078_v13 }
 0x2a5   : > { %v750_v18 = vpop.trf.xlu1 }
 0x2a6   : > { %v2847_v20 = vadd.f32 %v1082_v19, %v750_v18  ;;  %v1079_v19 = vmul.f32 0.2, %v1047_v14 }
 0x2a8   : > { %1132 = vmax.xlane.f32.xlu0 %v2847_v20 }
 0x2a9   : > { %v751_v24 = vpop.trf.xlu1 }
 0x2aa   : > { %v2851_v26 = vadd.f32 %v1083_v25, %v751_v24  ;;  %v1095_v24 = vsel %vm1063_vm15, %v1047_v14, %v1079_v19  ;;  %v2989_v19 = vld [vmem:[#allocation3 + $0x68] sm:$0xff] }
 0x2ac   : > { %1134 = vmax.xlane.f32.xlu0 %v2851_v26 }
 0x2ad   : > { %v752_v29 = vpop.trf.xlu1 }
 0x2ae   : > { %v2855_v33 = vadd.f32 %v1084_v30, %v752_v29  ;;  %v1113_v29 = vld [vmem:[#allocation3 + $0x8] sm:$0xff] }
 0x2b0   : > { %1136 = vmax.xlane.f32.xlu0 %v2855_v33 }
 0x2b1   : > { %v753_v36 = vpop.trf.xlu1 }
 0x2b2   : > { %v2859_v38 = vadd.f32 %v1085_v37, %v753_v36  ;;  %v2918_v37 = vld [vmem:[#allocation3 + $0x18] sm:$0xff] }
 0x2b4   : > { %1138 = vmax.xlane.f32.xlu0 %v2859_v38 }
 0x2b5   : > { %v754_v43 = vpop.trf.xlu1 }
 0x2b6   : > { %v2864_v47 = vadd.f32 %v1086_v44, %v754_v43  ;;  %v2922_v43 = vld [vmem:[#allocation3 + $0x20] sm:$0xff] }
 0x2b8   : > { %1140 = vmax.xlane.f32.xlu0 %v2864_v47 }
 0x2b9   : > { %v755_v51 = vpop.trf.xlu1 }
 0x2ba   : > { %v2869_v53 = vadd.f32 %v1087_v52, %v755_v51 }
 0x2bc   : > { %1142 = vmax.xlane.f32.xlu0 %v2869_v53 }
 0x2bd   : > { %v756_v55 = vpop.trf.xlu1 }
 0x2be   : > { %v2874_v57 = vadd.f32 %v1088_v56, %v756_v55  ;;  %v2940_v56 = vld [vmem:[#allocation3 + $0x38] sm:$0xff] }
 0x2c0   : > { %1144 = vmax.xlane.f32.xlu0 %v2874_v57 }
 0x2c1   : > { %v757_v46 = vpop.trf.xlu1 }
 0x2c2   : > { %v2879_v62 = vadd.f32 %v1089_v61, %v757_v46  ;;  %v2948_v46 = vld [vmem:[#allocation3 + $0x40] sm:$0xff] }
 0x2c4   : > { %1146 = vmax.xlane.f32.xlu0 %v2879_v62 }
 0x2c5   : > { %v758_v45 = vpop.trf.xlu1 }
 0x2c6   : > { %v2884_v49 = vadd.f32 %v1090_v1, %v758_v45 }
 0x2c8   : > { %1148 = vmax.xlane.f32.xlu0 %v2884_v49 }
 0x2c9   : > { %v759_v6 = vpop.trf.xlu1 }
 0x2ca   : > { %v2888_v7 = vadd.f32 %v1091_v50, %v759_v6  ;;  %v2972_v50 = vld [vmem:[#allocation3 + $0x58] sm:$0xff] }
 0x2cc   : > { %1150 = vmax.xlane.f32.xlu0 %v2888_v7 }
 0x2cd   : > { %v760_v9 = vpop.trf.xlu1 }
 0x2ce   : > { %v2893_v60 = vadd.f32 %v1092_v11, %v760_v9  ;;  %v2980_v11 = vld [vmem:[#allocation3 + $0x60] sm:$0xff] }
 0x2d0   : > { %1152 = vmax.xlane.f32.xlu0 %v2893_v60 }
 0x2d1   : > { %v761_v16 = vpop.trf.xlu1 }
 0x2d2   : > { %v2897_v18 = vadd.f32 %v1093_v17, %v761_v16 }
 0x2d4   : > { %1154 = vmax.xlane.f32.xlu0 %v2897_v18 }
 0x2d5   : > { %v762_v3 = vpop.trf.xlu1 }
 0x2d6   : > { %v2900_v22 = vadd.f32 %v1094_v21, %v762_v3 }
 0x2d8   : > { %1156 = vmax.xlane.f32.xlu0 %v2900_v22 }
 0x2d9   : > { %v763_v23 = vpop.trf.xlu1 }
 0x2da   : > { %v2903_v25 = vadd.f32 %v1095_v24, %v763_v23 }
 0x2dc   : > { %1158 = vmax.xlane.f32.xlu0 %v2903_v25 }
 0x32d   : > { %v1129_v27 = vpop.xlane.xlu0 %1128 }
 0x32e   : > { %v2909_v28 = vmax.f32 %v2906_v0, %v1129_v27 }
 0x330   : > { %1706 = vst.msk [vmem:[#allocation3] sm:$0xff] %vm1432_vm0, %v2909_v28  ;;  %1178 = vperm.xlu0 %2342, %v2909_v28   ;;  %v1304_v12 = vsub.f32 %v2906_v0, %v2909_v28  ;;  %v2995_v28 = vld [vmem:[#allocation3 + $0x70] sm:$0xff] }
 0x331   : > { %v1131_v30 = vpop.xlane.xlu0 %1130 }
 0x332   : > { %v1161_v31 = vmax.f32 %v1113_v29, %v1131_v30  ;;  %v1320_v3 = vmul.f32 1.442695, %v1304_v12 }
 0x334   : > { %1707 = vst.msk [vmem:[#allocation3 + $0x8] sm:$0xff] %vm1432_vm0, %v1161_v31  ;;  %1183 = vperm.xlu1 %2343, %v1161_v31   ;;  %v1305_v8 = vsub.f32 %v1113_v29, %v1161_v31 }
 0x335   : > { %v1133_v35 = vpop.xlane.xlu0 %1132 }
 0x336   : > { %v1162_v36 = vmax.f32 %v2914_v34, %v1133_v35  ;;  %v1322_v13 = vmul.f32 1.442695, %v1305_v8 }
 0x338   : > { %1708 = vst.msk [vmem:[#allocation3 + $0x10] sm:$0xff] %vm1432_vm0, %v1162_v36  ;;  %1188 = vperm.xlu0 %2342, %v1162_v36   ;;  %v1306_v14 = vsub.f32 %v2914_v34, %v1162_v36  ;;  %2344 = vpow2.f32 %v1322_v13 }
 0x339   : > { %v1135_v39 = vpop.xlane.xlu0 %1134  ;;  %2346 = vpow2.f32 %v1320_v3 }
 0x33a   : > { %v1163_v41 = vmax.f32 %v2918_v37, %v1135_v39  ;;  %v1324_v23 = vmul.f32 1.442695, %v1306_v14 }
 0x33c   : > { %1709 = vst.msk [vmem:[#allocation3 + $0x18] sm:$0xff] %vm1432_vm0, %v1163_v41  ;;  %1193 = vperm.xlu0 %2342, %v1163_v41   ;;  %v1307_v21 = vsub.f32 %v2918_v37, %v1163_v41  ;;  %2348 = vpow2.f32 %v1324_v23  ;;  %v3005_v37 = vld [vmem:[#allocation3 + $0x78] sm:$0xff] }
 0x33d   : > { %v1137_v44 = vpop.xlane.xlu0 %1136 }
 0x33e   : > { %v1164_v48 = vmax.f32 %v2922_v43, %v1137_v44  ;;  %v1326_v29 = vmul.f32 1.442695, %v1307_v21 }
 0x340   : > { %1710 = vst.msk [vmem:[#allocation3 + $0x20] sm:$0xff] %vm1432_vm0, %v1164_v48  ;;  %1198 = vperm.xlu1 %2343, %v1164_v48   ;;  %v1308_v24 = vsub.f32 %v2922_v43, %v1164_v48  ;;  %2350 = vpow2.f32 %v1326_v29 }
 0x341   : > { %v1139_v51 = vpop.xlane.xlu0 %1138 }
 0x342   : > { %v2930_v52 = vmax.f32 %v2926_v40, %v1139_v51  ;;  %v1328_v31 = vmul.f32 1.442695, %v1308_v24 }
 0x344   : > { %1711 = vst.msk [vmem:[#allocation3 + $0x28] sm:$0xff] %vm1432_vm0, %v2930_v52  ;;  %1203 = vperm.xlu0 %2342, %v2930_v52   ;;  %v1309_v30 = vsub.f32 %v2926_v40, %v2930_v52  ;;  %2352 = vpow2.f32 %v1328_v31  ;;  %v3019_v52 = vpop.eup %2344 }
 0x345   : > { %v1141_v54 = vpop.xlane.xlu0 %1140 }
 0x346   : > { %v2938_v55 = vmax.f32 %v2932_v5, %v1141_v54  ;;  %v1330_v39 = vmul.f32 1.442695, %v1309_v30 }
 0x348   : > { %1712 = vst.msk [vmem:[#allocation3 + $0x30] sm:$0xff] %vm1432_vm0, %v2938_v55  ;;  %1208 = vperm.xlu1 %2343, %v2938_v55   ;;  %v1310_v34 = vsub.f32 %v2932_v5, %v2938_v55  ;;  %2354 = vpow2.f32 %v1330_v39 }
 0x349   : > { %v1143_v58 = vpop.xlane.xlu0 %1142 }
 0x34a   : > { %v2946_v42 = vmax.f32 %v2940_v56, %v1143_v58  ;;  %v1332_v44 = vmul.f32 1.442695, %v1310_v34 }
 0x34c   : > { %1713 = vst.msk [vmem:[#allocation3 + $0x38] sm:$0xff] %vm1432_vm0, %v2946_v42  ;;  %1213 = vperm.xlu0 %2342, %v2946_v42   ;;  %v1311_v41 = vsub.f32 %v2940_v56, %v2946_v42  ;;  %2356 = vpow2.f32 %v1332_v44  ;;  %v3031_v42 = vpop.eup %2346 }
 0x34d   : > { %v1145_v61 = vpop.xlane.xlu0 %1144 }
 0x34e   : > { %v2954_v63 = vmax.f32 %v2948_v46, %v1145_v61  ;;  %v1334_v5 = vmul.f32 1.442695, %v1311_v41 }
 0x350   : > { %1714 = vst.msk [vmem:[#allocation3 + $0x40] sm:$0xff] %vm1432_vm0, %v2954_v63  ;;  %1218 = vperm.xlu0 %2342, %v2954_v63   ;;  %v1312_v48 = vsub.f32 %v2948_v46, %v2954_v63  ;;  %v3033_v46 = vpop.eup %2348  ;;  %2358 = vpow2.f32 %v1334_v5 }
 0x351   : > { %v1147_v45 = vpop.xlane.xlu0 %1146 }
 0x352   : > { %v2962_v1 = vmax.f32 %v2956_v32, %v1147_v45  ;;  %v1336_v56 = vmul.f32 1.442695, %v1312_v48 }
 0x354   : > { %1715 = vst.msk [vmem:[#allocation3 + $0x48] sm:$0xff] %vm1432_vm0, %v2962_v1  ;;  %1223 = vperm.xlu0 %2342, %v2962_v1   ;;  %v1313_v54 = vsub.f32 %v2956_v32, %v2962_v1  ;;  %2360 = vpow2.f32 %v1336_v56  ;;  %v3040_v1 = vpop.eup %2350 }
 0x355   : > { %v1149_v4 = vpop.xlane.xlu0 %1148 }
 0x356   : > { %v2970_v6 = vmax.f32 %v2964_v2, %v1149_v4  ;;  %v1338_v61 = vmul.f32 1.442695, %v1313_v54 }
 0x358   : > { %1716 = vst.msk [vmem:[#allocation3 + $0x50] sm:$0xff] %vm1432_vm0, %v2970_v6  ;;  %1228 = vperm.xlu1 %2343, %v2970_v6   ;;  %v1314_v58 = vsub.f32 %v2964_v2, %v2970_v6  ;;  %v3042_v2 = vpop.eup %2352  ;;  %2362 = vpow2.f32 %v1338_v61 }
 0x359   : > { %v1151_v59 = vpop.xlane.xlu0 %1150  ;;  %v3047_v8 = vpop.eup %2354 }
 0x35a   : > { %v2978_v9 = vmax.f32 %v2972_v50, %v1151_v59  ;;  %v1340_v32 = vmul.f32 1.442695, %v1314_v58  ;;  %v3049_v59 = vpop.eup %2356 }
 0x35c   : > { %1717 = vst.msk [vmem:[#allocation3 + $0x58] sm:$0xff] %vm1432_vm0, %v2978_v9  ;;  %1233 = vperm.xlu0 %2342, %v2978_v9   ;;  %v1315_v63 = vsub.f32 %v2972_v50, %v2978_v9  ;;  %2364 = vpow2.f32 %v1340_v32 }
 0x35d   : > { %v1153_v16 = vpop.xlane.xlu0 %1152 }
 0x35e   : > { %v1172_v17 = vmax.f32 %v2980_v11, %v1153_v16  ;;  %v1342_v4 = vmul.f32 1.442695, %v1315_v63 }
 0x360   : > { %1718 = vst.msk [vmem:[#allocation3 + $0x60] sm:$0xff] %vm1432_vm0, %v1172_v17  ;;  %1238 = vperm.xlu1 %2343, %v1172_v17   ;;  %v1316_v45 = vsub.f32 %v2980_v11, %v1172_v17  ;;  %2366 = vpow2.f32 %v1342_v4  ;;  %v3053_v11 = vpop.eup %2358 }
 0x361   : > { %v1155_v0 = vpop.xlane.xlu0 %1154  ;;  %v3055_v12 = vpop.eup %2360 }
 0x362   : > { %v1173_v27 = vmax.f32 %v2989_v19, %v1155_v0  ;;  %v1344_v6 = vmul.f32 1.442695, %v1316_v45  ;;  %v3059_v13 = vpop.eup %2362 }
 0x364   : > { %1719 = vst.msk [vmem:[#allocation3 + $0x68] sm:$0xff] %vm1432_vm0, %v1173_v27  ;;  %1243 = vperm.xlu0 %2342, %v1173_v27   ;;  %v1317_v50 = vsub.f32 %v2989_v19, %v1173_v27  ;;  %2368 = vpow2.f32 %v1344_v6 }
 0x365   : > { %v1157_v35 = vpop.xlane.xlu0 %1156 }
 0x366   : > { %v3003_v36 = vmax.f32 %v2995_v28, %v1157_v35  ;;  %v1346_v9 = vmul.f32 1.442695, %v1317_v50  ;;  %v3061_v14 = vpop.eup %2364 }
 0x368   : > { %v1318_v43 = vsub.f32 %v2995_v28, %v3003_v36  ;;  %1720 = vst.msk [vmem:[#allocation3 + $0x70] sm:$0xff] %vm1432_vm0, %v3003_v36  ;;  %1248 = vperm.xlu1 %2343, %v3003_v36   ;;  %2370 = vpow2.f32 %v1346_v9 }
 0x369   : > { %v1159_v40 = vpop.xlane.xlu0 %1158 }
 0x36a   : > { %v3017_v51 = vmax.f32 %v3005_v37, %v1159_v40  ;;  %v3065_v16 = vpop.eup %2366 }
 0x36c   : > { %v1319_v55 = vsub.f32 %v3005_v37, %v3017_v51  ;;  %1721 = vst.msk [vmem:[#allocation3 + $0x78] sm:$0xff] %vm1432_vm0, %v3017_v51  ;;  %1472 = vperm.xlu1 %2343, %v3019_v52   ;;  %1253 = vperm.xlu0 %2342, %v3017_v51  }
 0x36e   : > { %v3067_v17 = vpop.eup %2368 }
 0x370   : > { %1477 = vperm.xlu1 %2343, %v3033_v46   ;;  %1467 = vperm.xlu0 %2342, %v3031_v42  }
 0x372   : > { %v3071_v19 = vpop.eup %2370 }
 0x374   : > { %1487 = vperm.xlu1 %2343, %v3042_v2   ;;  %1482 = vperm.xlu0 %2342, %v3040_v1  }
 0x378   : > { %1497 = vperm.xlu1 %2343, %v3049_v59   ;;  %1492 = vperm.xlu0 %2342, %v3047_v8  }
 0x37c   : > { %1507 = vperm.xlu1 %2343, %v3055_v12   ;;  %1502 = vperm.xlu0 %2342, %v3053_v11  }
 0x380   : > { %1517 = vperm.xlu1 %2343, %v3061_v14   ;;  %1512 = vperm.xlu0 %2342, %v3059_v13  }
 0x384   : > { %1527 = vperm.xlu1 %2343, %v3067_v17   ;;  %1522 = vperm.xlu0 %2342, %v3065_v16  }
 0x388   : > { %1532 = vperm.xlu0 %2342, %v3071_v19  }
 0x3af   : > { %v1179_v3 = vpop.permute.xlu0 %1178 }
 0x3b0   : > { %v1256_v21 = vsub.f32 %v2839_v10, %v1179_v3 }
 0x3b2   : > { %v1272_v23 = vmul.f32 1.442695, %v1256_v21 }
 0x3b3   : > { %v1184_v24 = vpop.permute.xlu1 %1183 }
 0x3b4   : > { %2372 = vpow2.f32 %v1272_v23  ;;  %v1257_v0 = vsub.f32 %v2843_v15, %v1184_v24 }
 0x3b6   : > { %v1274_v27 = vmul.f32 1.442695, %v1257_v0 }
 0x3b7   : > { %v1189_v29 = vpop.permute.xlu0 %1188 }
 0x3b8   : > { %2374 = vpow2.f32 %v1274_v27  ;;  %v1258_v30 = vsub.f32 %v2847_v20, %v1189_v29 }
 0x3ba   : > { %v1276_v31 = vmul.f32 1.442695, %v1258_v30 }
 0x3bb   : > { %v1194_v34 = vpop.permute.xlu0 %1193 }
 0x3bc   : > { %2376 = vpow2.f32 %v1276_v31  ;;  %v1259_v35 = vsub.f32 %v2851_v26, %v1194_v34 }
 0x3be   : > { %v2373_v39 = vpop.eup %2372  ;;  %v1278_v41 = vmul.f32 1.442695, %v1259_v35 }
 0x3bf   : > { %v1199_v44 = vpop.permute.xlu1 %1198  ;;  %1384 = vadd.xlane.f32.xlu1 %v2373_v39 }
 0x3c0   : > { %2378 = vpow2.f32 %v1278_v41  ;;  %v1260_v10 = vsub.f32 %v2855_v33, %v1199_v44 }
 0x3c2   : > { %v2375_v48 = vpop.eup %2374  ;;  %v1280_v40 = vmul.f32 1.442695, %v1260_v10 }
 0x3c3   : > { %1386 = vadd.xlane.f32.xlu0 %v2375_v48  ;;  %v1204_v15 = vpop.permute.xlu0 %1203  ;;  %v1561_v5 = vpack.c.bf16 %v2375_v48, %v2373_v39 }
 0x3c4   : > { %2380 = vpow2.f32 %v1280_v40  ;;  %v1261_v20 = vsub.f32 %v2859_v38, %v1204_v15 }
 0x3c5   : > { %2230 = vmatprep.mubr.bf16.mxu0 %v1561_v5 }
 0x3c6   : > { %v2377_v54 = vpop.eup %2376  ;;  %v1282_v56 = vmul.f32 1.442695, %v1261_v20 }
 0x3c7   : > { %v1209_v58 = vpop.permute.xlu1 %1208  ;;  %1388 = vadd.xlane.f32.xlu0 %v2377_v54 }
 0x3c8   : > { %2382 = vpow2.f32 %v1282_v56  ;;  %v1262_v26 = vsub.f32 %v2864_v47, %v1209_v58 }
 0x3ca   : > { %v2379_v61 = vpop.eup %2378  ;;  %v1284_v63 = vmul.f32 1.442695, %v1262_v26 }
 0x3cb   : > { %1390 = vadd.xlane.f32.xlu1 %v2379_v61  ;;  %v1214_v33 = vpop.permute.xlu0 %1213  ;;  %v1562_v32 = vpack.c.bf16 %v2379_v61, %v2377_v54 }
 0x3cc   : > { %2384 = vpow2.f32 %v1284_v63  ;;  %v1263_v45 = vsub.f32 %v2869_v53, %v1214_v33 }
 0x3cd   : > { %2231 = vmatmul.mubr.bf16.vlgmr.msra.gmra.mrb[0].mxu0 %v1562_v32 }
 0x3ce   : > { %v2381_v4 = vpop.eup %2380  ;;  %v1286_v6 = vmul.f32 1.442695, %v1263_v45 }
 0x3cf   : > { %1392 = vadd.xlane.f32.xlu0 %v2381_v4  ;;  %v1219_v38 = vpop.permute.xlu0 %1218 }
 0x3d0   : > { %2386 = vpow2.f32 %v1286_v6  ;;  %v1264_v50 = vsub.f32 %v2874_v57, %v1219_v38 }
 0x3d2   : > { %v2383_v9 = vpop.eup %2382  ;;  %v1288_v3 = vmul.f32 1.442695, %v1264_v50 }
 0x3d3   : > { %1394 = vadd.xlane.f32.xlu1 %v2383_v9  ;;  %v1224_v47 = vpop.permute.xlu0 %1223  ;;  %v1563_v21 = vpack.c.bf16 %v2383_v9, %v2381_v4  ;;  %v1348_v4 = vmul.f32 1.442695, %v1318_v43 }
 0x3d4   : > { %2388 = vpow2.f32 %v1288_v3  ;;  %v1265_v23 = vsub.f32 %v2879_v62, %v1224_v47 }
 0x3d5   : > { %2234 = vmatprep.mubr.bf16.mxu0 %v1563_v21 }
 0x3d6   : > { %v2385_v24 = vpop.eup %2384  ;;  %v1290_v0 = vmul.f32 1.442695, %v1265_v23 }
 0x3d7   : > { %v1229_v53 = vpop.permute.xlu1 %1228  ;;  %1396 = vadd.xlane.f32.xlu0 %v2385_v24 }
 0x3d8   : > { %2390 = vpow2.f32 %v1290_v0  ;;  %v1266_v27 = vsub.f32 %v2884_v49, %v1229_v53  ;;  %v1352_v0 = vld [vmem:[#allocation4] sm:$0xff] }
 0x3d9   : > { %v1368_v53 = vmul.f32 %v3031_v42, %v1352_v0 }
 0x3da   : > { %v2387_v29 = vpop.eup %2386  ;;  %v1292_v30 = vmul.f32 1.442695, %v1266_v27 }
 0x3db   : > { %1398 = vadd.xlane.f32.xlu1 %v2387_v29  ;;  %v1234_v57 = vpop.permute.xlu0 %1233  ;;  %v1564_v31 = vpack.c.bf16 %v2387_v29, %v2385_v24 }
 0x3dc   : > { %2392 = vpow2.f32 %v1292_v30  ;;  %v1267_v34 = vsub.f32 %v2888_v7, %v1234_v57  ;;  %v1353_v30 = vld [vmem:[#allocation4 + $0x8] sm:$0xff] }
 0x3dd   : > { %2235 = vmatmul.mubr.bf16.gmra.mrb[4].mxu0 %v1564_v31  ;;  %v1369_v31 = vmul.f32 %v3019_v52, %v1353_v30 }
 0x3de   : > { %v2389_v35 = vpop.eup %2388  ;;  %v1294_v39 = vmul.f32 1.442695, %v1267_v34 }
 0x3df   : > { %v1239_v62 = vpop.permute.xlu1 %1238  ;;  %1400 = vadd.xlane.f32.xlu0 %v2389_v35 }
 0x3e0   : > { %2394 = vpow2.f32 %v1294_v39  ;;  %v1268_v41 = vsub.f32 %v2893_v60, %v1239_v62 }
 0x3e2   : > { %v2391_v44 = vpop.eup %2390  ;;  %v1296_v10 = vmul.f32 1.442695, %v1268_v41 }
 0x3e3   : > { %1402 = vadd.xlane.f32.xlu1 %v2391_v44  ;;  %v1244_v49 = vpop.permute.xlu0 %1243  ;;  %v1565_v48 = vpack.c.bf16 %v2391_v44, %v2389_v35  ;;  %v1354_v35 = vld [vmem:[#allocation4 + $0x10] sm:$0xff]  ;;  %v1355_v44 = vld [vmem:[#allocation4 + $0x18] sm:$0xff] }
 0x3e4   : > { %2396 = vpow2.f32 %v1296_v10  ;;  %v1269_v40 = vsub.f32 %v2897_v18, %v1244_v49  ;;  %v1370_v62 = vmul.f32 %v3033_v46, %v1354_v35  ;;  %v1371_v42 = vmul.f32 %v3040_v1, %v1355_v44  ;;  %v1365_v35 = vld [vmem:[#allocation4 + $0x68] sm:$0xff] }
 0x3e5   : > { %2238 = vmatprep.mubr.bf16.mxu1 %v1565_v48  ;;  %v1356_v48 = vld [vmem:[#allocation4 + $0x20] sm:$0xff] }
 0x3e6   : > { %v2393_v15 = vpop.eup %2392  ;;  %v1298_v5 = vmul.f32 1.442695, %v1269_v40  ;;  %v1372_v52 = vmul.f32 %v3042_v2, %v1356_v48 }
 0x3e7   : > { %v1249_v7 = vpop.permute.xlu1 %1248  ;;  %1404 = vadd.xlane.f32.xlu0 %v2393_v15 }
 0x3e8   : > { %2398 = vpow2.f32 %v1298_v5  ;;  %v1270_v20 = vsub.f32 %v2900_v22, %v1249_v7  ;;  %v1357_v5 = vld [vmem:[#allocation4 + $0x28] sm:$0xff] }
 0x3e9   : > { %v1373_v46 = vmul.f32 %v3047_v8, %v1357_v5  ;;  %v1450_v5 = vld [vmem:[#allocation5 + $0x8] sm:$0xff] }
 0x3ea   : > { %v2395_v54 = vpop.eup %2394  ;;  %v1300_v56 = vmul.f32 1.442695, %v1270_v20 }
 0x3eb   : > { %1406 = vadd.xlane.f32.xlu1 %v2395_v54  ;;  %v1254_v60 = vpop.permute.xlu0 %1253  ;;  %v1566_v58 = vpack.c.bf16 %v2395_v54, %v2393_v15  ;;  %v3102_v50 = vpop.permute.xlu1 %1472  ;;  %v1358_v54 = vld [vmem:[#allocation4 + $0x30] sm:$0xff] }
 0x3ec   : > { %2400 = vpow2.f32 %v1300_v56  ;;  %v1271_v26 = vsub.f32 %v2903_v25, %v1254_v60  ;;  %v1350_v25 = vmul.f32 1.442695, %v1319_v55  ;;  %v1374_v1 = vmul.f32 %v3049_v59, %v1358_v54 }
 0x3ed   : > { %2239 = vmatmul.mubr.bf16.vlgmr.msra.gmra.mrb[0].mxu1 %v1566_v58  ;;  %v1359_v58 = vld [vmem:[#allocation4 + $0x38] sm:$0xff] }
 0x3ee   : > { %v2397_v61 = vpop.eup %2396  ;;  %v1302_v63 = vmul.f32 1.442695, %v1271_v26  ;;  %v1375_v2 = vmul.f32 %v3053_v11, %v1359_v58 }
 0x3ef   : > { %1408 = vadd.xlane.f32.xlu0 %v2397_v61  ;;  %v3104_v9 = vpop.permute.xlu0 %1467  ;;  %v3106_v28 = vpop.permute.xlu1 %1477 }
 0x3f0   : > { %2402 = vpow2.f32 %v1302_v63  ;;  %v1360_v63 = vld [vmem:[#allocation4 + $0x40] sm:$0xff] }
 0x3f1   : > { %2404 = vpow2.f32 %v1348_v4  ;;  %v1376_v8 = vmul.f32 %v3055_v12, %v1360_v63  ;;  %v1362_v4 = vld [vmem:[#allocation4 + $0x50] sm:$0xff]  ;;  %v1456_v63 = vld [vmem:[#allocation5 + $0x38] sm:$0xff] }
 0x3f2   : > { %v2399_v18 = vpop.eup %2398  ;;  %2406 = vpow2.f32 %v1350_v25  ;;  %v1378_v11 = vmul.f32 %v3061_v14, %v1362_v4  ;;  %v1381_v14 = vmul.f32 %v3071_v19, %v1365_v35  ;;  %v1449_v19 = vld [vmem:[#allocation5] sm:$0xff] }
 0x3f3   : > { %1410 = vadd.xlane.f32.xlu1 %v2399_v18  ;;  %v1567_v33 = vpack.c.bf16 %v2399_v18, %v2397_v61  ;;  %v3108_v36 = vpop.permute.xlu0 %1482  ;;  %v3110_v37 = vpop.permute.xlu1 %1487 }
 0x3f5   : > { %2242 = vmatprep.mubr.bf16.mxu1 %v1567_v33 }
 0x3f6   : > { %v2401_v32 = vpop.eup %2400 }
 0x3f7   : > { %1412 = vadd.xlane.f32.xlu0 %v2401_v32  ;;  %v3112_v43 = vpop.permute.xlu0 %1492  ;;  %v3114_v51 = vpop.permute.xlu1 %1497 }
 0x3fa   : > { %v2403_v22 = vpop.eup %2402 }
 0x3fb   : > { %1414 = vadd.xlane.f32.xlu1 %v2403_v22  ;;  %v1568_v45 = vpack.c.bf16 %v2403_v22, %v2401_v32  ;;  %v3096_v6 = vpop.eup %2404  ;;  %v3116_v55 = vpop.permute.xlu0 %1502  ;;  %v1361_v32 = vld [vmem:[#allocation4 + $0x48] sm:$0xff] }
 0x3fc   : > { %v3098_v38 = vpop.eup %2406  ;;  %v3118_v3 = vpop.permute.xlu1 %1507  ;;  %v1377_v59 = vmul.f32 %v3059_v13, %v1361_v32 }
 0x3fd   : > { %2243 = vmatmul.mubr.bf16.gmra.mrb[4].mxu1 %v1568_v45 }
 0x3ff   : > { %v3120_v47 = vpop.permute.xlu0 %1512 }
 0x400   : > { %v3122_v21 = vpop.permute.xlu1 %1517 }
 0x403   : > { %v3124_v23 = vpop.permute.xlu0 %1522 }
 0x404   : > { %v3126_v24 = vpop.permute.xlu1 %1527 }
 0x407   : > { %v3129_v27 = vpop.permute.xlu0 %1532 }
 0x40c   : > { %1537 = vperm.xlu1 %2343, %v3096_v6  }
 0x40d   : > { %1542 = vperm.xlu0 %2342, %v3098_v38  }
 0x44c   : > { %v1385_v29 = vpop.xlane.xlu1 %1384 }
 0x44d   : > { %v1416_v57 = vadd.f32 %v1385_v29, %v1368_v53  ;;  %v1363_v53 = vld [vmem:[#allocation4 + $0x58] sm:$0xff] }
 0x44e   : > { %v1379_v12 = vmul.f32 %v3065_v16, %v1363_v53  ;;  %v1460_v53 = vld [vmem:[#allocation5 + $0x58] sm:$0xff] }
 0x44f   : > { %1433 = vst.msk [vmem:[#allocation4] sm:$0xff] %vm1432_vm0, %v1416_v57  ;;  %v1364_v57 = vld [vmem:[#allocation4 + $0x60] sm:$0xff] }
 0x450   : > { %v1387_v34 = vpop.xlane.xlu0 %1386  ;;  %v1380_v13 = vmul.f32 %v3067_v17, %v1364_v57 }
 0x451   : > { %v1417_v39 = vadd.f32 %v1387_v34, %v1369_v31 }
 0x453   : > { %1434 = vst.msk [vmem:[#allocation4 + $0x8] sm:$0xff] %vm1432_vm0, %v1417_v39 }
 0x454   : > { %v1389_v41 = vpop.xlane.xlu0 %1388 }
 0x455   : > { %v1418_v10 = vadd.f32 %v1389_v41, %v1370_v62  ;;  %v1366_v41 = vld [vmem:[#allocation4 + $0x70] sm:$0xff] }
 0x456   : > { %v1382_v16 = vmul.f32 %v3096_v6, %v1366_v41  ;;  %v1461_v41 = vld [vmem:[#allocation5 + $0x60] sm:$0xff] }
 0x457   : > { %1435 = vst.msk [vmem:[#allocation4 + $0x10] sm:$0xff] %vm1432_vm0, %v1418_v10 }
 0x458   : > { %v1391_v49 = vpop.xlane.xlu1 %1390 }
 0x459   : > { %v1419_v40 = vadd.f32 %v1391_v49, %v1371_v42  ;;  %v1367_v42 = vld [vmem:[#allocation4 + $0x78] sm:$0xff] }
 0x45a   : > { %v1383_v17 = vmul.f32 %v3098_v38, %v1367_v42 }
 0x45b   : > { %1436 = vst.msk [vmem:[#allocation4 + $0x18] sm:$0xff] %vm1432_vm0, %v1419_v40 }
 0x45c   : > { %v1393_v15 = vpop.xlane.xlu0 %1392 }
 0x45d   : > { %v1420_v7 = vadd.f32 %v1393_v15, %v1372_v52  ;;  %v1451_v52 = vld [vmem:[#allocation5 + $0x10] sm:$0xff]  ;;  %v1452_v15 = vld [vmem:[#allocation5 + $0x18] sm:$0xff] }
 0x45f   : > { %1437 = vst.msk [vmem:[#allocation4 + $0x20] sm:$0xff] %vm1432_vm0, %v1420_v7  ;;  %v1547_v7 = vmul.f32 %v3106_v28, %v1451_v52  ;;  %v1453_v28 = vld [vmem:[#allocation5 + $0x20] sm:$0xff] }
 0x460   : > { %v1395_v20 = vpop.xlane.xlu1 %1394 }
 0x461   : > { %v1421_v56 = vadd.f32 %v1395_v20, %v1373_v46  ;;  %v1545_v46 = vmul.f32 %v3104_v9, %v1449_v19  ;;  %v1548_v20 = vmul.f32 %v3108_v36, %v1452_v15  ;;  %v1549_v36 = vmul.f32 %v3110_v37, %v1453_v28 }
 0x463   : > { %1438 = vst.msk [vmem:[#allocation4 + $0x28] sm:$0xff] %vm1432_vm0, %v1421_v56 }
 0x464   : > { %v1397_v60 = vpop.xlane.xlu0 %1396 }
 0x465   : > { %v1422_v26 = vadd.f32 %v1397_v60, %v1374_v1  ;;  %v1546_v1 = vmul.f32 %v3102_v50, %v1450_v5  ;;  %v1552_v50 = vmul.f32 %v3116_v55, %v1456_v63 }
 0x467   : > { %1439 = vst.msk [vmem:[#allocation4 + $0x30] sm:$0xff] %vm1432_vm0, %v1422_v26 }
 0x468   : > { %v1399_v61 = vpop.xlane.xlu1 %1398 }
 0x469   : > { %v1423_v18 = vadd.f32 %v1399_v61, %v1375_v2  ;;  %v1455_v61 = vld [vmem:[#allocation5 + $0x30] sm:$0xff] }
 0x46a   : > { %v1551_v9 = vmul.f32 %v3114_v51, %v1455_v61  ;;  %v1459_v51 = vld [vmem:[#allocation5 + $0x50] sm:$0xff] }
 0x46b   : > { %1440 = vst.msk [vmem:[#allocation4 + $0x38] sm:$0xff] %vm1432_vm0, %v1423_v18  ;;  %v1454_v18 = vld [vmem:[#allocation5 + $0x28] sm:$0xff]  ;;  %v1555_v37 = vmul.f32 %v3122_v21, %v1459_v51  ;;  %v1463_v21 = vld [vmem:[#allocation5 + $0x70] sm:$0xff] }
 0x46c   : > { %v1401_v33 = vpop.xlane.xlu0 %1400 }
 0x46d   : > { %v1424_v22 = vadd.f32 %v1401_v33, %v1376_v8 }
 0x46e   : > { %v1732_v61 = vld [vmem:[#allocation4 + $0x30] sm:$0xff] (!%p2106_p13) }
 0x46f   : > { %1441 = vst.msk [vmem:[#allocation4 + $0x40] sm:$0xff] %vm1432_vm0, %v1424_v22  ;;  %v1550_v22 = vmul.f32 %v3112_v43, %v1454_v18  ;;  %v1556_v43 = vmul.f32 %v3124_v23, %v1460_v53 }
 0x470   : > { %v1403_v45 = vpop.xlane.xlu1 %1402 }
 0x471   : > { %v1425_v25 = vadd.f32 %v1403_v45, %v1377_v59 }
 0x473   : > { %1442 = vst.msk [vmem:[#allocation4 + $0x48] sm:$0xff] %vm1432_vm0, %v1425_v25 }
 0x474   : > { %v1405_v0 = vpop.xlane.xlu0 %1404 }
 0x475   : > { %v1426_v29 = vadd.f32 %v1405_v0, %v1378_v11  ;;  %v1457_v0 = vld [vmem:[#allocation5 + $0x40] sm:$0xff] }
 0x476   : > { %v1553_v55 = vmul.f32 %v3118_v3, %v1457_v0  ;;  %v1464_v3 = vld [vmem:[#allocation5 + $0x78] sm:$0xff]  ;;  %v3179_v18 = vld [vmem:[#allocation4 + $0x40] sm:$0xff] (!%p2106_p13) }
 0x477   : > { %1443 = vst.msk [vmem:[#allocation4 + $0x50] sm:$0xff] %vm1432_vm0, %v1426_v29  ;;  %v1458_v29 = vld [vmem:[#allocation5 + $0x48] sm:$0xff] }
 0x478   : > { %v1407_v30 = vpop.xlane.xlu1 %1406 }
 0x479   : > { %v1427_v31 = vadd.f32 %v1407_v30, %v1379_v12 }
 0x47a   : > { %v3177_v28 = vld [vmem:[#allocation4 + $0x48] sm:$0xff] (!%p2106_p13) }
 0x47b   : > { %1444 = vst.msk [vmem:[#allocation4 + $0x58] sm:$0xff] %vm1432_vm0, %v1427_v31  ;;  %v1554_v31 = vmul.f32 %v3120_v47, %v1458_v29 }
 0x47c   : > { %v1409_v34 = vpop.xlane.xlu0 %1408 }
 0x47d   : > { %v1428_v39 = vadd.f32 %v1409_v34, %v1380_v13 }
 0x47f   : > { %1445 = vst.msk [vmem:[#allocation4 + $0x60] sm:$0xff] %vm1432_vm0, %v1428_v39 }
 0x480   : > { %v1411_v62 = vpop.xlane.xlu1 %1410 }
 0x481   : > { %v1429_v44 = vadd.f32 %v1411_v62, %v1381_v14 }
 0x483   : > { %1446 = vst.msk [vmem:[#allocation4 + $0x68] sm:$0xff] %vm1432_vm0, %v1429_v44 }
 0x484   : > { %v1413_v10 = vpop.xlane.xlu0 %1412 }
 0x485   : > { %v1430_v49 = vadd.f32 %v1413_v10, %v1382_v16  ;;  %v1462_v16 = vld [vmem:[#allocation5 + $0x68] sm:$0xff]  ;;  %v1557_v10 = vmul.f32 %v3126_v24, %v1461_v41  ;;  %v1726_v24 = vld [vmem:[#allocation4] sm:$0xff] (!%p2106_p13) }
 0x487   : > { %1447 = vst.msk [vmem:[#allocation4 + $0x70] sm:$0xff] %vm1432_vm0, %v1430_v49 }
 0x488   : > { %v1415_v48 = vpop.xlane.xlu1 %1414 }
 0x489   : > { %v1431_v40 = vadd.f32 %v1415_v48, %v1383_v17  ;;  %v1558_v48 = vmul.f32 %v3129_v27, %v1462_v16  ;;  %v1742_v27 = vmax.f32 (!%p2106_p13), %v1726_v24, 1e-16 }
 0x48b   : > { %1448 = vst.msk [vmem:[#allocation4 + $0x78] sm:$0xff] %vm1432_vm0, %v1431_v40 }
 0x48c   : > { %v1538_v62 = vpop.permute.xlu1 %1537  ;;  %v1543_v44 = vpop.permute.xlu0 %1542 }
 0x48d   : > { %v1559_v23 = vmul.f32 %v1538_v62, %v1463_v21  ;;  %v1560_v47 = vmul.f32 %v1543_v44, %v1464_v3 }
 0x48e   : > { %v3196_v29 = vld [vmem:[#allocation4 + $0x70] sm:$0xff] (!%p2106_p13) }
 0x48f   : > { %v1756_v62 = vmax.f32 (!%p2106_p13), %v3196_v29, 1e-16 }
 0x492   : > { %v3193_v51 = vld [vmem:[#allocation4 + $0x78] sm:$0xff] (!%p2106_p13) }
 0x4a0   : > { %v2232_v6 = vpop.f32.mrb[0].mxu0 }
 0x4a1   : > { %v1676_v54 = vadd.f32 %v2232_v6, %v1547_v7  ;;  %v1611_v56 = vpop.f32.mrb[1].mxu0  ;;  %v1728_v7 = vld [vmem:[#allocation4 + $0x10] sm:$0xff] (!%p2106_p13)  ;;  %v2503_v6 = vmov (!%p2106_p13), 0  }
 0x4a2   : > { %v1674_v38 = vadd.f32 %v1611_v56, %v1545_v46  ;;  %v2233_v60 = vpop.f32.mrb[2].mxu0  ;;  %v1729_v46 = vld [vmem:[#allocation4 + $0x18] sm:$0xff] (!%p2106_p13)  ;;  %2409 = vset.pattern.permute.xlu1 (!%p2106_p13), %v2503_v6  ;;  %2408 = vset.pattern.permute.xlu0 (!%p2106_p13), %v2503_v6  ;;  %v1727_v56 = vld [vmem:[#allocation4 + $0x8] sm:$0xff] (!%p2106_p13) }
 0x4a3   : > { %1692 = vst [vmem:[#allocation5 + $0x10] sm:$0xff] %v1676_v54  ;;  %v1677_v58 = vadd.f32 %v2233_v60, %v1548_v20  ;;  %v1614_v26 = vpop.f32.mrb[3].mxu0  ;;  %v1744_v20 = vmax.f32 (!%p2106_p13), %v1728_v7, 1e-16  ;;  %v1745_v54 = vmax.f32 (!%p2106_p13), %v1729_v46, 1e-16 }
 0x4a4   : > { %1690 = vst [vmem:[#allocation5] sm:$0xff] %v1674_v38  ;;  %v1675_v2 = vadd.f32 %v1614_v26, %v1546_v1  ;;  %v1731_v1 = vld [vmem:[#allocation4 + $0x28] sm:$0xff] (!%p2106_p13)  ;;  %v1730_v38 = vld [vmem:[#allocation4 + $0x20] sm:$0xff] (!%p2106_p13)  ;;  %v1743_v60 = vmax.f32 (!%p2106_p13), %v1727_v56, 1e-16 }
 0x4a5   : > { %1693 = vst [vmem:[#allocation5 + $0x18] sm:$0xff] %v1677_v58  ;;  %2410 = vrcp.f32 (!%p2106_p13), %v1744_v20  ;;  %v1747_v58 = vmax.f32 (!%p2106_p13), %v1731_v1, 1e-16  ;;  %v1746_v26 = vmax.f32 (!%p2106_p13), %v1730_v38, 1e-16 }
 0x4a6   : > { %1691 = vst [vmem:[#allocation5 + $0x8] sm:$0xff] %v1675_v2  ;;  %2412 = vrcp.f32 (!%p2106_p13), %v1742_v27  ;;  %v1733_v2 = vld [vmem:[#allocation4 + $0x38] sm:$0xff] (!%p2106_p13) }
 0x4a7   : > { %2414 = vrcp.f32 (!%p2106_p13), %v1745_v54  ;;  %v1749_v63 = vmax.f32 (!%p2106_p13), %v1733_v2, 1e-16 }
 0x4a8   : > { %2416 = vrcp.f32 (!%p2106_p13), %v1743_v60 }
 0x4a9   : > { %2418 = vrcp.f32 (!%p2106_p13), %v1747_v58 }
 0x4aa   : > { %2420 = vrcp.f32 (!%p2106_p13), %v1746_v26 }
 0x4ab   : > { %2422 = vrcp.f32 (!%p2106_p13), %v1749_v63  ;;  %v1822_v29 = vld [vmem:[#allocation5] sm:$0xff] (!%p2106_p13) }
 0x4b0   : > { %v2236_v8 = vpop.f32.mrb[4].mxu0 }
 0x4b1   : > { %v1680_v33 = vadd.f32 %v2236_v8, %v1551_v9  ;;  %v1627_v32 = vpop.f32.mrb[5].mxu0  ;;  %v1748_v9 = vmax.f32 (!%p2106_p13), %v1732_v61, 1e-16  ;;  %v1750_v8 = vmax.f32 (!%p2106_p13), %v3179_v18, 1e-16 }
 0x4b2   : > { %v1678_v59 = vadd.f32 %v1627_v32, %v1549_v36  ;;  %v2237_v45 = vpop.f32.mrb[6].mxu0  ;;  %v1751_v36 = vmax.f32 (!%p2106_p13), %v3177_v28, 1e-16 }
 0x4b3   : > { %1696 = vst [vmem:[#allocation5 + $0x30] sm:$0xff] %v1680_v33  ;;  %v1681_v4 = vadd.f32 %v2237_v45, %v1552_v50  ;;  %v1630_v25 = vpop.f32.mrb[7].mxu0  ;;  %v3183_v50 = vld [vmem:[#allocation4 + $0x58] sm:$0xff] (!%p2106_p13)  ;;  %v3185_v33 = vld [vmem:[#allocation4 + $0x50] sm:$0xff] (!%p2106_p13)  ;;  %2424 = vrcp.f32 (!%p2106_p13), %v1748_v9  ;;  %v2411_v45 = vpop.eup (!%p2106_p13), %2410 }
 0x4b4   : > { %1694 = vst [vmem:[#allocation5 + $0x20] sm:$0xff] %v1678_v59  ;;  %v1679_v11 = vadd.f32 %v1630_v25, %v1550_v22  ;;  %2426 = vrcp.f32 (!%p2106_p13), %v1751_v36  ;;  %v1753_v32 = vmax.f32 (!%p2106_p13), %v3183_v50, 1e-16  ;;  %v1752_v22 = vmax.f32 (!%p2106_p13), %v3185_v33, 1e-16  ;;  %v3189_v59 = vld [vmem:[#allocation4 + $0x68] sm:$0xff] (!%p2106_p13)  ;;  %v2413_v25 = vpop.eup (!%p2106_p13), %2412 }
 0x4b5   : > { %1697 = vst [vmem:[#allocation5 + $0x38] sm:$0xff] %v1681_v4  ;;  %2428 = vrcp.f32 (!%p2106_p13), %v1750_v8  ;;  %v3191_v4 = vld [vmem:[#allocation4 + $0x60] sm:$0xff] (!%p2106_p13)  ;;  %v2415_v0 = vpop.eup (!%p2106_p13), %2414  ;;  %v1774_v53 = vmul.f32 (!%p2106_p13), %v2413_v25, %v1742_v27 }
 0x4b6   : > { %1695 = vst [vmem:[#allocation5 + $0x28] sm:$0xff] %v1679_v11  ;;  %v1776_v11 = vmul.f32 (!%p2106_p13), %v2411_v45, %v1744_v20  ;;  %2430 = vrcp.f32 (!%p2106_p13), %v1753_v32 }
 0x4b7   : > { %2432 = vrcp.f32 (!%p2106_p13), %v1752_v22 }
 0x4c0   : > { %v2240_v12 = vpop.f32.mrb[0].mxu1 }
 0x4c1   : > { %v1684_v30 = vadd.f32 %v2240_v12, %v1555_v37  ;;  %v1643_v57 = vpop.f32.mrb[1].mxu1  ;;  %v1755_v37 = vmax.f32 (!%p2106_p13), %v3189_v59, 1e-16  ;;  %v1792_v12 = vsub.f32 (!%p2106_p13), 2.0, %v1776_v11 }
 0x4c2   : > { %v1682_v13 = vadd.f32 %v1643_v57, %v1553_v55  ;;  %v2241_v34 = vpop.f32.mrb[2].mxu1  ;;  %v2417_v55 = vpop.eup (!%p2106_p13), %2416 }
 0x4c3   : > { %1700 = vst [vmem:[#allocation5 + $0x50] sm:$0xff] %v1684_v30  ;;  %v1685_v35 = vadd.f32 %v2241_v34, %v1556_v43  ;;  %v1646_v39 = vpop.f32.mrb[3].mxu1  ;;  %v1777_v43 = vmul.f32 (!%p2106_p13), %v2415_v0, %v1745_v54  ;;  %v1754_v30 = vmax.f32 (!%p2106_p13), %v3191_v4, 1e-16  ;;  %v2419_v57 = vpop.eup (!%p2106_p13), %2418  ;;  %v1757_v34 = vmax.f32 (!%p2106_p13), %v3193_v51, 1e-16 }
 0x4c4   : > { %1698 = vst [vmem:[#allocation5 + $0x40] sm:$0xff] %v1682_v13  ;;  %v1683_v14 = vadd.f32 %v1646_v39, %v1554_v31  ;;  %v1790_v31 = vsub.f32 (!%p2106_p13), 2.0, %v1774_v53  ;;  %v1775_v13 = vmul.f32 (!%p2106_p13), %v2417_v55, %v1743_v60  ;;  %v1808_v39 = vmul.f32 (!%p2106_p13), %v2411_v45, %v1792_v12 }
 0x4c5   : > { %1701 = vst [vmem:[#allocation5 + $0x58] sm:$0xff] %v1685_v35  ;;  %v2421_v35 = vpop.eup (!%p2106_p13), %2420  ;;  %v1779_v21 = vmul.f32 (!%p2106_p13), %v2419_v57, %v1747_v58  ;;  %2434 = vrcp.f32 (!%p2106_p13), %v1755_v37 }
 0x4c6   : > { %1699 = vst [vmem:[#allocation5 + $0x48] sm:$0xff] %v1683_v14  ;;  %v1793_v14 = vsub.f32 (!%p2106_p13), 2.0, %v1777_v43  ;;  %v2423_v41 = vpop.eup (!%p2106_p13), %2422  ;;  %v1806_v3 = vmul.f32 (!%p2106_p13), %v2413_v25, %v1790_v31  ;;  %v1791_v44 = vsub.f32 (!%p2106_p13), 2.0, %v1775_v13  ;;  %v1778_v16 = vmul.f32 (!%p2106_p13), %v2421_v35, %v1746_v26  ;;  %1850 = vperm.xlu1 (!%p2106_p13), %2409, %v1808_v39   ;;  %v1825_v31 = vld [vmem:[#allocation5 + $0x18] sm:$0xff] (!%p2106_p13) }
 0x4c7   : > { %2436 = vrcp.f32 (!%p2106_p13), %v1754_v30 }
 0x4c8   : > { %1840 = vperm.xlu0 (!%p2106_p13), %2408, %v1806_v3   ;;  %2438 = vrcp.f32 (!%p2106_p13), %v1757_v34 }
 0x4c9   : > { %2440 = vrcp.f32 (!%p2106_p13), %v1756_v62 }
 0x4d0   : > { %v2244_v42 = vpop.f32.mrb[4].mxu1  ;;  %1725 = sbr.rel (%p2106_p13) target bundleno = 1395 (0x573), region = 89 }
 0x4d1   : > { %v1688_v49 = vadd.f32 %v2244_v42, %v1559_v23  ;;  %v1659_v17 = vpop.f32.mrb[5].mxu1  ;;  %v2425_v23 = vpop.eup (!%p2106_p13), %2424  ;;  %v1795_v42 = vsub.f32 (!%p2106_p13), 2.0, %v1779_v21 }
 0x4d2   : > { %v1686_v40 = vadd.f32 %v1659_v17, %v1557_v10  ;;  %v2245_v52 = vpop.f32.mrb[6].mxu1  ;;  %v1809_v10 = vmul.f32 (!%p2106_p13), %v2415_v0, %v1793_v14  ;;  %v1807_v17 = vmul.f32 (!%p2106_p13), %v2417_v55, %v1791_v44  ;;  %v3208_v55 = vld [vmem:[%s3267_s4] ss:$0 sm:$0xff] (!%p2106_p13)  ;;  %v1827_v44 = vld [vmem:[#allocation5 + $0x28] sm:$0xff] (!%p2106_p13) }
 0x4d3   : > { %1704 = vst [vmem:[#allocation5 + $0x70] sm:$0xff] %v1688_v49  ;;  %v1689_v19 = vadd.f32 %v2245_v52, %v1560_v47  ;;  %v1662_v15 = vpop.f32.mrb[7].mxu1  ;;  %v1781_v47 = vmul.f32 (!%p2106_p13), %v2423_v41, %v1749_v63  ;;  %v2427_v49 = vpop.eup (!%p2106_p13), %2426 }
 0x4d4   : > { %1702 = vst [vmem:[#allocation5 + $0x60] sm:$0xff] %v1686_v40  ;;  %v1687_v5 = vadd.f32 %v1662_v15, %v1558_v48  ;;  %v1794_v48 = vsub.f32 (!%p2106_p13), 2.0, %v1778_v16  ;;  %v1780_v40 = vmul.f32 (!%p2106_p13), %v2425_v23, %v1748_v9  ;;  %v2429_v52 = vpop.eup (!%p2106_p13), %2428  ;;  %1855 = vperm.xlu1 (!%p2106_p13), %2409, %v1809_v10   ;;  %1845 = vperm.xlu0 (!%p2106_p13), %2408, %v1807_v17  }
 0x4d5   : > { %1705 = vst [vmem:[#allocation5 + $0x78] sm:$0xff] %v1689_v19  ;;  %v1811_v19 = vmul.f32 (!%p2106_p13), %v2419_v57, %v1795_v42  ;;  %v1797_v15 = vsub.f32 (!%p2106_p13), 2.0, %v1781_v47  ;;  %v2431_v7 = vpop.eup (!%p2106_p13), %2430  ;;  %v1782_v6 = vmul.f32 (!%p2106_p13), %v2429_v52, %v1750_v8 }
 0x4d6   : > { %1703 = vst [vmem:[#allocation5 + $0x68] sm:$0xff] %v1687_v5  ;;  %v1783_v5 = vmul.f32 (!%p2106_p13), %v2427_v49, %v1751_v36  ;;  %v1810_v24 = vmul.f32 (!%p2106_p13), %v2421_v35, %v1794_v48  ;;  %v1796_v46 = vsub.f32 (!%p2106_p13), 2.0, %v1780_v40  ;;  %v2433_v20 = vpop.eup (!%p2106_p13), %2432  ;;  %v1785_v56 = vmul.f32 (!%p2106_p13), %v2431_v7, %v1753_v32 }
 0x4d7   : > { %v1813_v27 = vmul.f32 %v2423_v41, %v1797_v15  ;;  %v2435_v1 = vpop.eup %2434  ;;  %v1798_v60 = vsub.f32 2.0, %v1782_v6  ;;  %v1784_v58 = vmul.f32 %v2433_v20, %v1752_v22  ;;  %v1828_v15 = vld [vmem:[#allocation5 + $0x30] sm:$0xff] }
 0x4d8   : > { %1865 = vperm.xlu1 %2409, %v1811_v19   ;;  %v1799_v54 = vsub.f32 2.0, %v1783_v5  ;;  %1860 = vperm.xlu0 %2408, %v1810_v24   ;;  %v1812_v38 = vmul.f32 %v2425_v23, %v1796_v46  ;;  %v2437_v26 = vpop.eup %2436  ;;  %v1801_v61 = vsub.f32 2.0, %v1785_v56  ;;  %v1787_v28 = vmul.f32 %v2435_v1, %v1755_v37  ;;  %v1824_v37 = vld [vmem:[#allocation5 + $0x10] sm:$0xff]  ;;  %v1826_v23 = vld [vmem:[#allocation5 + $0x20] sm:$0xff] }
 0x4d9   : > { %v2439_v63 = vpop.eup %2438  ;;  %v1814_v9 = vmul.f32 %v2429_v52, %v1798_v60  ;;  %v1800_v18 = vsub.f32 2.0, %v1784_v58  ;;  %v1786_v36 = vmul.f32 %v2437_v26, %v1754_v30  ;;  %v1829_v52 = vld [vmem:[#allocation5 + $0x38] sm:$0xff] }
 0x4da   : > { %v1815_v2 = vmul.f32 %v2427_v49, %v1799_v54  ;;  %v2441_v8 = vpop.eup %2440  ;;  %v1817_v50 = vmul.f32 %v2431_v7, %v1801_v61  ;;  %v1803_v32 = vsub.f32 2.0, %v1787_v28  ;;  %v1789_v59 = vmul.f32 %v2439_v63, %v1757_v34  ;;  %v1823_v34 = vld [vmem:[#allocation5 + $0x8] sm:$0xff] }
 0x4db   : > { %v1816_v45 = vmul.f32 %v2433_v20, %v1800_v18  ;;  %v1802_v4 = vsub.f32 2.0, %v1786_v36  ;;  %v1788_v33 = vmul.f32 %v2441_v8, %v1756_v62  ;;  %v1831_v54 = vld [vmem:[#allocation5 + $0x48] sm:$0xff]  ;;  %v1832_v18 = vld [vmem:[#allocation5 + $0x50] sm:$0xff] }
 0x4dc   : > { %1875 = vperm.xlu1 %2409, %v1813_v27   ;;  %1870 = vperm.xlu0 %2408, %v1812_v38   ;;  %v1819_v22 = vmul.f32 %v2435_v1, %v1803_v32  ;;  %v1805_v25 = vsub.f32 2.0, %v1789_v59  ;;  %v1830_v1 = vld [vmem:[#allocation5 + $0x40] sm:$0xff] }
 0x4dd   : > { %v1818_v11 = vmul.f32 %v2437_v26, %v1802_v4  ;;  %v1804_v51 = vsub.f32 2.0, %v1788_v33  ;;  %v1835_v33 = vld [vmem:[#allocation5 + $0x68] sm:$0xff] }
 0x4de   : > { %v1821_v0 = vmul.f32 %v2439_v63, %v1805_v25  ;;  %v1833_v63 = vld [vmem:[#allocation5 + $0x58] sm:$0xff]  ;;  %v1834_v25 = vld [vmem:[#allocation5 + $0x60] sm:$0xff] }
 0x4df   : > { %v1820_v53 = vmul.f32 %v2441_v8, %v1804_v51 }
 0x4e0   : > { %1885 = vperm.xlu1 %2409, %v1815_v2   ;;  %1880 = vperm.xlu0 %2408, %v1814_v9  }
 0x4e4   : > { %1895 = vperm.xlu1 %2409, %v1817_v50   ;;  %1890 = vperm.xlu0 %2408, %v1816_v45  }
 0x4e8   : > { %1905 = vperm.xlu1 %2409, %v1819_v22   ;;  %1900 = vperm.xlu0 %2408, %v1818_v11  }
 0x4ec   : > { %1915 = vperm.xlu1 %2409, %v1821_v0   ;;  %1910 = vperm.xlu0 %2408, %v1820_v53  }
 0x545   : > { %v1851_v12 = vpop.permute.xlu1 %1850 }
 0x546   : > { %v1920_v43 = vmul.f32 %v1851_v12, %v1824_v37 }
 0x547   : > { %v1841_v30 = vpop.permute.xlu0 %1840 }
 0x548   : > { %v1918_v57 = vmul.f32 %v1841_v30, %v1822_v29  ;;  %v1943_v13 = vadd.f32 %v3208_v55, %v1920_v43  ;;  %v1837_v43 = vld [vmem:[#allocation5 + $0x78] sm:$0xff] }
 0x54a   : > { %v1941_v35 = vadd.f32 %v3208_v55, %v1918_v57  ;;  %v1959_v14 = vmax.f32 %v1943_v13, 0.0  ;;  %v1836_v57 = vld [vmem:[#allocation5 + $0x70] sm:$0xff] }
 0x54c   : > { %v1957_v41 = vmax.f32 %v1941_v35, 0.0  ;;  %1975 = vst [vmem:[%s2630_s14 + $0x10] sm:$0xff] %v1959_v14 }
 0x54e   : > { %1973 = vst [vmem:[%s2630_s14] sm:$0xff] %v1957_v41 }
 0x553   : > { %v1856_v39 = vpop.permute.xlu1 %1855  ;;  %v1846_v62 = vpop.permute.xlu0 %1845 }
 0x554   : > { %v1921_v21 = vmul.f32 %v1856_v39, %v1825_v31  ;;  %v1919_v3 = vmul.f32 %v1846_v62, %v1823_v34 }
 0x556   : > { %v1944_v16 = vadd.f32 %v3208_v55, %v1921_v21  ;;  %v1942_v10 = vadd.f32 %v3208_v55, %v1919_v3 }
 0x557   : > { %v1866_v42 = vpop.permute.xlu1 %1865  ;;  %v1861_v17 = vpop.permute.xlu0 %1860 }
 0x558   : > { %v1960_v47 = vmax.f32 %v1944_v16, 0.0  ;;  %v1923_v49 = vmul.f32 %v1866_v42, %v1827_v44  ;;  %v1958_v48 = vmax.f32 %v1942_v10, 0.0  ;;  %v1922_v40 = vmul.f32 %v1861_v17, %v1826_v23 }
 0x55a   : > { %1976 = vst [vmem:[%s2630_s14 + $0x18] sm:$0xff] %v1960_v47  ;;  %v1946_v19 = vadd.f32 %v3208_v55, %v1923_v49  ;;  %1974 = vst [vmem:[%s2630_s14 + $0x8] sm:$0xff] %v1958_v48  ;;  %v1945_v5 = vadd.f32 %v3208_v55, %v1922_v40 }
 0x55b   : > { %v1876_v7 = vpop.permute.xlu1 %1875  ;;  %v1871_v6 = vpop.permute.xlu0 %1870 }
 0x55c   : > { %v1962_v24 = vmax.f32 %v1946_v19, 0.0  ;;  %v1925_v46 = vmul.f32 %v1876_v7, %v1829_v52  ;;  %v1961_v20 = vmax.f32 %v1945_v5, 0.0  ;;  %v1924_v27 = vmul.f32 %v1871_v6, %v1828_v15 }
 0x55e   : > { %1978 = vst [vmem:[%s2630_s14 + $0x28] sm:$0xff] %v1962_v24  ;;  %v1948_v56 = vadd.f32 %v3208_v55, %v1925_v46  ;;  %1977 = vst [vmem:[%s2630_s14 + $0x20] sm:$0xff] %v1961_v20  ;;  %v1947_v38 = vadd.f32 %v3208_v55, %v1924_v27 }
 0x55f   : > { %v1886_v60 = vpop.permute.xlu1 %1885  ;;  %v1881_v2 = vpop.permute.xlu0 %1880 }
 0x560   : > { %v1964_v58 = vmax.f32 %v1948_v56, 0.0  ;;  %v1927_v26 = vmul.f32 %v1886_v60, %v1831_v54  ;;  %v1963_v61 = vmax.f32 %v1947_v38, 0.0  ;;  %v1926_v28 = vmul.f32 %v1881_v2, %v1830_v1 }
 0x562   : > { %1980 = vst [vmem:[%s2630_s14 + $0x38] sm:$0xff] %v1964_v58  ;;  %v1950_v9 = vadd.f32 %v3208_v55, %v1927_v26  ;;  %1979 = vst [vmem:[%s2630_s14 + $0x30] sm:$0xff] %v1963_v61  ;;  %v1949_v36 = vadd.f32 %v3208_v55, %v1926_v28 }
 0x563   : > { %v1896_v8 = vpop.permute.xlu1 %1895  ;;  %v1891_v59 = vpop.permute.xlu0 %1890 }
 0x564   : > { %v1966_v50 = vmax.f32 %v1950_v9, 0.0  ;;  %v1929_v32 = vmul.f32 %v1896_v8, %v1833_v63  ;;  %v1965_v45 = vmax.f32 %v1949_v36, 0.0  ;;  %v1928_v4 = vmul.f32 %v1891_v59, %v1832_v18 }
 0x566   : > { %1982 = vst [vmem:[%s2630_s14 + $0x48] sm:$0xff] %v1966_v50  ;;  %v1952_v22 = vadd.f32 %v3208_v55, %v1929_v32  ;;  %1981 = vst [vmem:[%s2630_s14 + $0x40] sm:$0xff] %v1965_v45  ;;  %v1951_v11 = vadd.f32 %v3208_v55, %v1928_v4 }
 0x567   : > { %v1906_v51 = vpop.permute.xlu1 %1905  ;;  %v1901_v37 = vpop.permute.xlu0 %1900 }
 0x568   : > { %v1968_v0 = vmax.f32 %v1952_v22, 0.0  ;;  %v1931_v53 = vmul.f32 %v1906_v51, %v1835_v33  ;;  %v1967_v29 = vmax.f32 %v1951_v11, 0.0  ;;  %v1930_v12 = vmul.f32 %v1901_v37, %v1834_v25 }
 0x56a   : > { %1984 = vst [vmem:[%s2630_s14 + $0x58] sm:$0xff] %v1968_v0  ;;  %v1954_v30 = vadd.f32 %v3208_v55, %v1931_v53  ;;  %1983 = vst [vmem:[%s2630_s14 + $0x50] sm:$0xff] %v1967_v29  ;;  %v1953_v31 = vadd.f32 %v3208_v55, %v1930_v12 }
 0x56b   : > { %v1916_v13 = vpop.permute.xlu1 %1915  ;;  %v1911_v39 = vpop.permute.xlu0 %1910 }
 0x56c   : > { %v1970_v34 = vmax.f32 %v1954_v30, 0.0  ;;  %v1933_v35 = vmul.f32 %v1916_v13, %v1837_v43  ;;  %v1969_v14 = vmax.f32 %v1953_v31, 0.0  ;;  %v1932_v21 = vmul.f32 %v1911_v39, %v1836_v57 }
 0x56e   : > { %1986 = vst [vmem:[%s2630_s14 + $0x68] sm:$0xff] %v1970_v34  ;;  %v1956_v62 = vadd.f32 %v3208_v55, %v1933_v35  ;;  %1985 = vst [vmem:[%s2630_s14 + $0x60] sm:$0xff] %v1969_v14  ;;  %v1955_v41 = vadd.f32 %v3208_v55, %v1932_v21 }
 0x570   : > { %v1972_v3 = vmax.f32 %v1956_v62, 0.0  ;;  %v1971_v44 = vmax.f32 %v1955_v41, 0.0 }
 0x572   : > { %1988 = vst [vmem:[%s2630_s14 + $0x78] sm:$0xff] %v1972_v3  ;;  %1987 = vst [vmem:[%s2630_s14 + $0x70] sm:$0xff] %v1971_v44 }
 0x573 PF: > { %s15_s24 = sadd.s32 1, %s2496_s24   ;;  %s3269_s18 = smov %s2476_s19 }
 0x574   : > { %p12_p0 = scmp.ge.s32.totalorder %s15_s24, 6   ;;  %s3270_s19 = smov %s2585_s6 }
 0x575   : > { %s3271_s20 = smov %s2488_s22  ;;  %s3272_s21 = smov %s2492_s23 }
 0x576   : > { %s3273_s22 = smov %s3276_s25  ;;  %s3274_s23 = smov %s3280_s26 }
 0x577   :  { %14 = sbr.rel (!%p12_p0) target bundleno = 4 (0x4), region = 130 }

// kernel: model_forward_pallas.10
= control target key start
LH: loop header
LB: loop body
LE: loop exit
PB: predicated region body
PF: predicated region fallthrough
CT: control target
= control target key end

     0   :  { %s2502_s18 = smov 0   ;;  %s2504_s19 = smov 0   ;;  %s3160_s0 = inlined_call_operand.vmem [shape: f32[256,128], index: 0, kind: input, shape index: {}]   ;;  %s3161_s1 = inlined_call_operand.vmem [shape: f32[256,128], index: 1, kind: input, shape index: {}]   ;;  %s3162_s2 = inlined_call_operand.vmem [shape: f32[128,128], index: 2, kind: input, shape index: {}]   ;;  %s3163_s3 = inlined_call_operand.vmem [shape: bf16[256,256], index: 3, kind: input, shape index: {}]   ;;  %s3164_s4 = inlined_call_operand.vmem [shape: f32[1,128], index: 4, kind: input, shape index: {}]   ;;  %s3165_s5 = inlined_call_operand.vmem [shape: f32[256,128], index: 5, kind: output, shape index: {}]  }
   0x1   :  { %s2506_s20 = smov 0   ;;  %s2508_s21 = smov 0  }
   0x2   :  { %s2510_s22 = smov 0   ;;  %s2512_s23 = smov 0  }
   0x3   :  { %s2514_s24 = smov 0  }
   0x4 LB: > { %s24_s25 = sadd.s32 1, %s2456_s22  ;;  %s27_s26 = sadd.s32 1, %s2460_s23  ;;  %s2464_s24 = sphi %s2514_s24, %s15_s24   ;;  %s2460_s23 = sphi %s2512_s23, %s3171_s23   ;;  %s2456_s22 = sphi %s2510_s22, %s3170_s22   ;;  %s2452_s21 = sphi %s2508_s21, %s3169_s21   ;;  %s2448_s20 = sphi %s2506_s20, %s3168_s20   ;;  %s2444_s19 = sphi %s2504_s19, %s3167_s19   ;;  %s2440_s18 = sphi %s2502_s18, %s3166_s18  }
   0x5   : > { %p25_p0 = scmp.ge.s32.totalorder %s24_s25, 2  ;;  %p116_p1 = scmp.ne.s32.totalorder %s2444_s19, %s2440_s18 }
   0x6   : > { %p117_p2 = scmp.eq.s32.totalorder %s2464_s24, 0  ;;  %s109_s30 = sadd.s32 1, %s2444_s19 }
   0x7   : > { %s3173_s25 = smov (%p25_p0, %s24_s25), 0  ;;  %s3175_s26 = smov (!%p25_p0, %s27_s26), %s2460_s23 }
   0x8   : > { %p118_p3 = por %p117_p2, %p116_p1  ;;  %p29_p4 = scmp.ge.s32.totalorder %s3175_s26, 2 }
   0x9   : > { %s105_s27 = ssub.s32 %s2456_s22, %s3173_s25  ;;  %p2060_p6 = scmp.ge.s32.totalorder %s2464_s24, 4 }
   0xa   : > { %s3177_s26 = smov (%p29_p4, %s3175_s26), 0 }
   0xb   : > { %s104_s28 = ssub.s32 %s2460_s23, %s3177_s26  ;;  %195 = sbr.rel (%p2060_p6) target bundleno = 34 (0x22), region = 24 }
   0xc   : > { %s106_s29 = sor.u32 %s105_s27, %s104_s28 }
   0xd   : > { %p107_p5 = scmp.eq.s32.totalorder %s106_s29, 0 }
   0xf   : > { %s2553_s6 = scalar_select %p107_p5, %s2444_s19, %s109_s30  }
  0x12   : > { %216 = sbr.rel (!%p118_p3) target bundleno = 34 (0x22), region = 36  ;;  %s218_s7 = sand.u32 (%p118_p3), 1, %s2444_s19  }
  0x13   : > { %s2078_s8 = sshll.u32 (%p118_p3), %s2460_s23, 5  ;;  %s2061_s9 = sshll.u32 (%p118_p3), %s218_s7, 6 }
  0x14   : > { %s223_s10 = sadd.s32 (%p118_p3), %s2456_s22, %s2078_s8  ;;  %s220_s15 = scalar_lea.vmem (%p118_p3), [#allocation6], %s2061_s9 }
  0x15   : > { %s2064_s11 = sshll.u32 (%p118_p3), %s223_s10, 2 }
  0x16   : > { %s2562_s14 = scalar_lea.vmem (%p118_p3), %s3163_s3, %s2064_s11 }
  0x17   : > { %v241_v0 = vld [vmem:[%s2562_s14] sm:$0xf] (%p118_p3)  ;;  %v243_v1 = vld [vmem:[%s2562_s14 + $0x8] sm:$0xf] (%p118_p3)  ;;  %v245_v2 = vld [vmem:[%s2562_s14 + $0x10] sm:$0xf] (%p118_p3) }
  0x18   : > { %242 = vst [vmem:[%s220_s15] sm:$0xf] (%p118_p3), %v241_v0  ;;  %244 = vst [vmem:[%s220_s15 + $0x4] sm:$0xf] (%p118_p3), %v243_v1  ;;  %v247_v3 = vld [vmem:[%s2562_s14 + $0x18] sm:$0xf] (%p118_p3) }
  0x19   : > { %246 = vst [vmem:[%s220_s15 + $0x8] sm:$0xf] %v245_v2  ;;  %v249_v4 = vld [vmem:[%s2562_s14 + $0x20] sm:$0xf]  ;;  %v251_v5 = vld [vmem:[%s2562_s14 + $0x28] sm:$0xf] }
  0x1a   : > { %248 = vst [vmem:[%s220_s15 + $0xc] sm:$0xf] %v247_v3  ;;  %250 = vst [vmem:[%s220_s15 + $0x10] sm:$0xf] %v249_v4  ;;  %v253_v6 = vld [vmem:[%s2562_s14 + $0x30] sm:$0xf] }
  0x1b   : > { %252 = vst [vmem:[%s220_s15 + $0x14] sm:$0xf] %v251_v5  ;;  %v255_v7 = vld [vmem:[%s2562_s14 + $0x38] sm:$0xf]  ;;  %v257_v8 = vld [vmem:[%s2562_s14 + $0x40] sm:$0xf] }
  0x1c   : > { %254 = vst [vmem:[%s220_s15 + $0x18] sm:$0xf] %v253_v6  ;;  %256 = vst [vmem:[%s220_s15 + $0x1c] sm:$0xf] %v255_v7  ;;  %v259_v9 = vld [vmem:[%s2562_s14 + $0x48] sm:$0xf] }
  0x1d   : > { %258 = vst [vmem:[%s220_s15 + $0x20] sm:$0xf] %v257_v8  ;;  %v261_v10 = vld [vmem:[%s2562_s14 + $0x50] sm:$0xf]  ;;  %v263_v11 = vld [vmem:[%s2562_s14 + $0x58] sm:$0xf] }
  0x1e   : > { %260 = vst [vmem:[%s220_s15 + $0x24] sm:$0xf] %v259_v9  ;;  %262 = vst [vmem:[%s220_s15 + $0x28] sm:$0xf] %v261_v10  ;;  %v265_v12 = vld [vmem:[%s2562_s14 + $0x60] sm:$0xf] }
  0x1f   : > { %264 = vst [vmem:[%s220_s15 + $0x2c] sm:$0xf] %v263_v11  ;;  %v267_v13 = vld [vmem:[%s2562_s14 + $0x68] sm:$0xf]  ;;  %v269_v14 = vld [vmem:[%s2562_s14 + $0x70] sm:$0xf] }
  0x20   : > { %266 = vst [vmem:[%s220_s15 + $0x30] sm:$0xf] %v265_v12  ;;  %268 = vst [vmem:[%s220_s15 + $0x34] sm:$0xf] %v267_v13  ;;  %v271_v15 = vld [vmem:[%s2562_s14 + $0x78] sm:$0xf] }
  0x21   : > { %270 = vst [vmem:[%s220_s15 + $0x38] sm:$0xf] %v269_v14  ;;  %272 = vst [vmem:[%s220_s15 + $0x3c] sm:$0xf] %v271_v15 }
  0x22 PF: > { %p2065_p7 = scmp.ge.s32.totalorder %s2464_s24, 1  ;;  %p326_p8 = scmp.lt.s32.totalorder %s2464_s24, 5 }
  0x24   : > { %p327_p9 = pnand %p2065_p7, %p326_p8 }
  0x25   : > { %s333_s16 = sand.u32 (!%p327_p9), 1, %s2440_s18   ;;  %s2067_s17 = sshll.u32 (!%p327_p9), %s2448_s20, 4 }
  0x26   : > { %330 = sbr.rel (%p327_p9) target bundleno = 1302 (0x516), region = 77  ;;  %s2066_s27 = sshll.u32 (!%p327_p9), %s333_s16, 6 }
  0x27   : > { %p371_p10 = scmp.lt.s32.totalorder (!%p327_p9), %s2067_s17, 31  ;;  %s2069_s28 = sshll.u32 (!%p327_p9), %s2452_s21, 4 }
  0x28   : > { %p377_p11 = scmp.lt.s32.totalorder (!%p327_p9), %s2069_s28, 31  ;;  %s2600_s21 = scalar_lea.vmem (!%p327_p9), [#allocation6], %s2066_s27 }
  0x29   : > { %p2073_p12 = scmp.ne.s32.totalorder (!%p327_p9), %s2448_s20, 0 }
  0x2d   : > { %s3179_s17 = smov (!%p371_p10, %s2067_s17), 31  ;;  %s3181_s28 = smov (!%p377_p11, %s2069_s28), 31 }
  0x2e   : > { %s2068_s29 = sshll.u32 %s3179_s17, 3  ;;  %s2070_s9 = sshll.u32 %s3181_s28, 3  ;;  %v418_v16 = vld [vmem:[%s3162_s2] sm:$0xff] (!%p2073_p12)  ;;  %v419_v17 = vld [vmem:[%s3162_s2 + $0x8] sm:$0xff] (!%p2073_p12)  ;;  %v420_v18 = vld [vmem:[%s3162_s2 + $0x10] sm:$0xff] (!%p2073_p12)  ;;  %vm603_vm0 = vcmask (!%p2073_p12), 7168  }
  0x2f   : > { %s2588_s8 = scalar_lea.vmem %s3160_s0, %s2068_s29  ;;  %s2593_s12 = scalar_lea.vmem %s3161_s1, %s2070_s9  ;;  %v434_v19 = vpack.c.bf16 (!%p2073_p12), %v419_v17, %v418_v16  ;;  %v421_v20 = vld [vmem:[%s3162_s2 + $0x18] sm:$0xff] (!%p2073_p12)  ;;  %v422_v22 = vld [vmem:[%s3162_s2 + $0x20] sm:$0xff] (!%p2073_p12)  ;;  %v423_v23 = vld [vmem:[%s3162_s2 + $0x28] sm:$0xff] (!%p2073_p12)  ;;  %v2466_v0 = vmov (!%p2073_p12), -1e+20   ;;  %v2467_v1 = vmov (!%p2073_p12), 0.0  }
  0x30   : > { %s2598_s14 = scalar_lea.vmem %s3165_s5, %s2070_s9  ;;  %393 = sbr.rel (%p2073_p12) target bundleno = 437 (0x1b5), region = 85  ;;  %v435_v21 = vpack.c.bf16 (!%p2073_p12), %v421_v20, %v420_v18  ;;  %v436_v24 = vpack.c.bf16 (!%p2073_p12), %v423_v23, %v422_v22  ;;  %v424_v25 = vld [vmem:[%s3162_s2 + $0x30] sm:$0xff] (!%p2073_p12)  ;;  %v394_v26 = vld [vmem:[%s2593_s12] sm:$0xff] (!%p2073_p12)  ;;  %v395_v27 = vld [vmem:[%s2593_s12 + $0x8] sm:$0xff] (!%p2073_p12)  ;;  %620 = vst.msk [vmem:[#allocation3] sm:$0xff] (!%p2073_p12), %vm603_vm0, %v2466_v0 }
  0x31   : > { %2150 = vmatprep.subr.bf16.mxu0 (!%p2073_p12), %v434_v19  ;;  %2214 = vmatprep.subr.bf16.mxu1 (!%p2073_p12), %v434_v19  ;;  %v425_v28 = vld [vmem:[%s3162_s2 + $0x38] sm:$0xff] (!%p2073_p12)  ;;  %v410_v29 = vpack.c.bf16 (!%p2073_p12), %v395_v27, %v394_v26  ;;  %v402_v30 = vld [vmem:[%s2593_s12 + $0x40] sm:$0xff] (!%p2073_p12)  ;;  %v403_v31 = vld [vmem:[%s2593_s12 + $0x48] sm:$0xff] (!%p2073_p12)  ;;  %621 = vst.msk [vmem:[#allocation3 + $0x8] sm:$0xff] (!%p2073_p12), %vm603_vm0, %v2466_v0 }
  0x32   : > { %2151 = vmatpush3.bf16.msra.mxu0 (!%p2073_p12), %v434_v19  ;;  %2222 = vmatpush3.bf16.msra.mxu1 (!%p2073_p12), %v434_v19  ;;  %v414_v32 = vpack.c.bf16 (!%p2073_p12), %v403_v31, %v402_v30  ;;  %v437_v33 = vpack.c.bf16 (!%p2073_p12), %v425_v28, %v424_v25  ;;  %v426_v34 = vld [vmem:[%s3162_s2 + $0x40] sm:$0xff] (!%p2073_p12)  ;;  %v427_v35 = vld [vmem:[%s3162_s2 + $0x48] sm:$0xff] (!%p2073_p12)  ;;  %v428_v37 = vld [vmem:[%s3162_s2 + $0x50] sm:$0xff] (!%p2073_p12)  ;;  %622 = vst.msk [vmem:[#allocation3 + $0x10] sm:$0xff] (!%p2073_p12), %vm603_vm0, %v2466_v0 }
  0x33   : > { %2152 = vmatprep.subr.bf16.mxu0 (!%p2073_p12), %v435_v21  ;;  %2215 = vmatprep.subr.bf16.mxu1 (!%p2073_p12), %v435_v21  ;;  %v438_v36 = vpack.c.bf16 (!%p2073_p12), %v427_v35, %v426_v34  ;;  %v429_v38 = vld [vmem:[%s3162_s2 + $0x58] sm:$0xff] (!%p2073_p12)  ;;  %v430_v40 = vld [vmem:[%s3162_s2 + $0x60] sm:$0xff] (!%p2073_p12)  ;;  %v431_v41 = vld [vmem:[%s3162_s2 + $0x68] sm:$0xff] (!%p2073_p12)  ;;  %623 = vst.msk [vmem:[#allocation3 + $0x18] sm:$0xff] (!%p2073_p12), %vm603_vm0, %v2466_v0 }
  0x34   : > { %2166 = vmatprep.mubr.bf16.mxu0 (!%p2073_p12), %v410_v29  ;;  %2174 = vmatprep.mubr.bf16.mxu1 (!%p2073_p12), %v414_v32  ;;  %v439_v39 = vpack.c.bf16 (!%p2073_p12), %v429_v38, %v428_v37  ;;  %v440_v42 = vpack.c.bf16 (!%p2073_p12), %v431_v41, %v430_v40  ;;  %v432_v43 = vld [vmem:[%s3162_s2 + $0x70] sm:$0xff] (!%p2073_p12)  ;;  %v433_v44 = vld [vmem:[%s3162_s2 + $0x78] sm:$0xff] (!%p2073_p12)  ;;  %v398_v50 = vld [vmem:[%s2593_s12 + $0x20] sm:$0xff] (!%p2073_p12)  ;;  %624 = vst.msk [vmem:[#allocation3 + $0x20] sm:$0xff] (!%p2073_p12), %vm603_vm0, %v2466_v0 }
  0x35   : > { %v441_v45 = vpack.c.bf16 (!%p2073_p12), %v433_v44, %v432_v43  ;;  %v396_v46 = vld [vmem:[%s2593_s12 + $0x10] sm:$0xff] (!%p2073_p12)  ;;  %v397_v47 = vld [vmem:[%s2593_s12 + $0x18] sm:$0xff] (!%p2073_p12)  ;;  %v399_v51 = vld [vmem:[%s2593_s12 + $0x28] sm:$0xff] (!%p2073_p12)  ;;  %625 = vst.msk [vmem:[#allocation3 + $0x28] sm:$0xff] (!%p2073_p12), %vm603_vm0, %v2466_v0 }
  0x36   : > { %2153 = vmatpush3.bf16.msra.mxu0 (!%p2073_p12), %v435_v21  ;;  %2223 = vmatpush3.bf16.msra.mxu1 (!%p2073_p12), %v435_v21  ;;  %v404_v48 = vld [vmem:[%s2593_s12 + $0x50] sm:$0xff] (!%p2073_p12)  ;;  %v405_v49 = vld [vmem:[%s2593_s12 + $0x58] sm:$0xff] (!%p2073_p12)  ;;  %v406_v52 = vld [vmem:[%s2593_s12 + $0x60] sm:$0xff] (!%p2073_p12)  ;;  %v411_v54 = vpack.c.bf16 (!%p2073_p12), %v397_v47, %v396_v46  ;;  %v412_v56 = vpack.c.bf16 (!%p2073_p12), %v399_v51, %v398_v50  ;;  %626 = vst.msk [vmem:[#allocation3 + $0x30] sm:$0xff] (!%p2073_p12), %vm603_vm0, %v2466_v0 }
  0x37   : > { %2154 = vmatprep.subr.bf16.mxu0 %v436_v24  ;;  %2216 = vmatprep.subr.bf16.mxu1 %v436_v24  ;;  %v407_v53 = vld [vmem:[%s2593_s12 + $0x68] sm:$0xff]  ;;  %v415_v55 = vpack.c.bf16 %v405_v49, %v404_v48  ;;  %v400_v58 = vld [vmem:[%s2593_s12 + $0x30] sm:$0xff]  ;;  %v401_v59 = vld [vmem:[%s2593_s12 + $0x38] sm:$0xff]  ;;  %627 = vst.msk [vmem:[#allocation3 + $0x38] sm:$0xff] %vm603_vm0, %v2466_v0 }
  0x38   : > { %v416_v57 = vpack.c.bf16 %v407_v53, %v406_v52  ;;  %v408_v60 = vld [vmem:[%s2593_s12 + $0x70] sm:$0xff]  ;;  %v409_v61 = vld [vmem:[%s2593_s12 + $0x78] sm:$0xff]  ;;  %v413_v62 = vpack.c.bf16 %v401_v59, %v400_v58  ;;  %628 = vst.msk [vmem:[#allocation3 + $0x40] sm:$0xff] %vm603_vm0, %v2466_v0  ;;  %629 = vst.msk [vmem:[#allocation3 + $0x48] sm:$0xff] %vm603_vm0, %v2466_v0  ;;  %s2468_s12 = smov 1  }
  0x39   : > { %v417_v63 = vpack.c.bf16 %v409_v61, %v408_v60  ;;  %630 = vst.msk [vmem:[#allocation3 + $0x50] sm:$0xff] %vm603_vm0, %v2466_v0  ;;  %631 = vst.msk [vmem:[#allocation3 + $0x58] sm:$0xff] %vm603_vm0, %v2466_v0 }
  0x3a   : > { %2155 = vmatpush3.bf16.msra.mxu0 %v436_v24  ;;  %2224 = vmatpush3.bf16.msra.mxu1 %v436_v24  ;;  %632 = vst.msk [vmem:[#allocation3 + $0x60] sm:$0xff] %vm603_vm0, %v2466_v0  ;;  %633 = vst.msk [vmem:[#allocation3 + $0x68] sm:$0xff] %vm603_vm0, %v2466_v0 }
  0x3b   : > { %2156 = vmatprep.subr.bf16.mxu0 %v437_v33  ;;  %2217 = vmatprep.subr.bf16.mxu1 %v437_v33  ;;  %634 = vst.msk [vmem:[#allocation3 + $0x70] sm:$0xff] %vm603_vm0, %v2466_v0  ;;  %635 = vst.msk [vmem:[#allocation3 + $0x78] sm:$0xff] %vm603_vm0, %v2466_v0 }
  0x3c   : > { %636 = vst.msk [vmem:[#allocation4] sm:$0xff] %vm603_vm0, %v2467_v1  ;;  %637 = vst.msk [vmem:[#allocation4 + $0x8] sm:$0xff] %vm603_vm0, %v2467_v1 }
  0x3d   : > { %638 = vst.msk [vmem:[#allocation4 + $0x10] sm:$0xff] %vm603_vm0, %v2467_v1  ;;  %639 = vst.msk [vmem:[#allocation4 + $0x18] sm:$0xff] %vm603_vm0, %v2467_v1 }
  0x3e   : > { %2157 = vmatpush3.bf16.msra.mxu0 %v437_v33  ;;  %2225 = vmatpush3.bf16.msra.mxu1 %v437_v33  ;;  %640 = vst.msk [vmem:[#allocation4 + $0x20] sm:$0xff] %vm603_vm0, %v2467_v1  ;;  %641 = vst.msk [vmem:[#allocation4 + $0x28] sm:$0xff] %vm603_vm0, %v2467_v1 }
  0x3f   : > { %2158 = vmatprep.subr.bf16.mxu0 %v438_v36  ;;  %2218 = vmatprep.subr.bf16.mxu1 %v438_v36  ;;  %642 = vst.msk [vmem:[#allocation4 + $0x30] sm:$0xff] %vm603_vm0, %v2467_v1  ;;  %643 = vst.msk [vmem:[#allocation4 + $0x38] sm:$0xff] %vm603_vm0, %v2467_v1 }
  0x40   : > { %644 = vst.msk [vmem:[#allocation4 + $0x40] sm:$0xff] %vm603_vm0, %v2467_v1  ;;  %645 = vst.msk [vmem:[#allocation4 + $0x48] sm:$0xff] %vm603_vm0, %v2467_v1 }
  0x41   : > { %646 = vst.msk [vmem:[#allocation4 + $0x50] sm:$0xff] %vm603_vm0, %v2467_v1  ;;  %647 = vst.msk [vmem:[#allocation4 + $0x58] sm:$0xff] %vm603_vm0, %v2467_v1 }
  0x42   : > { %2159 = vmatpush3.bf16.msra.mxu0 %v438_v36  ;;  %2226 = vmatpush3.bf16.msra.mxu1 %v438_v36  ;;  %648 = vst.msk [vmem:[#allocation4 + $0x60] sm:$0xff] %vm603_vm0, %v2467_v1  ;;  %649 = vst.msk [vmem:[#allocation4 + $0x68] sm:$0xff] %vm603_vm0, %v2467_v1 }
  0x43   : > { %2160 = vmatprep.subr.bf16.mxu0 %v439_v39  ;;  %2219 = vmatprep.subr.bf16.mxu1 %v439_v39  ;;  %650 = vst.msk [vmem:[#allocation4 + $0x70] sm:$0xff] %vm603_vm0, %v2467_v1  ;;  %651 = vst.msk [vmem:[#allocation4 + $0x78] sm:$0xff] %vm603_vm0, %v2467_v1 }
  0x44   : > { %652 = vst [vmem:[#allocation5] sm:$0xff] %v2467_v1  ;;  %653 = vst [vmem:[#allocation5 + $0x8] sm:$0xff] %v2467_v1 }
  0x45   : > { %654 = vst [vmem:[#allocation5 + $0x10] sm:$0xff] %v2467_v1  ;;  %655 = vst [vmem:[#allocation5 + $0x18] sm:$0xff] %v2467_v1 }
  0x46   : > { %2161 = vmatpush3.bf16.msra.mxu0 %v439_v39  ;;  %2227 = vmatpush3.bf16.msra.mxu1 %v439_v39  ;;  %656 = vst [vmem:[#allocation5 + $0x20] sm:$0xff] %v2467_v1  ;;  %657 = vst [vmem:[#allocation5 + $0x28] sm:$0xff] %v2467_v1 }
  0x47   : > { %2162 = vmatprep.subr.bf16.mxu0 %v440_v42  ;;  %2220 = vmatprep.subr.bf16.mxu1 %v440_v42  ;;  %658 = vst [vmem:[#allocation5 + $0x30] sm:$0xff] %v2467_v1  ;;  %659 = vst [vmem:[#allocation5 + $0x38] sm:$0xff] %v2467_v1 }
  0x48   : > { %660 = vst [vmem:[#allocation5 + $0x40] sm:$0xff] %v2467_v1  ;;  %661 = vst [vmem:[#allocation5 + $0x48] sm:$0xff] %v2467_v1 }
  0x49   : > { %662 = vst [vmem:[#allocation5 + $0x50] sm:$0xff] %v2467_v1  ;;  %663 = vst [vmem:[#allocation5 + $0x58] sm:$0xff] %v2467_v1 }
  0x4a   : > { %2163 = vmatpush3.bf16.msra.mxu0 %v440_v42  ;;  %2228 = vmatpush3.bf16.msra.mxu1 %v440_v42  ;;  %664 = vst [vmem:[#allocation5 + $0x60] sm:$0xff] %v2467_v1  ;;  %665 = vst [vmem:[#allocation5 + $0x68] sm:$0xff] %v2467_v1 }
  0x4b   : > { %2164 = vmatprep.subr.bf16.mxu0 %v441_v45  ;;  %2221 = vmatprep.subr.bf16.mxu1 %v441_v45  ;;  %666 = vst [vmem:[#allocation5 + $0x70] sm:$0xff] %v2467_v1  ;;  %667 = vst [vmem:[#allocation5 + $0x78] sm:$0xff] %v2467_v1 }
  0x4e   : > { %2165 = vmatpush3.bf16.msra.mxu0 %v441_v45  ;;  %2229 = vmatpush3.bf16.msra.mxu1 %v441_v45 }
  0x51   : > { %2167 = vmatmul.mubr.bf16.vlgmr.msra.gmra.mrb[0].mxu0 %v411_v54  ;;  %2175 = vmatmul.mubr.bf16.vlgmr.msra.gmra.mrb[0].mxu1 %v415_v55 }
  0x52   : > { %2170 = vmatprep.mubr.bf16.mxu0 %v412_v56  ;;  %2178 = vmatprep.mubr.bf16.mxu1 %v416_v57 }
  0x59   : > { %2171 = vmatmul.mubr.bf16.gmra.mrb[4].mxu0 %v413_v62  ;;  %2179 = vmatmul.mubr.bf16.gmra.mrb[4].mxu1 %v417_v63 }
 0x124   : > { %v2168_v2 = vpop.f32.mrb[0].mxu0  ;;  %v2176_v3 = vpop.f32.mrb[0].mxu1 }
 0x125   : > { %575 = vrot.lane.b32.xlu0 %v2176_v3, %s2468_s12  ;;  %v508_v4 = vpop.f32.mrb[1].mxu1  ;;  %559 = vrot.lane.b32.xlu1 %v2168_v2, %s2468_s12  ;;  %v476_v5 = vpop.f32.mrb[1].mxu0 }
 0x126   : > { %v2169_v6 = vpop.f32.mrb[2].mxu0  ;;  %v2177_v7 = vpop.f32.mrb[2].mxu1 }
 0x127   : > { %v479_v8 = vpop.f32.mrb[3].mxu0  ;;  %v511_v9 = vpop.f32.mrb[3].mxu1 }
 0x129   : > { %555 = vrot.lane.b32.xlu0 %v476_v5, %s2468_s12  ;;  %561 = vrot.lane.b32.xlu1 %v2169_v6, %s2468_s12 }
 0x12c   : > { %v2172_v10 = vpop.f32.mrb[4].mxu0  ;;  %v2180_v11 = vpop.f32.mrb[4].mxu1 }
 0x12d   : > { %571 = vrot.lane.b32.xlu0 %v508_v4, %s2468_s12  ;;  %577 = vrot.lane.b32.xlu1 %v2177_v7, %s2468_s12  ;;  %v492_v12 = vpop.f32.mrb[5].mxu0  ;;  %v524_v13 = vpop.f32.mrb[5].mxu1 }
 0x12e   : > { %v2173_v14 = vpop.f32.mrb[6].mxu0  ;;  %v2181_v15 = vpop.f32.mrb[6].mxu1 }
 0x12f   : > { %v495_v16 = vpop.f32.mrb[7].mxu0  ;;  %v527_v17 = vpop.f32.mrb[7].mxu1 }
 0x131   : > { %573 = vrot.lane.b32.xlu1 %v511_v9, %s2468_s12  ;;  %557 = vrot.lane.b32.xlu0 %v479_v8, %s2468_s12 }
 0x135   : > { %567 = vrot.lane.b32.xlu0 %v2172_v10, %s2468_s12  ;;  %569 = vrot.lane.b32.xlu1 %v2173_v14, %s2468_s12 }
 0x139   : > { %563 = vrot.lane.b32.xlu0 %v492_v12, %s2468_s12  ;;  %565 = vrot.lane.b32.xlu1 %v495_v16, %s2468_s12 }
 0x13d   : > { %579 = vrot.lane.b32.xlu0 %v524_v13, %s2468_s12  ;;  %581 = vrot.lane.b32.xlu1 %v527_v17, %s2468_s12 }
 0x141   : > { %583 = vrot.lane.b32.xlu0 %v2180_v11, %s2468_s12  ;;  %585 = vrot.lane.b32.xlu1 %v2181_v15, %s2468_s12 }
 0x197   : > { %v576_v18 = vpop.permute.xlu0 %575  ;;  %v560_v19 = vpop.permute.xlu1 %559 }
 0x198   : > { %614 = vst.msk [vmem:[#allocation2 + $0x50] sm:$0xff] %vm603_vm0, %v576_v18  ;;  %606 = vst.msk [vmem:[#allocation2 + $0x10] sm:$0xff] %vm603_vm0, %v560_v19 }
 0x19b   : > { %v556_v20 = vpop.permute.xlu0 %555  ;;  %v562_v21 = vpop.permute.xlu1 %561 }
 0x19c   : > { %604 = vst.msk [vmem:[#allocation2] sm:$0xff] %vm603_vm0, %v556_v20  ;;  %607 = vst.msk [vmem:[#allocation2 + $0x18] sm:$0xff] %vm603_vm0, %v562_v21 }
 0x19f   : > { %v572_v22 = vpop.permute.xlu0 %571  ;;  %v578_v23 = vpop.permute.xlu1 %577 }
 0x1a0   : > { %612 = vst.msk [vmem:[#allocation2 + $0x40] sm:$0xff] %vm603_vm0, %v572_v22  ;;  %615 = vst.msk [vmem:[#allocation2 + $0x58] sm:$0xff] %vm603_vm0, %v578_v23 }
 0x1a3   : > { %v574_v24 = vpop.permute.xlu1 %573  ;;  %v558_v25 = vpop.permute.xlu0 %557 }
 0x1a4   : > { %613 = vst.msk [vmem:[#allocation2 + $0x48] sm:$0xff] %vm603_vm0, %v574_v24  ;;  %605 = vst.msk [vmem:[#allocation2 + $0x8] sm:$0xff] %vm603_vm0, %v558_v25 }
 0x1a7   : > { %v568_v26 = vpop.permute.xlu0 %567  ;;  %v570_v27 = vpop.permute.xlu1 %569 }
 0x1a8   : > { %610 = vst.msk [vmem:[#allocation2 + $0x30] sm:$0xff] %vm603_vm0, %v568_v26  ;;  %611 = vst.msk [vmem:[#allocation2 + $0x38] sm:$0xff] %vm603_vm0, %v570_v27 }
 0x1ab   : > { %v564_v28 = vpop.permute.xlu0 %563  ;;  %v566_v29 = vpop.permute.xlu1 %565 }
 0x1ac   : > { %608 = vst.msk [vmem:[#allocation2 + $0x20] sm:$0xff] %vm603_vm0, %v564_v28  ;;  %609 = vst.msk [vmem:[#allocation2 + $0x28] sm:$0xff] %vm603_vm0, %v566_v29 }
 0x1af   : > { %v580_v30 = vpop.permute.xlu0 %579  ;;  %v582_v31 = vpop.permute.xlu1 %581 }
 0x1b0   : > { %616 = vst.msk [vmem:[#allocation2 + $0x60] sm:$0xff] %vm603_vm0, %v580_v30  ;;  %617 = vst.msk [vmem:[#allocation2 + $0x68] sm:$0xff] %vm603_vm0, %v582_v31 }
 0x1b3   : > { %v584_v32 = vpop.permute.xlu0 %583  ;;  %v586_v33 = vpop.permute.xlu1 %585 }
 0x1b4   : > { %618 = vst.msk [vmem:[#allocation2 + $0x70] sm:$0xff] %vm603_vm0, %v584_v32  ;;  %619 = vst.msk [vmem:[#allocation2 + $0x78] sm:$0xff] %vm603_vm0, %v586_v33 }
 0x1b5 PF: > { %v670_v34 = vld [vmem:[%s2588_s8 + $0x10] sm:$0xff]  ;;  %v668_v35 = vld [vmem:[%s2588_s8] sm:$0xff]  ;;  %v2469_v36 = vmov 127   ;;  %v669_v37 = vld [vmem:[%s2588_s8 + $0x8] sm:$0xff]  ;;  %v2470_v61 = vmov 0   ;;  %v876_v12 = vlaneseq  ;;  %vm887_vm1 = vcmask 130112  }
 0x1b6   : > { %2309 = vset.pattern.permute.xlu1 %v2469_v36  ;;  %2308 = vset.pattern.permute.xlu0 %v2469_v36  ;;  %v671_v38 = vld [vmem:[%s2588_s8 + $0x18] sm:$0xff]  ;;  %v1537_v39 = vpack.c.bf16 %v669_v37, %v668_v35  ;;  %v673_v41 = vld [vmem:[%s2588_s8 + $0x28] sm:$0xff]  ;;  %v672_v42 = vld [vmem:[%s2588_s8 + $0x20] sm:$0xff]  ;;  %vm894_vm2 = vcmask 195712   ;;  %vm901_vm3 = vcmask 261312   ;;  %vm908_vm4 = vcmask 326912  }
 0x1b7   : > { %835 = vperm.xlu1 %2309, %v670_v34   ;;  %829 = vperm.xlu0 %2308, %v668_v35   ;;  %v1538_v40 = vpack.c.bf16 %v671_v38, %v670_v34  ;;  %v1539_v43 = vpack.c.bf16 %v673_v41, %v672_v42  ;;  %v675_v44 = vld [vmem:[%s2588_s8 + $0x38] sm:$0xff]  ;;  %v674_v45 = vld [vmem:[%s2588_s8 + $0x30] sm:$0xff]  ;;  %v677_v47 = vld [vmem:[%s2588_s8 + $0x48] sm:$0xff]  ;;  %v2731_v13 = vand.u32 127, %v876_v12  ;;  %v2733_v14 = vshrl.u32 %v876_v12, 7  ;;  %p2074_p13 = scmp.ne.s32.totalorder %s2448_s20, 1 }
 0x1b8   : > { %2182 = vmatprep.subr.bf16.mxu0 %v1537_v39  ;;  %2230 = vmatprep.subr.bf16.mxu1 %v1537_v39  ;;  %v1540_v46 = vpack.c.bf16 %v675_v44, %v674_v45  ;;  %v676_v48 = vld [vmem:[%s2588_s8 + $0x40] sm:$0xff]  ;;  %v679_v50 = vld [vmem:[%s2588_s8 + $0x58] sm:$0xff]  ;;  %v678_v51 = vld [vmem:[%s2588_s8 + $0x50] sm:$0xff]  ;;  %vm915_vm5 = vcmask 392512   ;;  %vm922_vm6 = vcmask 458112   ;;  %vm929_vm7 = vcmask 523712  }
 0x1b9   : > { %2183 = vmatpush3.bf16.msra.mxu0 %v1537_v39  ;;  %2238 = vmatpush3.bf16.msra.mxu1 %v1537_v39  ;;  %v1541_v49 = vpack.c.bf16 %v677_v47, %v676_v48  ;;  %v1542_v52 = vpack.c.bf16 %v679_v50, %v678_v51  ;;  %v681_v53 = vld [vmem:[%s2588_s8 + $0x68] sm:$0xff]  ;;  %v680_v54 = vld [vmem:[%s2588_s8 + $0x60] sm:$0xff]  ;;  %v683_v56 = vld [vmem:[%s2588_s8 + $0x78] sm:$0xff]  ;;  %v882_v15 = vadd.s32 4294967288, %v2731_v13  ;;  %v889_v16 = vadd.s32 4294967280, %v2731_v13 }
 0x1ba   : > { %2184 = vmatprep.subr.bf16.mxu0 %v1538_v40  ;;  %2231 = vmatprep.subr.bf16.mxu1 %v1538_v40  ;;  %v1543_v55 = vpack.c.bf16 %v681_v53, %v680_v54  ;;  %v682_v57 = vld [vmem:[%s2588_s8 + $0x70] sm:$0xff]  ;;  %v685_v59 = vld [vmem:[#allocation2 + $0x8] sm:$0xff]  ;;  %v684_v60 = vld [vmem:[#allocation2] sm:$0xff]  ;;  %v896_v17 = vadd.s32 4294967272, %v2731_v13  ;;  %v880_v20 = vsub.s32 %v2731_v13, %v2733_v14  ;;  %v903_v22 = vadd.s32 4294967264, %v2731_v13 }
 0x1bb   : > { %838 = vperm.xlu1 %2309, %v671_v38   ;;  %832 = vperm.xlu0 %2308, %v669_v37   ;;  %v1544_v58 = vpack.c.bf16 %v683_v56, %v682_v57  ;;  %v692_v62 = vld [vmem:[#allocation2 + $0x40] sm:$0xff]  ;;  %v693_v63 = vld [vmem:[#allocation2 + $0x48] sm:$0xff]  ;;  %v686_v0 = vld [vmem:[#allocation2 + $0x10] sm:$0xff]  ;;  %v885_v21 = vsub.s32 %v882_v15, %v2733_v14  ;;  %v892_v23 = vsub.s32 %v889_v16, %v2733_v14  ;;  %v910_v24 = vadd.s32 4294967256, %v2731_v13 }
 0x1bc   : > { %v687_v1 = vld [vmem:[#allocation2 + $0x18] sm:$0xff]  ;;  %v694_v2 = vld [vmem:[#allocation2 + $0x50] sm:$0xff]  ;;  %v688_v4 = vld [vmem:[#allocation2 + $0x20] sm:$0xff]  ;;  %v899_v25 = vsub.s32 %v896_v17, %v2733_v14  ;;  %v906_v30 = vsub.s32 %v903_v22, %v2733_v14  ;;  %v917_v31 = vadd.s32 4294967248, %v2731_v13  ;;  %v924_v34 = vadd.s32 4294967240, %v2731_v13 }
 0x1bd   : > { %2185 = vmatpush3.bf16.msra.mxu0 %v1538_v40  ;;  %2239 = vmatpush3.bf16.msra.mxu1 %v1538_v40  ;;  %v695_v3 = vld [vmem:[#allocation2 + $0x58] sm:$0xff]  ;;  %v689_v5 = vld [vmem:[#allocation2 + $0x28] sm:$0xff]  ;;  %v696_v6 = vld [vmem:[#allocation2 + $0x60] sm:$0xff]  ;;  %v913_v33 = vsub.s32 %v910_v24, %v2733_v14  ;;  %vm936_vm8 = vcmask 589312   ;;  %vm943_vm9 = vcmask 654912   ;;  %vm950_vm10 = vcmask 720512  }
 0x1be   : > { %2186 = vmatprep.subr.bf16.mxu0 %v1539_v43  ;;  %2232 = vmatprep.subr.bf16.mxu1 %v1539_v43  ;;  %v697_v7 = vld [vmem:[#allocation2 + $0x68] sm:$0xff]  ;;  %v690_v8 = vld [vmem:[#allocation2 + $0x30] sm:$0xff]  ;;  %v691_v9 = vld [vmem:[#allocation2 + $0x38] sm:$0xff]  ;;  %vm957_vm11 = vcmask 786112   ;;  %vm964_vm12 = vcmask 851712   ;;  %vm971_vm13 = vcmask 917312  }
 0x1bf   : > { %844 = vperm.xlu1 %2309, %v673_v41   ;;  %841 = vperm.xlu0 %2308, %v672_v42   ;;  %v698_v10 = vld [vmem:[#allocation2 + $0x70] sm:$0xff]  ;;  %v699_v11 = vld [vmem:[#allocation2 + $0x78] sm:$0xff]  ;;  %v920_v42 = vsub.s32 %v917_v31, %v2733_v14  ;;  %vm978_vm14 = vcmask 982912   ;;  %vm985_vm15 = vcmask 1048512  }
 0x1c1   : > { %2187 = vmatpush3.bf16.msra.mxu0 %v1539_v43  ;;  %2240 = vmatpush3.bf16.msra.mxu1 %v1539_v43  ;;  %v931_v43 = vadd.s32 4294967232, %v2731_v13 }
 0x1c2   : > { %2188 = vmatprep.subr.bf16.mxu0 %v1540_v46  ;;  %2233 = vmatprep.subr.bf16.mxu1 %v1540_v46 }
 0x1c3   : > { %850 = vperm.xlu1 %2309, %v675_v44   ;;  %847 = vperm.xlu0 %2308, %v674_v45   ;;  %v927_v45 = vsub.s32 %v924_v34, %v2733_v14 }
 0x1c5   : > { %2189 = vmatpush3.bf16.msra.mxu0 %v1540_v46  ;;  %2241 = vmatpush3.bf16.msra.mxu1 %v1540_v46  ;;  %v938_v46 = vadd.s32 4294967224, %v2731_v13 }
 0x1c6   : > { %2190 = vmatprep.subr.bf16.mxu0 %v1541_v49  ;;  %2234 = vmatprep.subr.bf16.mxu1 %v1541_v49 }
 0x1c7   : > { %856 = vperm.xlu1 %2309, %v677_v47   ;;  %853 = vperm.xlu0 %2308, %v676_v48  }
 0x1c9   : > { %2191 = vmatpush3.bf16.msra.mxu0 %v1541_v49  ;;  %2242 = vmatpush3.bf16.msra.mxu1 %v1541_v49 }
 0x1ca   : > { %2192 = vmatprep.subr.bf16.mxu0 %v1542_v52  ;;  %2235 = vmatprep.subr.bf16.mxu1 %v1542_v52 }
 0x1cb   : > { %862 = vperm.xlu1 %2309, %v679_v50   ;;  %859 = vperm.xlu0 %2308, %v678_v51   ;;  %v934_v51 = vsub.s32 %v931_v43, %v2733_v14 }
 0x1cd   : > { %2193 = vmatpush3.bf16.msra.mxu0 %v1542_v52  ;;  %2243 = vmatpush3.bf16.msra.mxu1 %v1542_v52  ;;  %v945_v52 = vadd.s32 4294967216, %v2731_v13 }
 0x1ce   : > { %2194 = vmatprep.subr.bf16.mxu0 %v1543_v55  ;;  %2236 = vmatprep.subr.bf16.mxu1 %v1543_v55 }
 0x1cf   : > { %868 = vperm.xlu1 %2309, %v681_v53   ;;  %865 = vperm.xlu0 %2308, %v680_v54  }
 0x1d1   : > { %2195 = vmatpush3.bf16.msra.mxu0 %v1543_v55  ;;  %2244 = vmatpush3.bf16.msra.mxu1 %v1543_v55  ;;  %v941_v55 = vsub.s32 %v938_v46, %v2733_v14 }
 0x1d2   : > { %2196 = vmatprep.subr.bf16.mxu0 %v1544_v58  ;;  %2237 = vmatprep.subr.bf16.mxu1 %v1544_v58 }
 0x1d3   : > { %874 = vperm.xlu1 %2309, %v683_v56   ;;  %871 = vperm.xlu0 %2308, %v682_v57   ;;  %v952_v56 = vadd.s32 4294967208, %v2731_v13 }
 0x1d5   : > { %2197 = vmatpush3.bf16.msra.mxu0 %v1544_v58  ;;  %2245 = vmatpush3.bf16.msra.mxu1 %v1544_v58 }
 0x1d7   : > { %2311 = vset.pattern.permute.xlu1 %v2470_v61  ;;  %2310 = vset.pattern.permute.xlu0 %v2470_v61  ;;  %v948_v61 = vsub.s32 %v945_v52, %v2733_v14 }
 0x1d8   : > { %739 = vperm.xlu1 %2311, %v685_v59   ;;  %734 = vperm.xlu0 %2310, %v684_v60  }
 0x1dc   : > { %774 = vperm.xlu1 %2311, %v692_v62   ;;  %779 = vperm.xlu0 %2310, %v693_v63   ;;  %v959_v62 = vadd.s32 4294967200, %v2731_v13 }
 0x1e0   : > { %744 = vperm.xlu1 %2311, %v686_v0   ;;  %749 = vperm.xlu0 %2310, %v687_v1   ;;  %v955_v1 = vsub.s32 %v952_v56, %v2733_v14 }
 0x1e4   : > { %784 = vperm.xlu1 %2311, %v694_v2   ;;  %789 = vperm.xlu0 %2310, %v695_v3   ;;  %v966_v2 = vadd.s32 4294967192, %v2731_v13 }
 0x1e6   : > { %v969_v12 = vsub.s32 %v966_v2, %v2733_v14 }
 0x1e8   : > { %754 = vperm.xlu1 %2311, %v688_v4   ;;  %759 = vperm.xlu0 %2310, %v689_v5  }
 0x1ec   : > { %794 = vperm.xlu1 %2311, %v696_v6   ;;  %799 = vperm.xlu0 %2310, %v697_v7   ;;  %v962_v7 = vsub.s32 %v959_v62, %v2733_v14  ;;  %v2115_v62 = vld [vmem:[%s2600_s21 + $0x28] sm:$0xff]  }
 0x1f0   : > { %764 = vperm.xlu1 %2311, %v690_v8   ;;  %769 = vperm.xlu0 %2310, %v691_v9   ;;  %v980_v8 = vadd.s32 4294967176, %v2731_v13  ;;  %v973_v9 = vadd.s32 4294967184, %v2731_v13 }
 0x1f4   : > { %804 = vperm.xlu1 %2311, %v698_v10   ;;  %809 = vperm.xlu0 %2310, %v699_v11  }
 0x236   : > { %v836_v18 = vpop.permute.xlu1 %835  ;;  %v830_v19 = vpop.permute.xlu0 %829 }
 0x237   : > { %v881_v28 = vrot.slane %v830_v19, %v880_v20  ;;  %v893_v32 = vrot.slane %v836_v18, %v892_v23  ;;  %v983_v19 = vsub.s32 %v980_v8, %v2733_v14  ;;  %v976_v20 = vsub.s32 %v973_v9, %v2733_v14 }
 0x238   : > { %v2101_v9 = vunpack.c.l.bf16 %v2115_v62 }
 0x23a   : > { %v839_v26 = vpop.permute.xlu1 %838  ;;  %v833_v27 = vpop.permute.xlu0 %832 }
 0x23b   : > { %v886_v29 = vrot.slane %v833_v27, %v885_v21  ;;  %v900_v35 = vrot.slane %v839_v26, %v899_v25 }
 0x23d   : > { %v888_v36 = vsel %vm887_vm1, %v886_v29, %v881_v28 }
 0x23e   : > { %v895_v37 = vsel %vm894_vm2, %v893_v32, %v888_v36  ;;  %v845_v38 = vpop.permute.xlu1 %844  ;;  %v842_v39 = vpop.permute.xlu0 %841  ;;  %v2114_v36 = vld [vmem:[%s2600_s21 + $0x20] sm:$0xff]  }
 0x23f   : > { %v902_v40 = vsel %vm901_vm3, %v900_v35, %v895_v37  ;;  %v907_v41 = vrot.slane %v842_v39, %v906_v30  ;;  %v914_v44 = vrot.slane %v845_v38, %v913_v33  ;;  %v2080_v30 = vld [vmem:[%s2600_s21] sm:$0xff]  }
 0x240   : > { %v2082_v34 = vunpack.c.h.bf16 %v2080_v30  ;;  %v2081_v35 = vunpack.c.l.bf16 %v2080_v30 }
 0x241   : > { %v909_v47 = vsel %vm908_vm4, %v907_v41, %v902_v40 }
 0x242   : > { %v851_v48 = vpop.permute.xlu1 %850  ;;  %v848_v49 = vpop.permute.xlu0 %847  ;;  %v916_v54 = vsel %vm915_vm5, %v914_v44, %v909_v47  ;;  %v2097_v47 = vunpack.c.l.bf16 %v2114_v36 }
 0x243   : > { %v921_v50 = vrot.slane %v848_v49, %v920_v42  ;;  %v928_v53 = vrot.slane %v851_v48, %v927_v45  ;;  %v2098_v48 = vunpack.c.h.bf16 %v2114_v36  ;;  %v2111_v49 = vld [vmem:[%s2600_s21 + $0x8] sm:$0xff]  }
 0x245   : > { %v923_v57 = vsel %vm922_vm6, %v921_v50, %v916_v54 }
 0x246   : > { %v857_v58 = vpop.permute.xlu1 %856  ;;  %v854_v59 = vpop.permute.xlu0 %853  ;;  %v930_v0 = vsel %vm929_vm7, %v928_v53, %v923_v57 }
 0x247   : > { %v935_v60 = vrot.slane %v854_v59, %v934_v51  ;;  %v942_v63 = vrot.slane %v857_v58, %v941_v55 }
 0x249   : > { %v937_v3 = vsel %vm936_vm8, %v935_v60, %v930_v0  ;;  %v2085_v60 = vunpack.c.l.bf16 %v2111_v49 }
 0x24a   : > { %v863_v4 = vpop.permute.xlu1 %862  ;;  %v860_v5 = vpop.permute.xlu0 %859  ;;  %v944_v11 = vsel %vm943_vm9, %v942_v63, %v937_v3 }
 0x24b   : > { %v949_v6 = vrot.slane %v860_v5, %v948_v61  ;;  %v956_v10 = vrot.slane %v863_v4, %v955_v1  ;;  %v2086_v61 = vunpack.c.h.bf16 %v2111_v49 }
 0x24d   : > { %v951_v15 = vsel %vm950_vm10, %v949_v6, %v944_v11  ;;  %v2112_v11 = vld [vmem:[%s2600_s21 + $0x10] sm:$0xff]  }
 0x24e   : > { %v869_v16 = vpop.permute.xlu1 %868  ;;  %v866_v17 = vpop.permute.xlu0 %865  ;;  %v958_v22 = vsel %vm957_vm11, %v956_v10, %v951_v15  ;;  %v2102_v10 = vunpack.c.h.bf16 %v2115_v62 }
 0x24f   : > { %v963_v18 = vrot.slane %v866_v17, %v962_v7  ;;  %v970_v21 = vrot.slane %v869_v16, %v969_v12 }
 0x251   : > { %v965_v23 = vsel %vm964_vm12, %v963_v18, %v958_v22 }
 0x252   : > { %v875_v13 = vpop.permute.xlu1 %874  ;;  %v872_v24 = vpop.permute.xlu0 %871  ;;  %v972_v27 = vsel %vm971_vm13, %v970_v21, %v965_v23 }
 0x253   : > { %v984_v25 = vrot.slane %v875_v13, %v983_v19  ;;  %v977_v26 = vrot.slane %v872_v24, %v976_v20  ;;  %v2089_v13 = vunpack.c.l.bf16 %v2112_v11  ;;  %v2090_v24 = vunpack.c.h.bf16 %v2112_v11  ;;  %v1080_v11 = vld [vmem:[#allocation3] sm:$0xff] }
 0x255   : > { %v979_v28 = vsel %vm978_vm14, %v977_v26, %v972_v27 }
 0x256   : > { %v2767_v29 = vsel %vm985_vm15, %v984_v25, %v979_v28  ;;  %v2116_v25 = vld [vmem:[%s2600_s21 + $0x30] sm:$0xff]  }
 0x257   : > { %v740_v31 = vpop.permute.xlu1 %739  ;;  %v735_v32 = vpop.permute.xlu0 %734  ;;  %v2105_v36 = vunpack.c.l.bf16 %v2116_v25 }
 0x258   : > { %v1001_v14 = vadd.f32 %v2767_v29, %v740_v31  ;;  %v1000_v33 = vadd.f32 %v2767_v29, %v735_v32 }
 0x25a   : > { %v1033_v37 = vmul.f32 0.2, %v1001_v14  ;;  %v1032_v38 = vmul.f32 0.2, %v1000_v33  ;;  %vm1017_vm0 = vcmp.gt.f32.partialorder %v1001_v14, 0.0  ;;  %vm1016_vm1 = vcmp.gt.f32.partialorder %v1000_v33, 0.0 }
 0x25b   : > { %v775_v39 = vpop.permute.xlu1 %774  ;;  %v780_v40 = vpop.permute.xlu0 %779 }
 0x25c   : > { %v1008_v41 = vadd.f32 %v2767_v29, %v775_v39  ;;  %v1009_v42 = vadd.f32 %v2767_v29, %v780_v40  ;;  %v1049_v43 = vsel %vm1017_vm0, %v1001_v14, %v1033_v37  ;;  %v1048_v44 = vsel %vm1016_vm1, %v1000_v33, %v1032_v38  ;;  %v2113_v38 = vld [vmem:[%s2600_s21 + $0x18] sm:$0xff]  }
 0x25d   : > { %v2775_v45 = vadd.f32 %v2082_v34, %v1049_v43  ;;  %v2777_v46 = vadd.f32 %v2081_v35, %v1048_v44  ;;  %v2106_v37 = vunpack.c.h.bf16 %v2116_v25  ;;  %vm1400_vm0 = vcmask 7168  }
 0x25e   : > { %v1040_v50 = vmul.f32 0.2, %v1008_v41  ;;  %v1041_v51 = vmul.f32 0.2, %v1009_v42  ;;  %vm1024_vm2 = vcmp.gt.f32.partialorder %v1008_v41, 0.0  ;;  %vm1025_vm3 = vcmp.gt.f32.partialorder %v1009_v42, 0.0 }
 0x25f   : > { %v745_v52 = vpop.permute.xlu1 %744  ;;  %1098 = vmax.xlane.f32.xlu0 %v2775_v45  ;;  %1096 = vmax.xlane.f32.xlu1 %v2777_v46  ;;  %v750_v53 = vpop.permute.xlu0 %749 }
 0x260   : > { %v1002_v54 = vadd.f32 %v2767_v29, %v745_v52  ;;  %v1003_v55 = vadd.f32 %v2767_v29, %v750_v53  ;;  %v1056_v56 = vsel %vm1024_vm2, %v1008_v41, %v1040_v50  ;;  %v1057_v57 = vsel %vm1025_vm3, %v1009_v42, %v1041_v51  ;;  %v2117_v53 = vld [vmem:[%s2600_s21 + $0x38] sm:$0xff]  }
 0x261   : > { %v2784_v58 = vadd.f32 %v2097_v47, %v1056_v56  ;;  %v2786_v59 = vadd.f32 %v2098_v48, %v1057_v57  ;;  %v2093_v51 = vunpack.c.l.bf16 %v2113_v38  ;;  %v2094_v52 = vunpack.c.h.bf16 %v2113_v38 }
 0x262   : > { %v1034_v63 = vmul.f32 0.2, %v1002_v54  ;;  %v1035_v0 = vmul.f32 0.2, %v1003_v55  ;;  %vm1018_vm4 = vcmp.gt.f32.partialorder %v1002_v54, 0.0  ;;  %vm1019_vm5 = vcmp.gt.f32.partialorder %v1003_v55, 0.0 }
 0x263   : > { %v785_v1 = vpop.permute.xlu1 %784  ;;  %1112 = vmax.xlane.f32.xlu0 %v2784_v58  ;;  %1114 = vmax.xlane.f32.xlu1 %v2786_v59  ;;  %v790_v2 = vpop.permute.xlu0 %789 }
 0x264   : > { %v1010_v3 = vadd.f32 %v2767_v29, %v785_v1  ;;  %v1011_v4 = vadd.f32 %v2767_v29, %v790_v2  ;;  %v1050_v5 = vsel %vm1018_vm4, %v1002_v54, %v1034_v63  ;;  %v1051_v6 = vsel %vm1019_vm5, %v1003_v55, %v1035_v0 }
 0x265   : > { %v2793_v7 = vadd.f32 %v2085_v60, %v1050_v5  ;;  %v2795_v8 = vadd.f32 %v2086_v61, %v1051_v6  ;;  %v2109_v2 = vunpack.c.l.bf16 %v2117_v53 }
 0x266   : > { %v1042_v12 = vmul.f32 0.2, %v1010_v3  ;;  %v1043_v15 = vmul.f32 0.2, %v1011_v4  ;;  %vm1026_vm6 = vcmp.gt.f32.partialorder %v1010_v3, 0.0  ;;  %vm1027_vm7 = vcmp.gt.f32.partialorder %v1011_v4, 0.0 }
 0x267   : > { %v755_v16 = vpop.permute.xlu1 %754  ;;  %1100 = vmax.xlane.f32.xlu0 %v2793_v7  ;;  %1102 = vmax.xlane.f32.xlu1 %v2795_v8  ;;  %v760_v17 = vpop.permute.xlu0 %759 }
 0x268   : > { %v1004_v18 = vadd.f32 %v2767_v29, %v755_v16  ;;  %v1005_v19 = vadd.f32 %v2767_v29, %v760_v17  ;;  %v1058_v20 = vsel %vm1026_vm6, %v1010_v3, %v1042_v12  ;;  %v1059_v21 = vsel %vm1027_vm7, %v1011_v4, %v1043_v15  ;;  %v1081_v12 = vld [vmem:[#allocation3 + $0x8] sm:$0xff] }
 0x269   : > { %v2802_v22 = vadd.f32 %v2101_v9, %v1058_v20  ;;  %v2804_v23 = vadd.f32 %v2102_v10, %v1059_v21  ;;  %v2110_v3 = vunpack.c.h.bf16 %v2117_v53  ;;  %v2843_v20 = vld [vmem:[#allocation3 + $0x40] sm:$0xff] }
 0x26a   : > { %v1036_v26 = vmul.f32 0.2, %v1004_v18  ;;  %v1037_v27 = vmul.f32 0.2, %v1005_v19  ;;  %vm1020_vm8 = vcmp.gt.f32.partialorder %v1004_v18, 0.0  ;;  %vm1021_vm9 = vcmp.gt.f32.partialorder %v1005_v19, 0.0 }
 0x26b   : > { %v795_v28 = vpop.permute.xlu1 %794  ;;  %1116 = vmax.xlane.f32.xlu0 %v2802_v22  ;;  %1118 = vmax.xlane.f32.xlu1 %v2804_v23  ;;  %v800_v30 = vpop.permute.xlu0 %799  ;;  %v2879_v53 = vld [vmem:[#allocation3 + $0x60] sm:$0xff] }
 0x26c   : > { %v1012_v31 = vadd.f32 %v2767_v29, %v795_v28  ;;  %v1013_v32 = vadd.f32 %v2767_v29, %v800_v30  ;;  %v1052_v14 = vsel %vm1020_vm8, %v1004_v18, %v1036_v26  ;;  %v1053_v33 = vsel %vm1021_vm9, %v1005_v19, %v1037_v27  ;;  %v2841_v19 = vld [vmem:[#allocation3 + $0x48] sm:$0xff]  ;;  %v1083_v26 = vld [vmem:[#allocation3 + $0x18] sm:$0xff]  ;;  %v1082_v27 = vld [vmem:[#allocation3 + $0x10] sm:$0xff] }
 0x26d   : > { %v2811_v34 = vadd.f32 %v2089_v13, %v1052_v14  ;;  %v2813_v35 = vadd.f32 %v2090_v24, %v1053_v33  ;;  %v2859_v14 = vld [vmem:[#allocation3 + $0x58] sm:$0xff]  ;;  %v2861_v33 = vld [vmem:[#allocation3 + $0x50] sm:$0xff] }
 0x26e   : > { %v1044_v39 = vmul.f32 0.2, %v1012_v31  ;;  %v1045_v40 = vmul.f32 0.2, %v1013_v32  ;;  %vm1028_vm10 = vcmp.gt.f32.partialorder %v1012_v31, 0.0  ;;  %vm1029_vm11 = vcmp.gt.f32.partialorder %v1013_v32, 0.0 }
 0x26f   : > { %v765_v41 = vpop.permute.xlu1 %764  ;;  %1104 = vmax.xlane.f32.xlu0 %v2811_v34  ;;  %1106 = vmax.xlane.f32.xlu1 %v2813_v35  ;;  %v770_v42 = vpop.permute.xlu0 %769 }
 0x270   : > { %v1006_v43 = vadd.f32 %v2767_v29, %v765_v41  ;;  %v1007_v44 = vadd.f32 %v2767_v29, %v770_v42  ;;  %v1060_v47 = vsel %vm1028_vm10, %v1012_v31, %v1044_v39  ;;  %v1061_v48 = vsel %vm1029_vm11, %v1013_v32, %v1045_v40  ;;  %v1085_v40 = vld [vmem:[#allocation3 + $0x28] sm:$0xff]  ;;  %v1084_v41 = vld [vmem:[#allocation3 + $0x20] sm:$0xff] }
 0x271   : > { %v2820_v49 = vadd.f32 %v2105_v36, %v1060_v47  ;;  %v2822_v50 = vadd.f32 %v2106_v37, %v1061_v48 }
 0x272   : > { %v1038_v54 = vmul.f32 0.2, %v1006_v43  ;;  %v1039_v55 = vmul.f32 0.2, %v1007_v44  ;;  %vm1022_vm12 = vcmp.gt.f32.partialorder %v1006_v43, 0.0  ;;  %vm1023_vm13 = vcmp.gt.f32.partialorder %v1007_v44, 0.0 }
 0x273   : > { %v805_v56 = vpop.permute.xlu1 %804  ;;  %1120 = vmax.xlane.f32.xlu0 %v2820_v49  ;;  %1122 = vmax.xlane.f32.xlu1 %v2822_v50  ;;  %v810_v57 = vpop.permute.xlu0 %809 }
 0x274   : > { %v1014_v60 = vadd.f32 %v2767_v29, %v805_v56  ;;  %v1015_v61 = vadd.f32 %v2767_v29, %v810_v57  ;;  %v1054_v62 = vsel %vm1022_vm12, %v1006_v43, %v1038_v54  ;;  %v1055_v63 = vsel %vm1023_vm13, %v1007_v44, %v1039_v55 }
 0x275   : > { %v2829_v0 = vadd.f32 %v2093_v51, %v1054_v62  ;;  %v2831_v1 = vadd.f32 %v2094_v52, %v1055_v63  ;;  %v2877_v52 = vld [vmem:[#allocation3 + $0x68] sm:$0xff] }
 0x276   : > { %v1046_v4 = vmul.f32 0.2, %v1014_v60  ;;  %v1047_v5 = vmul.f32 0.2, %v1015_v61  ;;  %vm1030_vm14 = vcmp.gt.f32.partialorder %v1014_v60, 0.0  ;;  %vm1031_vm15 = vcmp.gt.f32.partialorder %v1015_v61, 0.0 }
 0x277   : > { %1108 = vmax.xlane.f32.xlu0 %v2829_v0  ;;  %1110 = vmax.xlane.f32.xlu1 %v2831_v1 }
 0x278   : > { %v1062_v6 = vsel %vm1030_vm14, %v1014_v60, %v1046_v4  ;;  %v1063_v9 = vsel %vm1031_vm15, %v1015_v61, %v1047_v5 }
 0x279   : > { %v2835_v10 = vadd.f32 %v2109_v2, %v1062_v6  ;;  %v2837_v29 = vadd.f32 %v2110_v3, %v1063_v9  ;;  %v1087_v2 = vld [vmem:[#allocation3 + $0x38] sm:$0xff]  ;;  %v1086_v3 = vld [vmem:[#allocation3 + $0x30] sm:$0xff] }
 0x27b   : > { %1124 = vmax.xlane.f32.xlu0 %v2835_v10  ;;  %1126 = vmax.xlane.f32.xlu1 %v2837_v29 }
 0x2ec   : > { %v1097_v15 = vpop.xlane.xlu1 %1096  ;;  %v1099_v16 = vpop.xlane.xlu0 %1098 }
 0x2ed   : > { %v1128_v17 = vmax.f32 %v1080_v11, %v1097_v15  ;;  %v1129_v18 = vmax.f32 %v1081_v12, %v1099_v16 }
 0x2ef   : > { %1674 = vst.msk [vmem:[#allocation3] sm:$0xff] %vm1400_vm0, %v1128_v17  ;;  %1675 = vst.msk [vmem:[#allocation3 + $0x8] sm:$0xff] %vm1400_vm0, %v1129_v18  ;;  %1146 = vperm.xlu0 %2310, %v1128_v17   ;;  %1151 = vperm.xlu1 %2311, %v1129_v18   ;;  %v1272_v42 = vsub.f32 %v1080_v11, %v1128_v17  ;;  %v1273_v43 = vsub.f32 %v1081_v12, %v1129_v18  ;;  %v2895_v17 = vld [vmem:[#allocation3 + $0x78] sm:$0xff]  ;;  %v2897_v18 = vld [vmem:[#allocation3 + $0x70] sm:$0xff] }
 0x2f0   : > { %v1115_v21 = vpop.xlane.xlu1 %1114  ;;  %v1113_v13 = vpop.xlane.xlu0 %1112 }
 0x2f1   : > { %v2848_v24 = vmax.f32 %v2841_v19, %v1115_v21  ;;  %v2851_v25 = vmax.f32 %v2843_v20, %v1113_v13  ;;  %v1288_v54 = vmul.f32 1.442695, %v1272_v42  ;;  %v1290_v56 = vmul.f32 1.442695, %v1273_v43 }
 0x2f3   : > { %1683 = vst.msk [vmem:[#allocation3 + $0x48] sm:$0xff] %vm1400_vm0, %v2848_v24  ;;  %1682 = vst.msk [vmem:[#allocation3 + $0x40] sm:$0xff] %vm1400_vm0, %v2851_v25  ;;  %1191 = vperm.xlu0 %2310, %v2848_v24   ;;  %1186 = vperm.xlu1 %2311, %v2851_v25   ;;  %2312 = vpow2.f32 %v1288_v54 }
 0x2f4   : > { %v1103_v28 = vpop.xlane.xlu1 %1102  ;;  %v1101_v30 = vpop.xlane.xlu0 %1100  ;;  %2314 = vpow2.f32 %v1290_v56 }
 0x2f5   : > { %v1131_v31 = vmax.f32 %v1083_v26, %v1103_v28  ;;  %v1130_v32 = vmax.f32 %v1082_v27, %v1101_v30 }
 0x2f7   : > { %1677 = vst.msk [vmem:[#allocation3 + $0x18] sm:$0xff] %vm1400_vm0, %v1131_v31  ;;  %1676 = vst.msk [vmem:[#allocation3 + $0x10] sm:$0xff] %vm1400_vm0, %v1130_v32  ;;  %1161 = vperm.xlu0 %2310, %v1131_v31   ;;  %1156 = vperm.xlu1 %2311, %v1130_v32   ;;  %v1275_v55 = vsub.f32 %v1083_v26, %v1131_v31  ;;  %v1274_v57 = vsub.f32 %v1082_v27, %v1130_v32 }
 0x2f8   : > { %v1119_v36 = vpop.xlane.xlu1 %1118  ;;  %v1117_v37 = vpop.xlane.xlu0 %1116 }
 0x2f9   : > { %v2866_v38 = vmax.f32 %v2859_v14, %v1119_v36  ;;  %v2869_v39 = vmax.f32 %v2861_v33, %v1117_v37  ;;  %v1294_v4 = vmul.f32 1.442695, %v1275_v55  ;;  %v1292_v6 = vmul.f32 1.442695, %v1274_v57 }
 0x2fa   : > { %v1281_v36 = vsub.f32 %v2841_v19, %v2848_v24  ;;  %v1280_v19 = vsub.f32 %v2843_v20, %v2851_v25 }
 0x2fb   : > { %1685 = vst.msk [vmem:[#allocation3 + $0x58] sm:$0xff] %vm1400_vm0, %v2866_v38  ;;  %1684 = vst.msk [vmem:[#allocation3 + $0x50] sm:$0xff] %vm1400_vm0, %v2869_v39  ;;  %1201 = vperm.xlu0 %2310, %v2866_v38   ;;  %1196 = vperm.xlu1 %2311, %v2869_v39   ;;  %2316 = vpow2.f32 %v1294_v4 }
 0x2fc   : > { %v1107_v44 = vpop.xlane.xlu1 %1106  ;;  %v1105_v47 = vpop.xlane.xlu0 %1104  ;;  %2318 = vpow2.f32 %v1292_v6 }
 0x2fd   : > { %v1133_v48 = vmax.f32 %v1085_v40, %v1107_v44  ;;  %v1132_v51 = vmax.f32 %v1084_v41, %v1105_v47  ;;  %v2921_v42 = vpop.eup %2312  ;;  %v1306_v44 = vmul.f32 1.442695, %v1281_v36  ;;  %v1283_v47 = vsub.f32 %v2859_v14, %v2866_v38 }
 0x2fe   : > { %v2923_v43 = vpop.eup %2314 }
 0x2ff   : > { %1679 = vst.msk [vmem:[#allocation3 + $0x28] sm:$0xff] %vm1400_vm0, %v1133_v48  ;;  %1678 = vst.msk [vmem:[#allocation3 + $0x20] sm:$0xff] %vm1400_vm0, %v1132_v51  ;;  %1171 = vperm.xlu0 %2310, %v1133_v48   ;;  %1166 = vperm.xlu1 %2311, %v1132_v51   ;;  %v1277_v5 = vsub.f32 %v1085_v40, %v1133_v48  ;;  %v1276_v9 = vsub.f32 %v1084_v41, %v1132_v51  ;;  %v1304_v48 = vmul.f32 1.442695, %v1280_v19 }
 0x300   : > { %v1123_v60 = vpop.xlane.xlu1 %1122  ;;  %v1121_v61 = vpop.xlane.xlu0 %1120  ;;  %v1282_v51 = vsub.f32 %v2861_v33, %v2869_v39  ;;  %v1310_v54 = vmul.f32 1.442695, %v1283_v47 }
 0x301   : > { %v2884_v62 = vmax.f32 %v2877_v52, %v1123_v60  ;;  %v2887_v63 = vmax.f32 %v2879_v53, %v1121_v61  ;;  %v1298_v21 = vmul.f32 1.442695, %v1277_v5  ;;  %v1296_v26 = vmul.f32 1.442695, %v1276_v9 }
 0x302   : > { %v1308_v14 = vmul.f32 1.442695, %v1282_v51 }
 0x303   : > { %1687 = vst.msk [vmem:[#allocation3 + $0x68] sm:$0xff] %vm1400_vm0, %v2884_v62  ;;  %1686 = vst.msk [vmem:[#allocation3 + $0x60] sm:$0xff] %vm1400_vm0, %v2887_v63  ;;  %1211 = vperm.xlu0 %2310, %v2884_v62   ;;  %1206 = vperm.xlu1 %2311, %v2887_v63   ;;  %2320 = vpow2.f32 %v1298_v21  ;;  %v1285_v55 = vsub.f32 %v2877_v52, %v2884_v62  ;;  %v1284_v38 = vsub.f32 %v2879_v53, %v2887_v63 }
 0x304   : > { %v1111_v11 = vpop.xlane.xlu1 %1110  ;;  %v1109_v12 = vpop.xlane.xlu0 %1108  ;;  %2322 = vpow2.f32 %v1296_v26 }
 0x305   : > { %v1135_v15 = vmax.f32 %v1087_v2, %v1111_v11  ;;  %v1134_v16 = vmax.f32 %v1086_v3, %v1109_v12  ;;  %v2931_v20 = vpop.eup %2316  ;;  %v1314_v56 = vmul.f32 1.442695, %v1285_v55  ;;  %v1312_v52 = vmul.f32 1.442695, %v1284_v38 }
 0x306   : > { %v2933_v25 = vpop.eup %2318 }
 0x307   : > { %v1279_v13 = vsub.f32 %v1087_v2, %v1135_v15  ;;  %1681 = vst.msk [vmem:[#allocation3 + $0x38] sm:$0xff] %vm1400_vm0, %v1135_v15  ;;  %1680 = vst.msk [vmem:[#allocation3 + $0x30] sm:$0xff] %vm1400_vm0, %v1134_v16  ;;  %1181 = vperm.xlu0 %2310, %v1135_v15   ;;  %1176 = vperm.xlu1 %2311, %v1134_v16   ;;  %v1278_v27 = vsub.f32 %v1086_v3, %v1134_v16 }
 0x308   : > { %v1127_v28 = vpop.xlane.xlu1 %1126  ;;  %v1125_v30 = vpop.xlane.xlu0 %1124 }
 0x309   : > { %v2902_v31 = vmax.f32 %v2895_v17, %v1127_v28  ;;  %v2905_v32 = vmax.f32 %v2897_v18, %v1125_v30  ;;  %v1302_v37 = vmul.f32 1.442695, %v1279_v13  ;;  %v1300_v24 = vmul.f32 1.442695, %v1278_v27 }
 0x30b   : > { %v1287_v40 = vsub.f32 %v2895_v17, %v2902_v31  ;;  %1689 = vst.msk [vmem:[#allocation3 + $0x78] sm:$0xff] %vm1400_vm0, %v2902_v31  ;;  %v1286_v41 = vsub.f32 %v2897_v18, %v2905_v32  ;;  %1688 = vst.msk [vmem:[#allocation3 + $0x70] sm:$0xff] %vm1400_vm0, %v2905_v32  ;;  %1221 = vperm.xlu0 %2310, %v2902_v31   ;;  %1216 = vperm.xlu1 %2311, %v2905_v32   ;;  %2324 = vpow2.f32 %v1302_v37 }
 0x30c   : > { %2326 = vpow2.f32 %v1300_v24 }
 0x30d   : > { %2328 = vpow2.f32 %v1306_v44  ;;  %v2941_v33 = vpop.eup %2320 }
 0x30e   : > { %2330 = vpow2.f32 %v1304_v48  ;;  %v2943_v39 = vpop.eup %2322 }
 0x30f   : > { %1435 = vperm.xlu0 %2310, %v2921_v42   ;;  %1440 = vperm.xlu1 %2311, %v2923_v43   ;;  %2332 = vpow2.f32 %v1310_v54 }
 0x310   : > { %2334 = vpow2.f32 %v1308_v14 }
 0x311   : > { %2336 = vpow2.f32 %v1314_v56 }
 0x312   : > { %2338 = vpow2.f32 %v1312_v52 }
 0x313   : > { %1450 = vperm.xlu0 %2310, %v2931_v20   ;;  %1445 = vperm.xlu1 %2311, %v2933_v25  }
 0x315   : > { %v2947_v57 = vpop.eup %2324 }
 0x316   : > { %v2949_v60 = vpop.eup %2326 }
 0x317   : > { %1460 = vperm.xlu0 %2310, %v2941_v33   ;;  %1455 = vperm.xlu1 %2311, %v2943_v39   ;;  %v2953_v53 = vpop.eup %2328 }
 0x318   : > { %v2955_v61 = vpop.eup %2330 }
 0x319   : > { %v2959_v62 = vpop.eup %2332 }
 0x31a   : > { %v2961_v63 = vpop.eup %2334 }
 0x31b   : > { %1470 = vperm.xlu0 %2310, %v2947_v57   ;;  %1465 = vperm.xlu1 %2311, %v2949_v60   ;;  %v2965_v2 = vpop.eup %2336 }
 0x31c   : > { %v2967_v3 = vpop.eup %2338 }
 0x31f   : > { %1480 = vperm.xlu0 %2310, %v2953_v53   ;;  %1475 = vperm.xlu1 %2311, %v2955_v61  }
 0x323   : > { %1490 = vperm.xlu0 %2310, %v2959_v62   ;;  %1485 = vperm.xlu1 %2311, %v2961_v63  }
 0x327   : > { %1500 = vperm.xlu0 %2310, %v2965_v2   ;;  %1495 = vperm.xlu1 %2311, %v2967_v3  }
 0x36e   : > { %v1152_v4 = vpop.permute.xlu1 %1151  ;;  %v1147_v5 = vpop.permute.xlu0 %1146 }
 0x36f   : > { %v1225_v6 = vsub.f32 %v2775_v45, %v1152_v4  ;;  %v1224_v9 = vsub.f32 %v2777_v46, %v1147_v5 }
 0x371   : > { %v1242_v11 = vmul.f32 1.442695, %v1225_v6  ;;  %v1240_v12 = vmul.f32 1.442695, %v1224_v9 }
 0x372   : > { %v1187_v15 = vpop.permute.xlu1 %1186  ;;  %v1192_v16 = vpop.permute.xlu0 %1191 }
 0x373   : > { %2340 = vpow2.f32 %v1242_v11  ;;  %v1232_v21 = vsub.f32 %v2784_v58, %v1187_v15  ;;  %v1233_v13 = vsub.f32 %v2786_v59, %v1192_v16 }
 0x374   : > { %2342 = vpow2.f32 %v1240_v12 }
 0x375   : > { %v1256_v26 = vmul.f32 1.442695, %v1232_v21  ;;  %v1258_v27 = vmul.f32 1.442695, %v1233_v13 }
 0x376   : > { %v1157_v28 = vpop.permute.xlu1 %1156  ;;  %v1162_v30 = vpop.permute.xlu0 %1161 }
 0x377   : > { %2344 = vpow2.f32 %v1256_v26  ;;  %v1226_v36 = vsub.f32 %v2793_v7, %v1157_v28  ;;  %v1227_v45 = vsub.f32 %v2795_v8, %v1162_v30 }
 0x378   : > { %2346 = vpow2.f32 %v1258_v27 }
 0x379   : > { %v1244_v46 = vmul.f32 1.442695, %v1226_v36  ;;  %v1246_v37 = vmul.f32 1.442695, %v1227_v45 }
 0x37a   : > { %v1197_v19 = vpop.permute.xlu1 %1196  ;;  %v1202_v24 = vpop.permute.xlu0 %1201 }
 0x37b   : > { %2348 = vpow2.f32 %v1244_v46  ;;  %v1234_v58 = vsub.f32 %v2802_v22, %v1197_v19  ;;  %v1235_v59 = vsub.f32 %v2804_v23, %v1202_v24 }
 0x37c   : > { %2350 = vpow2.f32 %v1246_v37 }
 0x37d   : > { %v2341_v44 = vpop.eup %2340  ;;  %v1260_v47 = vmul.f32 1.442695, %v1234_v58  ;;  %v1262_v48 = vmul.f32 1.442695, %v1235_v59 }
 0x37e   : > { %v2343_v51 = vpop.eup %2342  ;;  %1354 = vadd.xlane.f32.xlu0 %v2341_v44  ;;  %v1167_v54 = vpop.permute.xlu1 %1166 }
 0x37f   : > { %v1172_v7 = vpop.permute.xlu0 %1171  ;;  %2352 = vpow2.f32 %v1260_v47  ;;  %v1228_v8 = vsub.f32 %v2811_v34, %v1167_v54  ;;  %1352 = vadd.xlane.f32.xlu1 %v2343_v51  ;;  %v1529_v14 = vpack.c.bf16 %v2341_v44, %v2343_v51 }
 0x380   : > { %v1229_v55 = vsub.f32 %v2813_v35, %v1172_v7  ;;  %2354 = vpow2.f32 %v1262_v48 }
 0x381   : > { %v2345_v38 = vpop.eup %2344  ;;  %v1248_v22 = vmul.f32 1.442695, %v1228_v8  ;;  %2198 = vmatprep.mubr.bf16.mxu0 %v1529_v14  ;;  %v1316_v8 = vmul.f32 1.442695, %v1286_v41 }
 0x382   : > { %v1250_v56 = vmul.f32 1.442695, %v1229_v55  ;;  %v2347_v23 = vpop.eup %2346  ;;  %v1207_v52 = vpop.permute.xlu1 %1206  ;;  %v1318_v55 = vmul.f32 1.442695, %v1287_v40 }
 0x383   : > { %v1212_v4 = vpop.permute.xlu0 %1211  ;;  %2356 = vpow2.f32 %v1248_v22  ;;  %v1236_v5 = vsub.f32 %v2820_v49, %v1207_v52  ;;  %v1533_v9 = vpack.c.bf16 %v2347_v23, %v2345_v38 }
 0x384   : > { %v1237_v6 = vsub.f32 %v2822_v50, %v1212_v4  ;;  %2358 = vpow2.f32 %v1250_v56 }
 0x385   : > { %v2349_v34 = vpop.eup %2348  ;;  %v1264_v11 = vmul.f32 1.442695, %v1236_v5  ;;  %2206 = vmatprep.mubr.bf16.mxu1 %v1533_v9  ;;  %v1321_v9 = vld [vmem:[#allocation4 + $0x8] sm:$0xff] }
 0x386   : > { %v1266_v12 = vmul.f32 1.442695, %v1237_v6  ;;  %v2351_v35 = vpop.eup %2350  ;;  %1356 = vadd.xlane.f32.xlu0 %v2349_v34  ;;  %v1177_v15 = vpop.permute.xlu1 %1176 }
 0x387   : > { %v1182_v16 = vpop.permute.xlu0 %1181  ;;  %2360 = vpow2.f32 %v1264_v11  ;;  %v1230_v21 = vsub.f32 %v2829_v0, %v1177_v15  ;;  %1358 = vadd.xlane.f32.xlu1 %v2351_v35  ;;  %v1530_v26 = vpack.c.bf16 %v2351_v35, %v2349_v34  ;;  %v1320_v11 = vld [vmem:[#allocation4] sm:$0xff] }
 0x388   : > { %v1231_v13 = vsub.f32 %v2831_v1, %v1182_v16  ;;  %2362 = vpow2.f32 %v1266_v12  ;;  %v1337_v12 = vmul.f32 %v2923_v43, %v1321_v9  ;;  %v1336_v35 = vmul.f32 %v2921_v42, %v1320_v11  ;;  %v1324_v42 = vld [vmem:[#allocation4 + $0x20] sm:$0xff] }
 0x389   : > { %v2353_v49 = vpop.eup %2352  ;;  %v1252_v50 = vmul.f32 1.442695, %v1230_v21  ;;  %2199 = vmatmul.mubr.bf16.vlgmr.msra.gmra.mrb[0].mxu0 %v1530_v26  ;;  %v1322_v26 = vld [vmem:[#allocation4 + $0x10] sm:$0xff] }
 0x38a   : > { %v1254_v27 = vmul.f32 1.442695, %v1231_v13  ;;  %v2355_v28 = vpop.eup %2354  ;;  %v1217_v30 = vpop.permute.xlu1 %1216 }
 0x38b   : > { %v1222_v36 = vpop.permute.xlu0 %1221  ;;  %2364 = vpow2.f32 %v1252_v50  ;;  %v1238_v45 = vsub.f32 %v2835_v10, %v1217_v30  ;;  %v1534_v37 = vpack.c.bf16 %v2355_v28, %v2353_v49  ;;  %v1338_v50 = vmul.f32 %v2933_v25, %v1322_v26 }
 0x38c   : > { %v1239_v46 = vsub.f32 %v2837_v29, %v1222_v36  ;;  %2366 = vpow2.f32 %v1254_v27 }
 0x38d   : > { %v2357_v0 = vpop.eup %2356  ;;  %v1268_v19 = vmul.f32 1.442695, %v1238_v45  ;;  %2207 = vmatmul.mubr.bf16.vlgmr.msra.gmra.mrb[0].mxu1 %v1534_v37  ;;  %v1325_v45 = vld [vmem:[#allocation4 + $0x28] sm:$0xff] }
 0x38e   : > { %v1270_v24 = vmul.f32 1.442695, %v1239_v46  ;;  %v2359_v1 = vpop.eup %2358  ;;  %1360 = vadd.xlane.f32.xlu0 %v2357_v0  ;;  %v3001_v56 = vpop.permute.xlu1 %1440  ;;  %v1340_v46 = vmul.f32 %v2943_v39, %v1324_v42  ;;  %v1341_v37 = vmul.f32 %v2941_v33, %v1325_v45  ;;  %v1417_v45 = vld [vmem:[#allocation5] sm:$0xff] }
 0x38f   : > { %2368 = vpow2.f32 %v1268_v19  ;;  %1362 = vadd.xlane.f32.xlu1 %v2359_v1  ;;  %v1531_v58 = vpack.c.bf16 %v2359_v1, %v2357_v0  ;;  %v2999_v22 = vpop.permute.xlu0 %1435  ;;  %v1327_v1 = vld [vmem:[#allocation4 + $0x38] sm:$0xff] }
 0x390   : > { %2370 = vpow2.f32 %v1270_v24 }
 0x391   : > { %v2361_v59 = vpop.eup %2360  ;;  %2202 = vmatprep.mubr.bf16.mxu0 %v1531_v58  ;;  %2372 = vpow2.f32 %v1316_v8 }
 0x392   : > { %v2363_v44 = vpop.eup %2362  ;;  %2374 = vpow2.f32 %v1318_v55  ;;  %v3005_v32 = vpop.permute.xlu1 %1445  ;;  %v1331_v55 = vld [vmem:[#allocation4 + $0x58] sm:$0xff] }
 0x393   : > { %v1535_v47 = vpack.c.bf16 %v2363_v44, %v2361_v59  ;;  %v3003_v18 = vpop.permute.xlu0 %1450  ;;  %v1347_v11 = vmul.f32 %v2959_v62, %v1331_v55 }
 0x395   : > { %v2365_v48 = vpop.eup %2364  ;;  %2210 = vmatprep.mubr.bf16.mxu1 %v1535_v47  ;;  %v1328_v47 = vld [vmem:[#allocation4 + $0x40] sm:$0xff] }
 0x396   : > { %v2367_v10 = vpop.eup %2366  ;;  %1364 = vadd.xlane.f32.xlu0 %v2365_v48  ;;  %v3009_v31 = vpop.permute.xlu1 %1455 }
 0x397   : > { %1366 = vadd.xlane.f32.xlu1 %v2367_v10  ;;  %v1532_v29 = vpack.c.bf16 %v2367_v10, %v2365_v48  ;;  %v3007_v17 = vpop.permute.xlu0 %1460  ;;  %v1329_v10 = vld [vmem:[#allocation4 + $0x48] sm:$0xff] }
 0x399   : > { %v2369_v51 = vpop.eup %2368  ;;  %2203 = vmatmul.mubr.bf16.gmra.mrb[4].mxu0 %v1532_v29  ;;  %v1344_v29 = vmul.f32 %v2955_v61, %v1328_v47  ;;  %v1332_v61 = vld [vmem:[#allocation4 + $0x60] sm:$0xff] }
 0x39a   : > { %v2371_v54 = vpop.eup %2370  ;;  %1368 = vadd.xlane.f32.xlu0 %v2345_v38  ;;  %v3013_v41 = vpop.permute.xlu1 %1465 }
 0x39b   : > { %1370 = vadd.xlane.f32.xlu1 %v2347_v23  ;;  %v1536_v7 = vpack.c.bf16 %v2371_v54, %v2369_v51  ;;  %v2993_v14 = vpop.eup %2372  ;;  %v3011_v40 = vpop.permute.xlu0 %1470 }
 0x39c   : > { %v2996_v38 = vpop.eup %2374 }
 0x39d   : > { %2211 = vmatmul.mubr.bf16.gmra.mrb[4].mxu1 %v1536_v7  ;;  %v1330_v7 = vld [vmem:[#allocation4 + $0x50] sm:$0xff] }
 0x39e   : > { %1372 = vadd.xlane.f32.xlu0 %v2353_v49  ;;  %v3017_v52 = vpop.permute.xlu1 %1475  ;;  %v1323_v49 = vld [vmem:[#allocation4 + $0x18] sm:$0xff]  ;;  %v1346_v9 = vmul.f32 %v2961_v63, %v1330_v7  ;;  %v1334_v63 = vld [vmem:[#allocation4 + $0x70] sm:$0xff] }
 0x39f   : > { %1374 = vadd.xlane.f32.xlu1 %v2355_v28  ;;  %v3015_v23 = vpop.permute.xlu0 %1480  ;;  %v1339_v27 = vmul.f32 %v2931_v20, %v1323_v49  ;;  %v1326_v20 = vld [vmem:[#allocation4 + $0x30] sm:$0xff] }
 0x3a0   : > { %v1342_v58 = vmul.f32 %v2949_v60, %v1326_v20 }
 0x3a2   : > { %1376 = vadd.xlane.f32.xlu0 %v2361_v59  ;;  %v3021_v5 = vpop.permute.xlu1 %1485  ;;  %v1343_v59 = vmul.f32 %v2947_v57, %v1327_v1 }
 0x3a3   : > { %1378 = vadd.xlane.f32.xlu1 %v2363_v44  ;;  %v3019_v4 = vpop.permute.xlu0 %1490 }
 0x3a6   : > { %1380 = vadd.xlane.f32.xlu0 %v2369_v51  ;;  %v3025_v34 = vpop.permute.xlu1 %1495  ;;  %v1345_v51 = vmul.f32 %v2953_v53, %v1329_v10 }
 0x3a7   : > { %1382 = vadd.xlane.f32.xlu1 %v2371_v54  ;;  %v3023_v6 = vpop.permute.xlu0 %1500 }
 0x3b8   : > { %1505 = vperm.xlu1 %2311, %v2993_v14  }
 0x3bc   : > { %1510 = vperm.xlu0 %2310, %v2996_v38  }
 0x40b   : > { %v1355_v15 = vpop.xlane.xlu0 %1354 }
 0x40c   : > { %v1353_v16 = vpop.xlane.xlu1 %1352  ;;  %v1385_v21 = vadd.f32 %v1355_v15, %v1337_v12 }
 0x40d   : > { %v1384_v13 = vadd.f32 %v1353_v16, %v1336_v35  ;;  %v1333_v16 = vld [vmem:[#allocation4 + $0x68] sm:$0xff] }
 0x40e   : > { %1402 = vst.msk [vmem:[#allocation4 + $0x8] sm:$0xff] %vm1400_vm0, %v1385_v21  ;;  %v1348_v21 = vmul.f32 %v2967_v3, %v1332_v61  ;;  %v1431_v61 = vld [vmem:[#allocation5 + $0x70] sm:$0xff] }
 0x40f   : > { %1401 = vst.msk [vmem:[#allocation4] sm:$0xff] %vm1400_vm0, %v1384_v13  ;;  %v1349_v13 = vmul.f32 %v2965_v2, %v1333_v16  ;;  %v1419_v2 = vld [vmem:[#allocation5 + $0x10] sm:$0xff]  ;;  %v1429_v16 = vld [vmem:[#allocation5 + $0x60] sm:$0xff] }
 0x413   : > { %v1357_v28 = vpop.xlane.xlu0 %1356 }
 0x414   : > { %v1359_v30 = vpop.xlane.xlu1 %1358  ;;  %v1386_v36 = vadd.f32 %v1357_v28, %v1338_v50  ;;  %v1350_v28 = vmul.f32 %v2993_v14, %v1334_v63  ;;  %v1513_v14 = vmul.f32 %v2999_v22, %v1417_v45 }
 0x415   : > { %v1387_v43 = vadd.f32 %v1359_v30, %v1339_v27  ;;  %v1335_v27 = vld [vmem:[#allocation4 + $0x78] sm:$0xff] }
 0x416   : > { %1403 = vst.msk [vmem:[#allocation4 + $0x10] sm:$0xff] %vm1400_vm0, %v1386_v36  ;;  %v1351_v30 = vmul.f32 %v2996_v38, %v1335_v27  ;;  %v1430_v27 = vld [vmem:[#allocation5 + $0x68] sm:$0xff] }
 0x417   : > { %1404 = vst.msk [vmem:[#allocation4 + $0x18] sm:$0xff] %vm1400_vm0, %v1387_v43 }
 0x41b   : > { %v1361_v0 = vpop.xlane.xlu0 %1360 }
 0x41c   : > { %v1363_v19 = vpop.xlane.xlu1 %1362  ;;  %v1388_v24 = vadd.f32 %v1361_v0, %v1340_v46  ;;  %v1420_v46 = vld [vmem:[#allocation5 + $0x18] sm:$0xff]  ;;  %v1515_v0 = vmul.f32 %v3005_v32, %v1419_v2 }
 0x41d   : > { %v1389_v25 = vadd.f32 %v1363_v19, %v1341_v37  ;;  %v1418_v37 = vld [vmem:[#allocation5 + $0x8] sm:$0xff]  ;;  %v1427_v19 = vld [vmem:[#allocation5 + $0x50] sm:$0xff]  ;;  %v1516_v38 = vmul.f32 %v3003_v18, %v1420_v46 }
 0x41e   : > { %1405 = vst.msk [vmem:[#allocation4 + $0x20] sm:$0xff] %vm1400_vm0, %v1388_v24 }
 0x41f   : > { %1406 = vst.msk [vmem:[#allocation4 + $0x28] sm:$0xff] %vm1400_vm0, %v1389_v25  ;;  %v1425_v25 = vld [vmem:[#allocation5 + $0x40] sm:$0xff] }
 0x420   : > { %v1521_v22 = vmul.f32 %v3017_v52, %v1425_v25  ;;  %v1423_v52 = vld [vmem:[#allocation5 + $0x30] sm:$0xff]  ;;  %v1695_v25 = vld [vmem:[#allocation4 + $0x8] sm:$0xff] (!%p2074_p13) }
 0x423   : > { %v1365_v44 = vpop.xlane.xlu0 %1364 }
 0x424   : > { %v1367_v48 = vpop.xlane.xlu1 %1366  ;;  %v1390_v39 = vadd.f32 %v1365_v44, %v1342_v58  ;;  %v1514_v58 = vmul.f32 %v3001_v56, %v1418_v37 }
 0x425   : > { %v1391_v33 = vadd.f32 %v1367_v48, %v1343_v59  ;;  %v1428_v59 = vld [vmem:[#allocation5 + $0x58] sm:$0xff]  ;;  %v1426_v48 = vld [vmem:[#allocation5 + $0x48] sm:$0xff] }
 0x426   : > { %1407 = vst.msk [vmem:[#allocation4 + $0x30] sm:$0xff] %vm1400_vm0, %v1390_v39  ;;  %v1523_v39 = vmul.f32 %v3021_v5, %v1427_v19  ;;  %v1524_v18 = vmul.f32 %v3019_v4, %v1428_v59  ;;  %v1522_v56 = vmul.f32 %v3015_v23, %v1426_v48  ;;  %v1519_v4 = vmul.f32 %v3013_v41, %v1423_v52 }
 0x427   : > { %1408 = vst.msk [vmem:[#allocation4 + $0x38] sm:$0xff] %vm1400_vm0, %v1391_v33  ;;  %v1369_v54 = vpop.xlane.xlu0 %1368  ;;  %v2471_v19 = vmov (!%p2074_p13), 0  }
 0x428   : > { %v1371_v8 = vpop.xlane.xlu1 %1370  ;;  %v1392_v60 = vadd.f32 %v1369_v54, %v1344_v29  ;;  %2377 = vset.pattern.permute.xlu1 (!%p2074_p13), %v2471_v19  ;;  %2376 = vset.pattern.permute.xlu0 (!%p2074_p13), %v2471_v19 }
 0x429   : > { %v1393_v57 = vadd.f32 %v1371_v8, %v1345_v51 }
 0x42a   : > { %1409 = vst.msk [vmem:[#allocation4 + $0x40] sm:$0xff] %vm1400_vm0, %v1392_v60 }
 0x42b   : > { %1410 = vst.msk [vmem:[#allocation4 + $0x48] sm:$0xff] %vm1400_vm0, %v1393_v57  ;;  %v1373_v12 = vpop.xlane.xlu0 %1372  ;;  %v1421_v57 = vld [vmem:[#allocation5 + $0x20] sm:$0xff] }
 0x42c   : > { %v1375_v35 = vpop.xlane.xlu1 %1374  ;;  %v1394_v15 = vadd.f32 %v1373_v12, %v1346_v9  ;;  %v1424_v9 = vld [vmem:[#allocation5 + $0x38] sm:$0xff]  ;;  %v1517_v12 = vmul.f32 %v3009_v31, %v1421_v57  ;;  %v1525_v31 = vmul.f32 %v3025_v34, %v1429_v16  ;;  %v1696_v34 = vld [vmem:[#allocation4 + $0x10] sm:$0xff] (!%p2074_p13) }
 0x42d   : > { %v1395_v53 = vadd.f32 %v1375_v35, %v1347_v11  ;;  %v1422_v11 = vld [vmem:[#allocation5 + $0x28] sm:$0xff]  ;;  %v1700_v48 = vld [vmem:[#allocation4 + $0x30] sm:$0xff] (!%p2074_p13) }
 0x42e   : > { %1411 = vst.msk [vmem:[#allocation4 + $0x50] sm:$0xff] %vm1400_vm0, %v1394_v15  ;;  %v1520_v15 = vmul.f32 %v3011_v40, %v1424_v9 }
 0x42f   : > { %1412 = vst.msk [vmem:[#allocation4 + $0x58] sm:$0xff] %vm1400_vm0, %v1395_v53  ;;  %v1377_v26 = vpop.xlane.xlu0 %1376 }
 0x430   : > { %v1379_v49 = vpop.xlane.xlu1 %1378  ;;  %v1396_v50 = vadd.f32 %v1377_v26, %v1348_v21  ;;  %v1432_v26 = vld [vmem:[#allocation5 + $0x78] sm:$0xff] }
 0x431   : > { %v1397_v62 = vadd.f32 %v1379_v49, %v1349_v13  ;;  %v1518_v13 = vmul.f32 %v3007_v17, %v1422_v11  ;;  %v1526_v17 = vmul.f32 %v3023_v6, %v1430_v27  ;;  %v1712_v6 = vmax.f32 (!%p2074_p13), %v1696_v34, 1e-16 }
 0x432   : > { %1413 = vst.msk [vmem:[#allocation4 + $0x60] sm:$0xff] %vm1400_vm0, %v1396_v50 }
 0x433   : > { %1414 = vst.msk [vmem:[#allocation4 + $0x68] sm:$0xff] %vm1400_vm0, %v1397_v62  ;;  %v1381_v36 = vpop.xlane.xlu0 %1380  ;;  %2378 = vrcp.f32 (!%p2074_p13), %v1712_v6 }
 0x434   : > { %v1383_v3 = vpop.xlane.xlu1 %1382  ;;  %v1398_v43 = vadd.f32 %v1381_v36, %v1350_v28 }
 0x435   : > { %v1399_v42 = vadd.f32 %v1383_v3, %v1351_v30 }
 0x436   : > { %1415 = vst.msk [vmem:[#allocation4 + $0x70] sm:$0xff] %vm1400_vm0, %v1398_v43 }
 0x437   : > { %1416 = vst.msk [vmem:[#allocation4 + $0x78] sm:$0xff] %vm1400_vm0, %v1399_v42 }
 0x438   : > { %v1506_v23 = vpop.permute.xlu1 %1505 }
 0x439   : > { %v1527_v62 = vmul.f32 %v1506_v23, %v1431_v61 }
 0x43b   : > { %v1511_v63 = vpop.permute.xlu0 %1510 }
 0x43c   : > { %v1528_v40 = vmul.f32 %v1511_v63, %v1432_v26 }
 0x43e   : > { %v3090_v52 = vld [vmem:[#allocation4 + $0x78] sm:$0xff] (!%p2074_p13) }
 0x45c   : > { %v2200_v24 = vpop.f32.mrb[0].mxu0 }
 0x45d   : > { %v1644_v20 = vadd.f32 %v2200_v24, %v1515_v0  ;;  %v1579_v1 = vpop.f32.mrb[1].mxu0  ;;  %v1694_v0 = vld [vmem:[#allocation4] sm:$0xff] (!%p2074_p13) }
 0x45e   : > { %v1642_v44 = vadd.f32 %v1579_v1, %v1513_v14  ;;  %v2201_v47 = vpop.f32.mrb[2].mxu0  ;;  %v1697_v14 = vld [vmem:[#allocation4 + $0x18] sm:$0xff] (!%p2074_p13)  ;;  %v1710_v24 = vmax.f32 (!%p2074_p13), %v1694_v0, 1e-16  ;;  %v1698_v1 = vld [vmem:[#allocation4 + $0x20] sm:$0xff] (!%p2074_p13) }
 0x45f   : > { %1660 = vst [vmem:[#allocation5 + $0x10] sm:$0xff] %v1644_v20  ;;  %v1645_v10 = vadd.f32 %v2201_v47, %v1516_v38  ;;  %v1582_v32 = vpop.f32.mrb[3].mxu0  ;;  %v1713_v38 = vmax.f32 (!%p2074_p13), %v1697_v14, 1e-16  ;;  %v1699_v20 = vld [vmem:[#allocation4 + $0x28] sm:$0xff] (!%p2074_p13)  ;;  %v1701_v47 = vld [vmem:[#allocation4 + $0x38] sm:$0xff] (!%p2074_p13) }
 0x460   : > { %1658 = vst [vmem:[#allocation5] sm:$0xff] %v1642_v44  ;;  %v1643_v33 = vadd.f32 %v1582_v32, %v1514_v58  ;;  %v2208_v29 = vpop.f32.mrb[0].mxu1  ;;  %v1711_v58 = vmax.f32 (!%p2074_p13), %v1695_v25, 1e-16  ;;  %v1715_v59 = vmax.f32 (!%p2074_p13), %v1699_v20, 1e-16  ;;  %2380 = vrcp.f32 (!%p2074_p13), %v1710_v24 }
 0x461   : > { %1661 = vst [vmem:[#allocation5 + $0x18] sm:$0xff] %v1645_v10  ;;  %v1652_v51 = vadd.f32 %v2208_v29, %v1523_v39  ;;  %v1611_v54 = vpop.f32.mrb[1].mxu1  ;;  %v1714_v44 = vmax.f32 (!%p2074_p13), %v1698_v1, 1e-16  ;;  %v3074_v39 = vld [vmem:[#allocation4 + $0x48] sm:$0xff] (!%p2074_p13)  ;;  %2382 = vrcp.f32 (!%p2074_p13), %v1713_v38 }
 0x462   : > { %1659 = vst [vmem:[#allocation5 + $0x8] sm:$0xff] %v1643_v33  ;;  %v1650_v7 = vadd.f32 %v1611_v54, %v1521_v22  ;;  %v2209_v8 = vpop.f32.mrb[2].mxu1  ;;  %v1717_v10 = vmax.f32 (!%p2074_p13), %v1701_v47, 1e-16  ;;  %2384 = vrcp.f32 (!%p2074_p13), %v1711_v58  ;;  %v1716_v32 = vmax.f32 (!%p2074_p13), %v1700_v48, 1e-16 }
 0x463   : > { %1668 = vst [vmem:[#allocation5 + $0x50] sm:$0xff] %v1652_v51  ;;  %v1653_v5 = vadd.f32 %v2209_v8, %v1524_v18  ;;  %v1614_v60 = vpop.f32.mrb[3].mxu1  ;;  %v3076_v22 = vld [vmem:[#allocation4 + $0x40] sm:$0xff] (!%p2074_p13)  ;;  %2386 = vrcp.f32 (!%p2074_p13), %v1715_v59  ;;  %v1719_v33 = vmax.f32 (!%p2074_p13), %v3074_v39, 1e-16  ;;  %v3080_v18 = vld [vmem:[#allocation4 + $0x58] sm:$0xff] (!%p2074_p13)  ;;  %v2379_v8 = vpop.eup (!%p2074_p13), %2378 }
 0x464   : > { %1666 = vst [vmem:[#allocation5 + $0x40] sm:$0xff] %v1650_v7  ;;  %v1651_v55 = vadd.f32 %v1614_v60, %v1522_v56  ;;  %2388 = vrcp.f32 (!%p2074_p13), %v1714_v44  ;;  %v1718_v29 = vmax.f32 (!%p2074_p13), %v3076_v22, 1e-16  ;;  %v3082_v51 = vld [vmem:[#allocation4 + $0x50] sm:$0xff] (!%p2074_p13)  ;;  %v1721_v54 = vmax.f32 (!%p2074_p13), %v3080_v18, 1e-16 }
 0x465   : > { %1669 = vst [vmem:[#allocation5 + $0x58] sm:$0xff] %v1653_v5  ;;  %2390 = vrcp.f32 (!%p2074_p13), %v1717_v10  ;;  %v1720_v56 = vmax.f32 (!%p2074_p13), %v3082_v51, 1e-16  ;;  %v3086_v7 = vld [vmem:[#allocation4 + $0x68] sm:$0xff] (!%p2074_p13)  ;;  %v3088_v5 = vld [vmem:[#allocation4 + $0x60] sm:$0xff] (!%p2074_p13) }
 0x466   : > { %1667 = vst [vmem:[#allocation5 + $0x48] sm:$0xff] %v1651_v55  ;;  %2392 = vrcp.f32 (!%p2074_p13), %v1716_v32  ;;  %v1744_v55 = vmul.f32 (!%p2074_p13), %v2379_v8, %v1712_v6  ;;  %v1723_v11 = vmax.f32 (!%p2074_p13), %v3086_v7, 1e-16 }
 0x467   : > { %2394 = vrcp.f32 (!%p2074_p13), %v1719_v33 }
 0x468   : > { %2396 = vrcp.f32 (!%p2074_p13), %v1718_v29  ;;  %v1760_v61 = vsub.f32 (!%p2074_p13), 2.0, %v1744_v55 }
 0x469   : > { %2398 = vrcp.f32 (!%p2074_p13), %v1721_v54 }
 0x46a   : > { %v2381_v60 = vpop.eup (!%p2074_p13), %2380  ;;  %2400 = vrcp.f32 (!%p2074_p13), %v1720_v56  ;;  %v1776_v26 = vmul.f32 (!%p2074_p13), %v2379_v8, %v1760_v61 }
 0x46b   : > { %v2383_v57 = vpop.eup (!%p2074_p13), %2382  ;;  %v1742_v9 = vmul.f32 (!%p2074_p13), %v2381_v60, %v1710_v24  ;;  %2402 = vrcp.f32 (!%p2074_p13), %v1723_v11 }
 0x46c   : > { %v2204_v35 = vpop.f32.mrb[4].mxu0  ;;  %v1745_v23 = vmul.f32 (!%p2074_p13), %v2383_v57, %v1713_v38  ;;  %1818 = vperm.xlu1 (!%p2074_p13), %2377, %v1776_v26  }
 0x46d   : > { %v1648_v53 = vadd.f32 %v2204_v35, %v1519_v4  ;;  %v1595_v21 = vpop.f32.mrb[5].mxu0  ;;  %v3093_v4 = vld [vmem:[#allocation4 + $0x70] sm:$0xff] (!%p2074_p13)  ;;  %v1722_v35 = vmax.f32 (!%p2074_p13), %v3088_v5, 1e-16  ;;  %v1758_v16 = vsub.f32 (!%p2074_p13), 2.0, %v1742_v9 }
 0x46e   : > { %v1646_v49 = vadd.f32 %v1595_v21, %v1517_v12  ;;  %v2205_v50 = vpop.f32.mrb[6].mxu0  ;;  %v2385_v12 = vpop.eup (!%p2074_p13), %2384  ;;  %v1725_v21 = vmax.f32 (!%p2074_p13), %v3090_v52, 1e-16  ;;  %v1761_v63 = vsub.f32 (!%p2074_p13), 2.0, %v1745_v23 }
 0x46f   : > { %1664 = vst [vmem:[#allocation5 + $0x30] sm:$0xff] %v1648_v53  ;;  %v1649_v41 = vadd.f32 %v2205_v50, %v1520_v15  ;;  %v1598_v28 = vpop.f32.mrb[7].mxu0  ;;  %v2387_v15 = vpop.eup (!%p2074_p13), %2386  ;;  %v1743_v53 = vmul.f32 (!%p2074_p13), %v2385_v12, %v1711_v58  ;;  %v1724_v50 = vmax.f32 (!%p2074_p13), %v3093_v4, 1e-16  ;;  %2404 = vrcp.f32 (!%p2074_p13), %v1722_v35  ;;  %v1790_v4 = vld [vmem:[#allocation5] sm:$0xff] (!%p2074_p13) }
 0x470   : > { %1662 = vst [vmem:[#allocation5 + $0x20] sm:$0xff] %v1646_v49  ;;  %v1647_v30 = vadd.f32 %v1598_v28, %v1518_v13  ;;  %v2212_v36 = vpop.f32.mrb[4].mxu1  ;;  %1693 = sbr.rel (%p2074_p13) target bundleno = 1302 (0x516), region = 89  ;;  %v2389_v13 = vpop.eup (!%p2074_p13), %2388  ;;  %v1747_v49 = vmul.f32 (!%p2074_p13), %v2387_v15, %v1715_v59  ;;  %2406 = vrcp.f32 (!%p2074_p13), %v1725_v21 }
 0x471   : > { %1665 = vst [vmem:[#allocation5 + $0x38] sm:$0xff] %v1649_v41  ;;  %v1656_v3 = vadd.f32 %v2212_v36, %v1527_v62  ;;  %v1627_v43 = vpop.f32.mrb[5].mxu1  ;;  %v2391_v27 = vpop.eup (!%p2074_p13), %2390  ;;  %v1774_v62 = vmul.f32 (!%p2074_p13), %v2381_v60, %v1758_v16  ;;  %v1759_v41 = vsub.f32 (!%p2074_p13), 2.0, %v1743_v53  ;;  %v1746_v28 = vmul.f32 (!%p2074_p13), %v2389_v13, %v1714_v44  ;;  %v1793_v16 = vld [vmem:[#allocation5 + $0x18] sm:$0xff] (!%p2074_p13) }
 0x472   : > { %1663 = vst [vmem:[#allocation5 + $0x28] sm:$0xff] %v1647_v30  ;;  %v1654_v42 = vadd.f32 %v1627_v43, %v1525_v31  ;;  %v2213_v2 = vpop.f32.mrb[6].mxu1  ;;  %v2393_v31 = vpop.eup (!%p2074_p13), %2392  ;;  %v1777_v30 = vmul.f32 (!%p2074_p13), %v2383_v57, %v1761_v63  ;;  %v1763_v36 = vsub.f32 (!%p2074_p13), 2.0, %v1747_v49  ;;  %2408 = vrcp.f32 (!%p2074_p13), %v1724_v50 }
 0x473   : > { %1672 = vst [vmem:[#allocation5 + $0x70] sm:$0xff] %v1656_v3  ;;  %v1657_v45 = vadd.f32 %v2213_v2, %v1528_v40  ;;  %v1630_v46 = vpop.f32.mrb[7].mxu1  ;;  %v1749_v40 = vmul.f32 (!%p2074_p13), %v2391_v27, %v1717_v10  ;;  %v2395_v3 = vpop.eup (!%p2074_p13), %2394  ;;  %1808 = vperm.xlu0 (!%p2074_p13), %2376, %v1774_v62   ;;  %v1775_v43 = vmul.f32 (!%p2074_p13), %v2385_v12, %v1759_v41  ;;  %v3105_v12 = vld [vmem:[%s3164_s4] ss:$0 sm:$0xff] (!%p2074_p13) }
 0x474   : > { %1670 = vst [vmem:[#allocation5 + $0x60] sm:$0xff] %v1654_v42  ;;  %v1655_v37 = vadd.f32 %v1630_v46, %v1526_v17  ;;  %v1762_v17 = vsub.f32 (!%p2074_p13), 2.0, %v1746_v28  ;;  %v1748_v42 = vmul.f32 (!%p2074_p13), %v2393_v31, %v1716_v32  ;;  %v2397_v2 = vpop.eup (!%p2074_p13), %2396  ;;  %1823 = vperm.xlu1 (!%p2074_p13), %2377, %v1777_v30  }
 0x475   : > { %1673 = vst [vmem:[#allocation5 + $0x78] sm:$0xff] %v1657_v45  ;;  %v1779_v45 = vmul.f32 (!%p2074_p13), %v2387_v15, %v1763_v36  ;;  %v1765_v46 = vsub.f32 (!%p2074_p13), 2.0, %v1749_v40  ;;  %v2399_v34 = vpop.eup (!%p2074_p13), %2398  ;;  %v1750_v19 = vmul.f32 (!%p2074_p13), %v2397_v2, %v1718_v29 }
 0x476   : > { %1671 = vst [vmem:[#allocation5 + $0x68] sm:$0xff] %v1655_v37  ;;  %v1751_v37 = vmul.f32 (!%p2074_p13), %v2395_v3, %v1719_v33  ;;  %v1778_v0 = vmul.f32 (!%p2074_p13), %v2389_v13, %v1762_v17  ;;  %v1764_v14 = vsub.f32 (!%p2074_p13), 2.0, %v1748_v42  ;;  %v2401_v6 = vpop.eup (!%p2074_p13), %2400  ;;  %v1753_v25 = vmul.f32 (!%p2074_p13), %v2399_v34, %v1721_v54 }
 0x477   : > { %1813 = vperm.xlu0 %2376, %v1775_v43   ;;  %v1781_v24 = vmul.f32 %v2391_v27, %v1765_v46  ;;  %v2403_v20 = vpop.eup %2402  ;;  %v1766_v58 = vsub.f32 2.0, %v1750_v19  ;;  %v1752_v59 = vmul.f32 %v2401_v6, %v1720_v56  ;;  %v1796_v46 = vld [vmem:[#allocation5 + $0x30] sm:$0xff] }
 0x478   : > { %1833 = vperm.xlu1 %2377, %v1779_v45   ;;  %v1767_v38 = vsub.f32 2.0, %v1751_v37  ;;  %v1780_v1 = vmul.f32 %v2393_v31, %v1764_v14  ;;  %v1769_v48 = vsub.f32 2.0, %v1753_v25  ;;  %v1755_v39 = vmul.f32 %v2403_v20, %v1723_v11  ;;  %v1792_v11 = vld [vmem:[#allocation5 + $0x10] sm:$0xff]  ;;  %v1794_v31 = vld [vmem:[#allocation5 + $0x20] sm:$0xff] }
 0x479   : > { %v2405_v44 = vpop.eup %2404  ;;  %v1782_v32 = vmul.f32 %v2397_v2, %v1766_v58  ;;  %v1768_v22 = vsub.f32 2.0, %v1752_v59  ;;  %v1795_v41 = vld [vmem:[#allocation5 + $0x28] sm:$0xff]  ;;  %v1797_v2 = vld [vmem:[#allocation5 + $0x38] sm:$0xff] }
 0x47a   : > { %v1783_v47 = vmul.f32 %v2395_v3, %v1767_v38  ;;  %v2407_v10 = vpop.eup %2406  ;;  %v1754_v33 = vmul.f32 %v2405_v44, %v1722_v35  ;;  %v1785_v18 = vmul.f32 %v2399_v34, %v1769_v48  ;;  %v1771_v54 = vsub.f32 2.0, %v1755_v39  ;;  %v1799_v38 = vld [vmem:[#allocation5 + $0x48] sm:$0xff] }
 0x47b   : > { %1828 = vperm.xlu0 %2376, %v1778_v0   ;;  %v1757_v7 = vmul.f32 %v2407_v10, %v1725_v21  ;;  %v1784_v8 = vmul.f32 %v2401_v6, %v1768_v22  ;;  %v1791_v21 = vld [vmem:[#allocation5 + $0x8] sm:$0xff]  ;;  %v1800_v22 = vld [vmem:[#allocation5 + $0x50] sm:$0xff] }
 0x47c   : > { %1843 = vperm.xlu1 %2377, %v1781_v24   ;;  %v2409_v29 = vpop.eup %2408  ;;  %v1770_v5 = vsub.f32 2.0, %v1754_v33  ;;  %v1787_v56 = vmul.f32 %v2403_v20, %v1771_v54  ;;  %v1798_v20 = vld [vmem:[#allocation5 + $0x40] sm:$0xff] }
 0x47d   : > { %v1756_v51 = vmul.f32 %v2409_v29, %v1724_v50  ;;  %v1773_v60 = vsub.f32 2.0, %v1757_v7 }
 0x47e   : > { %v1786_v55 = vmul.f32 %v2405_v44, %v1770_v5 }
 0x47f   : > { %1838 = vperm.xlu0 %2376, %v1780_v1   ;;  %v1772_v52 = vsub.f32 2.0, %v1756_v51  ;;  %v1789_v57 = vmul.f32 %v2407_v10, %v1773_v60  ;;  %v1801_v10 = vld [vmem:[#allocation5 + $0x58] sm:$0xff]  ;;  %v1803_v51 = vld [vmem:[#allocation5 + $0x68] sm:$0xff]  ;;  %v1802_v60 = vld [vmem:[#allocation5 + $0x60] sm:$0xff] }
 0x480   : > { %1853 = vperm.xlu1 %2377, %v1783_v47  }
 0x481   : > { %v1788_v9 = vmul.f32 %v2409_v29, %v1772_v52 }
 0x483   : > { %1848 = vperm.xlu0 %2376, %v1782_v32  }
 0x484   : > { %1863 = vperm.xlu1 %2377, %v1785_v18  }
 0x487   : > { %1858 = vperm.xlu0 %2376, %v1784_v8  }
 0x488   : > { %1873 = vperm.xlu1 %2377, %v1787_v56  }
 0x48b   : > { %1868 = vperm.xlu0 %2376, %v1786_v55  }
 0x48c   : > { %1883 = vperm.xlu1 %2377, %v1789_v57  }
 0x48f   : > { %1878 = vperm.xlu0 %2376, %v1788_v9  }
 0x4eb   : > { %v1819_v61 = vpop.permute.xlu1 %1818 }
 0x4ec   : > { %v1888_v23 = vmul.f32 %v1819_v61, %v1792_v11 }
 0x4ee   : > { %v1911_v53 = vadd.f32 %v3105_v12, %v1888_v23  ;;  %v1805_v23 = vld [vmem:[#allocation5 + $0x78] sm:$0xff] }
 0x4f0   : > { %v1927_v63 = vmax.f32 %v1911_v53, 0.0 }
 0x4f2   : > { %v1809_v35 = vpop.permute.xlu0 %1808  ;;  %1943 = vst [vmem:[%s2598_s14 + $0x10] sm:$0xff] %v1927_v63 }
 0x4f3   : > { %v1886_v15 = vmul.f32 %v1809_v35, %v1790_v4  ;;  %v1824_v26 = vpop.permute.xlu1 %1823 }
 0x4f4   : > { %v1889_v49 = vmul.f32 %v1824_v26, %v1793_v16 }
 0x4f5   : > { %v1909_v13 = vadd.f32 %v3105_v12, %v1886_v15  ;;  %v1804_v15 = vld [vmem:[#allocation5 + $0x70] sm:$0xff] }
 0x4f6   : > { %v1814_v50 = vpop.permute.xlu0 %1813  ;;  %v1912_v28 = vadd.f32 %v3105_v12, %v1889_v49 }
 0x4f7   : > { %v1925_v27 = vmax.f32 %v1909_v13, 0.0  ;;  %v1887_v62 = vmul.f32 %v1814_v50, %v1791_v21  ;;  %v1834_v36 = vpop.permute.xlu1 %1833 }
 0x4f8   : > { %v1928_v40 = vmax.f32 %v1912_v28, 0.0  ;;  %v1891_v3 = vmul.f32 %v1834_v36, %v1795_v41 }
 0x4f9   : > { %1941 = vst [vmem:[%s2598_s14] sm:$0xff] %v1925_v27  ;;  %v1910_v30 = vadd.f32 %v3105_v12, %v1887_v62 }
 0x4fa   : > { %v1829_v43 = vpop.permute.xlu0 %1828  ;;  %1944 = vst [vmem:[%s2598_s14 + $0x18] sm:$0xff] %v1928_v40  ;;  %v1914_v45 = vadd.f32 %v3105_v12, %v1891_v3 }
 0x4fb   : > { %v1926_v17 = vmax.f32 %v1910_v30, 0.0  ;;  %v1890_v42 = vmul.f32 %v1829_v43, %v1794_v31  ;;  %v1844_v34 = vpop.permute.xlu1 %1843 }
 0x4fc   : > { %v1930_v0 = vmax.f32 %v1914_v45, 0.0  ;;  %v1893_v14 = vmul.f32 %v1844_v34, %v1797_v2 }
 0x4fd   : > { %1942 = vst [vmem:[%s2598_s14 + $0x8] sm:$0xff] %v1926_v17  ;;  %v1913_v37 = vadd.f32 %v3105_v12, %v1890_v42 }
 0x4fe   : > { %v1839_v19 = vpop.permute.xlu0 %1838  ;;  %1946 = vst [vmem:[%s2598_s14 + $0x28] sm:$0xff] %v1930_v0  ;;  %v1916_v25 = vadd.f32 %v3105_v12, %v1893_v14 }
 0x4ff   : > { %v1929_v6 = vmax.f32 %v1913_v37, 0.0  ;;  %v1892_v24 = vmul.f32 %v1839_v19, %v1796_v46  ;;  %v1854_v58 = vpop.permute.xlu1 %1853 }
 0x500   : > { %v1932_v59 = vmax.f32 %v1916_v25, 0.0  ;;  %v1895_v44 = vmul.f32 %v1854_v58, %v1799_v38 }
 0x501   : > { %1945 = vst [vmem:[%s2598_s14 + $0x20] sm:$0xff] %v1929_v6  ;;  %v1915_v1 = vadd.f32 %v3105_v12, %v1892_v24 }
 0x502   : > { %v1849_v47 = vpop.permute.xlu0 %1848  ;;  %1948 = vst [vmem:[%s2598_s14 + $0x38] sm:$0xff] %v1932_v59  ;;  %v1918_v32 = vadd.f32 %v3105_v12, %v1895_v44 }
 0x503   : > { %v1931_v48 = vmax.f32 %v1915_v1, 0.0  ;;  %v1894_v39 = vmul.f32 %v1849_v47, %v1798_v20  ;;  %v1864_v29 = vpop.permute.xlu1 %1863 }
 0x504   : > { %v1934_v18 = vmax.f32 %v1918_v32, 0.0  ;;  %v1897_v54 = vmul.f32 %v1864_v29, %v1801_v10 }
 0x505   : > { %1947 = vst [vmem:[%s2598_s14 + $0x30] sm:$0xff] %v1931_v48  ;;  %v1917_v33 = vadd.f32 %v3105_v12, %v1894_v39 }
 0x506   : > { %v1859_v7 = vpop.permute.xlu0 %1858  ;;  %1950 = vst [vmem:[%s2598_s14 + $0x48] sm:$0xff] %v1934_v18  ;;  %v1920_v56 = vadd.f32 %v3105_v12, %v1897_v54 }
 0x507   : > { %v1933_v8 = vmax.f32 %v1917_v33, 0.0  ;;  %v1896_v5 = vmul.f32 %v1859_v7, %v1800_v22  ;;  %v1874_v52 = vpop.permute.xlu1 %1873 }
 0x508   : > { %v1936_v57 = vmax.f32 %v1920_v56, 0.0  ;;  %v1899_v9 = vmul.f32 %v1874_v52, %v1803_v51 }
 0x509   : > { %1949 = vst [vmem:[%s2598_s14 + $0x40] sm:$0xff] %v1933_v8  ;;  %v1919_v55 = vadd.f32 %v3105_v12, %v1896_v5 }
 0x50a   : > { %v1869_v11 = vpop.permute.xlu0 %1868  ;;  %1952 = vst [vmem:[%s2598_s14 + $0x58] sm:$0xff] %v1936_v57  ;;  %v1922_v35 = vadd.f32 %v3105_v12, %v1899_v9 }
 0x50b   : > { %v1935_v4 = vmax.f32 %v1919_v55, 0.0  ;;  %v1898_v61 = vmul.f32 %v1869_v11, %v1802_v60  ;;  %v1884_v53 = vpop.permute.xlu1 %1883 }
 0x50c   : > { %v1938_v21 = vmax.f32 %v1922_v35, 0.0  ;;  %v1901_v13 = vmul.f32 %v1884_v53, %v1805_v23 }
 0x50d   : > { %1951 = vst [vmem:[%s2598_s14 + $0x50] sm:$0xff] %v1935_v4  ;;  %v1921_v16 = vadd.f32 %v3105_v12, %v1898_v61 }
 0x50e   : > { %v1879_v26 = vpop.permute.xlu0 %1878  ;;  %1954 = vst [vmem:[%s2598_s14 + $0x68] sm:$0xff] %v1938_v21  ;;  %v1924_v50 = vadd.f32 %v3105_v12, %v1901_v13 }
 0x50f   : > { %v1937_v63 = vmax.f32 %v1921_v16, 0.0  ;;  %v1900_v49 = vmul.f32 %v1879_v26, %v1804_v15 }
 0x510   : > { %v1940_v62 = vmax.f32 %v1924_v50, 0.0 }
 0x511   : > { %1953 = vst [vmem:[%s2598_s14 + $0x60] sm:$0xff] %v1937_v63  ;;  %v1923_v27 = vadd.f32 %v3105_v12, %v1900_v49 }
 0x512   : > { %1956 = vst [vmem:[%s2598_s14 + $0x78] sm:$0xff] %v1940_v62 }
 0x513   : > { %v1939_v41 = vmax.f32 %v1923_v27, 0.0 }
 0x515   : > { %1955 = vst [vmem:[%s2598_s14 + $0x70] sm:$0xff] %v1939_v41 }
 0x516 PF: > { %s15_s24 = sadd.s32 1, %s2464_s24   ;;  %s3166_s18 = smov %s2444_s19 }
 0x517   : > { %p12_p0 = scmp.ge.s32.totalorder %s15_s24, 6   ;;  %s3167_s19 = smov %s2553_s6 }
 0x518   : > { %s3168_s20 = smov %s2456_s22  ;;  %s3169_s21 = smov %s2460_s23 }
 0x519   : > { %s3170_s22 = smov %s3173_s25  ;;  %s3171_s23 = smov %s3177_s26 }
 0x51a   :  { %14 = sbr.rel (!%p12_p0) target bundleno = 4 (0x4), region = 130 }

// kernel: model_forward_pallas.16
= control target key start
LH: loop header
LB: loop body
LE: loop exit
PB: predicated region body
PF: predicated region fallthrough
CT: control target
= control target key end

     0   :  { %s2518_s18 = smov 0   ;;  %s2520_s19 = smov 0   ;;  %s3247_s0 = inlined_call_operand.vmem [shape: f32[256,128], index: 0, kind: input, shape index: {}]   ;;  %s3248_s1 = inlined_call_operand.vmem [shape: f32[256,128], index: 1, kind: input, shape index: {}]   ;;  %s3249_s2 = inlined_call_operand.vmem [shape: f32[128,128], index: 2, kind: input, shape index: {}]   ;;  %s3250_s3 = inlined_call_operand.vmem [shape: bf16[256,256], index: 3, kind: input, shape index: {}]   ;;  %s3251_s4 = inlined_call_operand.vmem [shape: f32[1,128], index: 4, kind: input, shape index: {}]   ;;  %s3252_s5 = inlined_call_operand.vmem [shape: f32[256,128], index: 5, kind: output, shape index: {}]  }
   0x1   :  { %s2522_s20 = smov 0   ;;  %s2524_s21 = smov 0  }
   0x2   :  { %s2526_s22 = smov 0   ;;  %s2528_s23 = smov 0  }
   0x3   :  { %s2530_s24 = smov 0  }
   0x4 LB: > { %s24_s25 = sadd.s32 1, %s2472_s22  ;;  %s27_s26 = sadd.s32 1, %s2476_s23  ;;  %s2480_s24 = sphi %s2530_s24, %s15_s24   ;;  %s2476_s23 = sphi %s2528_s23, %s3258_s23   ;;  %s2472_s22 = sphi %s2526_s22, %s3257_s22   ;;  %s2468_s21 = sphi %s2524_s21, %s3256_s21   ;;  %s2464_s20 = sphi %s2522_s20, %s3255_s20   ;;  %s2460_s19 = sphi %s2520_s19, %s3254_s19   ;;  %s2456_s18 = sphi %s2518_s18, %s3253_s18  }
   0x5   : > { %p25_p0 = scmp.ge.s32.totalorder %s24_s25, 2  ;;  %p116_p1 = scmp.ne.s32.totalorder %s2460_s19, %s2456_s18 }
   0x6   : > { %p117_p2 = scmp.eq.s32.totalorder %s2480_s24, 0  ;;  %s109_s30 = sadd.s32 1, %s2460_s19 }
   0x7   : > { %s3260_s25 = smov (%p25_p0, %s24_s25), 0  ;;  %s3262_s26 = smov (!%p25_p0, %s27_s26), %s2476_s23 }
   0x8   : > { %p118_p3 = por %p117_p2, %p116_p1  ;;  %p29_p4 = scmp.ge.s32.totalorder %s3262_s26, 2 }
   0x9   : > { %s104_s27 = ssub.s32 %s2472_s22, %s3260_s25  ;;  %p2076_p6 = scmp.ge.s32.totalorder %s2480_s24, 4 }
   0xa   : > { %s3264_s26 = smov (%p29_p4, %s3262_s26), 0 }
   0xb   : > { %s105_s28 = ssub.s32 %s2476_s23, %s3264_s26  ;;  %195 = sbr.rel (%p2076_p6) target bundleno = 34 (0x22), region = 24 }
   0xc   : > { %s106_s29 = sor.u32 %s105_s28, %s104_s27 }
   0xd   : > { %p107_p5 = scmp.eq.s32.totalorder %s106_s29, 0 }
   0xf   : > { %s2569_s6 = scalar_select %p107_p5, %s2460_s19, %s109_s30  }
  0x12   : > { %216 = sbr.rel (!%p118_p3) target bundleno = 34 (0x22), region = 36  ;;  %s218_s7 = sand.u32 (%p118_p3), 1, %s2460_s19  }
  0x13   : > { %s2094_s8 = sshll.u32 (%p118_p3), %s2472_s22, 5  ;;  %s2077_s9 = sshll.u32 (%p118_p3), %s218_s7, 6 }
  0x14   : > { %s223_s10 = sadd.s32 (%p118_p3), %s2476_s23, %s2094_s8  ;;  %s220_s15 = scalar_lea.vmem (%p118_p3), [#allocation6], %s2077_s9 }
  0x15   : > { %s2080_s11 = sshll.u32 (%p118_p3), %s223_s10, 2 }
  0x16   : > { %s2578_s14 = scalar_lea.vmem (%p118_p3), %s3250_s3, %s2080_s11 }
  0x17   : > { %v241_v0 = vld [vmem:[%s2578_s14] sm:$0xf] (%p118_p3)  ;;  %v243_v1 = vld [vmem:[%s2578_s14 + $0x8] sm:$0xf] (%p118_p3)  ;;  %v245_v2 = vld [vmem:[%s2578_s14 + $0x10] sm:$0xf] (%p118_p3) }
  0x18   : > { %242 = vst [vmem:[%s220_s15] sm:$0xf] (%p118_p3), %v241_v0  ;;  %244 = vst [vmem:[%s220_s15 + $0x4] sm:$0xf] (%p118_p3), %v243_v1  ;;  %v247_v3 = vld [vmem:[%s2578_s14 + $0x18] sm:$0xf] (%p118_p3) }
  0x19   : > { %246 = vst [vmem:[%s220_s15 + $0x8] sm:$0xf] %v245_v2  ;;  %v249_v4 = vld [vmem:[%s2578_s14 + $0x20] sm:$0xf]  ;;  %v251_v5 = vld [vmem:[%s2578_s14 + $0x28] sm:$0xf] }
  0x1a   : > { %248 = vst [vmem:[%s220_s15 + $0xc] sm:$0xf] %v247_v3  ;;  %250 = vst [vmem:[%s220_s15 + $0x10] sm:$0xf] %v249_v4  ;;  %v253_v6 = vld [vmem:[%s2578_s14 + $0x30] sm:$0xf] }
  0x1b   : > { %252 = vst [vmem:[%s220_s15 + $0x14] sm:$0xf] %v251_v5  ;;  %v255_v7 = vld [vmem:[%s2578_s14 + $0x38] sm:$0xf]  ;;  %v257_v8 = vld [vmem:[%s2578_s14 + $0x40] sm:$0xf] }
  0x1c   : > { %254 = vst [vmem:[%s220_s15 + $0x18] sm:$0xf] %v253_v6  ;;  %256 = vst [vmem:[%s220_s15 + $0x1c] sm:$0xf] %v255_v7  ;;  %v259_v9 = vld [vmem:[%s2578_s14 + $0x48] sm:$0xf] }
  0x1d   : > { %258 = vst [vmem:[%s220_s15 + $0x20] sm:$0xf] %v257_v8  ;;  %v261_v10 = vld [vmem:[%s2578_s14 + $0x50] sm:$0xf]  ;;  %v263_v11 = vld [vmem:[%s2578_s14 + $0x58] sm:$0xf] }
  0x1e   : > { %260 = vst [vmem:[%s220_s15 + $0x24] sm:$0xf] %v259_v9  ;;  %262 = vst [vmem:[%s220_s15 + $0x28] sm:$0xf] %v261_v10  ;;  %v265_v12 = vld [vmem:[%s2578_s14 + $0x60] sm:$0xf] }
  0x1f   : > { %264 = vst [vmem:[%s220_s15 + $0x2c] sm:$0xf] %v263_v11  ;;  %v267_v13 = vld [vmem:[%s2578_s14 + $0x68] sm:$0xf]  ;;  %v269_v14 = vld [vmem:[%s2578_s14 + $0x70] sm:$0xf] }
  0x20   : > { %266 = vst [vmem:[%s220_s15 + $0x30] sm:$0xf] %v265_v12  ;;  %268 = vst [vmem:[%s220_s15 + $0x34] sm:$0xf] %v267_v13  ;;  %v271_v15 = vld [vmem:[%s2578_s14 + $0x78] sm:$0xf] }
  0x21   : > { %270 = vst [vmem:[%s220_s15 + $0x38] sm:$0xf] %v269_v14  ;;  %272 = vst [vmem:[%s220_s15 + $0x3c] sm:$0xf] %v271_v15 }
  0x22 PF: > { %p2081_p7 = scmp.ge.s32.totalorder %s2480_s24, 1  ;;  %p326_p8 = scmp.lt.s32.totalorder %s2480_s24, 5 }
  0x24   : > { %p327_p9 = pnand %p2081_p7, %p326_p8 }
  0x25   : > { %s333_s16 = sand.u32 (!%p327_p9), 1, %s2456_s18   ;;  %s2083_s17 = sshll.u32 (!%p327_p9), %s2464_s20, 4 }
  0x26   : > { %330 = sbr.rel (%p327_p9) target bundleno = 1393 (0x571), region = 77  ;;  %s2082_s27 = sshll.u32 (!%p327_p9), %s333_s16, 6 }
  0x27   : > { %p371_p10 = scmp.lt.s32.totalorder (!%p327_p9), %s2083_s17, 31  ;;  %s2085_s28 = sshll.u32 (!%p327_p9), %s2468_s21, 4 }
  0x28   : > { %p377_p11 = scmp.lt.s32.totalorder (!%p327_p9), %s2085_s28, 31  ;;  %s2616_s21 = scalar_lea.vmem (!%p327_p9), [#allocation6], %s2082_s27 }
  0x29   : > { %p2089_p12 = scmp.ne.s32.totalorder (!%p327_p9), %s2464_s20, 0 }
  0x2d   : > { %s3266_s17 = smov (!%p371_p10, %s2083_s17), 31  ;;  %s3268_s28 = smov (!%p377_p11, %s2085_s28), 31 }
  0x2e   : > { %s2084_s29 = sshll.u32 %s3266_s17, 3  ;;  %s2086_s9 = sshll.u32 %s3268_s28, 3  ;;  %v418_v16 = vld [vmem:[%s3249_s2] sm:$0xff] (!%p2089_p12)  ;;  %v419_v17 = vld [vmem:[%s3249_s2 + $0x8] sm:$0xff] (!%p2089_p12)  ;;  %v420_v18 = vld [vmem:[%s3249_s2 + $0x10] sm:$0xff] (!%p2089_p12)  ;;  %vm603_vm0 = vcmask (!%p2089_p12), 7168  }
  0x2f   : > { %s2604_s8 = scalar_lea.vmem %s3247_s0, %s2084_s29  ;;  %s2609_s12 = scalar_lea.vmem %s3248_s1, %s2086_s9  ;;  %v434_v19 = vpack.c.bf16 (!%p2089_p12), %v419_v17, %v418_v16  ;;  %v421_v20 = vld [vmem:[%s3249_s2 + $0x18] sm:$0xff] (!%p2089_p12)  ;;  %v422_v22 = vld [vmem:[%s3249_s2 + $0x20] sm:$0xff] (!%p2089_p12)  ;;  %v423_v23 = vld [vmem:[%s3249_s2 + $0x28] sm:$0xff] (!%p2089_p12)  ;;  %v2482_v0 = vmov (!%p2089_p12), -1e+20   ;;  %v2483_v1 = vmov (!%p2089_p12), 0.0  }
  0x30   : > { %s2614_s14 = scalar_lea.vmem %s3252_s5, %s2086_s9  ;;  %393 = sbr.rel (%p2089_p12) target bundleno = 437 (0x1b5), region = 85  ;;  %v435_v21 = vpack.c.bf16 (!%p2089_p12), %v421_v20, %v420_v18  ;;  %v436_v24 = vpack.c.bf16 (!%p2089_p12), %v423_v23, %v422_v22  ;;  %v424_v25 = vld [vmem:[%s3249_s2 + $0x30] sm:$0xff] (!%p2089_p12)  ;;  %v394_v26 = vld [vmem:[%s2609_s12] sm:$0xff] (!%p2089_p12)  ;;  %v395_v27 = vld [vmem:[%s2609_s12 + $0x8] sm:$0xff] (!%p2089_p12)  ;;  %620 = vst.msk [vmem:[#allocation3] sm:$0xff] (!%p2089_p12), %vm603_vm0, %v2482_v0 }
  0x31   : > { %2166 = vmatprep.subr.bf16.mxu0 (!%p2089_p12), %v434_v19  ;;  %2230 = vmatprep.subr.bf16.mxu1 (!%p2089_p12), %v434_v19  ;;  %v425_v28 = vld [vmem:[%s3249_s2 + $0x38] sm:$0xff] (!%p2089_p12)  ;;  %v410_v29 = vpack.c.bf16 (!%p2089_p12), %v395_v27, %v394_v26  ;;  %v402_v30 = vld [vmem:[%s2609_s12 + $0x40] sm:$0xff] (!%p2089_p12)  ;;  %v403_v31 = vld [vmem:[%s2609_s12 + $0x48] sm:$0xff] (!%p2089_p12)  ;;  %621 = vst.msk [vmem:[#allocation3 + $0x8] sm:$0xff] (!%p2089_p12), %vm603_vm0, %v2482_v0 }
  0x32   : > { %2167 = vmatpush3.bf16.msra.mxu0 (!%p2089_p12), %v434_v19  ;;  %2238 = vmatpush3.bf16.msra.mxu1 (!%p2089_p12), %v434_v19  ;;  %v414_v32 = vpack.c.bf16 (!%p2089_p12), %v403_v31, %v402_v30  ;;  %v437_v33 = vpack.c.bf16 (!%p2089_p12), %v425_v28, %v424_v25  ;;  %v426_v34 = vld [vmem:[%s3249_s2 + $0x40] sm:$0xff] (!%p2089_p12)  ;;  %v427_v35 = vld [vmem:[%s3249_s2 + $0x48] sm:$0xff] (!%p2089_p12)  ;;  %v428_v37 = vld [vmem:[%s3249_s2 + $0x50] sm:$0xff] (!%p2089_p12)  ;;  %622 = vst.msk [vmem:[#allocation3 + $0x10] sm:$0xff] (!%p2089_p12), %vm603_vm0, %v2482_v0 }
  0x33   : > { %2168 = vmatprep.subr.bf16.mxu0 (!%p2089_p12), %v435_v21  ;;  %2231 = vmatprep.subr.bf16.mxu1 (!%p2089_p12), %v435_v21  ;;  %v438_v36 = vpack.c.bf16 (!%p2089_p12), %v427_v35, %v426_v34  ;;  %v429_v38 = vld [vmem:[%s3249_s2 + $0x58] sm:$0xff] (!%p2089_p12)  ;;  %v430_v40 = vld [vmem:[%s3249_s2 + $0x60] sm:$0xff] (!%p2089_p12)  ;;  %v431_v41 = vld [vmem:[%s3249_s2 + $0x68] sm:$0xff] (!%p2089_p12)  ;;  %623 = vst.msk [vmem:[#allocation3 + $0x18] sm:$0xff] (!%p2089_p12), %vm603_vm0, %v2482_v0 }
  0x34   : > { %2182 = vmatprep.mubr.bf16.mxu0 (!%p2089_p12), %v410_v29  ;;  %2190 = vmatprep.mubr.bf16.mxu1 (!%p2089_p12), %v414_v32  ;;  %v439_v39 = vpack.c.bf16 (!%p2089_p12), %v429_v38, %v428_v37  ;;  %v440_v42 = vpack.c.bf16 (!%p2089_p12), %v431_v41, %v430_v40  ;;  %v432_v43 = vld [vmem:[%s3249_s2 + $0x70] sm:$0xff] (!%p2089_p12)  ;;  %v433_v44 = vld [vmem:[%s3249_s2 + $0x78] sm:$0xff] (!%p2089_p12)  ;;  %v398_v50 = vld [vmem:[%s2609_s12 + $0x20] sm:$0xff] (!%p2089_p12)  ;;  %624 = vst.msk [vmem:[#allocation3 + $0x20] sm:$0xff] (!%p2089_p12), %vm603_vm0, %v2482_v0 }
  0x35   : > { %v441_v45 = vpack.c.bf16 (!%p2089_p12), %v433_v44, %v432_v43  ;;  %v396_v46 = vld [vmem:[%s2609_s12 + $0x10] sm:$0xff] (!%p2089_p12)  ;;  %v397_v47 = vld [vmem:[%s2609_s12 + $0x18] sm:$0xff] (!%p2089_p12)  ;;  %v399_v51 = vld [vmem:[%s2609_s12 + $0x28] sm:$0xff] (!%p2089_p12)  ;;  %625 = vst.msk [vmem:[#allocation3 + $0x28] sm:$0xff] (!%p2089_p12), %vm603_vm0, %v2482_v0 }
  0x36   : > { %2169 = vmatpush3.bf16.msra.mxu0 (!%p2089_p12), %v435_v21  ;;  %2239 = vmatpush3.bf16.msra.mxu1 (!%p2089_p12), %v435_v21  ;;  %v404_v48 = vld [vmem:[%s2609_s12 + $0x50] sm:$0xff] (!%p2089_p12)  ;;  %v405_v49 = vld [vmem:[%s2609_s12 + $0x58] sm:$0xff] (!%p2089_p12)  ;;  %v406_v52 = vld [vmem:[%s2609_s12 + $0x60] sm:$0xff] (!%p2089_p12)  ;;  %v411_v54 = vpack.c.bf16 (!%p2089_p12), %v397_v47, %v396_v46  ;;  %v412_v56 = vpack.c.bf16 (!%p2089_p12), %v399_v51, %v398_v50  ;;  %626 = vst.msk [vmem:[#allocation3 + $0x30] sm:$0xff] (!%p2089_p12), %vm603_vm0, %v2482_v0 }
  0x37   : > { %2170 = vmatprep.subr.bf16.mxu0 %v436_v24  ;;  %2232 = vmatprep.subr.bf16.mxu1 %v436_v24  ;;  %v407_v53 = vld [vmem:[%s2609_s12 + $0x68] sm:$0xff]  ;;  %v415_v55 = vpack.c.bf16 %v405_v49, %v404_v48  ;;  %v400_v58 = vld [vmem:[%s2609_s12 + $0x30] sm:$0xff]  ;;  %v401_v59 = vld [vmem:[%s2609_s12 + $0x38] sm:$0xff]  ;;  %627 = vst.msk [vmem:[#allocation3 + $0x38] sm:$0xff] %vm603_vm0, %v2482_v0 }
  0x38   : > { %v416_v57 = vpack.c.bf16 %v407_v53, %v406_v52  ;;  %v408_v60 = vld [vmem:[%s2609_s12 + $0x70] sm:$0xff]  ;;  %v409_v61 = vld [vmem:[%s2609_s12 + $0x78] sm:$0xff]  ;;  %v413_v62 = vpack.c.bf16 %v401_v59, %v400_v58  ;;  %628 = vst.msk [vmem:[#allocation3 + $0x40] sm:$0xff] %vm603_vm0, %v2482_v0  ;;  %629 = vst.msk [vmem:[#allocation3 + $0x48] sm:$0xff] %vm603_vm0, %v2482_v0  ;;  %s2484_s12 = smov 1  }
  0x39   : > { %v417_v63 = vpack.c.bf16 %v409_v61, %v408_v60  ;;  %630 = vst.msk [vmem:[#allocation3 + $0x50] sm:$0xff] %vm603_vm0, %v2482_v0  ;;  %631 = vst.msk [vmem:[#allocation3 + $0x58] sm:$0xff] %vm603_vm0, %v2482_v0 }
  0x3a   : > { %2171 = vmatpush3.bf16.msra.mxu0 %v436_v24  ;;  %2240 = vmatpush3.bf16.msra.mxu1 %v436_v24  ;;  %632 = vst.msk [vmem:[#allocation3 + $0x60] sm:$0xff] %vm603_vm0, %v2482_v0  ;;  %633 = vst.msk [vmem:[#allocation3 + $0x68] sm:$0xff] %vm603_vm0, %v2482_v0 }
  0x3b   : > { %2172 = vmatprep.subr.bf16.mxu0 %v437_v33  ;;  %2233 = vmatprep.subr.bf16.mxu1 %v437_v33  ;;  %634 = vst.msk [vmem:[#allocation3 + $0x70] sm:$0xff] %vm603_vm0, %v2482_v0  ;;  %635 = vst.msk [vmem:[#allocation3 + $0x78] sm:$0xff] %vm603_vm0, %v2482_v0 }
  0x3c   : > { %636 = vst.msk [vmem:[#allocation4] sm:$0xff] %vm603_vm0, %v2483_v1  ;;  %637 = vst.msk [vmem:[#allocation4 + $0x8] sm:$0xff] %vm603_vm0, %v2483_v1 }
  0x3d   : > { %638 = vst.msk [vmem:[#allocation4 + $0x10] sm:$0xff] %vm603_vm0, %v2483_v1  ;;  %639 = vst.msk [vmem:[#allocation4 + $0x18] sm:$0xff] %vm603_vm0, %v2483_v1 }
  0x3e   : > { %2173 = vmatpush3.bf16.msra.mxu0 %v437_v33  ;;  %2241 = vmatpush3.bf16.msra.mxu1 %v437_v33  ;;  %640 = vst.msk [vmem:[#allocation4 + $0x20] sm:$0xff] %vm603_vm0, %v2483_v1  ;;  %641 = vst.msk [vmem:[#allocation4 + $0x28] sm:$0xff] %vm603_vm0, %v2483_v1 }
  0x3f   : > { %2174 = vmatprep.subr.bf16.mxu0 %v438_v36  ;;  %2234 = vmatprep.subr.bf16.mxu1 %v438_v36  ;;  %642 = vst.msk [vmem:[#allocation4 + $0x30] sm:$0xff] %vm603_vm0, %v2483_v1  ;;  %643 = vst.msk [vmem:[#allocation4 + $0x38] sm:$0xff] %vm603_vm0, %v2483_v1 }
  0x40   : > { %644 = vst.msk [vmem:[#allocation4 + $0x40] sm:$0xff] %vm603_vm0, %v2483_v1  ;;  %645 = vst.msk [vmem:[#allocation4 + $0x48] sm:$0xff] %vm603_vm0, %v2483_v1 }
  0x41   : > { %646 = vst.msk [vmem:[#allocation4 + $0x50] sm:$0xff] %vm603_vm0, %v2483_v1  ;;  %647 = vst.msk [vmem:[#allocation4 + $0x58] sm:$0xff] %vm603_vm0, %v2483_v1 }
  0x42   : > { %2175 = vmatpush3.bf16.msra.mxu0 %v438_v36  ;;  %2242 = vmatpush3.bf16.msra.mxu1 %v438_v36  ;;  %648 = vst.msk [vmem:[#allocation4 + $0x60] sm:$0xff] %vm603_vm0, %v2483_v1  ;;  %649 = vst.msk [vmem:[#allocation4 + $0x68] sm:$0xff] %vm603_vm0, %v2483_v1 }
  0x43   : > { %2176 = vmatprep.subr.bf16.mxu0 %v439_v39  ;;  %2235 = vmatprep.subr.bf16.mxu1 %v439_v39  ;;  %650 = vst.msk [vmem:[#allocation4 + $0x70] sm:$0xff] %vm603_vm0, %v2483_v1  ;;  %651 = vst.msk [vmem:[#allocation4 + $0x78] sm:$0xff] %vm603_vm0, %v2483_v1 }
  0x44   : > { %652 = vst [vmem:[#allocation5] sm:$0xff] %v2483_v1  ;;  %653 = vst [vmem:[#allocation5 + $0x8] sm:$0xff] %v2483_v1 }
  0x45   : > { %654 = vst [vmem:[#allocation5 + $0x10] sm:$0xff] %v2483_v1  ;;  %655 = vst [vmem:[#allocation5 + $0x18] sm:$0xff] %v2483_v1 }
  0x46   : > { %2177 = vmatpush3.bf16.msra.mxu0 %v439_v39  ;;  %2243 = vmatpush3.bf16.msra.mxu1 %v439_v39  ;;  %656 = vst [vmem:[#allocation5 + $0x20] sm:$0xff] %v2483_v1  ;;  %657 = vst [vmem:[#allocation5 + $0x28] sm:$0xff] %v2483_v1 }
  0x47   : > { %2178 = vmatprep.subr.bf16.mxu0 %v440_v42  ;;  %2236 = vmatprep.subr.bf16.mxu1 %v440_v42  ;;  %658 = vst [vmem:[#allocation5 + $0x30] sm:$0xff] %v2483_v1  ;;  %659 = vst [vmem:[#allocation5 + $0x38] sm:$0xff] %v2483_v1 }
  0x48   : > { %660 = vst [vmem:[#allocation5 + $0x40] sm:$0xff] %v2483_v1  ;;  %661 = vst [vmem:[#allocation5 + $0x48] sm:$0xff] %v2483_v1 }
  0x49   : > { %662 = vst [vmem:[#allocation5 + $0x50] sm:$0xff] %v2483_v1  ;;  %663 = vst [vmem:[#allocation5 + $0x58] sm:$0xff] %v2483_v1 }
  0x4a   : > { %2179 = vmatpush3.bf16.msra.mxu0 %v440_v42  ;;  %2244 = vmatpush3.bf16.msra.mxu1 %v440_v42  ;;  %664 = vst [vmem:[#allocation5 + $0x60] sm:$0xff] %v2483_v1  ;;  %665 = vst [vmem:[#allocation5 + $0x68] sm:$0xff] %v2483_v1 }
  0x4b   : > { %2180 = vmatprep.subr.bf16.mxu0 %v441_v45  ;;  %2237 = vmatprep.subr.bf16.mxu1 %v441_v45  ;;  %666 = vst [vmem:[#allocation5 + $0x70] sm:$0xff] %v2483_v1  ;;  %667 = vst [vmem:[#allocation5 + $0x78] sm:$0xff] %v2483_v1 }
  0x4e   : > { %2181 = vmatpush3.bf16.msra.mxu0 %v441_v45  ;;  %2245 = vmatpush3.bf16.msra.mxu1 %v441_v45 }
  0x51   : > { %2183 = vmatmul.mubr.bf16.vlgmr.msra.gmra.mrb[0].mxu0 %v411_v54  ;;  %2191 = vmatmul.mubr.bf16.vlgmr.msra.gmra.mrb[0].mxu1 %v415_v55 }
  0x52   : > { %2186 = vmatprep.mubr.bf16.mxu0 %v412_v56  ;;  %2194 = vmatprep.mubr.bf16.mxu1 %v416_v57 }
  0x59   : > { %2187 = vmatmul.mubr.bf16.gmra.mrb[4].mxu0 %v413_v62  ;;  %2195 = vmatmul.mubr.bf16.gmra.mrb[4].mxu1 %v417_v63 }
 0x124   : > { %v2184_v2 = vpop.f32.mrb[0].mxu0  ;;  %v2192_v3 = vpop.f32.mrb[0].mxu1 }
 0x125   : > { %575 = vrot.lane.b32.xlu0 %v2192_v3, %s2484_s12  ;;  %v508_v4 = vpop.f32.mrb[1].mxu1  ;;  %559 = vrot.lane.b32.xlu1 %v2184_v2, %s2484_s12  ;;  %v476_v5 = vpop.f32.mrb[1].mxu0 }
 0x126   : > { %v2185_v6 = vpop.f32.mrb[2].mxu0  ;;  %v2193_v7 = vpop.f32.mrb[2].mxu1 }
 0x127   : > { %v479_v8 = vpop.f32.mrb[3].mxu0  ;;  %v511_v9 = vpop.f32.mrb[3].mxu1 }
 0x129   : > { %555 = vrot.lane.b32.xlu0 %v476_v5, %s2484_s12  ;;  %561 = vrot.lane.b32.xlu1 %v2185_v6, %s2484_s12 }
 0x12c   : > { %v2188_v10 = vpop.f32.mrb[4].mxu0  ;;  %v2196_v11 = vpop.f32.mrb[4].mxu1 }
 0x12d   : > { %571 = vrot.lane.b32.xlu0 %v508_v4, %s2484_s12  ;;  %577 = vrot.lane.b32.xlu1 %v2193_v7, %s2484_s12  ;;  %v492_v12 = vpop.f32.mrb[5].mxu0  ;;  %v524_v13 = vpop.f32.mrb[5].mxu1 }
 0x12e   : > { %v2189_v14 = vpop.f32.mrb[6].mxu0  ;;  %v2197_v15 = vpop.f32.mrb[6].mxu1 }
 0x12f   : > { %v495_v16 = vpop.f32.mrb[7].mxu0  ;;  %v527_v17 = vpop.f32.mrb[7].mxu1 }
 0x131   : > { %573 = vrot.lane.b32.xlu1 %v511_v9, %s2484_s12  ;;  %557 = vrot.lane.b32.xlu0 %v479_v8, %s2484_s12 }
 0x135   : > { %567 = vrot.lane.b32.xlu0 %v2188_v10, %s2484_s12  ;;  %569 = vrot.lane.b32.xlu1 %v2189_v14, %s2484_s12 }
 0x139   : > { %563 = vrot.lane.b32.xlu0 %v492_v12, %s2484_s12  ;;  %565 = vrot.lane.b32.xlu1 %v495_v16, %s2484_s12 }
 0x13d   : > { %579 = vrot.lane.b32.xlu0 %v524_v13, %s2484_s12  ;;  %581 = vrot.lane.b32.xlu1 %v527_v17, %s2484_s12 }
 0x141   : > { %583 = vrot.lane.b32.xlu0 %v2196_v11, %s2484_s12  ;;  %585 = vrot.lane.b32.xlu1 %v2197_v15, %s2484_s12 }
 0x197   : > { %v576_v18 = vpop.permute.xlu0 %575  ;;  %v560_v19 = vpop.permute.xlu1 %559 }
 0x198   : > { %614 = vst.msk [vmem:[#allocation2 + $0x50] sm:$0xff] %vm603_vm0, %v576_v18  ;;  %606 = vst.msk [vmem:[#allocation2 + $0x10] sm:$0xff] %vm603_vm0, %v560_v19 }
 0x19b   : > { %v556_v20 = vpop.permute.xlu0 %555  ;;  %v562_v21 = vpop.permute.xlu1 %561 }
 0x19c   : > { %604 = vst.msk [vmem:[#allocation2] sm:$0xff] %vm603_vm0, %v556_v20  ;;  %607 = vst.msk [vmem:[#allocation2 + $0x18] sm:$0xff] %vm603_vm0, %v562_v21 }
 0x19f   : > { %v572_v22 = vpop.permute.xlu0 %571  ;;  %v578_v23 = vpop.permute.xlu1 %577 }
 0x1a0   : > { %612 = vst.msk [vmem:[#allocation2 + $0x40] sm:$0xff] %vm603_vm0, %v572_v22  ;;  %615 = vst.msk [vmem:[#allocation2 + $0x58] sm:$0xff] %vm603_vm0, %v578_v23 }
 0x1a3   : > { %v574_v24 = vpop.permute.xlu1 %573  ;;  %v558_v25 = vpop.permute.xlu0 %557 }
 0x1a4   : > { %613 = vst.msk [vmem:[#allocation2 + $0x48] sm:$0xff] %vm603_vm0, %v574_v24  ;;  %605 = vst.msk [vmem:[#allocation2 + $0x8] sm:$0xff] %vm603_vm0, %v558_v25 }
 0x1a7   : > { %v568_v26 = vpop.permute.xlu0 %567  ;;  %v570_v27 = vpop.permute.xlu1 %569 }
 0x1a8   : > { %610 = vst.msk [vmem:[#allocation2 + $0x30] sm:$0xff] %vm603_vm0, %v568_v26  ;;  %611 = vst.msk [vmem:[#allocation2 + $0x38] sm:$0xff] %vm603_vm0, %v570_v27 }
 0x1ab   : > { %v564_v28 = vpop.permute.xlu0 %563  ;;  %v566_v29 = vpop.permute.xlu1 %565 }
 0x1ac   : > { %608 = vst.msk [vmem:[#allocation2 + $0x20] sm:$0xff] %vm603_vm0, %v564_v28  ;;  %609 = vst.msk [vmem:[#allocation2 + $0x28] sm:$0xff] %vm603_vm0, %v566_v29 }
 0x1af   : > { %v580_v30 = vpop.permute.xlu0 %579  ;;  %v582_v31 = vpop.permute.xlu1 %581 }
 0x1b0   : > { %616 = vst.msk [vmem:[#allocation2 + $0x60] sm:$0xff] %vm603_vm0, %v580_v30  ;;  %617 = vst.msk [vmem:[#allocation2 + $0x68] sm:$0xff] %vm603_vm0, %v582_v31 }
 0x1b3   : > { %v584_v32 = vpop.permute.xlu0 %583  ;;  %v586_v33 = vpop.permute.xlu1 %585 }
 0x1b4   : > { %618 = vst.msk [vmem:[#allocation2 + $0x70] sm:$0xff] %vm603_vm0, %v584_v32  ;;  %619 = vst.msk [vmem:[#allocation2 + $0x78] sm:$0xff] %vm603_vm0, %v586_v33 }
 0x1b5 PF: > { %v670_v34 = vld [vmem:[%s2604_s8 + $0x10] sm:$0xff]  ;;  %v668_v35 = vld [vmem:[%s2604_s8] sm:$0xff]  ;;  %v2485_v36 = vmov 127   ;;  %v669_v37 = vld [vmem:[%s2604_s8 + $0x8] sm:$0xff]  ;;  %v2486_v61 = vmov 0   ;;  %vm919_vm1 = vcmask 130112  }
 0x1b6   : > { %2325 = vset.pattern.permute.xlu1 %v2485_v36  ;;  %2324 = vset.pattern.permute.xlu0 %v2485_v36  ;;  %v671_v38 = vld [vmem:[%s2604_s8 + $0x18] sm:$0xff]  ;;  %v1569_v39 = vpack.c.bf16 %v669_v37, %v668_v35  ;;  %v673_v41 = vld [vmem:[%s2604_s8 + $0x28] sm:$0xff]  ;;  %v672_v42 = vld [vmem:[%s2604_s8 + $0x20] sm:$0xff]  ;;  %vm926_vm2 = vcmask 195712   ;;  %vm933_vm3 = vcmask 261312   ;;  %vm940_vm4 = vcmask 326912  }
 0x1b7   : > { %867 = vperm.xlu1 %2325, %v670_v34   ;;  %861 = vperm.xlu0 %2324, %v668_v35   ;;  %v1570_v40 = vpack.c.bf16 %v671_v38, %v670_v34  ;;  %v1571_v43 = vpack.c.bf16 %v673_v41, %v672_v42  ;;  %v675_v44 = vld [vmem:[%s2604_s8 + $0x38] sm:$0xff]  ;;  %v674_v45 = vld [vmem:[%s2604_s8 + $0x30] sm:$0xff]  ;;  %v677_v47 = vld [vmem:[%s2604_s8 + $0x48] sm:$0xff]  ;;  %vm947_vm5 = vcmask 392512   ;;  %vm954_vm6 = vcmask 458112   ;;  %p2090_p13 = scmp.ne.s32.totalorder %s2464_s20, 1 }
 0x1b8   : > { %2198 = vmatprep.subr.bf16.mxu0 %v1569_v39  ;;  %2246 = vmatprep.subr.bf16.mxu1 %v1569_v39  ;;  %v1572_v46 = vpack.c.bf16 %v675_v44, %v674_v45  ;;  %v676_v48 = vld [vmem:[%s2604_s8 + $0x40] sm:$0xff]  ;;  %v679_v50 = vld [vmem:[%s2604_s8 + $0x58] sm:$0xff]  ;;  %v678_v51 = vld [vmem:[%s2604_s8 + $0x50] sm:$0xff]  ;;  %vm961_vm7 = vcmask 523712   ;;  %vm968_vm8 = vcmask 589312   ;;  %vm975_vm9 = vcmask 654912  }
 0x1b9   : > { %2199 = vmatpush3.bf16.msra.mxu0 %v1569_v39  ;;  %2254 = vmatpush3.bf16.msra.mxu1 %v1569_v39  ;;  %v1573_v49 = vpack.c.bf16 %v677_v47, %v676_v48  ;;  %v1574_v52 = vpack.c.bf16 %v679_v50, %v678_v51  ;;  %v681_v53 = vld [vmem:[%s2604_s8 + $0x68] sm:$0xff]  ;;  %v680_v54 = vld [vmem:[%s2604_s8 + $0x60] sm:$0xff]  ;;  %v683_v56 = vld [vmem:[%s2604_s8 + $0x78] sm:$0xff]  ;;  %vm982_vm10 = vcmask 720512   ;;  %vm989_vm11 = vcmask 786112  }
 0x1ba   : > { %2200 = vmatprep.subr.bf16.mxu0 %v1570_v40  ;;  %2247 = vmatprep.subr.bf16.mxu1 %v1570_v40  ;;  %v1575_v55 = vpack.c.bf16 %v681_v53, %v680_v54  ;;  %v682_v57 = vld [vmem:[%s2604_s8 + $0x70] sm:$0xff]  ;;  %v685_v59 = vld [vmem:[#allocation2 + $0x8] sm:$0xff]  ;;  %v684_v60 = vld [vmem:[#allocation2] sm:$0xff]  ;;  %vm996_vm12 = vcmask 851712   ;;  %vm1003_vm13 = vcmask 917312   ;;  %vm1010_vm14 = vcmask 982912  }
 0x1bb   : > { %870 = vperm.xlu1 %2325, %v671_v38   ;;  %864 = vperm.xlu0 %2324, %v669_v37   ;;  %v1576_v58 = vpack.c.bf16 %v683_v56, %v682_v57  ;;  %v692_v62 = vld [vmem:[#allocation2 + $0x40] sm:$0xff]  ;;  %v693_v63 = vld [vmem:[#allocation2 + $0x48] sm:$0xff]  ;;  %v686_v0 = vld [vmem:[#allocation2 + $0x10] sm:$0xff]  ;;  %vm1017_vm15 = vcmask 1048512  }
 0x1bc   : > { %v687_v1 = vld [vmem:[#allocation2 + $0x18] sm:$0xff]  ;;  %v694_v2 = vld [vmem:[#allocation2 + $0x50] sm:$0xff]  ;;  %v688_v4 = vld [vmem:[#allocation2 + $0x20] sm:$0xff] }
 0x1bd   : > { %2201 = vmatpush3.bf16.msra.mxu0 %v1570_v40  ;;  %2255 = vmatpush3.bf16.msra.mxu1 %v1570_v40  ;;  %v695_v3 = vld [vmem:[#allocation2 + $0x58] sm:$0xff]  ;;  %v689_v5 = vld [vmem:[#allocation2 + $0x28] sm:$0xff]  ;;  %v696_v6 = vld [vmem:[#allocation2 + $0x60] sm:$0xff] }
 0x1be   : > { %2202 = vmatprep.subr.bf16.mxu0 %v1571_v43  ;;  %2248 = vmatprep.subr.bf16.mxu1 %v1571_v43  ;;  %v697_v7 = vld [vmem:[#allocation2 + $0x68] sm:$0xff]  ;;  %v690_v8 = vld [vmem:[#allocation2 + $0x30] sm:$0xff]  ;;  %v691_v9 = vld [vmem:[#allocation2 + $0x38] sm:$0xff] }
 0x1bf   : > { %876 = vperm.xlu1 %2325, %v673_v41   ;;  %873 = vperm.xlu0 %2324, %v672_v42   ;;  %v698_v10 = vld [vmem:[#allocation2 + $0x70] sm:$0xff]  ;;  %v699_v11 = vld [vmem:[#allocation2 + $0x78] sm:$0xff]  ;;  %v2096_v12 = vld [vmem:[%s2616_s21] sm:$0xff]  }
 0x1c0   : > { %v2097_v13 = vunpack.c.l.bf16 %v2096_v12  ;;  %v2098_v14 = vunpack.c.h.bf16 %v2096_v12  ;;  %v2127_v15 = vld [vmem:[%s2616_s21 + $0x8] sm:$0xff]   ;;  %v2128_v18 = vld [vmem:[%s2616_s21 + $0x10] sm:$0xff]   ;;  %v2129_v21 = vld [vmem:[%s2616_s21 + $0x18] sm:$0xff]  }
 0x1c1   : > { %2203 = vmatpush3.bf16.msra.mxu0 %v1571_v43  ;;  %2256 = vmatpush3.bf16.msra.mxu1 %v1571_v43  ;;  %v2101_v16 = vunpack.c.l.bf16 %v2127_v15  ;;  %v2102_v17 = vunpack.c.h.bf16 %v2127_v15  ;;  %v2105_v19 = vunpack.c.l.bf16 %v2128_v18  ;;  %v2106_v20 = vunpack.c.h.bf16 %v2128_v18  ;;  %v2130_v24 = vld [vmem:[%s2616_s21 + $0x20] sm:$0xff]   ;;  %v2131_v27 = vld [vmem:[%s2616_s21 + $0x28] sm:$0xff]   ;;  %v2132_v32 = vld [vmem:[%s2616_s21 + $0x30] sm:$0xff]  }
 0x1c2   : > { %2204 = vmatprep.subr.bf16.mxu0 %v1572_v46  ;;  %2249 = vmatprep.subr.bf16.mxu1 %v1572_v46  ;;  %v2109_v22 = vunpack.c.l.bf16 %v2129_v21  ;;  %v2110_v23 = vunpack.c.h.bf16 %v2129_v21  ;;  %v2113_v25 = vunpack.c.l.bf16 %v2130_v24  ;;  %v2114_v26 = vunpack.c.h.bf16 %v2130_v24  ;;  %v2133_v36 = vld [vmem:[%s2616_s21 + $0x38] sm:$0xff]  }
 0x1c3   : > { %882 = vperm.xlu1 %2325, %v675_v44   ;;  %879 = vperm.xlu0 %2324, %v674_v45   ;;  %v2117_v29 = vunpack.c.l.bf16 %v2131_v27  ;;  %v2118_v31 = vunpack.c.h.bf16 %v2131_v27  ;;  %v2121_v33 = vunpack.c.l.bf16 %v2132_v32  ;;  %v2122_v35 = vunpack.c.h.bf16 %v2132_v32 }
 0x1c4   : > { %v2125_v38 = vunpack.c.l.bf16 %v2133_v36  ;;  %v2126_v39 = vunpack.c.h.bf16 %v2133_v36  ;;  %v908_v43 = vlaneseq }
 0x1c5   : > { %2205 = vmatpush3.bf16.msra.mxu0 %v1572_v46  ;;  %2257 = vmatpush3.bf16.msra.mxu1 %v1572_v46 }
 0x1c6   : > { %2206 = vmatprep.subr.bf16.mxu0 %v1573_v49  ;;  %2250 = vmatprep.subr.bf16.mxu1 %v1573_v49  ;;  %v2761_v46 = vand.u32 127, %v908_v43 }
 0x1c7   : > { %888 = vperm.xlu1 %2325, %v677_v47   ;;  %885 = vperm.xlu0 %2324, %v676_v48  }
 0x1c8   : > { %v914_v47 = vadd.s32 4294967288, %v2761_v46 }
 0x1c9   : > { %2207 = vmatpush3.bf16.msra.mxu0 %v1573_v49  ;;  %2258 = vmatpush3.bf16.msra.mxu1 %v1573_v49  ;;  %v2764_v49 = vshrl.u32 %v908_v43, 7 }
 0x1ca   : > { %2208 = vmatprep.subr.bf16.mxu0 %v1574_v52  ;;  %2251 = vmatprep.subr.bf16.mxu1 %v1574_v52 }
 0x1cb   : > { %894 = vperm.xlu1 %2325, %v679_v50   ;;  %891 = vperm.xlu0 %2324, %v678_v51   ;;  %v912_v51 = vsub.s32 %v2761_v46, %v2764_v49 }
 0x1cd   : > { %2209 = vmatpush3.bf16.msra.mxu0 %v1574_v52  ;;  %2259 = vmatpush3.bf16.msra.mxu1 %v1574_v52  ;;  %v917_v52 = vsub.s32 %v914_v47, %v2764_v49 }
 0x1ce   : > { %2210 = vmatprep.subr.bf16.mxu0 %v1575_v55  ;;  %2252 = vmatprep.subr.bf16.mxu1 %v1575_v55 }
 0x1cf   : > { %900 = vperm.xlu1 %2325, %v681_v53   ;;  %897 = vperm.xlu0 %2324, %v680_v54   ;;  %v921_v53 = vadd.s32 4294967280, %v2761_v46 }
 0x1d1   : > { %2211 = vmatpush3.bf16.msra.mxu0 %v1575_v55  ;;  %2260 = vmatpush3.bf16.msra.mxu1 %v1575_v55 }
 0x1d2   : > { %2212 = vmatprep.subr.bf16.mxu0 %v1576_v58  ;;  %2253 = vmatprep.subr.bf16.mxu1 %v1576_v58 }
 0x1d3   : > { %906 = vperm.xlu1 %2325, %v683_v56   ;;  %903 = vperm.xlu0 %2324, %v682_v57   ;;  %v928_v56 = vadd.s32 4294967272, %v2761_v46 }
 0x1d5   : > { %2213 = vmatpush3.bf16.msra.mxu0 %v1576_v58  ;;  %2261 = vmatpush3.bf16.msra.mxu1 %v1576_v58  ;;  %v924_v58 = vsub.s32 %v921_v53, %v2764_v49 }
 0x1d7   : > { %2327 = vset.pattern.permute.xlu1 %v2486_v61  ;;  %2326 = vset.pattern.permute.xlu0 %v2486_v61  ;;  %v931_v61 = vsub.s32 %v928_v56, %v2764_v49 }
 0x1d8   : > { %771 = vperm.xlu1 %2327, %v685_v59   ;;  %766 = vperm.xlu0 %2326, %v684_v60   ;;  %v935_v59 = vadd.s32 4294967264, %v2761_v46 }
 0x1dc   : > { %806 = vperm.xlu1 %2327, %v692_v62   ;;  %811 = vperm.xlu0 %2326, %v693_v63   ;;  %v942_v63 = vadd.s32 4294967256, %v2761_v46 }
 0x1e0   : > { %776 = vperm.xlu1 %2327, %v686_v0   ;;  %781 = vperm.xlu0 %2326, %v687_v1  }
 0x1e4   : > { %816 = vperm.xlu1 %2327, %v694_v2   ;;  %821 = vperm.xlu0 %2326, %v695_v3   ;;  %v938_v2 = vsub.s32 %v935_v59, %v2764_v49  ;;  %v949_v3 = vadd.s32 4294967248, %v2761_v46 }
 0x1e8   : > { %786 = vperm.xlu1 %2327, %v688_v4   ;;  %791 = vperm.xlu0 %2326, %v689_v5  }
 0x1ec   : > { %826 = vperm.xlu1 %2327, %v696_v6   ;;  %831 = vperm.xlu0 %2326, %v697_v7   ;;  %v945_v7 = vsub.s32 %v942_v63, %v2764_v49 }
 0x1f0   : > { %796 = vperm.xlu1 %2327, %v690_v8   ;;  %801 = vperm.xlu0 %2326, %v691_v9   ;;  %v956_v8 = vadd.s32 4294967240, %v2761_v46 }
 0x1f2   : > { %v959_v15 = vsub.s32 %v956_v8, %v2764_v49 }
 0x1f4   : > { %836 = vperm.xlu1 %2327, %v698_v10   ;;  %841 = vperm.xlu0 %2326, %v699_v11   ;;  %v952_v10 = vsub.s32 %v949_v3, %v2764_v49  ;;  %v963_v11 = vadd.s32 4294967232, %v2761_v46 }
 0x21d   : > { %732 = vxpose.xlu1.b32.start [1/16] %v2097_v13, 128 }
 0x221   : > { %733 = vxpose.xlu1.b32.cont [2/16] %v2098_v14, 128 }
 0x225   : > { %734 = vxpose.xlu1.b32.cont [3/16] %v2101_v16, 128  ;;  %v970_v16 = vadd.s32 4294967224, %v2761_v46 }
 0x229   : > { %735 = vxpose.xlu1.b32.cont [4/16] %v2102_v17, 128 }
 0x22d   : > { %736 = vxpose.xlu1.b32.cont [5/16] %v2105_v19, 128  ;;  %v966_v19 = vsub.s32 %v963_v11, %v2764_v49 }
 0x231   : > { %737 = vxpose.xlu1.b32.cont [6/16] %v2106_v20, 128  ;;  %v977_v20 = vadd.s32 4294967216, %v2761_v46 }
 0x235   : > { %738 = vxpose.xlu1.b32.cont [7/16] %v2109_v22, 128  ;;  %v984_v22 = vadd.s32 4294967208, %v2761_v46 }
 0x236   : > { %v868_v28 = vpop.permute.xlu1 %867  ;;  %v862_v41 = vpop.permute.xlu0 %861 }
 0x237   : > { %v913_v55 = vrot.slane %v862_v41, %v912_v51  ;;  %v925_v1 = vrot.slane %v868_v28, %v924_v58 }
 0x239   : > { %739 = vxpose.xlu1.b32.cont [8/16] %v2110_v23, 128 }
 0x23a   : > { %v871_v30 = vpop.permute.xlu1 %870  ;;  %v865_v44 = vpop.permute.xlu0 %864 }
 0x23b   : > { %v918_v57 = vrot.slane %v865_v44, %v917_v52  ;;  %v932_v6 = vrot.slane %v871_v30, %v931_v61  ;;  %v991_v30 = vadd.s32 4294967200, %v2761_v46 }
 0x23d   : > { %740 = vxpose.xlu1.b32.cont [9/16] %v2113_v25, 128  ;;  %v920_v62 = vsel %vm919_vm1, %v918_v57, %v913_v55  ;;  %v973_v25 = vsub.s32 %v970_v16, %v2764_v49 }
 0x23e   : > { %v877_v34 = vpop.permute.xlu1 %876  ;;  %v874_v48 = vpop.permute.xlu0 %873  ;;  %v927_v4 = vsel %vm926_vm2, %v925_v1, %v920_v62 }
 0x23f   : > { %v939_v9 = vrot.slane %v874_v48, %v938_v2  ;;  %v934_v12 = vsel %vm933_vm3, %v932_v6, %v927_v4  ;;  %v946_v14 = vrot.slane %v877_v34, %v945_v7  ;;  %v1012_v48 = vadd.s32 4294967176, %v2761_v46 }
 0x241   : > { %741 = vxpose.xlu1.b32.cont [10/16] %v2114_v26, 128  ;;  %v941_v17 = vsel %vm940_vm4, %v939_v9, %v934_v12  ;;  %v1015_v56 = vsub.s32 %v1012_v48, %v2764_v49 }
 0x242   : > { %v883_v37 = vpop.permute.xlu1 %882  ;;  %v880_v54 = vpop.permute.xlu0 %879  ;;  %v948_v24 = vsel %vm947_vm5, %v946_v14, %v941_v17 }
 0x243   : > { %v953_v18 = vrot.slane %v880_v54, %v952_v10  ;;  %v960_v23 = vrot.slane %v883_v37, %v959_v15 }
 0x245   : > { %742 = vxpose.xlu1.b32.cont [11/16] %v2117_v29, 128  ;;  %v955_v27 = vsel %vm954_vm6, %v953_v18, %v948_v24  ;;  %v980_v29 = vsub.s32 %v977_v20, %v2764_v49 }
 0x246   : > { %v2755_v40 = vpop.permute.xlu1 %888  ;;  %v886_v0 = vpop.permute.xlu0 %885  ;;  %v962_v34 = vsel %vm961_vm7, %v960_v23, %v955_v27 }
 0x247   : > { %v967_v28 = vrot.slane %v886_v0, %v966_v19 }
 0x249   : > { %743 = vxpose.xlu1.b32.cont [12/16] %v2118_v31, 128  ;;  %v987_v31 = vsub.s32 %v984_v22, %v2764_v49  ;;  %v969_v36 = vsel %vm968_vm8, %v967_v28, %v962_v34 }
 0x24a   : > { %v2757_v42 = vpop.permute.xlu1 %894  ;;  %v892_v13 = vpop.permute.xlu0 %891 }
 0x24b   : > { %v981_v37 = vrot.slane %v892_v13, %v980_v29  ;;  %v988_v43 = vrot.slane %v2757_v42, %v987_v31 }
 0x24d   : > { %744 = vxpose.xlu1.b32.cont [13/16] %v2121_v33, 128  ;;  %v974_v33 = vrot.slane %v2755_v40, %v973_v25 }
 0x24e   : > { %v2759_v45 = vpop.permute.xlu1 %900  ;;  %v898_v26 = vpop.permute.xlu0 %897 }
 0x24f   : > { %v976_v44 = vsel %vm975_vm9, %v974_v33, %v969_v36 }
 0x250   : > { %v983_v40 = vsel %vm982_vm10, %v981_v37, %v976_v44 }
 0x251   : > { %745 = vxpose.xlu1.b32.cont [14/16] %v2122_v35, 128  ;;  %v998_v35 = vadd.s32 4294967192, %v2761_v46  ;;  %v990_v55 = vsel %vm989_vm11, %v988_v43, %v983_v40 }
 0x252   : > { %v2766_v50 = vpop.permute.xlu1 %906  ;;  %v904_v41 = vpop.permute.xlu0 %903 }
 0x253   : > { %v1001_v47 = vsub.s32 %v998_v35, %v2764_v49 }
 0x255   : > { %746 = vxpose.xlu1.b32.cont [15/16] %v2125_v38, 128  ;;  %v994_v38 = vsub.s32 %v991_v30, %v2764_v49  ;;  %v1002_v54 = vrot.slane %v2759_v45, %v1001_v47 }
 0x257   : > { %v2775_v60 = vpop.permute.xlu1 %771  ;;  %v995_v51 = vrot.slane %v898_v26, %v994_v38  ;;  %v767_v57 = vpop.permute.xlu0 %766 }
 0x259   : > { %747 = vxpose.xlu1.b32.end [16/16] %v2126_v39, 128  ;;  %v1005_v39 = vadd.s32 4294967184, %v2761_v46  ;;  %v997_v58 = vsel %vm996_vm12, %v995_v51, %v990_v55  ;;  %v1016_v46 = vrot.slane %v2766_v50, %v1015_v56 }
 0x25a   : > { %v1004_v61 = vsel %vm1003_vm13, %v1002_v54, %v997_v58 }
 0x25b   : > { %v2781_v5 = vpop.permute.xlu1 %806  ;;  %v1008_v52 = vsub.s32 %v1005_v39, %v2764_v49  ;;  %v2811_v63 = vpop.permute.xlu0 %811 }
 0x25d   : > { %v1009_v42 = vrot.slane %v904_v41, %v1008_v52 }
 0x25f   : > { %v777_v21 = vpop.permute.xlu1 %776  ;;  %v1011_v62 = vsel %vm1010_vm14, %v1009_v42, %v1004_v61  ;;  %v782_v49 = vpop.permute.xlu0 %781 }
 0x260   : > { %v2813_v0 = vsel %vm1017_vm15, %v1016_v46, %v1011_v62 }
 0x261   : > { %v1032_v1 = vadd.f32 %v2813_v0, %v767_v57  ;;  %v1033_v2 = vadd.f32 %v2813_v0, %v2775_v60  ;;  %v1034_v7 = vadd.f32 %v2813_v0, %v777_v21  ;;  %v1035_v12 = vadd.f32 %v2813_v0, %v782_v49 }
 0x262   : > { %v1040_v39 = vadd.f32 %v2813_v0, %v2781_v5  ;;  %v1041_v40 = vadd.f32 %v2813_v0, %v2811_v63 }
 0x263   : > { %v2796_v32 = vpop.permute.xlu1 %816  ;;  %v1064_v4 = vmul.f32 0.2, %v1032_v1  ;;  %vm1048_vm0 = vcmp.gt.f32.partialorder %v1032_v1, 0.0  ;;  %v2820_v6 = vpop.permute.xlu0 %821  ;;  %v1065_v50 = vmul.f32 0.2, %v1033_v2  ;;  %vm1049_vm1 = vcmp.gt.f32.partialorder %v1033_v2, 0.0 }
 0x264   : > { %v1066_v11 = vmul.f32 0.2, %v1034_v7  ;;  %vm1050_vm2 = vcmp.gt.f32.partialorder %v1034_v7, 0.0  ;;  %v1067_v16 = vmul.f32 0.2, %v1035_v12  ;;  %vm1051_vm3 = vcmp.gt.f32.partialorder %v1035_v12, 0.0 }
 0x265   : > { %v1080_v9 = vsel %vm1048_vm0, %v1032_v1, %v1064_v4  ;;  %v1081_v13 = vsel %vm1049_vm1, %v1033_v2, %v1065_v50  ;;  %v1072_v48 = vmul.f32 0.2, %v1040_v39  ;;  %vm1056_vm8 = vcmp.gt.f32.partialorder %v1040_v39, 0.0 }
 0x266   : > { %v1082_v19 = vsel %vm1050_vm2, %v1034_v7, %v1066_v11  ;;  %v1083_v25 = vsel %vm1051_vm3, %v1035_v12, %v1067_v16  ;;  %v1073_v5 = vmul.f32 0.2, %v1041_v40  ;;  %v1042_v54 = vadd.f32 %v2813_v0, %v2796_v32 }
 0x267   : > { %v787_v53 = vpop.permute.xlu1 %786  ;;  %v792_v14 = vpop.permute.xlu0 %791  ;;  %v1088_v56 = vsel %vm1056_vm8, %v1040_v39, %v1072_v48  ;;  %vm1057_vm9 = vcmp.gt.f32.partialorder %v1041_v40, 0.0  ;;  %v1043_v42 = vadd.f32 %v2813_v0, %v2820_v6  ;;  %vm1432_vm0 = vcmask 7168  }
 0x268   : > { %v1036_v17 = vadd.f32 %v2813_v0, %v787_v53  ;;  %v1037_v23 = vadd.f32 %v2813_v0, %v792_v14  ;;  %v1074_v58 = vmul.f32 0.2, %v1042_v54  ;;  %v1089_v61 = vsel %vm1057_vm9, %v1041_v40, %v1073_v5  ;;  %v2910_v40 = vld [vmem:[#allocation3 + $0x28] sm:$0xff]  ;;  %v2916_v5 = vld [vmem:[#allocation3 + $0x30] sm:$0xff] }
 0x269   : > { %vm1058_vm10 = vcmp.gt.f32.partialorder %v1042_v54, 0.0  ;;  %v1075_v63 = vmul.f32 0.2, %v1043_v42  ;;  %vm1059_vm11 = vcmp.gt.f32.partialorder %v1043_v42, 0.0 }
 0x26a   : > { %v1068_v22 = vmul.f32 0.2, %v1036_v17  ;;  %vm1052_vm4 = vcmp.gt.f32.partialorder %v1036_v17, 0.0  ;;  %v1069_v27 = vmul.f32 0.2, %v1037_v23  ;;  %vm1053_vm5 = vcmp.gt.f32.partialorder %v1037_v23, 0.0 }
 0x26b   : > { %v2808_v59 = vpop.permute.xlu1 %826  ;;  %v832_v21 = vpop.permute.xlu0 %831  ;;  %v1090_v1 = vsel %vm1058_vm10, %v1042_v54, %v1074_v58  ;;  %v1091_v50 = vsel %vm1059_vm11, %v1043_v42, %v1075_v63 }
 0x26c   : > { %v1084_v30 = vsel %vm1052_vm4, %v1036_v17, %v1068_v22  ;;  %v1085_v37 = vsel %vm1053_vm5, %v1037_v23, %v1069_v27  ;;  %v1044_v32 = vadd.f32 %v2813_v0, %v2808_v59  ;;  %v1045_v4 = vadd.f32 %v2813_v0, %v832_v21 }
 0x26e   : > { %v1076_v2 = vmul.f32 0.2, %v1044_v32  ;;  %vm1060_vm12 = vcmp.gt.f32.partialorder %v1044_v32, 0.0  ;;  %vm1061_vm13 = vcmp.gt.f32.partialorder %v1045_v4, 0.0 }
 0x26f   : > { %v797_v45 = vpop.permute.xlu1 %796  ;;  %v802_v31 = vpop.permute.xlu0 %801 }
 0x270   : > { %v1038_v28 = vadd.f32 %v2813_v0, %v797_v45  ;;  %v1039_v35 = vadd.f32 %v2813_v0, %v802_v31  ;;  %v1092_v11 = vsel %vm1060_vm12, %v1044_v32, %v1076_v2  ;;  %v2940_v32 = vld [vmem:[#allocation3 + $0x48] sm:$0xff]  ;;  %v2948_v2 = vld [vmem:[#allocation3 + $0x50] sm:$0xff] }
 0x272   : > { %v1070_v34 = vmul.f32 0.2, %v1038_v28  ;;  %vm1054_vm6 = vcmp.gt.f32.partialorder %v1038_v28, 0.0  ;;  %v1071_v41 = vmul.f32 0.2, %v1039_v35  ;;  %vm1055_vm7 = vcmp.gt.f32.partialorder %v1039_v35, 0.0 }
 0x273   : > { %v2818_v3 = vpop.permute.xlu1 %836  ;;  %v842_v12 = vpop.permute.xlu0 %841 }
 0x274   : > { %v1086_v44 = vsel %vm1054_vm6, %v1038_v28, %v1070_v34  ;;  %v1087_v52 = vsel %vm1055_vm7, %v1039_v35, %v1071_v41  ;;  %v1046_v59 = vadd.f32 %v2813_v0, %v2818_v3  ;;  %v1047_v14 = vadd.f32 %v2813_v0, %v842_v12  ;;  %v2890_v0 = vld [vmem:[#allocation3] sm:$0xff]  ;;  %v2898_v34 = vld [vmem:[#allocation3 + $0x10] sm:$0xff] }
 0x276   : > { %vm1062_vm14 = vcmp.gt.f32.partialorder %v1046_v59, 0.0  ;;  %vm1063_vm15 = vcmp.gt.f32.partialorder %v1047_v14, 0.0 }
 0x29d   : > { %v748_v8 = vpop.trf.xlu1 }
 0x29e   : > { %v2823_v10 = vadd.f32 %v1080_v9, %v748_v8  ;;  %v1077_v8 = vmul.f32 0.2, %v1045_v4 }
 0x2a0   : > { %1128 = vmax.xlane.f32.xlu0 %v2823_v10  ;;  %v1093_v17 = vsel %vm1061_vm13, %v1045_v4, %v1077_v8 }
 0x2a1   : > { %v749_v60 = vpop.trf.xlu1 }
 0x2a2   : > { %v2827_v15 = vadd.f32 %v1081_v13, %v749_v60  ;;  %v1078_v13 = vmul.f32 0.2, %v1046_v59 }
 0x2a4   : > { %1130 = vmax.xlane.f32.xlu0 %v2827_v15  ;;  %v1094_v21 = vsel %vm1062_vm14, %v1046_v59, %v1078_v13 }
 0x2a5   : > { %v750_v18 = vpop.trf.xlu1 }
 0x2a6   : > { %v2831_v20 = vadd.f32 %v1082_v19, %v750_v18  ;;  %v1079_v19 = vmul.f32 0.2, %v1047_v14 }
 0x2a8   : > { %1132 = vmax.xlane.f32.xlu0 %v2831_v20 }
 0x2a9   : > { %v751_v24 = vpop.trf.xlu1 }
 0x2aa   : > { %v2835_v26 = vadd.f32 %v1083_v25, %v751_v24  ;;  %v1095_v24 = vsel %vm1063_vm15, %v1047_v14, %v1079_v19  ;;  %v2973_v19 = vld [vmem:[#allocation3 + $0x68] sm:$0xff] }
 0x2ac   : > { %1134 = vmax.xlane.f32.xlu0 %v2835_v26 }
 0x2ad   : > { %v752_v29 = vpop.trf.xlu1 }
 0x2ae   : > { %v2839_v33 = vadd.f32 %v1084_v30, %v752_v29  ;;  %v1113_v29 = vld [vmem:[#allocation3 + $0x8] sm:$0xff] }
 0x2b0   : > { %1136 = vmax.xlane.f32.xlu0 %v2839_v33 }
 0x2b1   : > { %v753_v36 = vpop.trf.xlu1 }
 0x2b2   : > { %v2843_v38 = vadd.f32 %v1085_v37, %v753_v36  ;;  %v2902_v37 = vld [vmem:[#allocation3 + $0x18] sm:$0xff] }
 0x2b4   : > { %1138 = vmax.xlane.f32.xlu0 %v2843_v38 }
 0x2b5   : > { %v754_v43 = vpop.trf.xlu1 }
 0x2b6   : > { %v2848_v47 = vadd.f32 %v1086_v44, %v754_v43  ;;  %v2906_v43 = vld [vmem:[#allocation3 + $0x20] sm:$0xff] }
 0x2b8   : > { %1140 = vmax.xlane.f32.xlu0 %v2848_v47 }
 0x2b9   : > { %v755_v51 = vpop.trf.xlu1 }
 0x2ba   : > { %v2853_v53 = vadd.f32 %v1087_v52, %v755_v51 }
 0x2bc   : > { %1142 = vmax.xlane.f32.xlu0 %v2853_v53 }
 0x2bd   : > { %v756_v55 = vpop.trf.xlu1 }
 0x2be   : > { %v2858_v57 = vadd.f32 %v1088_v56, %v756_v55  ;;  %v2924_v56 = vld [vmem:[#allocation3 + $0x38] sm:$0xff] }
 0x2c0   : > { %1144 = vmax.xlane.f32.xlu0 %v2858_v57 }
 0x2c1   : > { %v757_v46 = vpop.trf.xlu1 }
 0x2c2   : > { %v2863_v62 = vadd.f32 %v1089_v61, %v757_v46  ;;  %v2932_v46 = vld [vmem:[#allocation3 + $0x40] sm:$0xff] }
 0x2c4   : > { %1146 = vmax.xlane.f32.xlu0 %v2863_v62 }
 0x2c5   : > { %v758_v45 = vpop.trf.xlu1 }
 0x2c6   : > { %v2868_v49 = vadd.f32 %v1090_v1, %v758_v45 }
 0x2c8   : > { %1148 = vmax.xlane.f32.xlu0 %v2868_v49 }
 0x2c9   : > { %v759_v6 = vpop.trf.xlu1 }
 0x2ca   : > { %v2872_v7 = vadd.f32 %v1091_v50, %v759_v6  ;;  %v2956_v50 = vld [vmem:[#allocation3 + $0x58] sm:$0xff] }
 0x2cc   : > { %1150 = vmax.xlane.f32.xlu0 %v2872_v7 }
 0x2cd   : > { %v760_v9 = vpop.trf.xlu1 }
 0x2ce   : > { %v2877_v60 = vadd.f32 %v1092_v11, %v760_v9  ;;  %v2964_v11 = vld [vmem:[#allocation3 + $0x60] sm:$0xff] }
 0x2d0   : > { %1152 = vmax.xlane.f32.xlu0 %v2877_v60 }
 0x2d1   : > { %v761_v16 = vpop.trf.xlu1 }
 0x2d2   : > { %v2881_v18 = vadd.f32 %v1093_v17, %v761_v16 }
 0x2d4   : > { %1154 = vmax.xlane.f32.xlu0 %v2881_v18 }
 0x2d5   : > { %v762_v3 = vpop.trf.xlu1 }
 0x2d6   : > { %v2884_v22 = vadd.f32 %v1094_v21, %v762_v3 }
 0x2d8   : > { %1156 = vmax.xlane.f32.xlu0 %v2884_v22 }
 0x2d9   : > { %v763_v23 = vpop.trf.xlu1 }
 0x2da   : > { %v2887_v25 = vadd.f32 %v1095_v24, %v763_v23 }
 0x2dc   : > { %1158 = vmax.xlane.f32.xlu0 %v2887_v25 }
 0x32d   : > { %v1129_v27 = vpop.xlane.xlu0 %1128 }
 0x32e   : > { %v2893_v28 = vmax.f32 %v2890_v0, %v1129_v27 }
 0x330   : > { %1706 = vst.msk [vmem:[#allocation3] sm:$0xff] %vm1432_vm0, %v2893_v28  ;;  %1178 = vperm.xlu0 %2326, %v2893_v28   ;;  %v1304_v12 = vsub.f32 %v2890_v0, %v2893_v28  ;;  %v2979_v28 = vld [vmem:[#allocation3 + $0x70] sm:$0xff] }
 0x331   : > { %v1131_v30 = vpop.xlane.xlu0 %1130 }
 0x332   : > { %v1161_v31 = vmax.f32 %v1113_v29, %v1131_v30  ;;  %v1320_v3 = vmul.f32 1.442695, %v1304_v12 }
 0x334   : > { %1707 = vst.msk [vmem:[#allocation3 + $0x8] sm:$0xff] %vm1432_vm0, %v1161_v31  ;;  %1183 = vperm.xlu1 %2327, %v1161_v31   ;;  %v1305_v8 = vsub.f32 %v1113_v29, %v1161_v31 }
 0x335   : > { %v1133_v35 = vpop.xlane.xlu0 %1132 }
 0x336   : > { %v1162_v36 = vmax.f32 %v2898_v34, %v1133_v35  ;;  %v1322_v13 = vmul.f32 1.442695, %v1305_v8 }
 0x338   : > { %1708 = vst.msk [vmem:[#allocation3 + $0x10] sm:$0xff] %vm1432_vm0, %v1162_v36  ;;  %1188 = vperm.xlu0 %2326, %v1162_v36   ;;  %v1306_v14 = vsub.f32 %v2898_v34, %v1162_v36  ;;  %2328 = vpow2.f32 %v1322_v13 }
 0x339   : > { %v1135_v39 = vpop.xlane.xlu0 %1134  ;;  %2330 = vpow2.f32 %v1320_v3 }
 0x33a   : > { %v1163_v41 = vmax.f32 %v2902_v37, %v1135_v39  ;;  %v1324_v23 = vmul.f32 1.442695, %v1306_v14 }
 0x33c   : > { %1709 = vst.msk [vmem:[#allocation3 + $0x18] sm:$0xff] %vm1432_vm0, %v1163_v41  ;;  %1193 = vperm.xlu0 %2326, %v1163_v41   ;;  %v1307_v21 = vsub.f32 %v2902_v37, %v1163_v41  ;;  %2332 = vpow2.f32 %v1324_v23  ;;  %v2989_v37 = vld [vmem:[#allocation3 + $0x78] sm:$0xff] }
 0x33d   : > { %v1137_v44 = vpop.xlane.xlu0 %1136 }
 0x33e   : > { %v1164_v48 = vmax.f32 %v2906_v43, %v1137_v44  ;;  %v1326_v29 = vmul.f32 1.442695, %v1307_v21 }
 0x340   : > { %1710 = vst.msk [vmem:[#allocation3 + $0x20] sm:$0xff] %vm1432_vm0, %v1164_v48  ;;  %1198 = vperm.xlu1 %2327, %v1164_v48   ;;  %v1308_v24 = vsub.f32 %v2906_v43, %v1164_v48  ;;  %2334 = vpow2.f32 %v1326_v29 }
 0x341   : > { %v1139_v51 = vpop.xlane.xlu0 %1138 }
 0x342   : > { %v2914_v52 = vmax.f32 %v2910_v40, %v1139_v51  ;;  %v1328_v31 = vmul.f32 1.442695, %v1308_v24 }
 0x344   : > { %1711 = vst.msk [vmem:[#allocation3 + $0x28] sm:$0xff] %vm1432_vm0, %v2914_v52  ;;  %1203 = vperm.xlu0 %2326, %v2914_v52   ;;  %v1309_v30 = vsub.f32 %v2910_v40, %v2914_v52  ;;  %2336 = vpow2.f32 %v1328_v31  ;;  %v3003_v52 = vpop.eup %2328 }
 0x345   : > { %v1141_v54 = vpop.xlane.xlu0 %1140 }
 0x346   : > { %v2922_v55 = vmax.f32 %v2916_v5, %v1141_v54  ;;  %v1330_v39 = vmul.f32 1.442695, %v1309_v30 }
 0x348   : > { %1712 = vst.msk [vmem:[#allocation3 + $0x30] sm:$0xff] %vm1432_vm0, %v2922_v55  ;;  %1208 = vperm.xlu1 %2327, %v2922_v55   ;;  %v1310_v34 = vsub.f32 %v2916_v5, %v2922_v55  ;;  %2338 = vpow2.f32 %v1330_v39 }
 0x349   : > { %v1143_v58 = vpop.xlane.xlu0 %1142 }
 0x34a   : > { %v2930_v42 = vmax.f32 %v2924_v56, %v1143_v58  ;;  %v1332_v44 = vmul.f32 1.442695, %v1310_v34 }
 0x34c   : > { %1713 = vst.msk [vmem:[#allocation3 + $0x38] sm:$0xff] %vm1432_vm0, %v2930_v42  ;;  %1213 = vperm.xlu0 %2326, %v2930_v42   ;;  %v1311_v41 = vsub.f32 %v2924_v56, %v2930_v42  ;;  %2340 = vpow2.f32 %v1332_v44  ;;  %v3015_v42 = vpop.eup %2330 }
 0x34d   : > { %v1145_v61 = vpop.xlane.xlu0 %1144 }
 0x34e   : > { %v2938_v63 = vmax.f32 %v2932_v46, %v1145_v61  ;;  %v1334_v5 = vmul.f32 1.442695, %v1311_v41 }
 0x350   : > { %1714 = vst.msk [vmem:[#allocation3 + $0x40] sm:$0xff] %vm1432_vm0, %v2938_v63  ;;  %1218 = vperm.xlu0 %2326, %v2938_v63   ;;  %v1312_v48 = vsub.f32 %v2932_v46, %v2938_v63  ;;  %v3017_v46 = vpop.eup %2332  ;;  %2342 = vpow2.f32 %v1334_v5 }
 0x351   : > { %v1147_v45 = vpop.xlane.xlu0 %1146 }
 0x352   : > { %v2946_v1 = vmax.f32 %v2940_v32, %v1147_v45  ;;  %v1336_v56 = vmul.f32 1.442695, %v1312_v48 }
 0x354   : > { %1715 = vst.msk [vmem:[#allocation3 + $0x48] sm:$0xff] %vm1432_vm0, %v2946_v1  ;;  %1223 = vperm.xlu0 %2326, %v2946_v1   ;;  %v1313_v54 = vsub.f32 %v2940_v32, %v2946_v1  ;;  %2344 = vpow2.f32 %v1336_v56  ;;  %v3024_v1 = vpop.eup %2334 }
 0x355   : > { %v1149_v4 = vpop.xlane.xlu0 %1148 }
 0x356   : > { %v2954_v6 = vmax.f32 %v2948_v2, %v1149_v4  ;;  %v1338_v61 = vmul.f32 1.442695, %v1313_v54 }
 0x358   : > { %1716 = vst.msk [vmem:[#allocation3 + $0x50] sm:$0xff] %vm1432_vm0, %v2954_v6  ;;  %1228 = vperm.xlu1 %2327, %v2954_v6   ;;  %v1314_v58 = vsub.f32 %v2948_v2, %v2954_v6  ;;  %v3026_v2 = vpop.eup %2336  ;;  %2346 = vpow2.f32 %v1338_v61 }
 0x359   : > { %v1151_v59 = vpop.xlane.xlu0 %1150  ;;  %v3031_v8 = vpop.eup %2338 }
 0x35a   : > { %v2962_v9 = vmax.f32 %v2956_v50, %v1151_v59  ;;  %v1340_v32 = vmul.f32 1.442695, %v1314_v58  ;;  %v3033_v59 = vpop.eup %2340 }
 0x35c   : > { %1717 = vst.msk [vmem:[#allocation3 + $0x58] sm:$0xff] %vm1432_vm0, %v2962_v9  ;;  %1233 = vperm.xlu0 %2326, %v2962_v9   ;;  %v1315_v63 = vsub.f32 %v2956_v50, %v2962_v9  ;;  %2348 = vpow2.f32 %v1340_v32 }
 0x35d   : > { %v1153_v16 = vpop.xlane.xlu0 %1152 }
 0x35e   : > { %v1172_v17 = vmax.f32 %v2964_v11, %v1153_v16  ;;  %v1342_v4 = vmul.f32 1.442695, %v1315_v63 }
 0x360   : > { %1718 = vst.msk [vmem:[#allocation3 + $0x60] sm:$0xff] %vm1432_vm0, %v1172_v17  ;;  %1238 = vperm.xlu1 %2327, %v1172_v17   ;;  %v1316_v45 = vsub.f32 %v2964_v11, %v1172_v17  ;;  %2350 = vpow2.f32 %v1342_v4  ;;  %v3037_v11 = vpop.eup %2342 }
 0x361   : > { %v1155_v0 = vpop.xlane.xlu0 %1154  ;;  %v3039_v12 = vpop.eup %2344 }
 0x362   : > { %v1173_v27 = vmax.f32 %v2973_v19, %v1155_v0  ;;  %v1344_v6 = vmul.f32 1.442695, %v1316_v45  ;;  %v3043_v13 = vpop.eup %2346 }
 0x364   : > { %1719 = vst.msk [vmem:[#allocation3 + $0x68] sm:$0xff] %vm1432_vm0, %v1173_v27  ;;  %1243 = vperm.xlu0 %2326, %v1173_v27   ;;  %v1317_v50 = vsub.f32 %v2973_v19, %v1173_v27  ;;  %2352 = vpow2.f32 %v1344_v6 }
 0x365   : > { %v1157_v35 = vpop.xlane.xlu0 %1156 }
 0x366   : > { %v2987_v36 = vmax.f32 %v2979_v28, %v1157_v35  ;;  %v1346_v9 = vmul.f32 1.442695, %v1317_v50  ;;  %v3045_v14 = vpop.eup %2348 }
 0x368   : > { %v1318_v43 = vsub.f32 %v2979_v28, %v2987_v36  ;;  %1720 = vst.msk [vmem:[#allocation3 + $0x70] sm:$0xff] %vm1432_vm0, %v2987_v36  ;;  %1248 = vperm.xlu1 %2327, %v2987_v36   ;;  %2354 = vpow2.f32 %v1346_v9 }
 0x369   : > { %v1159_v40 = vpop.xlane.xlu0 %1158 }
 0x36a   : > { %v3001_v51 = vmax.f32 %v2989_v37, %v1159_v40  ;;  %v3049_v16 = vpop.eup %2350 }
 0x36c   : > { %v1319_v55 = vsub.f32 %v2989_v37, %v3001_v51  ;;  %1721 = vst.msk [vmem:[#allocation3 + $0x78] sm:$0xff] %vm1432_vm0, %v3001_v51  ;;  %1472 = vperm.xlu1 %2327, %v3003_v52   ;;  %1253 = vperm.xlu0 %2326, %v3001_v51  }
 0x36e   : > { %v3051_v17 = vpop.eup %2352 }
 0x370   : > { %1477 = vperm.xlu1 %2327, %v3017_v46   ;;  %1467 = vperm.xlu0 %2326, %v3015_v42  }
 0x372   : > { %v3055_v19 = vpop.eup %2354 }
 0x374   : > { %1487 = vperm.xlu1 %2327, %v3026_v2   ;;  %1482 = vperm.xlu0 %2326, %v3024_v1  }
 0x378   : > { %1497 = vperm.xlu1 %2327, %v3033_v59   ;;  %1492 = vperm.xlu0 %2326, %v3031_v8  }
 0x37c   : > { %1507 = vperm.xlu1 %2327, %v3039_v12   ;;  %1502 = vperm.xlu0 %2326, %v3037_v11  }
 0x380   : > { %1517 = vperm.xlu1 %2327, %v3045_v14   ;;  %1512 = vperm.xlu0 %2326, %v3043_v13  }
 0x384   : > { %1527 = vperm.xlu1 %2327, %v3051_v17   ;;  %1522 = vperm.xlu0 %2326, %v3049_v16  }
 0x388   : > { %1532 = vperm.xlu0 %2326, %v3055_v19  }
 0x3af   : > { %v1179_v3 = vpop.permute.xlu0 %1178 }
 0x3b0   : > { %v1256_v21 = vsub.f32 %v2823_v10, %v1179_v3 }
 0x3b2   : > { %v1272_v23 = vmul.f32 1.442695, %v1256_v21 }
 0x3b3   : > { %v1184_v24 = vpop.permute.xlu1 %1183 }
 0x3b4   : > { %2356 = vpow2.f32 %v1272_v23  ;;  %v1257_v0 = vsub.f32 %v2827_v15, %v1184_v24 }
 0x3b6   : > { %v1274_v27 = vmul.f32 1.442695, %v1257_v0 }
 0x3b7   : > { %v1189_v29 = vpop.permute.xlu0 %1188 }
 0x3b8   : > { %2358 = vpow2.f32 %v1274_v27  ;;  %v1258_v30 = vsub.f32 %v2831_v20, %v1189_v29 }
 0x3ba   : > { %v1276_v31 = vmul.f32 1.442695, %v1258_v30 }
 0x3bb   : > { %v1194_v34 = vpop.permute.xlu0 %1193 }
 0x3bc   : > { %2360 = vpow2.f32 %v1276_v31  ;;  %v1259_v35 = vsub.f32 %v2835_v26, %v1194_v34 }
 0x3be   : > { %v2357_v39 = vpop.eup %2356  ;;  %v1278_v41 = vmul.f32 1.442695, %v1259_v35 }
 0x3bf   : > { %v1199_v44 = vpop.permute.xlu1 %1198  ;;  %1384 = vadd.xlane.f32.xlu1 %v2357_v39 }
 0x3c0   : > { %2362 = vpow2.f32 %v1278_v41  ;;  %v1260_v10 = vsub.f32 %v2839_v33, %v1199_v44 }
 0x3c2   : > { %v2359_v48 = vpop.eup %2358  ;;  %v1280_v40 = vmul.f32 1.442695, %v1260_v10 }
 0x3c3   : > { %1386 = vadd.xlane.f32.xlu0 %v2359_v48  ;;  %v1204_v15 = vpop.permute.xlu0 %1203  ;;  %v1561_v5 = vpack.c.bf16 %v2359_v48, %v2357_v39 }
 0x3c4   : > { %2364 = vpow2.f32 %v1280_v40  ;;  %v1261_v20 = vsub.f32 %v2843_v38, %v1204_v15 }
 0x3c5   : > { %2214 = vmatprep.mubr.bf16.mxu0 %v1561_v5 }
 0x3c6   : > { %v2361_v54 = vpop.eup %2360  ;;  %v1282_v56 = vmul.f32 1.442695, %v1261_v20 }
 0x3c7   : > { %v1209_v58 = vpop.permute.xlu1 %1208  ;;  %1388 = vadd.xlane.f32.xlu0 %v2361_v54 }
 0x3c8   : > { %2366 = vpow2.f32 %v1282_v56  ;;  %v1262_v26 = vsub.f32 %v2848_v47, %v1209_v58 }
 0x3ca   : > { %v2363_v61 = vpop.eup %2362  ;;  %v1284_v63 = vmul.f32 1.442695, %v1262_v26 }
 0x3cb   : > { %1390 = vadd.xlane.f32.xlu1 %v2363_v61  ;;  %v1214_v33 = vpop.permute.xlu0 %1213  ;;  %v1562_v32 = vpack.c.bf16 %v2363_v61, %v2361_v54 }
 0x3cc   : > { %2368 = vpow2.f32 %v1284_v63  ;;  %v1263_v45 = vsub.f32 %v2853_v53, %v1214_v33 }
 0x3cd   : > { %2215 = vmatmul.mubr.bf16.vlgmr.msra.gmra.mrb[0].mxu0 %v1562_v32 }
 0x3ce   : > { %v2365_v4 = vpop.eup %2364  ;;  %v1286_v6 = vmul.f32 1.442695, %v1263_v45 }
 0x3cf   : > { %1392 = vadd.xlane.f32.xlu0 %v2365_v4  ;;  %v1219_v38 = vpop.permute.xlu0 %1218 }
 0x3d0   : > { %2370 = vpow2.f32 %v1286_v6  ;;  %v1264_v50 = vsub.f32 %v2858_v57, %v1219_v38 }
 0x3d2   : > { %v2367_v9 = vpop.eup %2366  ;;  %v1288_v3 = vmul.f32 1.442695, %v1264_v50 }
 0x3d3   : > { %1394 = vadd.xlane.f32.xlu1 %v2367_v9  ;;  %v1224_v47 = vpop.permute.xlu0 %1223  ;;  %v1563_v21 = vpack.c.bf16 %v2367_v9, %v2365_v4  ;;  %v1348_v4 = vmul.f32 1.442695, %v1318_v43 }
 0x3d4   : > { %2372 = vpow2.f32 %v1288_v3  ;;  %v1265_v23 = vsub.f32 %v2863_v62, %v1224_v47 }
 0x3d5   : > { %2218 = vmatprep.mubr.bf16.mxu0 %v1563_v21 }
 0x3d6   : > { %v2369_v24 = vpop.eup %2368  ;;  %v1290_v0 = vmul.f32 1.442695, %v1265_v23 }
 0x3d7   : > { %v1229_v53 = vpop.permute.xlu1 %1228  ;;  %1396 = vadd.xlane.f32.xlu0 %v2369_v24 }
 0x3d8   : > { %2374 = vpow2.f32 %v1290_v0  ;;  %v1266_v27 = vsub.f32 %v2868_v49, %v1229_v53  ;;  %v1352_v0 = vld [vmem:[#allocation4] sm:$0xff] }
 0x3d9   : > { %v1368_v53 = vmul.f32 %v3015_v42, %v1352_v0 }
 0x3da   : > { %v2371_v29 = vpop.eup %2370  ;;  %v1292_v30 = vmul.f32 1.442695, %v1266_v27 }
 0x3db   : > { %1398 = vadd.xlane.f32.xlu1 %v2371_v29  ;;  %v1234_v57 = vpop.permute.xlu0 %1233  ;;  %v1564_v31 = vpack.c.bf16 %v2371_v29, %v2369_v24 }
 0x3dc   : > { %2376 = vpow2.f32 %v1292_v30  ;;  %v1267_v34 = vsub.f32 %v2872_v7, %v1234_v57  ;;  %v1353_v30 = vld [vmem:[#allocation4 + $0x8] sm:$0xff] }
 0x3dd   : > { %2219 = vmatmul.mubr.bf16.gmra.mrb[4].mxu0 %v1564_v31  ;;  %v1369_v31 = vmul.f32 %v3003_v52, %v1353_v30 }
 0x3de   : > { %v2373_v35 = vpop.eup %2372  ;;  %v1294_v39 = vmul.f32 1.442695, %v1267_v34 }
 0x3df   : > { %v1239_v62 = vpop.permute.xlu1 %1238  ;;  %1400 = vadd.xlane.f32.xlu0 %v2373_v35 }
 0x3e0   : > { %2378 = vpow2.f32 %v1294_v39  ;;  %v1268_v41 = vsub.f32 %v2877_v60, %v1239_v62 }
 0x3e2   : > { %v2375_v44 = vpop.eup %2374  ;;  %v1296_v10 = vmul.f32 1.442695, %v1268_v41 }
 0x3e3   : > { %1402 = vadd.xlane.f32.xlu1 %v2375_v44  ;;  %v1244_v49 = vpop.permute.xlu0 %1243  ;;  %v1565_v48 = vpack.c.bf16 %v2375_v44, %v2373_v35  ;;  %v1354_v35 = vld [vmem:[#allocation4 + $0x10] sm:$0xff]  ;;  %v1355_v44 = vld [vmem:[#allocation4 + $0x18] sm:$0xff] }
 0x3e4   : > { %2380 = vpow2.f32 %v1296_v10  ;;  %v1269_v40 = vsub.f32 %v2881_v18, %v1244_v49  ;;  %v1370_v62 = vmul.f32 %v3017_v46, %v1354_v35  ;;  %v1371_v42 = vmul.f32 %v3024_v1, %v1355_v44  ;;  %v1365_v35 = vld [vmem:[#allocation4 + $0x68] sm:$0xff] }
 0x3e5   : > { %2222 = vmatprep.mubr.bf16.mxu1 %v1565_v48  ;;  %v1356_v48 = vld [vmem:[#allocation4 + $0x20] sm:$0xff] }
 0x3e6   : > { %v2377_v15 = vpop.eup %2376  ;;  %v1298_v5 = vmul.f32 1.442695, %v1269_v40  ;;  %v1372_v52 = vmul.f32 %v3026_v2, %v1356_v48 }
 0x3e7   : > { %v1249_v7 = vpop.permute.xlu1 %1248  ;;  %1404 = vadd.xlane.f32.xlu0 %v2377_v15 }
 0x3e8   : > { %2382 = vpow2.f32 %v1298_v5  ;;  %v1270_v20 = vsub.f32 %v2884_v22, %v1249_v7  ;;  %v1357_v5 = vld [vmem:[#allocation4 + $0x28] sm:$0xff] }
 0x3e9   : > { %v1373_v46 = vmul.f32 %v3031_v8, %v1357_v5  ;;  %v1450_v5 = vld [vmem:[#allocation5 + $0x8] sm:$0xff] }
 0x3ea   : > { %v2379_v54 = vpop.eup %2378  ;;  %v1300_v56 = vmul.f32 1.442695, %v1270_v20 }
 0x3eb   : > { %1406 = vadd.xlane.f32.xlu1 %v2379_v54  ;;  %v1254_v60 = vpop.permute.xlu0 %1253  ;;  %v1566_v58 = vpack.c.bf16 %v2379_v54, %v2377_v15  ;;  %v3086_v50 = vpop.permute.xlu1 %1472  ;;  %v1358_v54 = vld [vmem:[#allocation4 + $0x30] sm:$0xff] }
 0x3ec   : > { %2384 = vpow2.f32 %v1300_v56  ;;  %v1271_v26 = vsub.f32 %v2887_v25, %v1254_v60  ;;  %v1350_v25 = vmul.f32 1.442695, %v1319_v55  ;;  %v1374_v1 = vmul.f32 %v3033_v59, %v1358_v54 }
 0x3ed   : > { %2223 = vmatmul.mubr.bf16.vlgmr.msra.gmra.mrb[0].mxu1 %v1566_v58  ;;  %v1359_v58 = vld [vmem:[#allocation4 + $0x38] sm:$0xff] }
 0x3ee   : > { %v2381_v61 = vpop.eup %2380  ;;  %v1302_v63 = vmul.f32 1.442695, %v1271_v26  ;;  %v1375_v2 = vmul.f32 %v3037_v11, %v1359_v58 }
 0x3ef   : > { %1408 = vadd.xlane.f32.xlu0 %v2381_v61  ;;  %v3088_v9 = vpop.permute.xlu0 %1467  ;;  %v3090_v28 = vpop.permute.xlu1 %1477 }
 0x3f0   : > { %2386 = vpow2.f32 %v1302_v63  ;;  %v1360_v63 = vld [vmem:[#allocation4 + $0x40] sm:$0xff] }
 0x3f1   : > { %2388 = vpow2.f32 %v1348_v4  ;;  %v1376_v8 = vmul.f32 %v3039_v12, %v1360_v63  ;;  %v1362_v4 = vld [vmem:[#allocation4 + $0x50] sm:$0xff]  ;;  %v1456_v63 = vld [vmem:[#allocation5 + $0x38] sm:$0xff] }
 0x3f2   : > { %v2383_v18 = vpop.eup %2382  ;;  %2390 = vpow2.f32 %v1350_v25  ;;  %v1378_v11 = vmul.f32 %v3045_v14, %v1362_v4  ;;  %v1381_v14 = vmul.f32 %v3055_v19, %v1365_v35  ;;  %v1449_v19 = vld [vmem:[#allocation5] sm:$0xff] }
 0x3f3   : > { %1410 = vadd.xlane.f32.xlu1 %v2383_v18  ;;  %v1567_v33 = vpack.c.bf16 %v2383_v18, %v2381_v61  ;;  %v3092_v36 = vpop.permute.xlu0 %1482  ;;  %v3094_v37 = vpop.permute.xlu1 %1487 }
 0x3f5   : > { %2226 = vmatprep.mubr.bf16.mxu1 %v1567_v33 }
 0x3f6   : > { %v2385_v32 = vpop.eup %2384 }
 0x3f7   : > { %1412 = vadd.xlane.f32.xlu0 %v2385_v32  ;;  %v3096_v43 = vpop.permute.xlu0 %1492  ;;  %v3098_v51 = vpop.permute.xlu1 %1497 }
 0x3fa   : > { %v2387_v22 = vpop.eup %2386 }
 0x3fb   : > { %1414 = vadd.xlane.f32.xlu1 %v2387_v22  ;;  %v1568_v45 = vpack.c.bf16 %v2387_v22, %v2385_v32  ;;  %v3080_v6 = vpop.eup %2388  ;;  %v3100_v55 = vpop.permute.xlu0 %1502  ;;  %v1361_v32 = vld [vmem:[#allocation4 + $0x48] sm:$0xff] }
 0x3fc   : > { %v3082_v38 = vpop.eup %2390  ;;  %v3102_v3 = vpop.permute.xlu1 %1507  ;;  %v1377_v59 = vmul.f32 %v3043_v13, %v1361_v32 }
 0x3fd   : > { %2227 = vmatmul.mubr.bf16.gmra.mrb[4].mxu1 %v1568_v45 }
 0x3ff   : > { %v3104_v47 = vpop.permute.xlu0 %1512 }
 0x400   : > { %v3106_v21 = vpop.permute.xlu1 %1517 }
 0x403   : > { %v3108_v23 = vpop.permute.xlu0 %1522 }
 0x404   : > { %v3110_v24 = vpop.permute.xlu1 %1527 }
 0x407   : > { %v3113_v27 = vpop.permute.xlu0 %1532 }
 0x40c   : > { %1537 = vperm.xlu1 %2327, %v3080_v6  }
 0x40d   : > { %1542 = vperm.xlu0 %2326, %v3082_v38  }
 0x44c   : > { %v1385_v29 = vpop.xlane.xlu1 %1384 }
 0x44d   : > { %v1416_v57 = vadd.f32 %v1385_v29, %v1368_v53  ;;  %v1363_v53 = vld [vmem:[#allocation4 + $0x58] sm:$0xff] }
 0x44e   : > { %v1379_v12 = vmul.f32 %v3049_v16, %v1363_v53  ;;  %v1460_v53 = vld [vmem:[#allocation5 + $0x58] sm:$0xff] }
 0x44f   : > { %1433 = vst.msk [vmem:[#allocation4] sm:$0xff] %vm1432_vm0, %v1416_v57  ;;  %v1364_v57 = vld [vmem:[#allocation4 + $0x60] sm:$0xff] }
 0x450   : > { %v1387_v34 = vpop.xlane.xlu0 %1386  ;;  %v1380_v13 = vmul.f32 %v3051_v17, %v1364_v57 }
 0x451   : > { %v1417_v39 = vadd.f32 %v1387_v34, %v1369_v31 }
 0x453   : > { %1434 = vst.msk [vmem:[#allocation4 + $0x8] sm:$0xff] %vm1432_vm0, %v1417_v39 }
 0x454   : > { %v1389_v41 = vpop.xlane.xlu0 %1388 }
 0x455   : > { %v1418_v10 = vadd.f32 %v1389_v41, %v1370_v62  ;;  %v1366_v41 = vld [vmem:[#allocation4 + $0x70] sm:$0xff] }
 0x456   : > { %v1382_v16 = vmul.f32 %v3080_v6, %v1366_v41  ;;  %v1461_v41 = vld [vmem:[#allocation5 + $0x60] sm:$0xff] }
 0x457   : > { %1435 = vst.msk [vmem:[#allocation4 + $0x10] sm:$0xff] %vm1432_vm0, %v1418_v10 }
 0x458   : > { %v1391_v49 = vpop.xlane.xlu1 %1390 }
 0x459   : > { %v1419_v40 = vadd.f32 %v1391_v49, %v1371_v42  ;;  %v1367_v42 = vld [vmem:[#allocation4 + $0x78] sm:$0xff] }
 0x45a   : > { %v1383_v17 = vmul.f32 %v3082_v38, %v1367_v42 }
 0x45b   : > { %1436 = vst.msk [vmem:[#allocation4 + $0x18] sm:$0xff] %vm1432_vm0, %v1419_v40 }
 0x45c   : > { %v1393_v15 = vpop.xlane.xlu0 %1392 }
 0x45d   : > { %v1420_v7 = vadd.f32 %v1393_v15, %v1372_v52  ;;  %v1451_v52 = vld [vmem:[#allocation5 + $0x10] sm:$0xff]  ;;  %v1452_v15 = vld [vmem:[#allocation5 + $0x18] sm:$0xff] }
 0x45f   : > { %1437 = vst.msk [vmem:[#allocation4 + $0x20] sm:$0xff] %vm1432_vm0, %v1420_v7  ;;  %v1547_v7 = vmul.f32 %v3090_v28, %v1451_v52  ;;  %v1453_v28 = vld [vmem:[#allocation5 + $0x20] sm:$0xff] }
 0x460   : > { %v1395_v20 = vpop.xlane.xlu1 %1394 }
 0x461   : > { %v1421_v56 = vadd.f32 %v1395_v20, %v1373_v46  ;;  %v1545_v46 = vmul.f32 %v3088_v9, %v1449_v19  ;;  %v1548_v20 = vmul.f32 %v3092_v36, %v1452_v15  ;;  %v1549_v36 = vmul.f32 %v3094_v37, %v1453_v28 }
 0x463   : > { %1438 = vst.msk [vmem:[#allocation4 + $0x28] sm:$0xff] %vm1432_vm0, %v1421_v56 }
 0x464   : > { %v1397_v60 = vpop.xlane.xlu0 %1396 }
 0x465   : > { %v1422_v26 = vadd.f32 %v1397_v60, %v1374_v1  ;;  %v1546_v1 = vmul.f32 %v3086_v50, %v1450_v5  ;;  %v1552_v50 = vmul.f32 %v3100_v55, %v1456_v63 }
 0x467   : > { %1439 = vst.msk [vmem:[#allocation4 + $0x30] sm:$0xff] %vm1432_vm0, %v1422_v26 }
 0x468   : > { %v1399_v61 = vpop.xlane.xlu1 %1398 }
 0x469   : > { %v1423_v18 = vadd.f32 %v1399_v61, %v1375_v2  ;;  %v1455_v61 = vld [vmem:[#allocation5 + $0x30] sm:$0xff] }
 0x46a   : > { %v1551_v9 = vmul.f32 %v3098_v51, %v1455_v61  ;;  %v1459_v51 = vld [vmem:[#allocation5 + $0x50] sm:$0xff] }
 0x46b   : > { %1440 = vst.msk [vmem:[#allocation4 + $0x38] sm:$0xff] %vm1432_vm0, %v1423_v18  ;;  %v1454_v18 = vld [vmem:[#allocation5 + $0x28] sm:$0xff]  ;;  %v1555_v37 = vmul.f32 %v3106_v21, %v1459_v51  ;;  %v1463_v21 = vld [vmem:[#allocation5 + $0x70] sm:$0xff] }
 0x46c   : > { %v1401_v33 = vpop.xlane.xlu0 %1400 }
 0x46d   : > { %v1424_v22 = vadd.f32 %v1401_v33, %v1376_v8 }
 0x46e   : > { %v1732_v61 = vld [vmem:[#allocation4 + $0x30] sm:$0xff] (!%p2090_p13) }
 0x46f   : > { %1441 = vst.msk [vmem:[#allocation4 + $0x40] sm:$0xff] %vm1432_vm0, %v1424_v22  ;;  %v1550_v22 = vmul.f32 %v3096_v43, %v1454_v18  ;;  %v1556_v43 = vmul.f32 %v3108_v23, %v1460_v53 }
 0x470   : > { %v1403_v45 = vpop.xlane.xlu1 %1402 }
 0x471   : > { %v1425_v25 = vadd.f32 %v1403_v45, %v1377_v59 }
 0x473   : > { %1442 = vst.msk [vmem:[#allocation4 + $0x48] sm:$0xff] %vm1432_vm0, %v1425_v25 }
 0x474   : > { %v1405_v0 = vpop.xlane.xlu0 %1404 }
 0x475   : > { %v1426_v29 = vadd.f32 %v1405_v0, %v1378_v11  ;;  %v1457_v0 = vld [vmem:[#allocation5 + $0x40] sm:$0xff] }
 0x476   : > { %v1553_v55 = vmul.f32 %v3102_v3, %v1457_v0  ;;  %v1464_v3 = vld [vmem:[#allocation5 + $0x78] sm:$0xff]  ;;  %v3163_v18 = vld [vmem:[#allocation4 + $0x40] sm:$0xff] (!%p2090_p13) }
 0x477   : > { %1443 = vst.msk [vmem:[#allocation4 + $0x50] sm:$0xff] %vm1432_vm0, %v1426_v29  ;;  %v1458_v29 = vld [vmem:[#allocation5 + $0x48] sm:$0xff] }
 0x478   : > { %v1407_v30 = vpop.xlane.xlu1 %1406 }
 0x479   : > { %v1427_v31 = vadd.f32 %v1407_v30, %v1379_v12 }
 0x47a   : > { %v3161_v28 = vld [vmem:[#allocation4 + $0x48] sm:$0xff] (!%p2090_p13) }
 0x47b   : > { %1444 = vst.msk [vmem:[#allocation4 + $0x58] sm:$0xff] %vm1432_vm0, %v1427_v31  ;;  %v1554_v31 = vmul.f32 %v3104_v47, %v1458_v29 }
 0x47c   : > { %v1409_v34 = vpop.xlane.xlu0 %1408 }
 0x47d   : > { %v1428_v39 = vadd.f32 %v1409_v34, %v1380_v13 }
 0x47f   : > { %1445 = vst.msk [vmem:[#allocation4 + $0x60] sm:$0xff] %vm1432_vm0, %v1428_v39 }
 0x480   : > { %v1411_v62 = vpop.xlane.xlu1 %1410 }
 0x481   : > { %v1429_v44 = vadd.f32 %v1411_v62, %v1381_v14 }
 0x483   : > { %1446 = vst.msk [vmem:[#allocation4 + $0x68] sm:$0xff] %vm1432_vm0, %v1429_v44 }
 0x484   : > { %v1413_v10 = vpop.xlane.xlu0 %1412 }
 0x485   : > { %v1430_v49 = vadd.f32 %v1413_v10, %v1382_v16  ;;  %v1462_v16 = vld [vmem:[#allocation5 + $0x68] sm:$0xff]  ;;  %v1557_v10 = vmul.f32 %v3110_v24, %v1461_v41  ;;  %v1726_v24 = vld [vmem:[#allocation4] sm:$0xff] (!%p2090_p13) }
 0x487   : > { %1447 = vst.msk [vmem:[#allocation4 + $0x70] sm:$0xff] %vm1432_vm0, %v1430_v49 }
 0x488   : > { %v1415_v48 = vpop.xlane.xlu1 %1414 }
 0x489   : > { %v1431_v40 = vadd.f32 %v1415_v48, %v1383_v17  ;;  %v1558_v48 = vmul.f32 %v3113_v27, %v1462_v16  ;;  %v1742_v27 = vmax.f32 (!%p2090_p13), %v1726_v24, 1e-16 }
 0x48b   : > { %1448 = vst.msk [vmem:[#allocation4 + $0x78] sm:$0xff] %vm1432_vm0, %v1431_v40 }
 0x48c   : > { %v1538_v62 = vpop.permute.xlu1 %1537  ;;  %v1543_v44 = vpop.permute.xlu0 %1542 }
 0x48d   : > { %v1559_v23 = vmul.f32 %v1538_v62, %v1463_v21  ;;  %v1560_v47 = vmul.f32 %v1543_v44, %v1464_v3 }
 0x48e   : > { %v3180_v29 = vld [vmem:[#allocation4 + $0x70] sm:$0xff] (!%p2090_p13) }
 0x48f   : > { %v1756_v62 = vmax.f32 (!%p2090_p13), %v3180_v29, 1e-16 }
 0x492   : > { %v3177_v51 = vld [vmem:[#allocation4 + $0x78] sm:$0xff] (!%p2090_p13) }
 0x4a0   : > { %v2216_v6 = vpop.f32.mrb[0].mxu0 }
 0x4a1   : > { %v1676_v54 = vadd.f32 %v2216_v6, %v1547_v7  ;;  %v1611_v56 = vpop.f32.mrb[1].mxu0  ;;  %v1728_v7 = vld [vmem:[#allocation4 + $0x10] sm:$0xff] (!%p2090_p13)  ;;  %v2487_v6 = vmov (!%p2090_p13), 0  }
 0x4a2   : > { %v1674_v38 = vadd.f32 %v1611_v56, %v1545_v46  ;;  %v2217_v60 = vpop.f32.mrb[2].mxu0  ;;  %v1729_v46 = vld [vmem:[#allocation4 + $0x18] sm:$0xff] (!%p2090_p13)  ;;  %2393 = vset.pattern.permute.xlu1 (!%p2090_p13), %v2487_v6  ;;  %2392 = vset.pattern.permute.xlu0 (!%p2090_p13), %v2487_v6  ;;  %v1727_v56 = vld [vmem:[#allocation4 + $0x8] sm:$0xff] (!%p2090_p13) }
 0x4a3   : > { %1692 = vst [vmem:[#allocation5 + $0x10] sm:$0xff] %v1676_v54  ;;  %v1677_v58 = vadd.f32 %v2217_v60, %v1548_v20  ;;  %v1614_v26 = vpop.f32.mrb[3].mxu0  ;;  %v1744_v20 = vmax.f32 (!%p2090_p13), %v1728_v7, 1e-16  ;;  %v1745_v54 = vmax.f32 (!%p2090_p13), %v1729_v46, 1e-16 }
 0x4a4   : > { %1690 = vst [vmem:[#allocation5] sm:$0xff] %v1674_v38  ;;  %v1675_v2 = vadd.f32 %v1614_v26, %v1546_v1  ;;  %v1731_v1 = vld [vmem:[#allocation4 + $0x28] sm:$0xff] (!%p2090_p13)  ;;  %v1730_v38 = vld [vmem:[#allocation4 + $0x20] sm:$0xff] (!%p2090_p13)  ;;  %v1743_v60 = vmax.f32 (!%p2090_p13), %v1727_v56, 1e-16 }
 0x4a5   : > { %1693 = vst [vmem:[#allocation5 + $0x18] sm:$0xff] %v1677_v58  ;;  %2394 = vrcp.f32 (!%p2090_p13), %v1744_v20  ;;  %v1747_v58 = vmax.f32 (!%p2090_p13), %v1731_v1, 1e-16  ;;  %v1746_v26 = vmax.f32 (!%p2090_p13), %v1730_v38, 1e-16 }
 0x4a6   : > { %1691 = vst [vmem:[#allocation5 + $0x8] sm:$0xff] %v1675_v2  ;;  %2396 = vrcp.f32 (!%p2090_p13), %v1742_v27  ;;  %v1733_v2 = vld [vmem:[#allocation4 + $0x38] sm:$0xff] (!%p2090_p13) }
 0x4a7   : > { %2398 = vrcp.f32 (!%p2090_p13), %v1745_v54  ;;  %v1749_v63 = vmax.f32 (!%p2090_p13), %v1733_v2, 1e-16 }
 0x4a8   : > { %2400 = vrcp.f32 (!%p2090_p13), %v1743_v60 }
 0x4a9   : > { %2402 = vrcp.f32 (!%p2090_p13), %v1747_v58 }
 0x4aa   : > { %2404 = vrcp.f32 (!%p2090_p13), %v1746_v26 }
 0x4ab   : > { %2406 = vrcp.f32 (!%p2090_p13), %v1749_v63  ;;  %v1822_v29 = vld [vmem:[#allocation5] sm:$0xff] (!%p2090_p13) }
 0x4b0   : > { %v2220_v8 = vpop.f32.mrb[4].mxu0 }
 0x4b1   : > { %v1680_v33 = vadd.f32 %v2220_v8, %v1551_v9  ;;  %v1627_v32 = vpop.f32.mrb[5].mxu0  ;;  %v1748_v9 = vmax.f32 (!%p2090_p13), %v1732_v61, 1e-16  ;;  %v1750_v8 = vmax.f32 (!%p2090_p13), %v3163_v18, 1e-16 }
 0x4b2   : > { %v1678_v59 = vadd.f32 %v1627_v32, %v1549_v36  ;;  %v2221_v45 = vpop.f32.mrb[6].mxu0  ;;  %v1751_v36 = vmax.f32 (!%p2090_p13), %v3161_v28, 1e-16 }
 0x4b3   : > { %1696 = vst [vmem:[#allocation5 + $0x30] sm:$0xff] %v1680_v33  ;;  %v1681_v4 = vadd.f32 %v2221_v45, %v1552_v50  ;;  %v1630_v25 = vpop.f32.mrb[7].mxu0  ;;  %v3167_v50 = vld [vmem:[#allocation4 + $0x58] sm:$0xff] (!%p2090_p13)  ;;  %v3169_v33 = vld [vmem:[#allocation4 + $0x50] sm:$0xff] (!%p2090_p13)  ;;  %2408 = vrcp.f32 (!%p2090_p13), %v1748_v9  ;;  %v2395_v45 = vpop.eup (!%p2090_p13), %2394 }
 0x4b4   : > { %1694 = vst [vmem:[#allocation5 + $0x20] sm:$0xff] %v1678_v59  ;;  %v1679_v11 = vadd.f32 %v1630_v25, %v1550_v22  ;;  %2410 = vrcp.f32 (!%p2090_p13), %v1751_v36  ;;  %v1753_v32 = vmax.f32 (!%p2090_p13), %v3167_v50, 1e-16  ;;  %v1752_v22 = vmax.f32 (!%p2090_p13), %v3169_v33, 1e-16  ;;  %v3173_v59 = vld [vmem:[#allocation4 + $0x68] sm:$0xff] (!%p2090_p13)  ;;  %v2397_v25 = vpop.eup (!%p2090_p13), %2396 }
 0x4b5   : > { %1697 = vst [vmem:[#allocation5 + $0x38] sm:$0xff] %v1681_v4  ;;  %2412 = vrcp.f32 (!%p2090_p13), %v1750_v8  ;;  %v3175_v4 = vld [vmem:[#allocation4 + $0x60] sm:$0xff] (!%p2090_p13)  ;;  %v2399_v0 = vpop.eup (!%p2090_p13), %2398  ;;  %v1774_v53 = vmul.f32 (!%p2090_p13), %v2397_v25, %v1742_v27 }
 0x4b6   : > { %1695 = vst [vmem:[#allocation5 + $0x28] sm:$0xff] %v1679_v11  ;;  %v1776_v11 = vmul.f32 (!%p2090_p13), %v2395_v45, %v1744_v20  ;;  %2414 = vrcp.f32 (!%p2090_p13), %v1753_v32 }
 0x4b7   : > { %2416 = vrcp.f32 (!%p2090_p13), %v1752_v22 }
 0x4c0   : > { %v2224_v12 = vpop.f32.mrb[0].mxu1 }
 0x4c1   : > { %v1684_v30 = vadd.f32 %v2224_v12, %v1555_v37  ;;  %v1643_v57 = vpop.f32.mrb[1].mxu1  ;;  %v1755_v37 = vmax.f32 (!%p2090_p13), %v3173_v59, 1e-16  ;;  %v1792_v12 = vsub.f32 (!%p2090_p13), 2.0, %v1776_v11 }
 0x4c2   : > { %v1682_v13 = vadd.f32 %v1643_v57, %v1553_v55  ;;  %v2225_v34 = vpop.f32.mrb[2].mxu1  ;;  %v2401_v55 = vpop.eup (!%p2090_p13), %2400 }
 0x4c3   : > { %1700 = vst [vmem:[#allocation5 + $0x50] sm:$0xff] %v1684_v30  ;;  %v1685_v35 = vadd.f32 %v2225_v34, %v1556_v43  ;;  %v1646_v39 = vpop.f32.mrb[3].mxu1  ;;  %v1777_v43 = vmul.f32 (!%p2090_p13), %v2399_v0, %v1745_v54  ;;  %v1754_v30 = vmax.f32 (!%p2090_p13), %v3175_v4, 1e-16  ;;  %v2403_v57 = vpop.eup (!%p2090_p13), %2402  ;;  %v1757_v34 = vmax.f32 (!%p2090_p13), %v3177_v51, 1e-16 }
 0x4c4   : > { %1698 = vst [vmem:[#allocation5 + $0x40] sm:$0xff] %v1682_v13  ;;  %v1683_v14 = vadd.f32 %v1646_v39, %v1554_v31  ;;  %v1790_v31 = vsub.f32 (!%p2090_p13), 2.0, %v1774_v53  ;;  %v1775_v13 = vmul.f32 (!%p2090_p13), %v2401_v55, %v1743_v60  ;;  %v1808_v39 = vmul.f32 (!%p2090_p13), %v2395_v45, %v1792_v12 }
 0x4c5   : > { %1701 = vst [vmem:[#allocation5 + $0x58] sm:$0xff] %v1685_v35  ;;  %v2405_v35 = vpop.eup (!%p2090_p13), %2404  ;;  %v1779_v21 = vmul.f32 (!%p2090_p13), %v2403_v57, %v1747_v58  ;;  %2418 = vrcp.f32 (!%p2090_p13), %v1755_v37 }
 0x4c6   : > { %1699 = vst [vmem:[#allocation5 + $0x48] sm:$0xff] %v1683_v14  ;;  %v1793_v14 = vsub.f32 (!%p2090_p13), 2.0, %v1777_v43  ;;  %v2407_v41 = vpop.eup (!%p2090_p13), %2406  ;;  %v1806_v3 = vmul.f32 (!%p2090_p13), %v2397_v25, %v1790_v31  ;;  %v1791_v44 = vsub.f32 (!%p2090_p13), 2.0, %v1775_v13  ;;  %v1778_v16 = vmul.f32 (!%p2090_p13), %v2405_v35, %v1746_v26  ;;  %1850 = vperm.xlu1 (!%p2090_p13), %2393, %v1808_v39   ;;  %v1825_v31 = vld [vmem:[#allocation5 + $0x18] sm:$0xff] (!%p2090_p13) }
 0x4c7   : > { %2420 = vrcp.f32 (!%p2090_p13), %v1754_v30 }
 0x4c8   : > { %1840 = vperm.xlu0 (!%p2090_p13), %2392, %v1806_v3   ;;  %2422 = vrcp.f32 (!%p2090_p13), %v1757_v34 }
 0x4c9   : > { %2424 = vrcp.f32 (!%p2090_p13), %v1756_v62 }
 0x4d0   : > { %v2228_v42 = vpop.f32.mrb[4].mxu1  ;;  %1725 = sbr.rel (%p2090_p13) target bundleno = 1393 (0x571), region = 89 }
 0x4d1   : > { %v1688_v49 = vadd.f32 %v2228_v42, %v1559_v23  ;;  %v1659_v17 = vpop.f32.mrb[5].mxu1  ;;  %v2409_v23 = vpop.eup (!%p2090_p13), %2408  ;;  %v1795_v42 = vsub.f32 (!%p2090_p13), 2.0, %v1779_v21 }
 0x4d2   : > { %v1686_v40 = vadd.f32 %v1659_v17, %v1557_v10  ;;  %v2229_v52 = vpop.f32.mrb[6].mxu1  ;;  %v1809_v10 = vmul.f32 (!%p2090_p13), %v2399_v0, %v1793_v14  ;;  %v1807_v17 = vmul.f32 (!%p2090_p13), %v2401_v55, %v1791_v44  ;;  %v3192_v55 = vld [vmem:[%s3251_s4] ss:$0 sm:$0xff] (!%p2090_p13) }
 0x4d3   : > { %1704 = vst [vmem:[#allocation5 + $0x70] sm:$0xff] %v1688_v49  ;;  %v1689_v19 = vadd.f32 %v2229_v52, %v1560_v47  ;;  %v1662_v15 = vpop.f32.mrb[7].mxu1  ;;  %v1781_v47 = vmul.f32 (!%p2090_p13), %v2407_v41, %v1749_v63  ;;  %v2411_v49 = vpop.eup (!%p2090_p13), %2410  ;;  %v1826_v44 = vld [vmem:[#allocation5 + $0x20] sm:$0xff] (!%p2090_p13) }
 0x4d4   : > { %1702 = vst [vmem:[#allocation5 + $0x60] sm:$0xff] %v1686_v40  ;;  %v1687_v5 = vadd.f32 %v1662_v15, %v1558_v48  ;;  %v1794_v48 = vsub.f32 (!%p2090_p13), 2.0, %v1778_v16  ;;  %v1780_v40 = vmul.f32 (!%p2090_p13), %v2409_v23, %v1748_v9  ;;  %v2413_v52 = vpop.eup (!%p2090_p13), %2412  ;;  %1855 = vperm.xlu1 (!%p2090_p13), %2393, %v1809_v10   ;;  %1845 = vperm.xlu0 (!%p2090_p13), %2392, %v1807_v17  }
 0x4d5   : > { %1705 = vst [vmem:[#allocation5 + $0x78] sm:$0xff] %v1689_v19  ;;  %v1811_v19 = vmul.f32 (!%p2090_p13), %v2403_v57, %v1795_v42  ;;  %v1797_v15 = vsub.f32 (!%p2090_p13), 2.0, %v1781_v47  ;;  %v2415_v7 = vpop.eup (!%p2090_p13), %2414  ;;  %v1782_v6 = vmul.f32 (!%p2090_p13), %v2413_v52, %v1750_v8 }
 0x4d6   : > { %1703 = vst [vmem:[#allocation5 + $0x68] sm:$0xff] %v1687_v5  ;;  %v1783_v5 = vmul.f32 (!%p2090_p13), %v2411_v49, %v1751_v36  ;;  %v1810_v24 = vmul.f32 (!%p2090_p13), %v2405_v35, %v1794_v48  ;;  %v1796_v46 = vsub.f32 (!%p2090_p13), 2.0, %v1780_v40  ;;  %v2417_v20 = vpop.eup (!%p2090_p13), %2416  ;;  %v1785_v56 = vmul.f32 (!%p2090_p13), %v2415_v7, %v1753_v32  ;;  %v1828_v48 = vld [vmem:[#allocation5 + $0x30] sm:$0xff] (!%p2090_p13) }
 0x4d7   : > { %v1813_v27 = vmul.f32 %v2407_v41, %v1797_v15  ;;  %v2419_v1 = vpop.eup %2418  ;;  %v1798_v60 = vsub.f32 2.0, %v1782_v6  ;;  %v1784_v58 = vmul.f32 %v2417_v20, %v1752_v22  ;;  %v1827_v41 = vld [vmem:[#allocation5 + $0x28] sm:$0xff] }
 0x4d8   : > { %1865 = vperm.xlu1 %2393, %v1811_v19   ;;  %v1799_v54 = vsub.f32 2.0, %v1783_v5  ;;  %1860 = vperm.xlu0 %2392, %v1810_v24   ;;  %v1812_v38 = vmul.f32 %v2409_v23, %v1796_v46  ;;  %v2421_v26 = vpop.eup %2420  ;;  %v1801_v61 = vsub.f32 2.0, %v1785_v56  ;;  %v1787_v28 = vmul.f32 %v2419_v1, %v1755_v37  ;;  %v1824_v37 = vld [vmem:[#allocation5 + $0x10] sm:$0xff]  ;;  %v1830_v46 = vld [vmem:[#allocation5 + $0x40] sm:$0xff] }
 0x4d9   : > { %v2423_v63 = vpop.eup %2422  ;;  %v1814_v9 = vmul.f32 %v2413_v52, %v1798_v60  ;;  %v1800_v18 = vsub.f32 2.0, %v1784_v58  ;;  %v1786_v36 = vmul.f32 %v2421_v26, %v1754_v30  ;;  %v1832_v60 = vld [vmem:[#allocation5 + $0x50] sm:$0xff] }
 0x4da   : > { %v1815_v2 = vmul.f32 %v2411_v49, %v1799_v54  ;;  %v2425_v8 = vpop.eup %2424  ;;  %v1817_v50 = vmul.f32 %v2415_v7, %v1801_v61  ;;  %v1803_v32 = vsub.f32 2.0, %v1787_v28  ;;  %v1789_v59 = vmul.f32 %v2423_v63, %v1757_v34  ;;  %v1823_v34 = vld [vmem:[#allocation5 + $0x8] sm:$0xff]  ;;  %v1829_v49 = vld [vmem:[#allocation5 + $0x38] sm:$0xff] }
 0x4db   : > { %v1816_v45 = vmul.f32 %v2417_v20, %v1800_v18  ;;  %v1802_v4 = vsub.f32 2.0, %v1786_v36  ;;  %v1788_v33 = vmul.f32 %v2425_v8, %v1756_v62  ;;  %v1831_v7 = vld [vmem:[#allocation5 + $0x48] sm:$0xff]  ;;  %v1834_v18 = vld [vmem:[#allocation5 + $0x60] sm:$0xff] }
 0x4dc   : > { %1875 = vperm.xlu1 %2393, %v1813_v27   ;;  %1870 = vperm.xlu0 %2392, %v1812_v38   ;;  %v1819_v22 = vmul.f32 %v2419_v1, %v1803_v32  ;;  %v1805_v25 = vsub.f32 2.0, %v1789_v59  ;;  %v1833_v1 = vld [vmem:[#allocation5 + $0x58] sm:$0xff] }
 0x4dd   : > { %v1818_v11 = vmul.f32 %v2421_v26, %v1802_v4  ;;  %v1804_v51 = vsub.f32 2.0, %v1788_v33  ;;  %v1836_v33 = vld [vmem:[#allocation5 + $0x70] sm:$0xff] }
 0x4de   : > { %v1821_v0 = vmul.f32 %v2423_v63, %v1805_v25  ;;  %v1835_v63 = vld [vmem:[#allocation5 + $0x68] sm:$0xff] }
 0x4df   : > { %v1820_v53 = vmul.f32 %v2425_v8, %v1804_v51 }
 0x4e0   : > { %1885 = vperm.xlu1 %2393, %v1815_v2   ;;  %1880 = vperm.xlu0 %2392, %v1814_v9  }
 0x4e4   : > { %1895 = vperm.xlu1 %2393, %v1817_v50   ;;  %1890 = vperm.xlu0 %2392, %v1816_v45   ;;  %v1837_v45 = vld [vmem:[#allocation5 + $0x78] sm:$0xff] }
 0x4e8   : > { %1905 = vperm.xlu1 %2393, %v1819_v22   ;;  %1900 = vperm.xlu0 %2392, %v1818_v11  }
 0x4ec   : > { %1915 = vperm.xlu1 %2393, %v1821_v0   ;;  %1910 = vperm.xlu0 %2392, %v1820_v53  }
 0x545   : > { %v1851_v12 = vpop.permute.xlu1 %1850 }
 0x546   : > { %v1920_v43 = vmul.f32 %v1851_v12, %v1824_v37 }
 0x547   : > { %v1841_v30 = vpop.permute.xlu0 %1840 }
 0x548   : > { %v1918_v57 = vmul.f32 %v1841_v30, %v1822_v29  ;;  %v1943_v13 = vadd.f32 %v3192_v55, %v1920_v43 }
 0x54a   : > { %v1941_v35 = vadd.f32 %v3192_v55, %v1918_v57  ;;  %1959 = vst [vmem:[%s2614_s14 + $0x10] sm:$0xff] %v1943_v13 }
 0x54c   : > { %1957 = vst [vmem:[%s2614_s14] sm:$0xff] %v1941_v35 }
 0x553   : > { %v1856_v39 = vpop.permute.xlu1 %1855  ;;  %v1846_v21 = vpop.permute.xlu0 %1845 }
 0x554   : > { %v1921_v14 = vmul.f32 %v1856_v39, %v1825_v31  ;;  %v1919_v62 = vmul.f32 %v1846_v21, %v1823_v34 }
 0x556   : > { %v1944_v3 = vadd.f32 %v3192_v55, %v1921_v14  ;;  %v1942_v16 = vadd.f32 %v3192_v55, %v1919_v62 }
 0x557   : > { %v1866_v23 = vpop.permute.xlu1 %1865  ;;  %v1861_v42 = vpop.permute.xlu0 %1860 }
 0x558   : > { %1960 = vst [vmem:[%s2614_s14 + $0x18] sm:$0xff] %v1944_v3  ;;  %v1923_v10 = vmul.f32 %v1866_v23, %v1827_v41  ;;  %1958 = vst [vmem:[%s2614_s14 + $0x8] sm:$0xff] %v1942_v16  ;;  %v1922_v47 = vmul.f32 %v1861_v42, %v1826_v44 }
 0x55a   : > { %v1946_v17 = vadd.f32 %v3192_v55, %v1923_v10  ;;  %v1945_v40 = vadd.f32 %v3192_v55, %v1922_v47 }
 0x55b   : > { %v1876_v52 = vpop.permute.xlu1 %1875  ;;  %v1871_v15 = vpop.permute.xlu0 %1870 }
 0x55c   : > { %1962 = vst [vmem:[%s2614_s14 + $0x28] sm:$0xff] %v1946_v17  ;;  %v1925_v19 = vmul.f32 %v1876_v52, %v1829_v49  ;;  %1961 = vst [vmem:[%s2614_s14 + $0x20] sm:$0xff] %v1945_v40  ;;  %v1924_v5 = vmul.f32 %v1871_v15, %v1828_v48 }
 0x55e   : > { %v1948_v24 = vadd.f32 %v3192_v55, %v1925_v19  ;;  %v1947_v6 = vadd.f32 %v3192_v55, %v1924_v5 }
 0x55f   : > { %v1886_v20 = vpop.permute.xlu1 %1885  ;;  %v1881_v54 = vpop.permute.xlu0 %1880 }
 0x560   : > { %1964 = vst [vmem:[%s2614_s14 + $0x38] sm:$0xff] %v1948_v24  ;;  %v1927_v27 = vmul.f32 %v1886_v20, %v1831_v7  ;;  %1963 = vst [vmem:[%s2614_s14 + $0x30] sm:$0xff] %v1947_v6  ;;  %v1926_v56 = vmul.f32 %v1881_v54, %v1830_v46 }
 0x562   : > { %v1950_v38 = vadd.f32 %v3192_v55, %v1927_v27  ;;  %v1949_v58 = vadd.f32 %v3192_v55, %v1926_v56 }
 0x563   : > { %v1896_v26 = vpop.permute.xlu1 %1895  ;;  %v1891_v61 = vpop.permute.xlu0 %1890 }
 0x564   : > { %1966 = vst [vmem:[%s2614_s14 + $0x48] sm:$0xff] %v1950_v38  ;;  %v1929_v2 = vmul.f32 %v1896_v26, %v1833_v1  ;;  %1965 = vst [vmem:[%s2614_s14 + $0x40] sm:$0xff] %v1949_v58  ;;  %v1928_v28 = vmul.f32 %v1891_v61, %v1832_v60 }
 0x566   : > { %v1952_v9 = vadd.f32 %v3192_v55, %v1929_v2  ;;  %v1951_v36 = vadd.f32 %v3192_v55, %v1928_v28 }
 0x567   : > { %v1906_v8 = vpop.permute.xlu1 %1905  ;;  %v1901_v32 = vpop.permute.xlu0 %1900 }
 0x568   : > { %1968 = vst [vmem:[%s2614_s14 + $0x58] sm:$0xff] %v1952_v9  ;;  %v1931_v50 = vmul.f32 %v1906_v8, %v1835_v63  ;;  %1967 = vst [vmem:[%s2614_s14 + $0x50] sm:$0xff] %v1951_v36  ;;  %v1930_v59 = vmul.f32 %v1901_v32, %v1834_v18 }
 0x56a   : > { %v1954_v4 = vadd.f32 %v3192_v55, %v1931_v50  ;;  %v1953_v22 = vadd.f32 %v3192_v55, %v1930_v59 }
 0x56b   : > { %v1916_v25 = vpop.permute.xlu1 %1915  ;;  %v1911_v51 = vpop.permute.xlu0 %1910 }
 0x56c   : > { %1970 = vst [vmem:[%s2614_s14 + $0x68] sm:$0xff] %v1954_v4  ;;  %v1933_v11 = vmul.f32 %v1916_v25, %v1837_v45  ;;  %1969 = vst [vmem:[%s2614_s14 + $0x60] sm:$0xff] %v1953_v22  ;;  %v1932_v0 = vmul.f32 %v1911_v51, %v1836_v33 }
 0x56e   : > { %v1956_v53 = vadd.f32 %v3192_v55, %v1933_v11  ;;  %v1955_v37 = vadd.f32 %v3192_v55, %v1932_v0 }
 0x570   : > { %1972 = vst [vmem:[%s2614_s14 + $0x78] sm:$0xff] %v1956_v53  ;;  %1971 = vst [vmem:[%s2614_s14 + $0x70] sm:$0xff] %v1955_v37 }
 0x571 PF: > { %s15_s24 = sadd.s32 1, %s2480_s24   ;;  %s3253_s18 = smov %s2460_s19 }
 0x572   : > { %p12_p0 = scmp.ge.s32.totalorder %s15_s24, 6   ;;  %s3254_s19 = smov %s2569_s6 }
 0x573   : > { %s3255_s20 = smov %s2472_s22  ;;  %s3256_s21 = smov %s2476_s23 }
 0x574   : > { %s3257_s22 = smov %s3260_s25  ;;  %s3258_s23 = smov %s3264_s26 }
 0x575   :  { %14 = sbr.rel (!%p12_p0) target bundleno = 4 (0x4), region = 130 }

// kernel: model_forward_pallas.17
= control target key start
LH: loop header
LB: loop body
LE: loop exit
PB: predicated region body
PF: predicated region fallthrough
CT: control target
= control target key end

     0   :  { %vm383_vm0 = vmmov 0   ;;  %s672_s2 = inlined_call_operand.vmem [shape: f32[256,128], index: 2, kind: input, shape index: {}]   ;;  %s673_s3 = inlined_call_operand.vmem [shape: f32[256,128], index: 3, kind: input, shape index: {}]   ;;  %s674_s0 = inlined_call_operand.vmem [shape: bf16[16,256], index: 0, kind: input, shape index: {}]   ;;  %s675_s1 = inlined_call_operand.vmem [shape: bf16[16,256], index: 1, kind: input, shape index: {}]   ;;  %s676_s4 = inlined_call_operand.vmem [shape: f32[128,128], index: 4, kind: input, shape index: {}]   ;;  %s677_s5 = inlined_call_operand.vmem [shape: f32[16,128], index: 5, kind: output, shape index: {}]  }
   0x1   :  { %v39_v0 = vld [vmem:[%s672_s2 + $0x80] sm:$0xff]  ;;  %v40_v1 = vld [vmem:[%s672_s2 + $0x88] sm:$0xff]  ;;  %v41_v11 = vld [vmem:[%s672_s2 + $0x90] sm:$0xff] }
   0x2   :  { %v140_v2 = vld [vmem:[%s673_s3 + $0x80] sm:$0xff]  ;;  %v63_v3 = vpack.c.bf16 %v40_v1, %v39_v0  ;;  %v141_v4 = vld [vmem:[%s673_s3 + $0x88] sm:$0xff]  ;;  %v42_v13 = vld [vmem:[%s672_s2 + $0x98] sm:$0xff] }
   0x3   :  { %v23_v5 = vld [vmem:[%s672_s2] sm:$0xff]  ;;  %v24_v6 = vld [vmem:[%s672_s2 + $0x8] sm:$0xff]  ;;  %v164_v7 = vpack.c.bf16 %v141_v4, %v140_v2  ;;  %v142_v14 = vld [vmem:[%s673_s3 + $0x90] sm:$0xff]  ;;  %v64_v16 = vpack.c.bf16 %v42_v13, %v41_v11 }
   0x4   :  { %v55_v8 = vpack.c.bf16 %v24_v6, %v23_v5  ;;  %v124_v9 = vld [vmem:[%s673_s3] sm:$0xff]  ;;  %v125_v10 = vld [vmem:[%s673_s3 + $0x8] sm:$0xff]  ;;  %301 = vmatprep.subr.bf16.mxu0 %v63_v3  ;;  %v143_v15 = vld [vmem:[%s673_s3 + $0x98] sm:$0xff] }
   0x5   :  { %v156_v12 = vpack.c.bf16 %v125_v10, %v124_v9  ;;  %323 = vmatprep.subr.bf16.mxu1 %v164_v7  ;;  %v165_v17 = vpack.c.bf16 %v143_v15, %v142_v14  ;;  %v25_v18 = vld [vmem:[%s672_s2 + $0x10] sm:$0xff]  ;;  %v26_v19 = vld [vmem:[%s672_s2 + $0x18] sm:$0xff]  ;;  %v43_v23 = vld [vmem:[%s672_s2 + $0xa0] sm:$0xff] }
   0x6   :  { %302 = vmatpush3.bf16.msra.mxu0 %v55_v8  ;;  %v126_v20 = vld [vmem:[%s673_s3 + $0x10] sm:$0xff]  ;;  %v56_v21 = vpack.c.bf16 %v26_v19, %v25_v18  ;;  %v127_v22 = vld [vmem:[%s673_s3 + $0x18] sm:$0xff]  ;;  %v44_v24 = vld [vmem:[%s672_s2 + $0xa8] sm:$0xff] }
   0x7   :  { %324 = vmatpush3.bf16.msra.mxu1 %v156_v12  ;;  %303 = vmatprep.subr.bf16.mxu0 %v64_v16  ;;  %v157_v25 = vpack.c.bf16 %v127_v22, %v126_v20  ;;  %v65_v26 = vpack.c.bf16 %v44_v24, %v43_v23  ;;  %v144_v27 = vld [vmem:[%s673_s3 + $0xa0] sm:$0xff]  ;;  %v145_v28 = vld [vmem:[%s673_s3 + $0xa8] sm:$0xff]  ;;  %v45_v35 = vld [vmem:[%s672_s2 + $0xb0] sm:$0xff] }
   0x8   :  { %325 = vmatprep.subr.bf16.mxu1 %v165_v17  ;;  %v27_v29 = vld [vmem:[%s672_s2 + $0x20] sm:$0xff]  ;;  %v166_v30 = vpack.c.bf16 %v145_v28, %v144_v27  ;;  %v28_v31 = vld [vmem:[%s672_s2 + $0x28] sm:$0xff]  ;;  %v46_v36 = vld [vmem:[%s672_s2 + $0xb8] sm:$0xff] }
   0x9   :  { %v128_v32 = vld [vmem:[%s673_s3 + $0x20] sm:$0xff]  ;;  %v129_v33 = vld [vmem:[%s673_s3 + $0x28] sm:$0xff]  ;;  %v57_v34 = vpack.c.bf16 %v28_v31, %v27_v29  ;;  %v146_v37 = vld [vmem:[%s673_s3 + $0xb0] sm:$0xff]  ;;  %v66_v39 = vpack.c.bf16 %v46_v36, %v45_v35 }
   0xa   :  { %304 = vmatpush3.bf16.msra.mxu0 %v56_v21  ;;  %v158_v38 = vpack.c.bf16 %v129_v33, %v128_v32  ;;  %v147_v40 = vld [vmem:[%s673_s3 + $0xb8] sm:$0xff]  ;;  %v29_v41 = vld [vmem:[%s672_s2 + $0x30] sm:$0xff]  ;;  %v47_v46 = vld [vmem:[%s672_s2 + $0xc0] sm:$0xff] }
   0xb   :  { %326 = vmatpush3.bf16.msra.mxu1 %v157_v25  ;;  %305 = vmatprep.subr.bf16.mxu0 %v65_v26  ;;  %v30_v42 = vld [vmem:[%s672_s2 + $0x38] sm:$0xff]  ;;  %v167_v43 = vpack.c.bf16 %v147_v40, %v146_v37  ;;  %v130_v44 = vld [vmem:[%s673_s3 + $0x30] sm:$0xff]  ;;  %v48_v47 = vld [vmem:[%s672_s2 + $0xc8] sm:$0xff] }
   0xc   :  { %327 = vmatprep.subr.bf16.mxu1 %v166_v30  ;;  %v131_v45 = vld [vmem:[%s673_s3 + $0x38] sm:$0xff]  ;;  %v148_v48 = vld [vmem:[%s673_s3 + $0xc0] sm:$0xff]  ;;  %v149_v49 = vld [vmem:[%s673_s3 + $0xc8] sm:$0xff]  ;;  %v58_v50 = vpack.c.bf16 %v30_v42, %v29_v41  ;;  %v67_v52 = vpack.c.bf16 %v48_v47, %v47_v46 }
   0xd   :  { %v159_v51 = vpack.c.bf16 %v131_v45, %v130_v44  ;;  %v31_v53 = vld [vmem:[%s672_s2 + $0x40] sm:$0xff]  ;;  %v32_v54 = vld [vmem:[%s672_s2 + $0x48] sm:$0xff]  ;;  %v168_v56 = vpack.c.bf16 %v149_v49, %v148_v48  ;;  %v49_v58 = vld [vmem:[%s672_s2 + $0xd0] sm:$0xff] }
   0xe   :  { %306 = vmatpush3.bf16.msra.mxu0 %v57_v34  ;;  %v132_v55 = vld [vmem:[%s673_s3 + $0x40] sm:$0xff]  ;;  %v133_v57 = vld [vmem:[%s673_s3 + $0x48] sm:$0xff]  ;;  %v50_v59 = vld [vmem:[%s672_s2 + $0xd8] sm:$0xff]  ;;  %v59_v62 = vpack.c.bf16 %v32_v54, %v31_v53 }
   0xf   :  { %328 = vmatpush3.bf16.msra.mxu1 %v158_v38  ;;  %307 = vmatprep.subr.bf16.mxu0 %v66_v39  ;;  %v150_v60 = vld [vmem:[%s673_s3 + $0xd0] sm:$0xff]  ;;  %v151_v61 = vld [vmem:[%s673_s3 + $0xd8] sm:$0xff]  ;;  %v160_v0 = vpack.c.bf16 %v133_v57, %v132_v55  ;;  %v68_v1 = vpack.c.bf16 %v50_v59, %v49_v58  ;;  %v51_v6 = vld [vmem:[%s672_s2 + $0xe0] sm:$0xff]  ;;  %v382_v39 = vmov 0.0  }
  0x10   :  { %329 = vmatprep.subr.bf16.mxu1 %v167_v43  ;;  %v33_v63 = vld [vmem:[%s672_s2 + $0x50] sm:$0xff]  ;;  %v34_v2 = vld [vmem:[%s672_s2 + $0x58] sm:$0xff]  ;;  %v169_v5 = vpack.c.bf16 %v151_v61, %v150_v60  ;;  %v52_v7 = vld [vmem:[%s672_s2 + $0xe8] sm:$0xff] }
  0x11   :  { %v134_v3 = vld [vmem:[%s673_s3 + $0x50] sm:$0xff]  ;;  %v135_v4 = vld [vmem:[%s673_s3 + $0x58] sm:$0xff]  ;;  %v152_v8 = vld [vmem:[%s673_s3 + $0xe0] sm:$0xff]  ;;  %v60_v12 = vpack.c.bf16 %v34_v2, %v33_v63  ;;  %v69_v17 = vpack.c.bf16 %v52_v7, %v51_v6 }
  0x12   :  { %308 = vmatpush3.bf16.msra.mxu0 %v58_v50  ;;  %v153_v9 = vld [vmem:[%s673_s3 + $0xe8] sm:$0xff]  ;;  %v35_v10 = vld [vmem:[%s672_s2 + $0x60] sm:$0xff]  ;;  %v53_v15 = vld [vmem:[%s672_s2 + $0xf0] sm:$0xff]  ;;  %v161_v16 = vpack.c.bf16 %v135_v4, %v134_v3 }
  0x13   :  { %330 = vmatpush3.bf16.msra.mxu1 %v159_v51  ;;  %309 = vmatprep.subr.bf16.mxu0 %v67_v52  ;;  %v36_v11 = vld [vmem:[%s672_s2 + $0x68] sm:$0xff]  ;;  %v136_v13 = vld [vmem:[%s673_s3 + $0x60] sm:$0xff]  ;;  %v54_v18 = vld [vmem:[%s672_s2 + $0xf8] sm:$0xff]  ;;  %v170_v19 = vpack.c.bf16 %v153_v9, %v152_v8 }
  0x14   :  { %331 = vmatprep.subr.bf16.mxu1 %v168_v56  ;;  %v137_v14 = vld [vmem:[%s673_s3 + $0x68] sm:$0xff]  ;;  %v154_v20 = vld [vmem:[%s673_s3 + $0xf0] sm:$0xff]  ;;  %v155_v22 = vld [vmem:[%s673_s3 + $0xf8] sm:$0xff]  ;;  %v61_v24 = vpack.c.bf16 %v36_v11, %v35_v10  ;;  %v70_v26 = vpack.c.bf16 %v54_v18, %v53_v15 }
  0x15   :  { %v378_v21 = vld [vmem:[%s674_s0 + $0x4] ss:$8 sps:$4 sm:$0xff]   ;;  %v162_v25 = vpack.c.bf16 %v137_v14, %v136_v13  ;;  %v37_v27 = vld [vmem:[%s672_s2 + $0x70] sm:$0xff]  ;;  %v38_v28 = vld [vmem:[%s672_s2 + $0x78] sm:$0xff]  ;;  %v171_v29 = vpack.c.bf16 %v155_v22, %v154_v20 }
  0x16   :  { %310 = vmatpush3.bf16.msra.mxu0 %v59_v62  ;;  %v381_v23 = vld [vmem:[%s675_s1 + $0x4] ss:$8 sps:$4 sm:$0xff]   ;;  %113 = vmatprep.mubr.bf16.mxu0 %v378_v21  ;;  %v138_v30 = vld [vmem:[%s673_s3 + $0x70] sm:$0xff]  ;;  %v139_v31 = vld [vmem:[%s673_s3 + $0x78] sm:$0xff]  ;;  %v62_v32 = vpack.c.bf16 %v38_v28, %v37_v27 }
  0x17   :  { %332 = vmatpush3.bf16.msra.mxu1 %v160_v0  ;;  %311 = vmatprep.subr.bf16.mxu0 %v68_v1  ;;  %v163_v33 = vpack.c.bf16 %v139_v31, %v138_v30  ;;  %v226_v34 = vld [vmem:[%s676_s4] sm:$0xff]  ;;  %v227_v35 = vld [vmem:[%s676_s4 + $0x8] sm:$0xff]  ;;  %v228_v40 = vld [vmem:[%s676_s4 + $0x10] sm:$0xff] }
  0x18   :  { %333 = vmatprep.subr.bf16.mxu1 %v169_v5  ;;  %214 = vmatprep.mubr.bf16.mxu1 %v381_v23  ;;  %v376_v36 = vld [vmem:[%s674_s0] ss:$8 sps:$4 sm:$0xff]   ;;  %v242_v38 = vpack.c.bf16 %v227_v35, %v226_v34  ;;  %v229_v41 = vld [vmem:[%s676_s4 + $0x18] sm:$0xff]  ;;  %v232_v46 = vld [vmem:[%s676_s4 + $0x30] sm:$0xff] }
  0x19   :  { %v379_v37 = vld [vmem:[%s675_s1] ss:$8 sps:$4 sm:$0xff]   ;;  %v243_v42 = vpack.c.bf16 %v229_v41, %v228_v40  ;;  %v233_v47 = vld [vmem:[%s676_s4 + $0x38] sm:$0xff]  ;;  %v236_v52 = vld [vmem:[%s676_s4 + $0x50] sm:$0xff] }
  0x1a   :  { %312 = vmatpush3.bf16.msra.mxu0 %v60_v12  ;;  %v230_v43 = vld [vmem:[%s676_s4 + $0x20] sm:$0xff]  ;;  %v231_v44 = vld [vmem:[%s676_s4 + $0x28] sm:$0xff]  ;;  %v245_v48 = vpack.c.bf16 %v233_v47, %v232_v46  ;;  %v237_v53 = vld [vmem:[%s676_s4 + $0x58] sm:$0xff] }
  0x1b   :  { %334 = vmatpush3.bf16.msra.mxu1 %v161_v16  ;;  %313 = vmatprep.subr.bf16.mxu0 %v69_v17  ;;  %v244_v45 = vpack.c.bf16 %v231_v44, %v230_v43  ;;  %v234_v49 = vld [vmem:[%s676_s4 + $0x40] sm:$0xff]  ;;  %v235_v50 = vld [vmem:[%s676_s4 + $0x48] sm:$0xff]  ;;  %v247_v54 = vpack.c.bf16 %v237_v53, %v236_v52  ;;  %v240_v58 = vld [vmem:[%s676_s4 + $0x70] sm:$0xff] }
  0x1c   :  { %335 = vmatprep.subr.bf16.mxu1 %v170_v19  ;;  %v246_v51 = vpack.c.bf16 %v235_v50, %v234_v49  ;;  %v238_v55 = vld [vmem:[%s676_s4 + $0x60] sm:$0xff]  ;;  %v239_v56 = vld [vmem:[%s676_s4 + $0x68] sm:$0xff]  ;;  %v241_v59 = vld [vmem:[%s676_s4 + $0x78] sm:$0xff] }
  0x1d   :  { %v248_v57 = vpack.c.bf16 %v239_v56, %v238_v55  ;;  %v249_v60 = vpack.c.bf16 %v241_v59, %v240_v58 }
  0x1e   :  { %314 = vmatpush3.bf16.msra.mxu0 %v61_v24 }
  0x1f   :  { %336 = vmatpush3.bf16.msra.mxu1 %v162_v25  ;;  %315 = vmatprep.subr.bf16.mxu0 %v70_v26 }
  0x20   :  { %337 = vmatprep.subr.bf16.mxu1 %v171_v29 }
  0x22   :  { %316 = vmatpush3.bf16.msra.mxu0 %v62_v32 }
  0x23   :  { %338 = vmatpush3.bf16.msra.mxu1 %v163_v33  ;;  %354 = vmatprep.subr.bf16.mxu0 %v382_v39 }
  0x25   :  { %114 = vmatmul.mubr.bf16.vlgmr.msra.gmra.mrb[0].mxu0 %v376_v36 }
  0x26   :  { %215 = vmatmul.mubr.bf16.vlgmr.msra.gmra.mrb[0].mxu1 %v379_v37  ;;  %355 = vmatpush3.bf16.msra.mxu0 %v242_v38 }
  0x27   :  { %356 = vmatprep.subr.bf16.mxu0 %v382_v39  ;;  %370 = vmatprep.mubr.msk.bf16.mxu0 %vm383_vm0, %v382_v39 }
  0x2a   :  { %357 = vmatpush3.bf16.msra.mxu0 %v243_v42 }
  0x2b   :  { %358 = vmatprep.subr.bf16.mxu0 %v382_v39 }
  0x2e   :  { %359 = vmatpush3.bf16.msra.mxu0 %v244_v45 }
  0x2f   :  { %360 = vmatprep.subr.bf16.mxu0 %v382_v39 }
  0x32   :  { %361 = vmatpush3.bf16.msra.mxu0 %v245_v48 }
  0x33   :  { %362 = vmatprep.subr.bf16.mxu0 %v382_v39 }
  0x36   :  { %363 = vmatpush3.bf16.msra.mxu0 %v246_v51 }
  0x37   :  { %364 = vmatprep.subr.bf16.mxu0 %v382_v39 }
  0x3a   :  { %365 = vmatpush3.bf16.msra.mxu0 %v247_v54 }
  0x3b   :  { %366 = vmatprep.subr.bf16.mxu0 %v382_v39 }
  0x3e   :  { %367 = vmatpush3.bf16.msra.mxu0 %v248_v57 }
  0x3f   :  { %368 = vmatprep.subr.bf16.mxu0 %v382_v39 }
  0x42   :  { %369 = vmatpush3.bf16.msra.mxu0 %v249_v60 }
  0xf8   :  { %v317_v61 = vpop.f32.mrb[0].mxu0 }
  0xf9   :  { %v339_v62 = vpop.f32.mrb[0].mxu1  ;;  %v318_v63 = vpop.f32.mrb[1].mxu0 }
  0xfa   :  { %v319_v0 = vadd.f32 %v318_v63, %v317_v61  ;;  %v340_v1 = vpop.f32.mrb[1].mxu1  ;;  %v320_v2 = vpop.f32.mrb[2].mxu0 }
  0xfb   :  { %v341_v3 = vadd.f32 %v340_v1, %v339_v62  ;;  %v342_v4 = vpop.f32.mrb[2].mxu1  ;;  %v321_v5 = vpop.f32.mrb[3].mxu0 }
  0xfc   :  { %v322_v6 = vadd.f32 %v321_v5, %v320_v2  ;;  %v343_v7 = vpop.f32.mrb[3].mxu1 }
  0xfd   :  { %v223_v8 = vmul.f32 %v341_v3, %v319_v0  ;;  %v344_v9 = vadd.f32 %v343_v7, %v342_v4 }
  0xff   :  { %v224_v10 = vmul.f32 %v344_v9, %v322_v6 }
 0x101   :  { %v225_v11 = vpack.c.bf16 %v224_v10, %v223_v8 }
 0x103   :  { %371 = vmatmul.mubr.bf16.vlgmr.msra.gmra.mrb[4].mxu0 %v225_v11 }
 0x1d6   :  { %v284_v12 = vpop.f32.mrb[4].mxu0 }
 0x1d7   :  { %291 = vst [vmem:[%s677_s5] sm:$0xff] %v284_v12  ;;  %v372_v13 = vpop.f32.mrb[5].mxu0 }
 0x1d8   :  { %v287_v14 = vpop.f32.mrb[6].mxu0 }
 0x1d9   :  { %292 = vst [vmem:[%s677_s5 + $0x8] sm:$0xff] %v287_v14  ;;  %v373_v15 = vpop.f32.mrb[7].mxu0 }

</bundles_post_ra>
